<compile_context>
chip_gen: v5e
topology: v5e:2x2
jax: 0.10.0
libtpu: 0.0.40
codegen_flags: <defaults>
</compile_context>

<pallas_src>
import numpy as np
import jax
import jax.numpy as jnp
from jax import lax
from jax.experimental import pallas as pl
from jax.experimental.pallas import tpu as pltpu

N_QUBITS = 4
N_QLAYERS = 1
DIM = 1 << N_QUBITS            # 16 statevector amplitudes
INV_SQRT2 = 0.7071067811865476


# ----------------------------------------------------------------------------
# Pallas kernel: single invocation, in-kernel fori_loop over time.
# ----------------------------------------------------------------------------
def qlstm_kernel(x_ref, wh_ref, wx_ref, bin_ref, mencr_ref, menci_ref,
                 mout_ref, ball_ref, bits_ref,
                 hseq_ref, hT_ref, cT_ref):
    T = x_ref.shape[0]
    Bp = x_ref.shape[1]
    H = hT_ref.shape[1]

    # Loop-invariant operands: load once, close over them.
    wh = wh_ref[...]                                   # (H, nq)
    wx = wx_ref[...]                                   # (F, nq)
    b_in = bin_ref[...]                                # (1, nq)
    menc_r = mencr_ref[...]                            # (16, 128)
    menc_i = menci_ref[...]                            # (16, 128)
    mout = mout_ref[...]                               # (128, 4H)
    b_all = ball_ref[...]                              # (1, 4H)
    bits1 = bits_ref[...]                              # (nq, 16)  0/1
    bits0 = 1.0 - bits1

    def step(t, carry):
        h, c = carry                                   # (Bp, H) each
        x_t = x_ref[t]                                 # (Bp, F)

        # y_t = clayer_in(concat(h_t, x_t))  -> (Bp, n_qubits)
        y = (jnp.dot(h, wh, preferred_element_type=jnp.float32)
             + jnp.dot(x_t, wx, preferred_element_type=jnp.float32)
             + b_in)

        # --- quantum data encoding (half-angle identities, no arctan) ------
        #   a = arctan(y): cos(a) = 1/sqrt(1+y^2),  a in (-pi/2, pi/2)
        ca = lax.rsqrt(1.0 + y * y)
        cha = jnp.sqrt(jnp.maximum((1.0 + ca) * 0.5, 0.0))              # cos(a/2)
        sha = jnp.where(y >= 0.0, 1.0, -1.0) * jnp.sqrt(
            jnp.maximum((1.0 - ca) * 0.5, 0.0))                         # sin(a/2)
        y2 = y * y
        cb = lax.rsqrt(1.0 + y2 * y2)
        chb = jnp.sqrt(jnp.maximum((1.0 + cb) * 0.5, 0.0))              # cos(b/2)
        shb = jnp.sqrt(jnp.maximum((1.0 - cb) * 0.5, 0.0))              # sin(b/2)

        # per-qubit state after H, RY(a), RZ(b):  (alpha, beta) complex
        amp0 = (cha - sha) * INV_SQRT2
        amp1 = (cha + sha) * INV_SQRT2
        alpha_r, alpha_i = chb * amp0, -shb * amp0
        beta_r, beta_i = chb * amp1, shb * amp1

        # tensor product over the 4 qubits -> initial statevector phi (Bp, 16)
        phi_r = alpha_r[:, 0:1] * bits0[0:1, :] + beta_r[:, 0:1] * bits1[0:1, :]
        phi_i = alpha_i[:, 0:1] * bits0[0:1, :] + beta_i[:, 0:1] * bits1[0:1, :]
        for q in range(1, N_QUBITS):
            sr = alpha_r[:, q:q + 1] * bits0[q:q + 1, :] + beta_r[:, q:q + 1] * bits1[q:q + 1, :]
            si = alpha_i[:, q:q + 1] * bits0[q:q + 1, :] + beta_i[:, q:q + 1] * bits1[q:q + 1, :]
            nr = phi_r * sr - phi_i * si
            ni = phi_r * si + phi_i * sr
            phi_r, phi_i = nr, ni

        # Fused ansatz unitaries of all 4 gates: one lane-dense (Bp, 128) result
        #   columns [g*32 : g*32+16]  = Re(psi_g),  [g*32+16 : g*32+32] = Im(psi_g)
        psi = (jnp.dot(phi_r, menc_r, preferred_element_type=jnp.float32)
               + jnp.dot(phi_i, menc_i, preferred_element_type=jnp.float32))

        # |psi|^2 -> PauliZ expvals -> clayer_out for all 4 gates in one matmul:
        # the block matrix mout carries (Z-signs @ W_out) per gate for both the
        # Re^2 and Im^2 row blocks, so squared amplitudes map straight to the
        # four gate pre-activations (width 4H).
        pre = jnp.dot(psi * psi, mout, preferred_element_type=jnp.float32) + b_all

        f_t = jax.nn.sigmoid(pre[:, 0:H])              # forget
        i_t = jax.nn.sigmoid(pre[:, H:2 * H])          # input
        g_t = jnp.tanh(pre[:, 2 * H:3 * H])            # update
        o_t = jax.nn.sigmoid(pre[:, 3 * H:4 * H])      # output

        c_new = f_t * c + i_t * g_t
        h_new = o_t * jnp.tanh(c_new)
        hseq_ref[t] = h_new
        return h_new, c_new

    h0 = jnp.zeros((Bp, H), jnp.float32)
    c0 = jnp.zeros((Bp, H), jnp.float32)
    hT, cT = lax.fori_loop(0, T, step, (h0, c0), unroll=True)
    hT_ref[...] = hT
    cT_ref[...] = cT


# ----------------------------------------------------------------------------
# Host-side helpers: build the (data-independent) ansatz unitaries from weights.
# Wire 0 == most-significant bit (PennyLane convention).
# ----------------------------------------------------------------------------
def _kron_all(ops):
    u = ops[0]
    for m in ops[1:]:
        u = np.kron(u, m)
    return u


def _single(g, wire, n):
    ops = [np.eye(2, dtype=np.complex128) for _ in range(n)]
    ops[wire] = g
    return _kron_all(ops)


def _cnot(c, t, n):
    p0 = np.array([[1, 0], [0, 0]], np.complex128)
    p1 = np.array([[0, 0], [0, 1]], np.complex128)
    x = np.array([[0, 1], [1, 0]], np.complex128)
    i2 = np.eye(2, dtype=np.complex128)
    a = [i2] * n
    a[c] = p0
    b = [i2] * n
    b[c] = p1
    b[t] = x
    return _kron_all(a) + _kron_all(b)


def _rx(th):
    c, s = np.cos(th / 2), np.sin(th / 2)
    return np.array([[c, -1j * s], [-1j * s, c]], np.complex128)


def _ry(th):
    c, s = np.cos(th / 2), np.sin(th / 2)
    return np.array([[c, -s], [s, c]], np.complex128)


def _rz(th):
    return np.array([[np.exp(-1j * th / 2), 0], [0, np.exp(1j * th / 2)]], np.complex128)


def ansatz_unitary(weights):
    """weights: (n_qlayers, 3, n_qubits) -> 16x16 complex unitary."""
    n = N_QUBITS
    u = np.eye(1 << n, dtype=np.complex128)
    for layer in range(weights.shape[0]):
        p = weights[layer]
        for i in (1, 2):
            for j in range(n):
                tgt = j + i if j + i < n else j + i - n
                u = _cnot(j, tgt, n) @ u
        for q in range(n):
            u = _single(_rx(p[0][q]), q, n) @ u
            u = _single(_ry(p[1][q]), q, n) @ u
            u = _single(_rz(p[2][q]), q, n) @ u
    return u


def _bit_tables():
    z = np.arange(DIM)
    bits = np.stack([(z >> (N_QUBITS - 1 - q)) & 1 for q in range(N_QUBITS)], 0)
    zsign = (1 - 2 * bits.T).astype(np.float64)        # (16, n_qubits)
    return bits.astype(np.float32), zsign


def _build_fused_matrices(params, H):
    """Fold the 4-gate VQC pipeline into two lane-dense matrices."""
    vqc_w = np.asarray(params["vqc_weights"], np.float64)   # (4, L, 3, nq)
    us = [ansatz_unitary(vqc_w[g]) for g in range(4)]
    bits_np, zsign = _bit_tables()
    w_out = np.asarray(params["w_out"], np.float64)          # (H, nq)
    b_out = np.asarray(params["b_out"], np.float64)          # (H,)
    A = zsign @ w_out.T                                      # (16, H): Z-expvals -> clayer_out

    width = 4 * 2 * DIM                                      # 128
    menc_r = np.zeros((DIM, width), np.float64)              # rows hit by phi_r
    menc_i = np.zeros((DIM, width), np.float64)              # rows hit by phi_i
    mout = np.zeros((width, 4 * H), np.float64)
    for g, u in enumerate(us):
        ur_t = np.real(u).T
        ui_t = np.imag(u).T
        c0 = g * 2 * DIM
        # Re(psi_g) columns
        menc_r[:, c0:c0 + DIM] = ur_t
        menc_i[:, c0:c0 + DIM] = -ui_t
        # Im(psi_g) columns
        menc_r[:, c0 + DIM:c0 + 2 * DIM] = ui_t
        menc_i[:, c0 + DIM:c0 + 2 * DIM] = ur_t
        # |psi_g|^2 = Re^2 + Im^2 -> both row blocks map via A to gate g's slot
        mout[c0:c0 + DIM, g * H:(g + 1) * H] = A
        mout[c0 + DIM:c0 + 2 * DIM, g * H:(g + 1) * H] = A
    ball = np.tile(b_out.reshape(1, H), (1, 4))              # (1, 4H)
    return (jnp.asarray(menc_r, jnp.float32), jnp.asarray(menc_i, jnp.float32),
            jnp.asarray(mout, jnp.float32), jnp.asarray(ball, jnp.float32),
            jnp.asarray(bits_np))


# ----------------------------------------------------------------------------
# Wrapper
# ----------------------------------------------------------------------------
def qlstm_forward(x, params):
    """x: (B, T, F) float32 (batch_first).  Returns (hidden_seq, (h_T, c_T))."""
    B, T, F = x.shape
    H = params["w_out"].shape[0]
    Bp = ((B + 7) // 8) * 8                            # pad batch to 8-sublane group

    w_in = np.asarray(params["w_in"], np.float32)      # (nq, H+F) torch layout
    wh = jnp.asarray(w_in[:, :H].T)                    # (H, nq)
    wx = jnp.asarray(w_in[:, H:].T)                    # (F, nq)
    bin_ = jnp.asarray(np.asarray(params["b_in"], np.float32).reshape(1, N_QUBITS))

    menc_r, menc_i, mout, ball, bits = _build_fused_matrices(params, H)

    x_p = jnp.zeros((Bp, T, F), jnp.float32).at[:B].set(x.astype(jnp.float32))
    x_tbf = jnp.transpose(x_p, (1, 0, 2))              # (T, Bp, F)

    W = 4 * 2 * DIM                                    # 128
    call = pl.pallas_call(
        qlstm_kernel,
        out_shape=(jax.ShapeDtypeStruct((T, Bp, H), jnp.float32),
                   jax.ShapeDtypeStruct((Bp, H), jnp.float32),
                   jax.ShapeDtypeStruct((Bp, H), jnp.float32)),
        grid_spec=pltpu.PrefetchScalarGridSpec(
            num_scalar_prefetch=0,
            grid=(1,),
            in_specs=[
                pl.BlockSpec((T, Bp, F), lambda i: (0, 0, 0)),        # x sequence
                pl.BlockSpec((H, N_QUBITS), lambda i: (0, 0)),        # wh
                pl.BlockSpec((F, N_QUBITS), lambda i: (0, 0)),        # wx
                pl.BlockSpec((1, N_QUBITS), lambda i: (0, 0)),        # b_in
                pl.BlockSpec((DIM, W), lambda i: (0, 0)),             # M_enc (phi_r rows)
                pl.BlockSpec((DIM, W), lambda i: (0, 0)),             # M_enc (phi_i rows)
                pl.BlockSpec((W, 4 * H), lambda i: (0, 0)),           # M_out block matrix
                pl.BlockSpec((1, 4 * H), lambda i: (0, 0)),           # tiled b_out
                pl.BlockSpec((N_QUBITS, DIM), lambda i: (0, 0)),      # bit table
            ],
            out_specs=[
                pl.BlockSpec((T, Bp, H), lambda i: (0, 0, 0)),        # hidden seq
                pl.BlockSpec((Bp, H), lambda i: (0, 0)),              # h_T
                pl.BlockSpec((Bp, H), lambda i: (0, 0)),              # c_T
            ],
        ),
        compiler_params=pltpu.CompilerParams(dimension_semantics=("arbitrary",)),
    )
    hseq_tbh, h_t, c_t = call(x_tbf, wh, wx, bin_, menc_r, menc_i, mout, ball, bits)
    hidden_seq = jnp.transpose(hseq_tbh, (1, 0, 2))[:B]               # (B, T, H)
    return hidden_seq, (h_t[:B], c_t[:B])


# ----------------------------------------------------------------------------
# Pure-numpy reference (float64) for verification
# ----------------------------------------------------------------------------
def reference_forward(x, params):
    x = np.asarray(x, np.float64)
    B, T, F = x.shape
    w_in = np.asarray(params["w_in"], np.float64)
    b_in = np.asarray(params["b_in"], np.float64)
    w_out = np.asarray(params["w_out"], np.float64)
    b_out = np.asarray(params["b_out"], np.float64)
    H = w_out.shape[0]
    vqc_w = np.asarray(params["vqc_weights"], np.float64)
    us = [ansatz_unitary(vqc_w[g]) for g in range(4)]
    bits, _ = _bit_tables()

    def vqc(y, u):
        ev = np.zeros((y.shape[0], N_QUBITS))
        for b in range(y.shape[0]):
            a = np.arctan(y[b])
            bng = np.arctan(y[b] ** 2)
            states = []
            for q in range(N_QUBITS):
                s = np.array([1.0, 1.0], complex) / np.sqrt(2.0)
                s = _rz(bng[q]) @ (_ry(a[q]) @ s)
                states.append(s)
            phi = states[0]
            for q in range(1, N_QUBITS):
                phi = np.kron(phi, states[q])
            prob = np.abs(u @ phi) ** 2
            for k in range(N_QUBITS):
                ev[b, k] = np.sum(prob * (1.0 - 2.0 * bits[k]))
        return ev

    def sigmoid(z):
        return 1.0 / (1.0 + np.exp(-z))

    h = np.zeros((B, H))
    c = np.zeros((B, H))
    seq = []
    for t in range(T):
        v = np.concatenate([h, x[:, t, :]], 1)
        y = v @ w_in.T + b_in
        f = sigmoid(vqc(y, us[0]) @ w_out.T + b_out)
        i = sigmoid(vqc(y, us[1]) @ w_out.T + b_out)
        g = np.tanh(vqc(y, us[2]) @ w_out.T + b_out)
        o = sigmoid(vqc(y, us[3]) @ w_out.T + b_out)
        c = f * c + i * g
        h = o * np.tanh(c)
        seq.append(h)
    return np.stack(seq, 1), (h, c)


if __name__ == "__main__":
    B, T, F, H = 2, 8, 8, 32
    concat = F + H

    key = jax.random.PRNGKey(0)
    k1, k2, k3, k4, k5, k6 = jax.random.split(key, 6)
    params = {
        "w_in": jax.random.normal(k1, (N_QUBITS, concat), jnp.float32) * 0.3,
        "b_in": jax.random.normal(k2, (N_QUBITS,), jnp.float32) * 0.1,
        "w_out": jax.random.normal(k3, (H, N_QUBITS), jnp.float32) * 0.3,
        "b_out": jax.random.normal(k4, (H,), jnp.float32) * 0.1,
        "vqc_weights": jax.random.uniform(
            k5, (4, N_QLAYERS, 3, N_QUBITS), jnp.float32,
            minval=0.0, maxval=2.0 * np.pi),
    }
    x = jax.random.normal(k6, (B, T, F), jnp.float32)

    hidden_seq, (h_t, c_t) = qlstm_forward(x, params)
    jax.block_until_ready((hidden_seq, h_t, c_t))

    ref_seq, (ref_h, ref_c) = reference_forward(np.asarray(x), params)
    np.testing.assert_allclose(np.asarray(hidden_seq), ref_seq, rtol=2e-2, atol=2e-2)
    np.testing.assert_allclose(np.asarray(h_t), ref_h, rtol=2e-2, atol=2e-2)
    np.testing.assert_allclose(np.asarray(c_t), ref_c, rtol=2e-2, atol=2e-2)

    print("KERNEL_OK")
</pallas_src>

<mosaic_0001>
module attributes {stable_mosaic.version = 11 : i64} {
  func.func @qlstm_kernel(%arg0: i32, %arg1: memref<8x8x8xf32, #tpu.memory_space<vmem>>, %arg2: memref<32x4xf32, #tpu.memory_space<vmem>>, %arg3: memref<8x4xf32, #tpu.memory_space<vmem>>, %arg4: memref<1x4xf32, #tpu.memory_space<vmem>>, %arg5: memref<16x128xf32, #tpu.memory_space<vmem>>, %arg6: memref<16x128xf32, #tpu.memory_space<vmem>>, %arg7: memref<128x128xf32, #tpu.memory_space<vmem>>, %arg8: memref<1x128xf32, #tpu.memory_space<vmem>>, %arg9: memref<4x16xf32, #tpu.memory_space<vmem>>, %arg10: memref<8x8x32xf32, #tpu.memory_space<vmem>>, %arg11: memref<8x32xf32, #tpu.memory_space<vmem>>, %arg12: memref<8x32xf32, #tpu.memory_space<vmem>>) attributes {dimension_semantics = [#tpu.dimension_semantics<arbitrary>], iteration_bounds = array<i64: 1>, scalar_prefetch = 0 : i64, scratch_operands = 0 : i64, tpu.core_type = #tpu.core_type<tc>, window_params = [{pipeline_mode = #tpu.pipeline_mode<synchronous>, transform_indices = @transform_0, window_bounds = array<i64: 8, 8, 8>}, {pipeline_mode = #tpu.pipeline_mode<synchronous>, transform_indices = @transform_1, window_bounds = array<i64: 32, 4>}, {pipeline_mode = #tpu.pipeline_mode<synchronous>, transform_indices = @transform_2, window_bounds = array<i64: 8, 4>}, {pipeline_mode = #tpu.pipeline_mode<synchronous>, transform_indices = @transform_3, window_bounds = array<i64: 1, 4>}, {pipeline_mode = #tpu.pipeline_mode<synchronous>, transform_indices = @transform_4, window_bounds = array<i64: 16, 128>}, {pipeline_mode = #tpu.pipeline_mode<synchronous>, transform_indices = @transform_5, window_bounds = array<i64: 16, 128>}, {pipeline_mode = #tpu.pipeline_mode<synchronous>, transform_indices = @transform_6, window_bounds = array<i64: 128, 128>}, {pipeline_mode = #tpu.pipeline_mode<synchronous>, transform_indices = @transform_7, window_bounds = array<i64: 1, 128>}, {pipeline_mode = #tpu.pipeline_mode<synchronous>, transform_indices = @transform_8, window_bounds = array<i64: 4, 16>}, {pipeline_mode = #tpu.pipeline_mode<synchronous>, transform_indices = @transform_9, window_bounds = array<i64: 8, 8, 32>}, {pipeline_mode = #tpu.pipeline_mode<synchronous>, transform_indices = @transform_10, window_bounds = array<i64: 8, 32>}, {pipeline_mode = #tpu.pipeline_mode<synchronous>, transform_indices = @transform_11, window_bounds = array<i64: 8, 32>}]} {
    %c0 = arith.constant 0 : index
    %c0_0 = arith.constant 0 : index
    %0 = vector.load %arg2[%c0, %c0_0] : memref<32x4xf32, #tpu.memory_space<vmem>>, vector<32x4xf32>
    %c0_1 = arith.constant 0 : index
    %c0_2 = arith.constant 0 : index
    %1 = vector.load %arg3[%c0_1, %c0_2] : memref<8x4xf32, #tpu.memory_space<vmem>>, vector<8x4xf32>
    %c0_3 = arith.constant 0 : index
    %c0_4 = arith.constant 0 : index
    %2 = vector.load %arg4[%c0_3, %c0_4] : memref<1x4xf32, #tpu.memory_space<vmem>>, vector<1x4xf32>
    %c0_5 = arith.constant 0 : index
    %c0_6 = arith.constant 0 : index
    %3 = vector.load %arg5[%c0_5, %c0_6] : memref<16x128xf32, #tpu.memory_space<vmem>>, vector<16x128xf32>
    %c0_7 = arith.constant 0 : index
    %c0_8 = arith.constant 0 : index
    %4 = vector.load %arg6[%c0_7, %c0_8] : memref<16x128xf32, #tpu.memory_space<vmem>>, vector<16x128xf32>
    %c0_9 = arith.constant 0 : index
    %c0_10 = arith.constant 0 : index
    %5 = vector.load %arg7[%c0_9, %c0_10] : memref<128x128xf32, #tpu.memory_space<vmem>>, vector<128x128xf32>
    %c0_11 = arith.constant 0 : index
    %c0_12 = arith.constant 0 : index
    %6 = vector.load %arg8[%c0_11, %c0_12] : memref<1x128xf32, #tpu.memory_space<vmem>>, vector<1x128xf32>
    %c0_13 = arith.constant 0 : index
    %c0_14 = arith.constant 0 : index
    %7 = vector.load %arg9[%c0_13, %c0_14] : memref<4x16xf32, #tpu.memory_space<vmem>>, vector<4x16xf32>
    %cst = arith.constant 1.000000e+00 : f32
    %8 = vector.broadcast %cst : f32 to vector<4x16xf32>
    %9 = arith.subf %8, %7 : vector<4x16xf32>
    %cst_15 = arith.constant 0.000000e+00 : f32
    %10 = vector.broadcast %cst_15 : f32 to vector<8x32xf32>
    %cst_16 = arith.constant 0.000000e+00 : f32
    %11 = vector.broadcast %cst_16 : f32 to vector<8x32xf32>
    %c0_i32 = arith.constant 0 : i32
    %12 = arith.index_cast %c0_i32 : i32 to index
    %c0_17 = arith.constant 0 : index
    %c0_18 = arith.constant 0 : index
    %13 = vector.load %arg1[%12, %c0_17, %c0_18] : memref<8x8x8xf32, #tpu.memory_space<vmem>>, vector<1x8x8xf32>
    %14 = vector.shape_cast %13 : vector<1x8x8xf32> to vector<8x8xf32>
    %cst_19 = arith.constant dense<0.000000e+00> : vector<8x4xf32>
    %15 = tpu.matmul %10, %0, %cst_19 {dimension_numbers = #tpu.dot_dimension_numbers<[1], [0], [0], [1], [0, 0, 1, 1], [], []>} : vector<8x32xf32>, vector<32x4xf32>, vector<8x4xf32> -> vector<8x4xf32>
    %cst_20 = arith.constant dense<0.000000e+00> : vector<8x4xf32>
    %16 = tpu.matmul %14, %1, %cst_20 {dimension_numbers = #tpu.dot_dimension_numbers<[1], [0], [0], [1], [0, 0, 1, 1], [], []>} : vector<8x8xf32>, vector<8x4xf32>, vector<8x4xf32> -> vector<8x4xf32>
    %17 = arith.addf %15, %16 : vector<8x4xf32>
    %18 = vector.broadcast %2 : vector<1x4xf32> to vector<8x4xf32>
    %19 = arith.addf %17, %18 : vector<8x4xf32>
    %20 = arith.mulf %19, %19 : vector<8x4xf32>
    %cst_21 = arith.constant 1.000000e+00 : f32
    %21 = vector.broadcast %cst_21 : f32 to vector<8x4xf32>
    %22 = arith.addf %21, %20 : vector<8x4xf32>
    %23 = math.rsqrt %22 : vector<8x4xf32>
    %cst_22 = arith.constant 1.000000e+00 : f32
    %24 = vector.broadcast %cst_22 : f32 to vector<8x4xf32>
    %25 = arith.addf %24, %23 : vector<8x4xf32>
    %cst_23 = arith.constant 5.000000e-01 : f32
    %26 = vector.broadcast %cst_23 : f32 to vector<8x4xf32>
    %27 = arith.mulf %25, %26 : vector<8x4xf32>
    %cst_24 = arith.constant 0.000000e+00 : f32
    %28 = vector.broadcast %cst_24 : f32 to vector<8x4xf32>
    %29 = arith.maximumf %27, %28 : vector<8x4xf32>
    %30 = math.sqrt %29 : vector<8x4xf32>
    %cst_25 = arith.constant 0.000000e+00 : f32
    %31 = vector.broadcast %cst_25 : f32 to vector<8x4xf32>
    %32 = arith.cmpf oge, %19, %31 : vector<8x4xf32>
    %cst_26 = arith.constant 1.000000e+00 : f32
    %cst_27 = arith.constant -1.000000e+00 : f32
    %33 = vector.broadcast %cst_26 : f32 to vector<8x4xf32>
    %34 = vector.broadcast %cst_27 : f32 to vector<8x4xf32>
    %35 = arith.select %32, %33, %34 : vector<8x4xi1>, vector<8x4xf32>
    %cst_28 = arith.constant 1.000000e+00 : f32
    %36 = vector.broadcast %cst_28 : f32 to vector<8x4xf32>
    %37 = arith.subf %36, %23 : vector<8x4xf32>
    %cst_29 = arith.constant 5.000000e-01 : f32
    %38 = vector.broadcast %cst_29 : f32 to vector<8x4xf32>
    %39 = arith.mulf %37, %38 : vector<8x4xf32>
    %cst_30 = arith.constant 0.000000e+00 : f32
    %40 = vector.broadcast %cst_30 : f32 to vector<8x4xf32>
    %41 = arith.maximumf %39, %40 : vector<8x4xf32>
    %42 = math.sqrt %41 : vector<8x4xf32>
    %43 = arith.mulf %35, %42 : vector<8x4xf32>
    %44 = arith.mulf %19, %19 : vector<8x4xf32>
    %45 = arith.mulf %44, %44 : vector<8x4xf32>
    %cst_31 = arith.constant 1.000000e+00 : f32
    %46 = vector.broadcast %cst_31 : f32 to vector<8x4xf32>
    %47 = arith.addf %46, %45 : vector<8x4xf32>
    %48 = math.rsqrt %47 : vector<8x4xf32>
    %cst_32 = arith.constant 1.000000e+00 : f32
    %49 = vector.broadcast %cst_32 : f32 to vector<8x4xf32>
    %50 = arith.addf %49, %48 : vector<8x4xf32>
    %cst_33 = arith.constant 5.000000e-01 : f32
    %51 = vector.broadcast %cst_33 : f32 to vector<8x4xf32>
    %52 = arith.mulf %50, %51 : vector<8x4xf32>
    %cst_34 = arith.constant 0.000000e+00 : f32
    %53 = vector.broadcast %cst_34 : f32 to vector<8x4xf32>
    %54 = arith.maximumf %52, %53 : vector<8x4xf32>
    %55 = math.sqrt %54 : vector<8x4xf32>
    %cst_35 = arith.constant 1.000000e+00 : f32
    %56 = vector.broadcast %cst_35 : f32 to vector<8x4xf32>
    %57 = arith.subf %56, %48 : vector<8x4xf32>
    %cst_36 = arith.constant 5.000000e-01 : f32
    %58 = vector.broadcast %cst_36 : f32 to vector<8x4xf32>
    %59 = arith.mulf %57, %58 : vector<8x4xf32>
    %cst_37 = arith.constant 0.000000e+00 : f32
    %60 = vector.broadcast %cst_37 : f32 to vector<8x4xf32>
    %61 = arith.maximumf %59, %60 : vector<8x4xf32>
    %62 = math.sqrt %61 : vector<8x4xf32>
    %63 = arith.subf %30, %43 : vector<8x4xf32>
    %cst_38 = arith.constant 0.707106769 : f32
    %64 = vector.broadcast %cst_38 : f32 to vector<8x4xf32>
    %65 = arith.mulf %63, %64 : vector<8x4xf32>
    %66 = arith.addf %30, %43 : vector<8x4xf32>
    %cst_39 = arith.constant 0.707106769 : f32
    %67 = vector.broadcast %cst_39 : f32 to vector<8x4xf32>
    %68 = arith.mulf %66, %67 : vector<8x4xf32>
    %69 = arith.mulf %55, %65 : vector<8x4xf32>
    %cst_40 = arith.constant 0.000000e+00 : f32
    %70 = vector.broadcast %cst_40 : f32 to vector<8x4xf32>
    %71 = arith.subf %70, %62 : vector<8x4xf32>
    %72 = arith.mulf %71, %65 : vector<8x4xf32>
    %73 = arith.mulf %55, %68 : vector<8x4xf32>
    %74 = arith.mulf %62, %68 : vector<8x4xf32>
    %75 = vector.extract_strided_slice %69 {offsets = [0, 0], sizes = [8, 1], strides = [1, 1]} : vector<8x4xf32> to vector<8x1xf32>
    %76 = vector.extract_strided_slice %9 {offsets = [0, 0], sizes = [1, 16], strides = [1, 1]} : vector<4x16xf32> to vector<1x16xf32>
    %77 = vector.broadcast %75 : vector<8x1xf32> to vector<8x16xf32>
    %78 = vector.broadcast %76 : vector<1x16xf32> to vector<8x16xf32>
    %79 = arith.mulf %77, %78 : vector<8x16xf32>
    %80 = vector.extract_strided_slice %73 {offsets = [0, 0], sizes = [8, 1], strides = [1, 1]} : vector<8x4xf32> to vector<8x1xf32>
    %81 = vector.extract_strided_slice %7 {offsets = [0, 0], sizes = [1, 16], strides = [1, 1]} : vector<4x16xf32> to vector<1x16xf32>
    %82 = vector.broadcast %80 : vector<8x1xf32> to vector<8x16xf32>
    %83 = vector.broadcast %81 : vector<1x16xf32> to vector<8x16xf32>
    %84 = arith.mulf %82, %83 : vector<8x16xf32>
    %85 = arith.addf %79, %84 : vector<8x16xf32>
    %86 = vector.extract_strided_slice %72 {offsets = [0, 0], sizes = [8, 1], strides = [1, 1]} : vector<8x4xf32> to vector<8x1xf32>
    %87 = vector.extract_strided_slice %9 {offsets = [0, 0], sizes = [1, 16], strides = [1, 1]} : vector<4x16xf32> to vector<1x16xf32>
    %88 = vector.broadcast %86 : vector<8x1xf32> to vector<8x16xf32>
    %89 = vector.broadcast %87 : vector<1x16xf32> to vector<8x16xf32>
    %90 = arith.mulf %88, %89 : vector<8x16xf32>
    %91 = vector.extract_strided_slice %74 {offsets = [0, 0], sizes = [8, 1], strides = [1, 1]} : vector<8x4xf32> to vector<8x1xf32>
    %92 = vector.extract_strided_slice %7 {offsets = [0, 0], sizes = [1, 16], strides = [1, 1]} : vector<4x16xf32> to vector<1x16xf32>
    %93 = vector.broadcast %91 : vector<8x1xf32> to vector<8x16xf32>
    %94 = vector.broadcast %92 : vector<1x16xf32> to vector<8x16xf32>
    %95 = arith.mulf %93, %94 : vector<8x16xf32>
    %96 = arith.addf %90, %95 : vector<8x16xf32>
    %97 = vector.extract_strided_slice %69 {offsets = [0, 1], sizes = [8, 1], strides = [1, 1]} : vector<8x4xf32> to vector<8x1xf32>
    %98 = vector.extract_strided_slice %9 {offsets = [1, 0], sizes = [1, 16], strides = [1, 1]} : vector<4x16xf32> to vector<1x16xf32>
    %99 = vector.broadcast %97 : vector<8x1xf32> to vector<8x16xf32>
    %100 = vector.broadcast %98 : vector<1x16xf32> to vector<8x16xf32>
    %101 = arith.mulf %99, %100 : vector<8x16xf32>
    %102 = vector.extract_strided_slice %73 {offsets = [0, 1], sizes = [8, 1], strides = [1, 1]} : vector<8x4xf32> to vector<8x1xf32>
    %103 = vector.extract_strided_slice %7 {offsets = [1, 0], sizes = [1, 16], strides = [1, 1]} : vector<4x16xf32> to vector<1x16xf32>
    %104 = vector.broadcast %102 : vector<8x1xf32> to vector<8x16xf32>
    %105 = vector.broadcast %103 : vector<1x16xf32> to vector<8x16xf32>
    %106 = arith.mulf %104, %105 : vector<8x16xf32>
    %107 = arith.addf %101, %106 : vector<8x16xf32>
    %108 = vector.extract_strided_slice %72 {offsets = [0, 1], sizes = [8, 1], strides = [1, 1]} : vector<8x4xf32> to vector<8x1xf32>
    %109 = vector.extract_strided_slice %9 {offsets = [1, 0], sizes = [1, 16], strides = [1, 1]} : vector<4x16xf32> to vector<1x16xf32>
    %110 = vector.broadcast %108 : vector<8x1xf32> to vector<8x16xf32>
    %111 = vector.broadcast %109 : vector<1x16xf32> to vector<8x16xf32>
    %112 = arith.mulf %110, %111 : vector<8x16xf32>
    %113 = vector.extract_strided_slice %74 {offsets = [0, 1], sizes = [8, 1], strides = [1, 1]} : vector<8x4xf32> to vector<8x1xf32>
    %114 = vector.extract_strided_slice %7 {offsets = [1, 0], sizes = [1, 16], strides = [1, 1]} : vector<4x16xf32> to vector<1x16xf32>
    %115 = vector.broadcast %113 : vector<8x1xf32> to vector<8x16xf32>
    %116 = vector.broadcast %114 : vector<1x16xf32> to vector<8x16xf32>
    %117 = arith.mulf %115, %116 : vector<8x16xf32>
    %118 = arith.addf %112, %117 : vector<8x16xf32>
    %119 = arith.mulf %85, %107 : vector<8x16xf32>
    %120 = arith.mulf %96, %118 : vector<8x16xf32>
    %121 = arith.subf %119, %120 : vector<8x16xf32>
    %122 = arith.mulf %85, %118 : vector<8x16xf32>
    %123 = arith.mulf %96, %107 : vector<8x16xf32>
    %124 = arith.addf %122, %123 : vector<8x16xf32>
    %125 = vector.extract_strided_slice %69 {offsets = [0, 2], sizes = [8, 1], strides = [1, 1]} : vector<8x4xf32> to vector<8x1xf32>
    %126 = vector.extract_strided_slice %9 {offsets = [2, 0], sizes = [1, 16], strides = [1, 1]} : vector<4x16xf32> to vector<1x16xf32>
    %127 = vector.broadcast %125 : vector<8x1xf32> to vector<8x16xf32>
    %128 = vector.broadcast %126 : vector<1x16xf32> to vector<8x16xf32>
    %129 = arith.mulf %127, %128 : vector<8x16xf32>
    %130 = vector.extract_strided_slice %73 {offsets = [0, 2], sizes = [8, 1], strides = [1, 1]} : vector<8x4xf32> to vector<8x1xf32>
    %131 = vector.extract_strided_slice %7 {offsets = [2, 0], sizes = [1, 16], strides = [1, 1]} : vector<4x16xf32> to vector<1x16xf32>
    %132 = vector.broadcast %130 : vector<8x1xf32> to vector<8x16xf32>
    %133 = vector.broadcast %131 : vector<1x16xf32> to vector<8x16xf32>
    %134 = arith.mulf %132, %133 : vector<8x16xf32>
    %135 = arith.addf %129, %134 : vector<8x16xf32>
    %136 = vector.extract_strided_slice %72 {offsets = [0, 2], sizes = [8, 1], strides = [1, 1]} : vector<8x4xf32> to vector<8x1xf32>
    %137 = vector.extract_strided_slice %9 {offsets = [2, 0], sizes = [1, 16], strides = [1, 1]} : vector<4x16xf32> to vector<1x16xf32>
    %138 = vector.broadcast %136 : vector<8x1xf32> to vector<8x16xf32>
    %139 = vector.broadcast %137 : vector<1x16xf32> to vector<8x16xf32>
    %140 = arith.mulf %138, %139 : vector<8x16xf32>
    %141 = vector.extract_strided_slice %74 {offsets = [0, 2], sizes = [8, 1], strides = [1, 1]} : vector<8x4xf32> to vector<8x1xf32>
    %142 = vector.extract_strided_slice %7 {offsets = [2, 0], sizes = [1, 16], strides = [1, 1]} : vector<4x16xf32> to vector<1x16xf32>
    %143 = vector.broadcast %141 : vector<8x1xf32> to vector<8x16xf32>
    %144 = vector.broadcast %142 : vector<1x16xf32> to vector<8x16xf32>
    %145 = arith.mulf %143, %144 : vector<8x16xf32>
    %146 = arith.addf %140, %145 : vector<8x16xf32>
    %147 = arith.mulf %121, %135 : vector<8x16xf32>
    %148 = arith.mulf %124, %146 : vector<8x16xf32>
    %149 = arith.subf %147, %148 : vector<8x16xf32>
    %150 = arith.mulf %121, %146 : vector<8x16xf32>
    %151 = arith.mulf %124, %135 : vector<8x16xf32>
    %152 = arith.addf %150, %151 : vector<8x16xf32>
    %153 = vector.extract_strided_slice %69 {offsets = [0, 3], sizes = [8, 1], strides = [1, 1]} : vector<8x4xf32> to vector<8x1xf32>
    %154 = vector.extract_strided_slice %9 {offsets = [3, 0], sizes = [1, 16], strides = [1, 1]} : vector<4x16xf32> to vector<1x16xf32>
    %155 = vector.broadcast %153 : vector<8x1xf32> to vector<8x16xf32>
    %156 = vector.broadcast %154 : vector<1x16xf32> to vector<8x16xf32>
    %157 = arith.mulf %155, %156 : vector<8x16xf32>
    %158 = vector.extract_strided_slice %73 {offsets = [0, 3], sizes = [8, 1], strides = [1, 1]} : vector<8x4xf32> to vector<8x1xf32>
    %159 = vector.extract_strided_slice %7 {offsets = [3, 0], sizes = [1, 16], strides = [1, 1]} : vector<4x16xf32> to vector<1x16xf32>
    %160 = vector.broadcast %158 : vector<8x1xf32> to vector<8x16xf32>
    %161 = vector.broadcast %159 : vector<1x16xf32> to vector<8x16xf32>
    %162 = arith.mulf %160, %161 : vector<8x16xf32>
    %163 = arith.addf %157, %162 : vector<8x16xf32>
    %164 = vector.extract_strided_slice %72 {offsets = [0, 3], sizes = [8, 1], strides = [1, 1]} : vector<8x4xf32> to vector<8x1xf32>
    %165 = vector.extract_strided_slice %9 {offsets = [3, 0], sizes = [1, 16], strides = [1, 1]} : vector<4x16xf32> to vector<1x16xf32>
    %166 = vector.broadcast %164 : vector<8x1xf32> to vector<8x16xf32>
    %167 = vector.broadcast %165 : vector<1x16xf32> to vector<8x16xf32>
    %168 = arith.mulf %166, %167 : vector<8x16xf32>
    %169 = vector.extract_strided_slice %74 {offsets = [0, 3], sizes = [8, 1], strides = [1, 1]} : vector<8x4xf32> to vector<8x1xf32>
    %170 = vector.extract_strided_slice %7 {offsets = [3, 0], sizes = [1, 16], strides = [1, 1]} : vector<4x16xf32> to vector<1x16xf32>
    %171 = vector.broadcast %169 : vector<8x1xf32> to vector<8x16xf32>
    %172 = vector.broadcast %170 : vector<1x16xf32> to vector<8x16xf32>
    %173 = arith.mulf %171, %172 : vector<8x16xf32>
    %174 = arith.addf %168, %173 : vector<8x16xf32>
    %175 = arith.mulf %149, %163 : vector<8x16xf32>
    %176 = arith.mulf %152, %174 : vector<8x16xf32>
    %177 = arith.subf %175, %176 : vector<8x16xf32>
    %178 = arith.mulf %149, %174 : vector<8x16xf32>
    %179 = arith.mulf %152, %163 : vector<8x16xf32>
    %180 = arith.addf %178, %179 : vector<8x16xf32>
    %cst_41 = arith.constant dense<0.000000e+00> : vector<8x128xf32>
    %181 = tpu.matmul %177, %3, %cst_41 {dimension_numbers = #tpu.dot_dimension_numbers<[1], [0], [0], [1], [0, 0, 1, 1], [], []>} : vector<8x16xf32>, vector<16x128xf32>, vector<8x128xf32> -> vector<8x128xf32>
    %cst_42 = arith.constant dense<0.000000e+00> : vector<8x128xf32>
    %182 = tpu.matmul %180, %4, %cst_42 {dimension_numbers = #tpu.dot_dimension_numbers<[1], [0], [0], [1], [0, 0, 1, 1], [], []>} : vector<8x16xf32>, vector<16x128xf32>, vector<8x128xf32> -> vector<8x128xf32>
    %183 = arith.addf %181, %182 : vector<8x128xf32>
    %184 = arith.mulf %183, %183 : vector<8x128xf32>
    %cst_43 = arith.constant dense<0.000000e+00> : vector<8x128xf32>
    %185 = tpu.matmul %184, %5, %cst_43 {dimension_numbers = #tpu.dot_dimension_numbers<[1], [0], [0], [1], [0, 0, 1, 1], [], []>} : vector<8x128xf32>, vector<128x128xf32>, vector<8x128xf32> -> vector<8x128xf32>
    %186 = vector.broadcast %6 : vector<1x128xf32> to vector<8x128xf32>
    %187 = arith.addf %185, %186 : vector<8x128xf32>
    %188 = vector.extract_strided_slice %187 {offsets = [0, 0], sizes = [8, 32], strides = [1, 1]} : vector<8x128xf32> to vector<8x32xf32>
    %189 = arith.negf %188 : vector<8x32xf32>
    %190 = math.exp %189 : vector<8x32xf32>
    %cst_44 = arith.constant 1.000000e+00 : f32
    %191 = vector.broadcast %cst_44 : f32 to vector<8x32xf32>
    %192 = arith.addf %191, %190 : vector<8x32xf32>
    %193 = arith.divf %191, %192 : vector<8x32xf32>
    %194 = vector.extract_strided_slice %187 {offsets = [0, 32], sizes = [8, 32], strides = [1, 1]} : vector<8x128xf32> to vector<8x32xf32>
    %195 = arith.negf %194 : vector<8x32xf32>
    %196 = math.exp %195 : vector<8x32xf32>
    %cst_45 = arith.constant 1.000000e+00 : f32
    %197 = vector.broadcast %cst_45 : f32 to vector<8x32xf32>
    %198 = arith.addf %197, %196 : vector<8x32xf32>
    %199 = arith.divf %197, %198 : vector<8x32xf32>
    %200 = vector.extract_strided_slice %187 {offsets = [0, 64], sizes = [8, 32], strides = [1, 1]} : vector<8x128xf32> to vector<8x32xf32>
    %201 = math.tanh %200 : vector<8x32xf32>
    %202 = vector.extract_strided_slice %187 {offsets = [0, 96], sizes = [8, 32], strides = [1, 1]} : vector<8x128xf32> to vector<8x32xf32>
    %203 = arith.negf %202 : vector<8x32xf32>
    %204 = math.exp %203 : vector<8x32xf32>
    %cst_46 = arith.constant 1.000000e+00 : f32
    %205 = vector.broadcast %cst_46 : f32 to vector<8x32xf32>
    %206 = arith.addf %205, %204 : vector<8x32xf32>
    %207 = arith.divf %205, %206 : vector<8x32xf32>
    %208 = arith.mulf %193, %11 : vector<8x32xf32>
    %209 = arith.mulf %199, %201 : vector<8x32xf32>
    %210 = arith.addf %208, %209 : vector<8x32xf32>
    %211 = math.tanh %210 : vector<8x32xf32>
    %212 = arith.mulf %207, %211 : vector<8x32xf32>
    %213 = arith.index_cast %c0_i32 : i32 to index
    %c0_47 = arith.constant 0 : index
    %c0_48 = arith.constant 0 : index
    %214 = vector.load %arg10[%213, %c0_47, %c0_48] : memref<8x8x32xf32, #tpu.memory_space<vmem>>, vector<1x8x32xf32>
    %215 = vector.shape_cast %214 : vector<1x8x32xf32> to vector<8x32xf32>
    %216 = vector.shape_cast %212 : vector<8x32xf32> to vector<1x8x32xf32>
    tpu.vector_store %arg10[%213, %c0_47, %c0_48], %216 {strides = array<i32>} : memref<8x8x32xf32, #tpu.memory_space<vmem>>, vector<1x8x32xf32>,
    %c1_i32 = arith.constant 1 : i32
    %217 = arith.index_cast %c1_i32 : i32 to index
    %c0_49 = arith.constant 0 : index
    %c0_50 = arith.constant 0 : index
    %218 = vector.load %arg1[%217, %c0_49, %c0_50] : memref<8x8x8xf32, #tpu.memory_space<vmem>>, vector<1x8x8xf32>
    %219 = vector.shape_cast %218 : vector<1x8x8xf32> to vector<8x8xf32>
    %cst_51 = arith.constant dense<0.000000e+00> : vector<8x4xf32>
    %220 = tpu.matmul %212, %0, %cst_51 {dimension_numbers = #tpu.dot_dimension_numbers<[1], [0], [0], [1], [0, 0, 1, 1], [], []>} : vector<8x32xf32>, vector<32x4xf32>, vector<8x4xf32> -> vector<8x4xf32>
    %cst_52 = arith.constant dense<0.000000e+00> : vector<8x4xf32>
    %221 = tpu.matmul %219, %1, %cst_52 {dimension_numbers = #tpu.dot_dimension_numbers<[1], [0], [0], [1], [0, 0, 1, 1], [], []>} : vector<8x8xf32>, vector<8x4xf32>, vector<8x4xf32> -> vector<8x4xf32>
    %222 = arith.addf %220, %221 : vector<8x4xf32>
    %223 = vector.broadcast %2 : vector<1x4xf32> to vector<8x4xf32>
    %224 = arith.addf %222, %223 : vector<8x4xf32>
    %225 = arith.mulf %224, %224 : vector<8x4xf32>
    %cst_53 = arith.constant 1.000000e+00 : f32
    %226 = vector.broadcast %cst_53 : f32 to vector<8x4xf32>
    %227 = arith.addf %226, %225 : vector<8x4xf32>
    %228 = math.rsqrt %227 : vector<8x4xf32>
    %cst_54 = arith.constant 1.000000e+00 : f32
    %229 = vector.broadcast %cst_54 : f32 to vector<8x4xf32>
    %230 = arith.addf %229, %228 : vector<8x4xf32>
    %cst_55 = arith.constant 5.000000e-01 : f32
    %231 = vector.broadcast %cst_55 : f32 to vector<8x4xf32>
    %232 = arith.mulf %230, %231 : vector<8x4xf32>
    %cst_56 = arith.constant 0.000000e+00 : f32
    %233 = vector.broadcast %cst_56 : f32 to vector<8x4xf32>
    %234 = arith.maximumf %232, %233 : vector<8x4xf32>
    %235 = math.sqrt %234 : vector<8x4xf32>
    %cst_57 = arith.constant 0.000000e+00 : f32
    %236 = vector.broadcast %cst_57 : f32 to vector<8x4xf32>
    %237 = arith.cmpf oge, %224, %236 : vector<8x4xf32>
    %cst_58 = arith.constant 1.000000e+00 : f32
    %cst_59 = arith.constant -1.000000e+00 : f32
    %238 = vector.broadcast %cst_58 : f32 to vector<8x4xf32>
    %239 = vector.broadcast %cst_59 : f32 to vector<8x4xf32>
    %240 = arith.select %237, %238, %239 : vector<8x4xi1>, vector<8x4xf32>
    %cst_60 = arith.constant 1.000000e+00 : f32
    %241 = vector.broadcast %cst_60 : f32 to vector<8x4xf32>
    %242 = arith.subf %241, %228 : vector<8x4xf32>
    %cst_61 = arith.constant 5.000000e-01 : f32
    %243 = vector.broadcast %cst_61 : f32 to vector<8x4xf32>
    %244 = arith.mulf %242, %243 : vector<8x4xf32>
    %cst_62 = arith.constant 0.000000e+00 : f32
    %245 = vector.broadcast %cst_62 : f32 to vector<8x4xf32>
    %246 = arith.maximumf %244, %245 : vector<8x4xf32>
    %247 = math.sqrt %246 : vector<8x4xf32>
    %248 = arith.mulf %240, %247 : vector<8x4xf32>
    %249 = arith.mulf %224, %224 : vector<8x4xf32>
    %250 = arith.mulf %249, %249 : vector<8x4xf32>
    %cst_63 = arith.constant 1.000000e+00 : f32
    %251 = vector.broadcast %cst_63 : f32 to vector<8x4xf32>
    %252 = arith.addf %251, %250 : vector<8x4xf32>
    %253 = math.rsqrt %252 : vector<8x4xf32>
    %cst_64 = arith.constant 1.000000e+00 : f32
    %254 = vector.broadcast %cst_64 : f32 to vector<8x4xf32>
    %255 = arith.addf %254, %253 : vector<8x4xf32>
    %cst_65 = arith.constant 5.000000e-01 : f32
    %256 = vector.broadcast %cst_65 : f32 to vector<8x4xf32>
    %257 = arith.mulf %255, %256 : vector<8x4xf32>
    %cst_66 = arith.constant 0.000000e+00 : f32
    %258 = vector.broadcast %cst_66 : f32 to vector<8x4xf32>
    %259 = arith.maximumf %257, %258 : vector<8x4xf32>
    %260 = math.sqrt %259 : vector<8x4xf32>
    %cst_67 = arith.constant 1.000000e+00 : f32
    %261 = vector.broadcast %cst_67 : f32 to vector<8x4xf32>
    %262 = arith.subf %261, %253 : vector<8x4xf32>
    %cst_68 = arith.constant 5.000000e-01 : f32
    %263 = vector.broadcast %cst_68 : f32 to vector<8x4xf32>
    %264 = arith.mulf %262, %263 : vector<8x4xf32>
    %cst_69 = arith.constant 0.000000e+00 : f32
    %265 = vector.broadcast %cst_69 : f32 to vector<8x4xf32>
    %266 = arith.maximumf %264, %265 : vector<8x4xf32>
    %267 = math.sqrt %266 : vector<8x4xf32>
    %268 = arith.subf %235, %248 : vector<8x4xf32>
    %cst_70 = arith.constant 0.707106769 : f32
    %269 = vector.broadcast %cst_70 : f32 to vector<8x4xf32>
    %270 = arith.mulf %268, %269 : vector<8x4xf32>
    %271 = arith.addf %235, %248 : vector<8x4xf32>
    %cst_71 = arith.constant 0.707106769 : f32
    %272 = vector.broadcast %cst_71 : f32 to vector<8x4xf32>
    %273 = arith.mulf %271, %272 : vector<8x4xf32>
    %274 = arith.mulf %260, %270 : vector<8x4xf32>
    %cst_72 = arith.constant 0.000000e+00 : f32
    %275 = vector.broadcast %cst_72 : f32 to vector<8x4xf32>
    %276 = arith.subf %275, %267 : vector<8x4xf32>
    %277 = arith.mulf %276, %270 : vector<8x4xf32>
    %278 = arith.mulf %260, %273 : vector<8x4xf32>
    %279 = arith.mulf %267, %273 : vector<8x4xf32>
    %280 = vector.extract_strided_slice %274 {offsets = [0, 0], sizes = [8, 1], strides = [1, 1]} : vector<8x4xf32> to vector<8x1xf32>
    %281 = vector.extract_strided_slice %9 {offsets = [0, 0], sizes = [1, 16], strides = [1, 1]} : vector<4x16xf32> to vector<1x16xf32>
    %282 = vector.broadcast %280 : vector<8x1xf32> to vector<8x16xf32>
    %283 = vector.broadcast %281 : vector<1x16xf32> to vector<8x16xf32>
    %284 = arith.mulf %282, %283 : vector<8x16xf32>
    %285 = vector.extract_strided_slice %278 {offsets = [0, 0], sizes = [8, 1], strides = [1, 1]} : vector<8x4xf32> to vector<8x1xf32>
    %286 = vector.extract_strided_slice %7 {offsets = [0, 0], sizes = [1, 16], strides = [1, 1]} : vector<4x16xf32> to vector<1x16xf32>
    %287 = vector.broadcast %285 : vector<8x1xf32> to vector<8x16xf32>
    %288 = vector.broadcast %286 : vector<1x16xf32> to vector<8x16xf32>
    %289 = arith.mulf %287, %288 : vector<8x16xf32>
    %290 = arith.addf %284, %289 : vector<8x16xf32>
    %291 = vector.extract_strided_slice %277 {offsets = [0, 0], sizes = [8, 1], strides = [1, 1]} : vector<8x4xf32> to vector<8x1xf32>
    %292 = vector.extract_strided_slice %9 {offsets = [0, 0], sizes = [1, 16], strides = [1, 1]} : vector<4x16xf32> to vector<1x16xf32>
    %293 = vector.broadcast %291 : vector<8x1xf32> to vector<8x16xf32>
    %294 = vector.broadcast %292 : vector<1x16xf32> to vector<8x16xf32>
    %295 = arith.mulf %293, %294 : vector<8x16xf32>
    %296 = vector.extract_strided_slice %279 {offsets = [0, 0], sizes = [8, 1], strides = [1, 1]} : vector<8x4xf32> to vector<8x1xf32>
    %297 = vector.extract_strided_slice %7 {offsets = [0, 0], sizes = [1, 16], strides = [1, 1]} : vector<4x16xf32> to vector<1x16xf32>
    %298 = vector.broadcast %296 : vector<8x1xf32> to vector<8x16xf32>
    %299 = vector.broadcast %297 : vector<1x16xf32> to vector<8x16xf32>
    %300 = arith.mulf %298, %299 : vector<8x16xf32>
    %301 = arith.addf %295, %300 : vector<8x16xf32>
    %302 = vector.extract_strided_slice %274 {offsets = [0, 1], sizes = [8, 1], strides = [1, 1]} : vector<8x4xf32> to vector<8x1xf32>
    %303 = vector.extract_strided_slice %9 {offsets = [1, 0], sizes = [1, 16], strides = [1, 1]} : vector<4x16xf32> to vector<1x16xf32>
    %304 = vector.broadcast %302 : vector<8x1xf32> to vector<8x16xf32>
    %305 = vector.broadcast %303 : vector<1x16xf32> to vector<8x16xf32>
    %306 = arith.mulf %304, %305 : vector<8x16xf32>
    %307 = vector.extract_strided_slice %278 {offsets = [0, 1], sizes = [8, 1], strides = [1, 1]} : vector<8x4xf32> to vector<8x1xf32>
    %308 = vector.extract_strided_slice %7 {offsets = [1, 0], sizes = [1, 16], strides = [1, 1]} : vector<4x16xf32> to vector<1x16xf32>
    %309 = vector.broadcast %307 : vector<8x1xf32> to vector<8x16xf32>
    %310 = vector.broadcast %308 : vector<1x16xf32> to vector<8x16xf32>
    %311 = arith.mulf %309, %310 : vector<8x16xf32>
    %312 = arith.addf %306, %311 : vector<8x16xf32>
    %313 = vector.extract_strided_slice %277 {offsets = [0, 1], sizes = [8, 1], strides = [1, 1]} : vector<8x4xf32> to vector<8x1xf32>
    %314 = vector.extract_strided_slice %9 {offsets = [1, 0], sizes = [1, 16], strides = [1, 1]} : vector<4x16xf32> to vector<1x16xf32>
    %315 = vector.broadcast %313 : vector<8x1xf32> to vector<8x16xf32>
    %316 = vector.broadcast %314 : vector<1x16xf32> to vector<8x16xf32>
    %317 = arith.mulf %315, %316 : vector<8x16xf32>
    %318 = vector.extract_strided_slice %279 {offsets = [0, 1], sizes = [8, 1], strides = [1, 1]} : vector<8x4xf32> to vector<8x1xf32>
    %319 = vector.extract_strided_slice %7 {offsets = [1, 0], sizes = [1, 16], strides = [1, 1]} : vector<4x16xf32> to vector<1x16xf32>
    %320 = vector.broadcast %318 : vector<8x1xf32> to vector<8x16xf32>
    %321 = vector.broadcast %319 : vector<1x16xf32> to vector<8x16xf32>
    %322 = arith.mulf %320, %321 : vector<8x16xf32>
    %323 = arith.addf %317, %322 : vector<8x16xf32>
    %324 = arith.mulf %290, %312 : vector<8x16xf32>
    %325 = arith.mulf %301, %323 : vector<8x16xf32>
    %326 = arith.subf %324, %325 : vector<8x16xf32>
    %327 = arith.mulf %290, %323 : vector<8x16xf32>
    %328 = arith.mulf %301, %312 : vector<8x16xf32>
    %329 = arith.addf %327, %328 : vector<8x16xf32>
    %330 = vector.extract_strided_slice %274 {offsets = [0, 2], sizes = [8, 1], strides = [1, 1]} : vector<8x4xf32> to vector<8x1xf32>
    %331 = vector.extract_strided_slice %9 {offsets = [2, 0], sizes = [1, 16], strides = [1, 1]} : vector<4x16xf32> to vector<1x16xf32>
    %332 = vector.broadcast %330 : vector<8x1xf32> to vector<8x16xf32>
    %333 = vector.broadcast %331 : vector<1x16xf32> to vector<8x16xf32>
    %334 = arith.mulf %332, %333 : vector<8x16xf32>
    %335 = vector.extract_strided_slice %278 {offsets = [0, 2], sizes = [8, 1], strides = [1, 1]} : vector<8x4xf32> to vector<8x1xf32>
    %336 = vector.extract_strided_slice %7 {offsets = [2, 0], sizes = [1, 16], strides = [1, 1]} : vector<4x16xf32> to vector<1x16xf32>
    %337 = vector.broadcast %335 : vector<8x1xf32> to vector<8x16xf32>
    %338 = vector.broadcast %336 : vector<1x16xf32> to vector<8x16xf32>
    %339 = arith.mulf %337, %338 : vector<8x16xf32>
    %340 = arith.addf %334, %339 : vector<8x16xf32>
    %341 = vector.extract_strided_slice %277 {offsets = [0, 2], sizes = [8, 1], strides = [1, 1]} : vector<8x4xf32> to vector<8x1xf32>
    %342 = vector.extract_strided_slice %9 {offsets = [2, 0], sizes = [1, 16], strides = [1, 1]} : vector<4x16xf32> to vector<1x16xf32>
    %343 = vector.broadcast %341 : vector<8x1xf32> to vector<8x16xf32>
    %344 = vector.broadcast %342 : vector<1x16xf32> to vector<8x16xf32>
    %345 = arith.mulf %343, %344 : vector<8x16xf32>
    %346 = vector.extract_strided_slice %279 {offsets = [0, 2], sizes = [8, 1], strides = [1, 1]} : vector<8x4xf32> to vector<8x1xf32>
    %347 = vector.extract_strided_slice %7 {offsets = [2, 0], sizes = [1, 16], strides = [1, 1]} : vector<4x16xf32> to vector<1x16xf32>
    %348 = vector.broadcast %346 : vector<8x1xf32> to vector<8x16xf32>
    %349 = vector.broadcast %347 : vector<1x16xf32> to vector<8x16xf32>
    %350 = arith.mulf %348, %349 : vector<8x16xf32>
    %351 = arith.addf %345, %350 : vector<8x16xf32>
    %352 = arith.mulf %326, %340 : vector<8x16xf32>
    %353 = arith.mulf %329, %351 : vector<8x16xf32>
    %354 = arith.subf %352, %353 : vector<8x16xf32>
    %355 = arith.mulf %326, %351 : vector<8x16xf32>
    %356 = arith.mulf %329, %340 : vector<8x16xf32>
    %357 = arith.addf %355, %356 : vector<8x16xf32>
    %358 = vector.extract_strided_slice %274 {offsets = [0, 3], sizes = [8, 1], strides = [1, 1]} : vector<8x4xf32> to vector<8x1xf32>
    %359 = vector.extract_strided_slice %9 {offsets = [3, 0], sizes = [1, 16], strides = [1, 1]} : vector<4x16xf32> to vector<1x16xf32>
    %360 = vector.broadcast %358 : vector<8x1xf32> to vector<8x16xf32>
    %361 = vector.broadcast %359 : vector<1x16xf32> to vector<8x16xf32>
    %362 = arith.mulf %360, %361 : vector<8x16xf32>
    %363 = vector.extract_strided_slice %278 {offsets = [0, 3], sizes = [8, 1], strides = [1, 1]} : vector<8x4xf32> to vector<8x1xf32>
    %364 = vector.extract_strided_slice %7 {offsets = [3, 0], sizes = [1, 16], strides = [1, 1]} : vector<4x16xf32> to vector<1x16xf32>
    %365 = vector.broadcast %363 : vector<8x1xf32> to vector<8x16xf32>
    %366 = vector.broadcast %364 : vector<1x16xf32> to vector<8x16xf32>
    %367 = arith.mulf %365, %366 : vector<8x16xf32>
    %368 = arith.addf %362, %367 : vector<8x16xf32>
    %369 = vector.extract_strided_slice %277 {offsets = [0, 3], sizes = [8, 1], strides = [1, 1]} : vector<8x4xf32> to vector<8x1xf32>
    %370 = vector.extract_strided_slice %9 {offsets = [3, 0], sizes = [1, 16], strides = [1, 1]} : vector<4x16xf32> to vector<1x16xf32>
    %371 = vector.broadcast %369 : vector<8x1xf32> to vector<8x16xf32>
    %372 = vector.broadcast %370 : vector<1x16xf32> to vector<8x16xf32>
    %373 = arith.mulf %371, %372 : vector<8x16xf32>
    %374 = vector.extract_strided_slice %279 {offsets = [0, 3], sizes = [8, 1], strides = [1, 1]} : vector<8x4xf32> to vector<8x1xf32>
    %375 = vector.extract_strided_slice %7 {offsets = [3, 0], sizes = [1, 16], strides = [1, 1]} : vector<4x16xf32> to vector<1x16xf32>
    %376 = vector.broadcast %374 : vector<8x1xf32> to vector<8x16xf32>
    %377 = vector.broadcast %375 : vector<1x16xf32> to vector<8x16xf32>
    %378 = arith.mulf %376, %377 : vector<8x16xf32>
    %379 = arith.addf %373, %378 : vector<8x16xf32>
    %380 = arith.mulf %354, %368 : vector<8x16xf32>
    %381 = arith.mulf %357, %379 : vector<8x16xf32>
    %382 = arith.subf %380, %381 : vector<8x16xf32>
    %383 = arith.mulf %354, %379 : vector<8x16xf32>
    %384 = arith.mulf %357, %368 : vector<8x16xf32>
    %385 = arith.addf %383, %384 : vector<8x16xf32>
    %cst_73 = arith.constant dense<0.000000e+00> : vector<8x128xf32>
    %386 = tpu.matmul %382, %3, %cst_73 {dimension_numbers = #tpu.dot_dimension_numbers<[1], [0], [0], [1], [0, 0, 1, 1], [], []>} : vector<8x16xf32>, vector<16x128xf32>, vector<8x128xf32> -> vector<8x128xf32>
    %cst_74 = arith.constant dense<0.000000e+00> : vector<8x128xf32>
    %387 = tpu.matmul %385, %4, %cst_74 {dimension_numbers = #tpu.dot_dimension_numbers<[1], [0], [0], [1], [0, 0, 1, 1], [], []>} : vector<8x16xf32>, vector<16x128xf32>, vector<8x128xf32> -> vector<8x128xf32>
    %388 = arith.addf %386, %387 : vector<8x128xf32>
    %389 = arith.mulf %388, %388 : vector<8x128xf32>
    %cst_75 = arith.constant dense<0.000000e+00> : vector<8x128xf32>
    %390 = tpu.matmul %389, %5, %cst_75 {dimension_numbers = #tpu.dot_dimension_numbers<[1], [0], [0], [1], [0, 0, 1, 1], [], []>} : vector<8x128xf32>, vector<128x128xf32>, vector<8x128xf32> -> vector<8x128xf32>
    %391 = vector.broadcast %6 : vector<1x128xf32> to vector<8x128xf32>
    %392 = arith.addf %390, %391 : vector<8x128xf32>
    %393 = vector.extract_strided_slice %392 {offsets = [0, 0], sizes = [8, 32], strides = [1, 1]} : vector<8x128xf32> to vector<8x32xf32>
    %394 = arith.negf %393 : vector<8x32xf32>
    %395 = math.exp %394 : vector<8x32xf32>
    %cst_76 = arith.constant 1.000000e+00 : f32
    %396 = vector.broadcast %cst_76 : f32 to vector<8x32xf32>
    %397 = arith.addf %396, %395 : vector<8x32xf32>
    %398 = arith.divf %396, %397 : vector<8x32xf32>
    %399 = vector.extract_strided_slice %392 {offsets = [0, 32], sizes = [8, 32], strides = [1, 1]} : vector<8x128xf32> to vector<8x32xf32>
    %400 = arith.negf %399 : vector<8x32xf32>
    %401 = math.exp %400 : vector<8x32xf32>
    %cst_77 = arith.constant 1.000000e+00 : f32
    %402 = vector.broadcast %cst_77 : f32 to vector<8x32xf32>
    %403 = arith.addf %402, %401 : vector<8x32xf32>
    %404 = arith.divf %402, %403 : vector<8x32xf32>
    %405 = vector.extract_strided_slice %392 {offsets = [0, 64], sizes = [8, 32], strides = [1, 1]} : vector<8x128xf32> to vector<8x32xf32>
    %406 = math.tanh %405 : vector<8x32xf32>
    %407 = vector.extract_strided_slice %392 {offsets = [0, 96], sizes = [8, 32], strides = [1, 1]} : vector<8x128xf32> to vector<8x32xf32>
    %408 = arith.negf %407 : vector<8x32xf32>
    %409 = math.exp %408 : vector<8x32xf32>
    %cst_78 = arith.constant 1.000000e+00 : f32
    %410 = vector.broadcast %cst_78 : f32 to vector<8x32xf32>
    %411 = arith.addf %410, %409 : vector<8x32xf32>
    %412 = arith.divf %410, %411 : vector<8x32xf32>
    %413 = arith.mulf %398, %210 : vector<8x32xf32>
    %414 = arith.mulf %404, %406 : vector<8x32xf32>
    %415 = arith.addf %413, %414 : vector<8x32xf32>
    %416 = math.tanh %415 : vector<8x32xf32>
    %417 = arith.mulf %412, %416 : vector<8x32xf32>
    %418 = arith.index_cast %c1_i32 : i32 to index
    %c0_79 = arith.constant 0 : index
    %c0_80 = arith.constant 0 : index
    %419 = vector.load %arg10[%418, %c0_79, %c0_80] : memref<8x8x32xf32, #tpu.memory_space<vmem>>, vector<1x8x32xf32>
    %420 = vector.shape_cast %419 : vector<1x8x32xf32> to vector<8x32xf32>
    %421 = vector.shape_cast %417 : vector<8x32xf32> to vector<1x8x32xf32>
    tpu.vector_store %arg10[%418, %c0_79, %c0_80], %421 {strides = array<i32>} : memref<8x8x32xf32, #tpu.memory_space<vmem>>, vector<1x8x32xf32>,
    %c2_i32 = arith.constant 2 : i32
    %422 = arith.index_cast %c2_i32 : i32 to index
    %c0_81 = arith.constant 0 : index
    %c0_82 = arith.constant 0 : index
    %423 = vector.load %arg1[%422, %c0_81, %c0_82] : memref<8x8x8xf32, #tpu.memory_space<vmem>>, vector<1x8x8xf32>
    %424 = vector.shape_cast %423 : vector<1x8x8xf32> to vector<8x8xf32>
    %cst_83 = arith.constant dense<0.000000e+00> : vector<8x4xf32>
    %425 = tpu.matmul %417, %0, %cst_83 {dimension_numbers = #tpu.dot_dimension_numbers<[1], [0], [0], [1], [0, 0, 1, 1], [], []>} : vector<8x32xf32>, vector<32x4xf32>, vector<8x4xf32> -> vector<8x4xf32>
    %cst_84 = arith.constant dense<0.000000e+00> : vector<8x4xf32>
    %426 = tpu.matmul %424, %1, %cst_84 {dimension_numbers = #tpu.dot_dimension_numbers<[1], [0], [0], [1], [0, 0, 1, 1], [], []>} : vector<8x8xf32>, vector<8x4xf32>, vector<8x4xf32> -> vector<8x4xf32>
    %427 = arith.addf %425, %426 : vector<8x4xf32>
    %428 = vector.broadcast %2 : vector<1x4xf32> to vector<8x4xf32>
    %429 = arith.addf %427, %428 : vector<8x4xf32>
    %430 = arith.mulf %429, %429 : vector<8x4xf32>
    %cst_85 = arith.constant 1.000000e+00 : f32
    %431 = vector.broadcast %cst_85 : f32 to vector<8x4xf32>
    %432 = arith.addf %431, %430 : vector<8x4xf32>
    %433 = math.rsqrt %432 : vector<8x4xf32>
    %cst_86 = arith.constant 1.000000e+00 : f32
    %434 = vector.broadcast %cst_86 : f32 to vector<8x4xf32>
    %435 = arith.addf %434, %433 : vector<8x4xf32>
    %cst_87 = arith.constant 5.000000e-01 : f32
    %436 = vector.broadcast %cst_87 : f32 to vector<8x4xf32>
    %437 = arith.mulf %435, %436 : vector<8x4xf32>
    %cst_88 = arith.constant 0.000000e+00 : f32
    %438 = vector.broadcast %cst_88 : f32 to vector<8x4xf32>
    %439 = arith.maximumf %437, %438 : vector<8x4xf32>
    %440 = math.sqrt %439 : vector<8x4xf32>
    %cst_89 = arith.constant 0.000000e+00 : f32
    %441 = vector.broadcast %cst_89 : f32 to vector<8x4xf32>
    %442 = arith.cmpf oge, %429, %441 : vector<8x4xf32>
    %cst_90 = arith.constant 1.000000e+00 : f32
    %cst_91 = arith.constant -1.000000e+00 : f32
    %443 = vector.broadcast %cst_90 : f32 to vector<8x4xf32>
    %444 = vector.broadcast %cst_91 : f32 to vector<8x4xf32>
    %445 = arith.select %442, %443, %444 : vector<8x4xi1>, vector<8x4xf32>
    %cst_92 = arith.constant 1.000000e+00 : f32
    %446 = vector.broadcast %cst_92 : f32 to vector<8x4xf32>
    %447 = arith.subf %446, %433 : vector<8x4xf32>
    %cst_93 = arith.constant 5.000000e-01 : f32
    %448 = vector.broadcast %cst_93 : f32 to vector<8x4xf32>
    %449 = arith.mulf %447, %448 : vector<8x4xf32>
    %cst_94 = arith.constant 0.000000e+00 : f32
    %450 = vector.broadcast %cst_94 : f32 to vector<8x4xf32>
    %451 = arith.maximumf %449, %450 : vector<8x4xf32>
    %452 = math.sqrt %451 : vector<8x4xf32>
    %453 = arith.mulf %445, %452 : vector<8x4xf32>
    %454 = arith.mulf %429, %429 : vector<8x4xf32>
    %455 = arith.mulf %454, %454 : vector<8x4xf32>
    %cst_95 = arith.constant 1.000000e+00 : f32
    %456 = vector.broadcast %cst_95 : f32 to vector<8x4xf32>
    %457 = arith.addf %456, %455 : vector<8x4xf32>
    %458 = math.rsqrt %457 : vector<8x4xf32>
    %cst_96 = arith.constant 1.000000e+00 : f32
    %459 = vector.broadcast %cst_96 : f32 to vector<8x4xf32>
    %460 = arith.addf %459, %458 : vector<8x4xf32>
    %cst_97 = arith.constant 5.000000e-01 : f32
    %461 = vector.broadcast %cst_97 : f32 to vector<8x4xf32>
    %462 = arith.mulf %460, %461 : vector<8x4xf32>
    %cst_98 = arith.constant 0.000000e+00 : f32
    %463 = vector.broadcast %cst_98 : f32 to vector<8x4xf32>
    %464 = arith.maximumf %462, %463 : vector<8x4xf32>
    %465 = math.sqrt %464 : vector<8x4xf32>
    %cst_99 = arith.constant 1.000000e+00 : f32
    %466 = vector.broadcast %cst_99 : f32 to vector<8x4xf32>
    %467 = arith.subf %466, %458 : vector<8x4xf32>
    %cst_100 = arith.constant 5.000000e-01 : f32
    %468 = vector.broadcast %cst_100 : f32 to vector<8x4xf32>
    %469 = arith.mulf %467, %468 : vector<8x4xf32>
    %cst_101 = arith.constant 0.000000e+00 : f32
    %470 = vector.broadcast %cst_101 : f32 to vector<8x4xf32>
    %471 = arith.maximumf %469, %470 : vector<8x4xf32>
    %472 = math.sqrt %471 : vector<8x4xf32>
    %473 = arith.subf %440, %453 : vector<8x4xf32>
    %cst_102 = arith.constant 0.707106769 : f32
    %474 = vector.broadcast %cst_102 : f32 to vector<8x4xf32>
    %475 = arith.mulf %473, %474 : vector<8x4xf32>
    %476 = arith.addf %440, %453 : vector<8x4xf32>
    %cst_103 = arith.constant 0.707106769 : f32
    %477 = vector.broadcast %cst_103 : f32 to vector<8x4xf32>
    %478 = arith.mulf %476, %477 : vector<8x4xf32>
    %479 = arith.mulf %465, %475 : vector<8x4xf32>
    %cst_104 = arith.constant 0.000000e+00 : f32
    %480 = vector.broadcast %cst_104 : f32 to vector<8x4xf32>
    %481 = arith.subf %480, %472 : vector<8x4xf32>
    %482 = arith.mulf %481, %475 : vector<8x4xf32>
    %483 = arith.mulf %465, %478 : vector<8x4xf32>
    %484 = arith.mulf %472, %478 : vector<8x4xf32>
    %485 = vector.extract_strided_slice %479 {offsets = [0, 0], sizes = [8, 1], strides = [1, 1]} : vector<8x4xf32> to vector<8x1xf32>
    %486 = vector.extract_strided_slice %9 {offsets = [0, 0], sizes = [1, 16], strides = [1, 1]} : vector<4x16xf32> to vector<1x16xf32>
    %487 = vector.broadcast %485 : vector<8x1xf32> to vector<8x16xf32>
    %488 = vector.broadcast %486 : vector<1x16xf32> to vector<8x16xf32>
    %489 = arith.mulf %487, %488 : vector<8x16xf32>
    %490 = vector.extract_strided_slice %483 {offsets = [0, 0], sizes = [8, 1], strides = [1, 1]} : vector<8x4xf32> to vector<8x1xf32>
    %491 = vector.extract_strided_slice %7 {offsets = [0, 0], sizes = [1, 16], strides = [1, 1]} : vector<4x16xf32> to vector<1x16xf32>
    %492 = vector.broadcast %490 : vector<8x1xf32> to vector<8x16xf32>
    %493 = vector.broadcast %491 : vector<1x16xf32> to vector<8x16xf32>
    %494 = arith.mulf %492, %493 : vector<8x16xf32>
    %495 = arith.addf %489, %494 : vector<8x16xf32>
    %496 = vector.extract_strided_slice %482 {offsets = [0, 0], sizes = [8, 1], strides = [1, 1]} : vector<8x4xf32> to vector<8x1xf32>
    %497 = vector.extract_strided_slice %9 {offsets = [0, 0], sizes = [1, 16], strides = [1, 1]} : vector<4x16xf32> to vector<1x16xf32>
    %498 = vector.broadcast %496 : vector<8x1xf32> to vector<8x16xf32>
    %499 = vector.broadcast %497 : vector<1x16xf32> to vector<8x16xf32>
    %500 = arith.mulf %498, %499 : vector<8x16xf32>
    %501 = vector.extract_strided_slice %484 {offsets = [0, 0], sizes = [8, 1], strides = [1, 1]} : vector<8x4xf32> to vector<8x1xf32>
    %502 = vector.extract_strided_slice %7 {offsets = [0, 0], sizes = [1, 16], strides = [1, 1]} : vector<4x16xf32> to vector<1x16xf32>
    %503 = vector.broadcast %501 : vector<8x1xf32> to vector<8x16xf32>
    %504 = vector.broadcast %502 : vector<1x16xf32> to vector<8x16xf32>
    %505 = arith.mulf %503, %504 : vector<8x16xf32>
    %506 = arith.addf %500, %505 : vector<8x16xf32>
    %507 = vector.extract_strided_slice %479 {offsets = [0, 1], sizes = [8, 1], strides = [1, 1]} : vector<8x4xf32> to vector<8x1xf32>
    %508 = vector.extract_strided_slice %9 {offsets = [1, 0], sizes = [1, 16], strides = [1, 1]} : vector<4x16xf32> to vector<1x16xf32>
    %509 = vector.broadcast %507 : vector<8x1xf32> to vector<8x16xf32>
    %510 = vector.broadcast %508 : vector<1x16xf32> to vector<8x16xf32>
    %511 = arith.mulf %509, %510 : vector<8x16xf32>
    %512 = vector.extract_strided_slice %483 {offsets = [0, 1], sizes = [8, 1], strides = [1, 1]} : vector<8x4xf32> to vector<8x1xf32>
    %513 = vector.extract_strided_slice %7 {offsets = [1, 0], sizes = [1, 16], strides = [1, 1]} : vector<4x16xf32> to vector<1x16xf32>
    %514 = vector.broadcast %512 : vector<8x1xf32> to vector<8x16xf32>
    %515 = vector.broadcast %513 : vector<1x16xf32> to vector<8x16xf32>
    %516 = arith.mulf %514, %515 : vector<8x16xf32>
    %517 = arith.addf %511, %516 : vector<8x16xf32>
    %518 = vector.extract_strided_slice %482 {offsets = [0, 1], sizes = [8, 1], strides = [1, 1]} : vector<8x4xf32> to vector<8x1xf32>
    %519 = vector.extract_strided_slice %9 {offsets = [1, 0], sizes = [1, 16], strides = [1, 1]} : vector<4x16xf32> to vector<1x16xf32>
    %520 = vector.broadcast %518 : vector<8x1xf32> to vector<8x16xf32>
    %521 = vector.broadcast %519 : vector<1x16xf32> to vector<8x16xf32>
    %522 = arith.mulf %520, %521 : vector<8x16xf32>
    %523 = vector.extract_strided_slice %484 {offsets = [0, 1], sizes = [8, 1], strides = [1, 1]} : vector<8x4xf32> to vector<8x1xf32>
    %524 = vector.extract_strided_slice %7 {offsets = [1, 0], sizes = [1, 16], strides = [1, 1]} : vector<4x16xf32> to vector<1x16xf32>
    %525 = vector.broadcast %523 : vector<8x1xf32> to vector<8x16xf32>
    %526 = vector.broadcast %524 : vector<1x16xf32> to vector<8x16xf32>
    %527 = arith.mulf %525, %526 : vector<8x16xf32>
    %528 = arith.addf %522, %527 : vector<8x16xf32>
    %529 = arith.mulf %495, %517 : vector<8x16xf32>
    %530 = arith.mulf %506, %528 : vector<8x16xf32>
    %531 = arith.subf %529, %530 : vector<8x16xf32>
    %532 = arith.mulf %495, %528 : vector<8x16xf32>
    %533 = arith.mulf %506, %517 : vector<8x16xf32>
    %534 = arith.addf %532, %533 : vector<8x16xf32>
    %535 = vector.extract_strided_slice %479 {offsets = [0, 2], sizes = [8, 1], strides = [1, 1]} : vector<8x4xf32> to vector<8x1xf32>
    %536 = vector.extract_strided_slice %9 {offsets = [2, 0], sizes = [1, 16], strides = [1, 1]} : vector<4x16xf32> to vector<1x16xf32>
    %537 = vector.broadcast %535 : vector<8x1xf32> to vector<8x16xf32>
    %538 = vector.broadcast %536 : vector<1x16xf32> to vector<8x16xf32>
    %539 = arith.mulf %537, %538 : vector<8x16xf32>
    %540 = vector.extract_strided_slice %483 {offsets = [0, 2], sizes = [8, 1], strides = [1, 1]} : vector<8x4xf32> to vector<8x1xf32>
    %541 = vector.extract_strided_slice %7 {offsets = [2, 0], sizes = [1, 16], strides = [1, 1]} : vector<4x16xf32> to vector<1x16xf32>
    %542 = vector.broadcast %540 : vector<8x1xf32> to vector<8x16xf32>
    %543 = vector.broadcast %541 : vector<1x16xf32> to vector<8x16xf32>
    %544 = arith.mulf %542, %543 : vector<8x16xf32>
    %545 = arith.addf %539, %544 : vector<8x16xf32>
    %546 = vector.extract_strided_slice %482 {offsets = [0, 2], sizes = [8, 1], strides = [1, 1]} : vector<8x4xf32> to vector<8x1xf32>
    %547 = vector.extract_strided_slice %9 {offsets = [2, 0], sizes = [1, 16], strides = [1, 1]} : vector<4x16xf32> to vector<1x16xf32>
    %548 = vector.broadcast %546 : vector<8x1xf32> to vector<8x16xf32>
    %549 = vector.broadcast %547 : vector<1x16xf32> to vector<8x16xf32>
    %550 = arith.mulf %548, %549 : vector<8x16xf32>
    %551 = vector.extract_strided_slice %484 {offsets = [0, 2], sizes = [8, 1], strides = [1, 1]} : vector<8x4xf32> to vector<8x1xf32>
    %552 = vector.extract_strided_slice %7 {offsets = [2, 0], sizes = [1, 16], strides = [1, 1]} : vector<4x16xf32> to vector<1x16xf32>
    %553 = vector.broadcast %551 : vector<8x1xf32> to vector<8x16xf32>
    %554 = vector.broadcast %552 : vector<1x16xf32> to vector<8x16xf32>
    %555 = arith.mulf %553, %554 : vector<8x16xf32>
    %556 = arith.addf %550, %555 : vector<8x16xf32>
    %557 = arith.mulf %531, %545 : vector<8x16xf32>
    %558 = arith.mulf %534, %556 : vector<8x16xf32>
    %559 = arith.subf %557, %558 : vector<8x16xf32>
    %560 = arith.mulf %531, %556 : vector<8x16xf32>
    %561 = arith.mulf %534, %545 : vector<8x16xf32>
    %562 = arith.addf %560, %561 : vector<8x16xf32>
    %563 = vector.extract_strided_slice %479 {offsets = [0, 3], sizes = [8, 1], strides = [1, 1]} : vector<8x4xf32> to vector<8x1xf32>
    %564 = vector.extract_strided_slice %9 {offsets = [3, 0], sizes = [1, 16], strides = [1, 1]} : vector<4x16xf32> to vector<1x16xf32>
    %565 = vector.broadcast %563 : vector<8x1xf32> to vector<8x16xf32>
    %566 = vector.broadcast %564 : vector<1x16xf32> to vector<8x16xf32>
    %567 = arith.mulf %565, %566 : vector<8x16xf32>
    %568 = vector.extract_strided_slice %483 {offsets = [0, 3], sizes = [8, 1], strides = [1, 1]} : vector<8x4xf32> to vector<8x1xf32>
    %569 = vector.extract_strided_slice %7 {offsets = [3, 0], sizes = [1, 16], strides = [1, 1]} : vector<4x16xf32> to vector<1x16xf32>
    %570 = vector.broadcast %568 : vector<8x1xf32> to vector<8x16xf32>
    %571 = vector.broadcast %569 : vector<1x16xf32> to vector<8x16xf32>
    %572 = arith.mulf %570, %571 : vector<8x16xf32>
    %573 = arith.addf %567, %572 : vector<8x16xf32>
    %574 = vector.extract_strided_slice %482 {offsets = [0, 3], sizes = [8, 1], strides = [1, 1]} : vector<8x4xf32> to vector<8x1xf32>
    %575 = vector.extract_strided_slice %9 {offsets = [3, 0], sizes = [1, 16], strides = [1, 1]} : vector<4x16xf32> to vector<1x16xf32>
    %576 = vector.broadcast %574 : vector<8x1xf32> to vector<8x16xf32>
    %577 = vector.broadcast %575 : vector<1x16xf32> to vector<8x16xf32>
    %578 = arith.mulf %576, %577 : vector<8x16xf32>
    %579 = vector.extract_strided_slice %484 {offsets = [0, 3], sizes = [8, 1], strides = [1, 1]} : vector<8x4xf32> to vector<8x1xf32>
    %580 = vector.extract_strided_slice %7 {offsets = [3, 0], sizes = [1, 16], strides = [1, 1]} : vector<4x16xf32> to vector<1x16xf32>
    %581 = vector.broadcast %579 : vector<8x1xf32> to vector<8x16xf32>
    %582 = vector.broadcast %580 : vector<1x16xf32> to vector<8x16xf32>
    %583 = arith.mulf %581, %582 : vector<8x16xf32>
    %584 = arith.addf %578, %583 : vector<8x16xf32>
    %585 = arith.mulf %559, %573 : vector<8x16xf32>
    %586 = arith.mulf %562, %584 : vector<8x16xf32>
    %587 = arith.subf %585, %586 : vector<8x16xf32>
    %588 = arith.mulf %559, %584 : vector<8x16xf32>
    %589 = arith.mulf %562, %573 : vector<8x16xf32>
    %590 = arith.addf %588, %589 : vector<8x16xf32>
    %cst_105 = arith.constant dense<0.000000e+00> : vector<8x128xf32>
    %591 = tpu.matmul %587, %3, %cst_105 {dimension_numbers = #tpu.dot_dimension_numbers<[1], [0], [0], [1], [0, 0, 1, 1], [], []>} : vector<8x16xf32>, vector<16x128xf32>, vector<8x128xf32> -> vector<8x128xf32>
    %cst_106 = arith.constant dense<0.000000e+00> : vector<8x128xf32>
    %592 = tpu.matmul %590, %4, %cst_106 {dimension_numbers = #tpu.dot_dimension_numbers<[1], [0], [0], [1], [0, 0, 1, 1], [], []>} : vector<8x16xf32>, vector<16x128xf32>, vector<8x128xf32> -> vector<8x128xf32>
    %593 = arith.addf %591, %592 : vector<8x128xf32>
    %594 = arith.mulf %593, %593 : vector<8x128xf32>
    %cst_107 = arith.constant dense<0.000000e+00> : vector<8x128xf32>
    %595 = tpu.matmul %594, %5, %cst_107 {dimension_numbers = #tpu.dot_dimension_numbers<[1], [0], [0], [1], [0, 0, 1, 1], [], []>} : vector<8x128xf32>, vector<128x128xf32>, vector<8x128xf32> -> vector<8x128xf32>
    %596 = vector.broadcast %6 : vector<1x128xf32> to vector<8x128xf32>
    %597 = arith.addf %595, %596 : vector<8x128xf32>
    %598 = vector.extract_strided_slice %597 {offsets = [0, 0], sizes = [8, 32], strides = [1, 1]} : vector<8x128xf32> to vector<8x32xf32>
    %599 = arith.negf %598 : vector<8x32xf32>
    %600 = math.exp %599 : vector<8x32xf32>
    %cst_108 = arith.constant 1.000000e+00 : f32
    %601 = vector.broadcast %cst_108 : f32 to vector<8x32xf32>
    %602 = arith.addf %601, %600 : vector<8x32xf32>
    %603 = arith.divf %601, %602 : vector<8x32xf32>
    %604 = vector.extract_strided_slice %597 {offsets = [0, 32], sizes = [8, 32], strides = [1, 1]} : vector<8x128xf32> to vector<8x32xf32>
    %605 = arith.negf %604 : vector<8x32xf32>
    %606 = math.exp %605 : vector<8x32xf32>
    %cst_109 = arith.constant 1.000000e+00 : f32
    %607 = vector.broadcast %cst_109 : f32 to vector<8x32xf32>
    %608 = arith.addf %607, %606 : vector<8x32xf32>
    %609 = arith.divf %607, %608 : vector<8x32xf32>
    %610 = vector.extract_strided_slice %597 {offsets = [0, 64], sizes = [8, 32], strides = [1, 1]} : vector<8x128xf32> to vector<8x32xf32>
    %611 = math.tanh %610 : vector<8x32xf32>
    %612 = vector.extract_strided_slice %597 {offsets = [0, 96], sizes = [8, 32], strides = [1, 1]} : vector<8x128xf32> to vector<8x32xf32>
    %613 = arith.negf %612 : vector<8x32xf32>
    %614 = math.exp %613 : vector<8x32xf32>
    %cst_110 = arith.constant 1.000000e+00 : f32
    %615 = vector.broadcast %cst_110 : f32 to vector<8x32xf32>
    %616 = arith.addf %615, %614 : vector<8x32xf32>
    %617 = arith.divf %615, %616 : vector<8x32xf32>
    %618 = arith.mulf %603, %415 : vector<8x32xf32>
    %619 = arith.mulf %609, %611 : vector<8x32xf32>
    %620 = arith.addf %618, %619 : vector<8x32xf32>
    %621 = math.tanh %620 : vector<8x32xf32>
    %622 = arith.mulf %617, %621 : vector<8x32xf32>
    %623 = arith.index_cast %c2_i32 : i32 to index
    %c0_111 = arith.constant 0 : index
    %c0_112 = arith.constant 0 : index
    %624 = vector.load %arg10[%623, %c0_111, %c0_112] : memref<8x8x32xf32, #tpu.memory_space<vmem>>, vector<1x8x32xf32>
    %625 = vector.shape_cast %624 : vector<1x8x32xf32> to vector<8x32xf32>
    %626 = vector.shape_cast %622 : vector<8x32xf32> to vector<1x8x32xf32>
    tpu.vector_store %arg10[%623, %c0_111, %c0_112], %626 {strides = array<i32>} : memref<8x8x32xf32, #tpu.memory_space<vmem>>, vector<1x8x32xf32>,
    %c3_i32 = arith.constant 3 : i32
    %627 = arith.index_cast %c3_i32 : i32 to index
    %c0_113 = arith.constant 0 : index
    %c0_114 = arith.constant 0 : index
    %628 = vector.load %arg1[%627, %c0_113, %c0_114] : memref<8x8x8xf32, #tpu.memory_space<vmem>>, vector<1x8x8xf32>
    %629 = vector.shape_cast %628 : vector<1x8x8xf32> to vector<8x8xf32>
    %cst_115 = arith.constant dense<0.000000e+00> : vector<8x4xf32>
    %630 = tpu.matmul %622, %0, %cst_115 {dimension_numbers = #tpu.dot_dimension_numbers<[1], [0], [0], [1], [0, 0, 1, 1], [], []>} : vector<8x32xf32>, vector<32x4xf32>, vector<8x4xf32> -> vector<8x4xf32>
    %cst_116 = arith.constant dense<0.000000e+00> : vector<8x4xf32>
    %631 = tpu.matmul %629, %1, %cst_116 {dimension_numbers = #tpu.dot_dimension_numbers<[1], [0], [0], [1], [0, 0, 1, 1], [], []>} : vector<8x8xf32>, vector<8x4xf32>, vector<8x4xf32> -> vector<8x4xf32>
    %632 = arith.addf %630, %631 : vector<8x4xf32>
    %633 = vector.broadcast %2 : vector<1x4xf32> to vector<8x4xf32>
    %634 = arith.addf %632, %633 : vector<8x4xf32>
    %635 = arith.mulf %634, %634 : vector<8x4xf32>
    %cst_117 = arith.constant 1.000000e+00 : f32
    %636 = vector.broadcast %cst_117 : f32 to vector<8x4xf32>
    %637 = arith.addf %636, %635 : vector<8x4xf32>
    %638 = math.rsqrt %637 : vector<8x4xf32>
    %cst_118 = arith.constant 1.000000e+00 : f32
    %639 = vector.broadcast %cst_118 : f32 to vector<8x4xf32>
    %640 = arith.addf %639, %638 : vector<8x4xf32>
    %cst_119 = arith.constant 5.000000e-01 : f32
    %641 = vector.broadcast %cst_119 : f32 to vector<8x4xf32>
    %642 = arith.mulf %640, %641 : vector<8x4xf32>
    %cst_120 = arith.constant 0.000000e+00 : f32
    %643 = vector.broadcast %cst_120 : f32 to vector<8x4xf32>
    %644 = arith.maximumf %642, %643 : vector<8x4xf32>
    %645 = math.sqrt %644 : vector<8x4xf32>
    %cst_121 = arith.constant 0.000000e+00 : f32
    %646 = vector.broadcast %cst_121 : f32 to vector<8x4xf32>
    %647 = arith.cmpf oge, %634, %646 : vector<8x4xf32>
    %cst_122 = arith.constant 1.000000e+00 : f32
    %cst_123 = arith.constant -1.000000e+00 : f32
    %648 = vector.broadcast %cst_122 : f32 to vector<8x4xf32>
    %649 = vector.broadcast %cst_123 : f32 to vector<8x4xf32>
    %650 = arith.select %647, %648, %649 : vector<8x4xi1>, vector<8x4xf32>
    %cst_124 = arith.constant 1.000000e+00 : f32
    %651 = vector.broadcast %cst_124 : f32 to vector<8x4xf32>
    %652 = arith.subf %651, %638 : vector<8x4xf32>
    %cst_125 = arith.constant 5.000000e-01 : f32
    %653 = vector.broadcast %cst_125 : f32 to vector<8x4xf32>
    %654 = arith.mulf %652, %653 : vector<8x4xf32>
    %cst_126 = arith.constant 0.000000e+00 : f32
    %655 = vector.broadcast %cst_126 : f32 to vector<8x4xf32>
    %656 = arith.maximumf %654, %655 : vector<8x4xf32>
    %657 = math.sqrt %656 : vector<8x4xf32>
    %658 = arith.mulf %650, %657 : vector<8x4xf32>
    %659 = arith.mulf %634, %634 : vector<8x4xf32>
    %660 = arith.mulf %659, %659 : vector<8x4xf32>
    %cst_127 = arith.constant 1.000000e+00 : f32
    %661 = vector.broadcast %cst_127 : f32 to vector<8x4xf32>
    %662 = arith.addf %661, %660 : vector<8x4xf32>
    %663 = math.rsqrt %662 : vector<8x4xf32>
    %cst_128 = arith.constant 1.000000e+00 : f32
    %664 = vector.broadcast %cst_128 : f32 to vector<8x4xf32>
    %665 = arith.addf %664, %663 : vector<8x4xf32>
    %cst_129 = arith.constant 5.000000e-01 : f32
    %666 = vector.broadcast %cst_129 : f32 to vector<8x4xf32>
    %667 = arith.mulf %665, %666 : vector<8x4xf32>
    %cst_130 = arith.constant 0.000000e+00 : f32
    %668 = vector.broadcast %cst_130 : f32 to vector<8x4xf32>
    %669 = arith.maximumf %667, %668 : vector<8x4xf32>
    %670 = math.sqrt %669 : vector<8x4xf32>
    %cst_131 = arith.constant 1.000000e+00 : f32
    %671 = vector.broadcast %cst_131 : f32 to vector<8x4xf32>
    %672 = arith.subf %671, %663 : vector<8x4xf32>
    %cst_132 = arith.constant 5.000000e-01 : f32
    %673 = vector.broadcast %cst_132 : f32 to vector<8x4xf32>
    %674 = arith.mulf %672, %673 : vector<8x4xf32>
    %cst_133 = arith.constant 0.000000e+00 : f32
    %675 = vector.broadcast %cst_133 : f32 to vector<8x4xf32>
    %676 = arith.maximumf %674, %675 : vector<8x4xf32>
    %677 = math.sqrt %676 : vector<8x4xf32>
    %678 = arith.subf %645, %658 : vector<8x4xf32>
    %cst_134 = arith.constant 0.707106769 : f32
    %679 = vector.broadcast %cst_134 : f32 to vector<8x4xf32>
    %680 = arith.mulf %678, %679 : vector<8x4xf32>
    %681 = arith.addf %645, %658 : vector<8x4xf32>
    %cst_135 = arith.constant 0.707106769 : f32
    %682 = vector.broadcast %cst_135 : f32 to vector<8x4xf32>
    %683 = arith.mulf %681, %682 : vector<8x4xf32>
    %684 = arith.mulf %670, %680 : vector<8x4xf32>
    %cst_136 = arith.constant 0.000000e+00 : f32
    %685 = vector.broadcast %cst_136 : f32 to vector<8x4xf32>
    %686 = arith.subf %685, %677 : vector<8x4xf32>
    %687 = arith.mulf %686, %680 : vector<8x4xf32>
    %688 = arith.mulf %670, %683 : vector<8x4xf32>
    %689 = arith.mulf %677, %683 : vector<8x4xf32>
    %690 = vector.extract_strided_slice %684 {offsets = [0, 0], sizes = [8, 1], strides = [1, 1]} : vector<8x4xf32> to vector<8x1xf32>
    %691 = vector.extract_strided_slice %9 {offsets = [0, 0], sizes = [1, 16], strides = [1, 1]} : vector<4x16xf32> to vector<1x16xf32>
    %692 = vector.broadcast %690 : vector<8x1xf32> to vector<8x16xf32>
    %693 = vector.broadcast %691 : vector<1x16xf32> to vector<8x16xf32>
    %694 = arith.mulf %692, %693 : vector<8x16xf32>
    %695 = vector.extract_strided_slice %688 {offsets = [0, 0], sizes = [8, 1], strides = [1, 1]} : vector<8x4xf32> to vector<8x1xf32>
    %696 = vector.extract_strided_slice %7 {offsets = [0, 0], sizes = [1, 16], strides = [1, 1]} : vector<4x16xf32> to vector<1x16xf32>
    %697 = vector.broadcast %695 : vector<8x1xf32> to vector<8x16xf32>
    %698 = vector.broadcast %696 : vector<1x16xf32> to vector<8x16xf32>
    %699 = arith.mulf %697, %698 : vector<8x16xf32>
    %700 = arith.addf %694, %699 : vector<8x16xf32>
    %701 = vector.extract_strided_slice %687 {offsets = [0, 0], sizes = [8, 1], strides = [1, 1]} : vector<8x4xf32> to vector<8x1xf32>
    %702 = vector.extract_strided_slice %9 {offsets = [0, 0], sizes = [1, 16], strides = [1, 1]} : vector<4x16xf32> to vector<1x16xf32>
    %703 = vector.broadcast %701 : vector<8x1xf32> to vector<8x16xf32>
    %704 = vector.broadcast %702 : vector<1x16xf32> to vector<8x16xf32>
    %705 = arith.mulf %703, %704 : vector<8x16xf32>
    %706 = vector.extract_strided_slice %689 {offsets = [0, 0], sizes = [8, 1], strides = [1, 1]} : vector<8x4xf32> to vector<8x1xf32>
    %707 = vector.extract_strided_slice %7 {offsets = [0, 0], sizes = [1, 16], strides = [1, 1]} : vector<4x16xf32> to vector<1x16xf32>
    %708 = vector.broadcast %706 : vector<8x1xf32> to vector<8x16xf32>
    %709 = vector.broadcast %707 : vector<1x16xf32> to vector<8x16xf32>
    %710 = arith.mulf %708, %709 : vector<8x16xf32>
    %711 = arith.addf %705, %710 : vector<8x16xf32>
    %712 = vector.extract_strided_slice %684 {offsets = [0, 1], sizes = [8, 1], strides = [1, 1]} : vector<8x4xf32> to vector<8x1xf32>
    %713 = vector.extract_strided_slice %9 {offsets = [1, 0], sizes = [1, 16], strides = [1, 1]} : vector<4x16xf32> to vector<1x16xf32>
    %714 = vector.broadcast %712 : vector<8x1xf32> to vector<8x16xf32>
    %715 = vector.broadcast %713 : vector<1x16xf32> to vector<8x16xf32>
    %716 = arith.mulf %714, %715 : vector<8x16xf32>
    %717 = vector.extract_strided_slice %688 {offsets = [0, 1], sizes = [8, 1], strides = [1, 1]} : vector<8x4xf32> to vector<8x1xf32>
    %718 = vector.extract_strided_slice %7 {offsets = [1, 0], sizes = [1, 16], strides = [1, 1]} : vector<4x16xf32> to vector<1x16xf32>
    %719 = vector.broadcast %717 : vector<8x1xf32> to vector<8x16xf32>
    %720 = vector.broadcast %718 : vector<1x16xf32> to vector<8x16xf32>
    %721 = arith.mulf %719, %720 : vector<8x16xf32>
    %722 = arith.addf %716, %721 : vector<8x16xf32>
    %723 = vector.extract_strided_slice %687 {offsets = [0, 1], sizes = [8, 1], strides = [1, 1]} : vector<8x4xf32> to vector<8x1xf32>
    %724 = vector.extract_strided_slice %9 {offsets = [1, 0], sizes = [1, 16], strides = [1, 1]} : vector<4x16xf32> to vector<1x16xf32>
    %725 = vector.broadcast %723 : vector<8x1xf32> to vector<8x16xf32>
    %726 = vector.broadcast %724 : vector<1x16xf32> to vector<8x16xf32>
    %727 = arith.mulf %725, %726 : vector<8x16xf32>
    %728 = vector.extract_strided_slice %689 {offsets = [0, 1], sizes = [8, 1], strides = [1, 1]} : vector<8x4xf32> to vector<8x1xf32>
    %729 = vector.extract_strided_slice %7 {offsets = [1, 0], sizes = [1, 16], strides = [1, 1]} : vector<4x16xf32> to vector<1x16xf32>
    %730 = vector.broadcast %728 : vector<8x1xf32> to vector<8x16xf32>
    %731 = vector.broadcast %729 : vector<1x16xf32> to vector<8x16xf32>
    %732 = arith.mulf %730, %731 : vector<8x16xf32>
    %733 = arith.addf %727, %732 : vector<8x16xf32>
    %734 = arith.mulf %700, %722 : vector<8x16xf32>
    %735 = arith.mulf %711, %733 : vector<8x16xf32>
    %736 = arith.subf %734, %735 : vector<8x16xf32>
    %737 = arith.mulf %700, %733 : vector<8x16xf32>
    %738 = arith.mulf %711, %722 : vector<8x16xf32>
    %739 = arith.addf %737, %738 : vector<8x16xf32>
    %740 = vector.extract_strided_slice %684 {offsets = [0, 2], sizes = [8, 1], strides = [1, 1]} : vector<8x4xf32> to vector<8x1xf32>
    %741 = vector.extract_strided_slice %9 {offsets = [2, 0], sizes = [1, 16], strides = [1, 1]} : vector<4x16xf32> to vector<1x16xf32>
    %742 = vector.broadcast %740 : vector<8x1xf32> to vector<8x16xf32>
    %743 = vector.broadcast %741 : vector<1x16xf32> to vector<8x16xf32>
    %744 = arith.mulf %742, %743 : vector<8x16xf32>
    %745 = vector.extract_strided_slice %688 {offsets = [0, 2], sizes = [8, 1], strides = [1, 1]} : vector<8x4xf32> to vector<8x1xf32>
    %746 = vector.extract_strided_slice %7 {offsets = [2, 0], sizes = [1, 16], strides = [1, 1]} : vector<4x16xf32> to vector<1x16xf32>
    %747 = vector.broadcast %745 : vector<8x1xf32> to vector<8x16xf32>
    %748 = vector.broadcast %746 : vector<1x16xf32> to vector<8x16xf32>
    %749 = arith.mulf %747, %748 : vector<8x16xf32>
    %750 = arith.addf %744, %749 : vector<8x16xf32>
    %751 = vector.extract_strided_slice %687 {offsets = [0, 2], sizes = [8, 1], strides = [1, 1]} : vector<8x4xf32> to vector<8x1xf32>
    %752 = vector.extract_strided_slice %9 {offsets = [2, 0], sizes = [1, 16], strides = [1, 1]} : vector<4x16xf32> to vector<1x16xf32>
    %753 = vector.broadcast %751 : vector<8x1xf32> to vector<8x16xf32>
    %754 = vector.broadcast %752 : vector<1x16xf32> to vector<8x16xf32>
    %755 = arith.mulf %753, %754 : vector<8x16xf32>
    %756 = vector.extract_strided_slice %689 {offsets = [0, 2], sizes = [8, 1], strides = [1, 1]} : vector<8x4xf32> to vector<8x1xf32>
    %757 = vector.extract_strided_slice %7 {offsets = [2, 0], sizes = [1, 16], strides = [1, 1]} : vector<4x16xf32> to vector<1x16xf32>
    %758 = vector.broadcast %756 : vector<8x1xf32> to vector<8x16xf32>
    %759 = vector.broadcast %757 : vector<1x16xf32> to vector<8x16xf32>
    %760 = arith.mulf %758, %759 : vector<8x16xf32>
    %761 = arith.addf %755, %760 : vector<8x16xf32>
    %762 = arith.mulf %736, %750 : vector<8x16xf32>
    %763 = arith.mulf %739, %761 : vector<8x16xf32>
    %764 = arith.subf %762, %763 : vector<8x16xf32>
    %765 = arith.mulf %736, %761 : vector<8x16xf32>
    %766 = arith.mulf %739, %750 : vector<8x16xf32>
    %767 = arith.addf %765, %766 : vector<8x16xf32>
    %768 = vector.extract_strided_slice %684 {offsets = [0, 3], sizes = [8, 1], strides = [1, 1]} : vector<8x4xf32> to vector<8x1xf32>
    %769 = vector.extract_strided_slice %9 {offsets = [3, 0], sizes = [1, 16], strides = [1, 1]} : vector<4x16xf32> to vector<1x16xf32>
    %770 = vector.broadcast %768 : vector<8x1xf32> to vector<8x16xf32>
    %771 = vector.broadcast %769 : vector<1x16xf32> to vector<8x16xf32>
    %772 = arith.mulf %770, %771 : vector<8x16xf32>
    %773 = vector.extract_strided_slice %688 {offsets = [0, 3], sizes = [8, 1], strides = [1, 1]} : vector<8x4xf32> to vector<8x1xf32>
    %774 = vector.extract_strided_slice %7 {offsets = [3, 0], sizes = [1, 16], strides = [1, 1]} : vector<4x16xf32> to vector<1x16xf32>
    %775 = vector.broadcast %773 : vector<8x1xf32> to vector<8x16xf32>
    %776 = vector.broadcast %774 : vector<1x16xf32> to vector<8x16xf32>
    %777 = arith.mulf %775, %776 : vector<8x16xf32>
    %778 = arith.addf %772, %777 : vector<8x16xf32>
    %779 = vector.extract_strided_slice %687 {offsets = [0, 3], sizes = [8, 1], strides = [1, 1]} : vector<8x4xf32> to vector<8x1xf32>
    %780 = vector.extract_strided_slice %9 {offsets = [3, 0], sizes = [1, 16], strides = [1, 1]} : vector<4x16xf32> to vector<1x16xf32>
    %781 = vector.broadcast %779 : vector<8x1xf32> to vector<8x16xf32>
    %782 = vector.broadcast %780 : vector<1x16xf32> to vector<8x16xf32>
    %783 = arith.mulf %781, %782 : vector<8x16xf32>
    %784 = vector.extract_strided_slice %689 {offsets = [0, 3], sizes = [8, 1], strides = [1, 1]} : vector<8x4xf32> to vector<8x1xf32>
    %785 = vector.extract_strided_slice %7 {offsets = [3, 0], sizes = [1, 16], strides = [1, 1]} : vector<4x16xf32> to vector<1x16xf32>
    %786 = vector.broadcast %784 : vector<8x1xf32> to vector<8x16xf32>
    %787 = vector.broadcast %785 : vector<1x16xf32> to vector<8x16xf32>
    %788 = arith.mulf %786, %787 : vector<8x16xf32>
    %789 = arith.addf %783, %788 : vector<8x16xf32>
    %790 = arith.mulf %764, %778 : vector<8x16xf32>
    %791 = arith.mulf %767, %789 : vector<8x16xf32>
    %792 = arith.subf %790, %791 : vector<8x16xf32>
    %793 = arith.mulf %764, %789 : vector<8x16xf32>
    %794 = arith.mulf %767, %778 : vector<8x16xf32>
    %795 = arith.addf %793, %794 : vector<8x16xf32>
    %cst_137 = arith.constant dense<0.000000e+00> : vector<8x128xf32>
    %796 = tpu.matmul %792, %3, %cst_137 {dimension_numbers = #tpu.dot_dimension_numbers<[1], [0], [0], [1], [0, 0, 1, 1], [], []>} : vector<8x16xf32>, vector<16x128xf32>, vector<8x128xf32> -> vector<8x128xf32>
    %cst_138 = arith.constant dense<0.000000e+00> : vector<8x128xf32>
    %797 = tpu.matmul %795, %4, %cst_138 {dimension_numbers = #tpu.dot_dimension_numbers<[1], [0], [0], [1], [0, 0, 1, 1], [], []>} : vector<8x16xf32>, vector<16x128xf32>, vector<8x128xf32> -> vector<8x128xf32>
    %798 = arith.addf %796, %797 : vector<8x128xf32>
    %799 = arith.mulf %798, %798 : vector<8x128xf32>
    %cst_139 = arith.constant dense<0.000000e+00> : vector<8x128xf32>
    %800 = tpu.matmul %799, %5, %cst_139 {dimension_numbers = #tpu.dot_dimension_numbers<[1], [0], [0], [1], [0, 0, 1, 1], [], []>} : vector<8x128xf32>, vector<128x128xf32>, vector<8x128xf32> -> vector<8x128xf32>
    %801 = vector.broadcast %6 : vector<1x128xf32> to vector<8x128xf32>
    %802 = arith.addf %800, %801 : vector<8x128xf32>
    %803 = vector.extract_strided_slice %802 {offsets = [0, 0], sizes = [8, 32], strides = [1, 1]} : vector<8x128xf32> to vector<8x32xf32>
    %804 = arith.negf %803 : vector<8x32xf32>
    %805 = math.exp %804 : vector<8x32xf32>
    %cst_140 = arith.constant 1.000000e+00 : f32
    %806 = vector.broadcast %cst_140 : f32 to vector<8x32xf32>
    %807 = arith.addf %806, %805 : vector<8x32xf32>
    %808 = arith.divf %806, %807 : vector<8x32xf32>
    %809 = vector.extract_strided_slice %802 {offsets = [0, 32], sizes = [8, 32], strides = [1, 1]} : vector<8x128xf32> to vector<8x32xf32>
    %810 = arith.negf %809 : vector<8x32xf32>
    %811 = math.exp %810 : vector<8x32xf32>
    %cst_141 = arith.constant 1.000000e+00 : f32
    %812 = vector.broadcast %cst_141 : f32 to vector<8x32xf32>
    %813 = arith.addf %812, %811 : vector<8x32xf32>
    %814 = arith.divf %812, %813 : vector<8x32xf32>
    %815 = vector.extract_strided_slice %802 {offsets = [0, 64], sizes = [8, 32], strides = [1, 1]} : vector<8x128xf32> to vector<8x32xf32>
    %816 = math.tanh %815 : vector<8x32xf32>
    %817 = vector.extract_strided_slice %802 {offsets = [0, 96], sizes = [8, 32], strides = [1, 1]} : vector<8x128xf32> to vector<8x32xf32>
    %818 = arith.negf %817 : vector<8x32xf32>
    %819 = math.exp %818 : vector<8x32xf32>
    %cst_142 = arith.constant 1.000000e+00 : f32
    %820 = vector.broadcast %cst_142 : f32 to vector<8x32xf32>
    %821 = arith.addf %820, %819 : vector<8x32xf32>
    %822 = arith.divf %820, %821 : vector<8x32xf32>
    %823 = arith.mulf %808, %620 : vector<8x32xf32>
    %824 = arith.mulf %814, %816 : vector<8x32xf32>
    %825 = arith.addf %823, %824 : vector<8x32xf32>
    %826 = math.tanh %825 : vector<8x32xf32>
    %827 = arith.mulf %822, %826 : vector<8x32xf32>
    %828 = arith.index_cast %c3_i32 : i32 to index
    %c0_143 = arith.constant 0 : index
    %c0_144 = arith.constant 0 : index
    %829 = vector.load %arg10[%828, %c0_143, %c0_144] : memref<8x8x32xf32, #tpu.memory_space<vmem>>, vector<1x8x32xf32>
    %830 = vector.shape_cast %829 : vector<1x8x32xf32> to vector<8x32xf32>
    %831 = vector.shape_cast %827 : vector<8x32xf32> to vector<1x8x32xf32>
    tpu.vector_store %arg10[%828, %c0_143, %c0_144], %831 {strides = array<i32>} : memref<8x8x32xf32, #tpu.memory_space<vmem>>, vector<1x8x32xf32>,
    %c4_i32 = arith.constant 4 : i32
    %832 = arith.index_cast %c4_i32 : i32 to index
    %c0_145 = arith.constant 0 : index
    %c0_146 = arith.constant 0 : index
    %833 = vector.load %arg1[%832, %c0_145, %c0_146] : memref<8x8x8xf32, #tpu.memory_space<vmem>>, vector<1x8x8xf32>
    %834 = vector.shape_cast %833 : vector<1x8x8xf32> to vector<8x8xf32>
    %cst_147 = arith.constant dense<0.000000e+00> : vector<8x4xf32>
    %835 = tpu.matmul %827, %0, %cst_147 {dimension_numbers = #tpu.dot_dimension_numbers<[1], [0], [0], [1], [0, 0, 1, 1], [], []>} : vector<8x32xf32>, vector<32x4xf32>, vector<8x4xf32> -> vector<8x4xf32>
    %cst_148 = arith.constant dense<0.000000e+00> : vector<8x4xf32>
    %836 = tpu.matmul %834, %1, %cst_148 {dimension_numbers = #tpu.dot_dimension_numbers<[1], [0], [0], [1], [0, 0, 1, 1], [], []>} : vector<8x8xf32>, vector<8x4xf32>, vector<8x4xf32> -> vector<8x4xf32>
    %837 = arith.addf %835, %836 : vector<8x4xf32>
    %838 = vector.broadcast %2 : vector<1x4xf32> to vector<8x4xf32>
    %839 = arith.addf %837, %838 : vector<8x4xf32>
    %840 = arith.mulf %839, %839 : vector<8x4xf32>
    %cst_149 = arith.constant 1.000000e+00 : f32
    %841 = vector.broadcast %cst_149 : f32 to vector<8x4xf32>
    %842 = arith.addf %841, %840 : vector<8x4xf32>
    %843 = math.rsqrt %842 : vector<8x4xf32>
    %cst_150 = arith.constant 1.000000e+00 : f32
    %844 = vector.broadcast %cst_150 : f32 to vector<8x4xf32>
    %845 = arith.addf %844, %843 : vector<8x4xf32>
    %cst_151 = arith.constant 5.000000e-01 : f32
    %846 = vector.broadcast %cst_151 : f32 to vector<8x4xf32>
    %847 = arith.mulf %845, %846 : vector<8x4xf32>
    %cst_152 = arith.constant 0.000000e+00 : f32
    %848 = vector.broadcast %cst_152 : f32 to vector<8x4xf32>
    %849 = arith.maximumf %847, %848 : vector<8x4xf32>
    %850 = math.sqrt %849 : vector<8x4xf32>
    %cst_153 = arith.constant 0.000000e+00 : f32
    %851 = vector.broadcast %cst_153 : f32 to vector<8x4xf32>
    %852 = arith.cmpf oge, %839, %851 : vector<8x4xf32>
    %cst_154 = arith.constant 1.000000e+00 : f32
    %cst_155 = arith.constant -1.000000e+00 : f32
    %853 = vector.broadcast %cst_154 : f32 to vector<8x4xf32>
    %854 = vector.broadcast %cst_155 : f32 to vector<8x4xf32>
    %855 = arith.select %852, %853, %854 : vector<8x4xi1>, vector<8x4xf32>
    %cst_156 = arith.constant 1.000000e+00 : f32
    %856 = vector.broadcast %cst_156 : f32 to vector<8x4xf32>
    %857 = arith.subf %856, %843 : vector<8x4xf32>
    %cst_157 = arith.constant 5.000000e-01 : f32
    %858 = vector.broadcast %cst_157 : f32 to vector<8x4xf32>
    %859 = arith.mulf %857, %858 : vector<8x4xf32>
    %cst_158 = arith.constant 0.000000e+00 : f32
    %860 = vector.broadcast %cst_158 : f32 to vector<8x4xf32>
    %861 = arith.maximumf %859, %860 : vector<8x4xf32>
    %862 = math.sqrt %861 : vector<8x4xf32>
    %863 = arith.mulf %855, %862 : vector<8x4xf32>
    %864 = arith.mulf %839, %839 : vector<8x4xf32>
    %865 = arith.mulf %864, %864 : vector<8x4xf32>
    %cst_159 = arith.constant 1.000000e+00 : f32
    %866 = vector.broadcast %cst_159 : f32 to vector<8x4xf32>
    %867 = arith.addf %866, %865 : vector<8x4xf32>
    %868 = math.rsqrt %867 : vector<8x4xf32>
    %cst_160 = arith.constant 1.000000e+00 : f32
    %869 = vector.broadcast %cst_160 : f32 to vector<8x4xf32>
    %870 = arith.addf %869, %868 : vector<8x4xf32>
    %cst_161 = arith.constant 5.000000e-01 : f32
    %871 = vector.broadcast %cst_161 : f32 to vector<8x4xf32>
    %872 = arith.mulf %870, %871 : vector<8x4xf32>
    %cst_162 = arith.constant 0.000000e+00 : f32
    %873 = vector.broadcast %cst_162 : f32 to vector<8x4xf32>
    %874 = arith.maximumf %872, %873 : vector<8x4xf32>
    %875 = math.sqrt %874 : vector<8x4xf32>
    %cst_163 = arith.constant 1.000000e+00 : f32
    %876 = vector.broadcast %cst_163 : f32 to vector<8x4xf32>
    %877 = arith.subf %876, %868 : vector<8x4xf32>
    %cst_164 = arith.constant 5.000000e-01 : f32
    %878 = vector.broadcast %cst_164 : f32 to vector<8x4xf32>
    %879 = arith.mulf %877, %878 : vector<8x4xf32>
    %cst_165 = arith.constant 0.000000e+00 : f32
    %880 = vector.broadcast %cst_165 : f32 to vector<8x4xf32>
    %881 = arith.maximumf %879, %880 : vector<8x4xf32>
    %882 = math.sqrt %881 : vector<8x4xf32>
    %883 = arith.subf %850, %863 : vector<8x4xf32>
    %cst_166 = arith.constant 0.707106769 : f32
    %884 = vector.broadcast %cst_166 : f32 to vector<8x4xf32>
    %885 = arith.mulf %883, %884 : vector<8x4xf32>
    %886 = arith.addf %850, %863 : vector<8x4xf32>
    %cst_167 = arith.constant 0.707106769 : f32
    %887 = vector.broadcast %cst_167 : f32 to vector<8x4xf32>
    %888 = arith.mulf %886, %887 : vector<8x4xf32>
    %889 = arith.mulf %875, %885 : vector<8x4xf32>
    %cst_168 = arith.constant 0.000000e+00 : f32
    %890 = vector.broadcast %cst_168 : f32 to vector<8x4xf32>
    %891 = arith.subf %890, %882 : vector<8x4xf32>
    %892 = arith.mulf %891, %885 : vector<8x4xf32>
    %893 = arith.mulf %875, %888 : vector<8x4xf32>
    %894 = arith.mulf %882, %888 : vector<8x4xf32>
    %895 = vector.extract_strided_slice %889 {offsets = [0, 0], sizes = [8, 1], strides = [1, 1]} : vector<8x4xf32> to vector<8x1xf32>
    %896 = vector.extract_strided_slice %9 {offsets = [0, 0], sizes = [1, 16], strides = [1, 1]} : vector<4x16xf32> to vector<1x16xf32>
    %897 = vector.broadcast %895 : vector<8x1xf32> to vector<8x16xf32>
    %898 = vector.broadcast %896 : vector<1x16xf32> to vector<8x16xf32>
    %899 = arith.mulf %897, %898 : vector<8x16xf32>
    %900 = vector.extract_strided_slice %893 {offsets = [0, 0], sizes = [8, 1], strides = [1, 1]} : vector<8x4xf32> to vector<8x1xf32>
    %901 = vector.extract_strided_slice %7 {offsets = [0, 0], sizes = [1, 16], strides = [1, 1]} : vector<4x16xf32> to vector<1x16xf32>
    %902 = vector.broadcast %900 : vector<8x1xf32> to vector<8x16xf32>
    %903 = vector.broadcast %901 : vector<1x16xf32> to vector<8x16xf32>
    %904 = arith.mulf %902, %903 : vector<8x16xf32>
    %905 = arith.addf %899, %904 : vector<8x16xf32>
    %906 = vector.extract_strided_slice %892 {offsets = [0, 0], sizes = [8, 1], strides = [1, 1]} : vector<8x4xf32> to vector<8x1xf32>
    %907 = vector.extract_strided_slice %9 {offsets = [0, 0], sizes = [1, 16], strides = [1, 1]} : vector<4x16xf32> to vector<1x16xf32>
    %908 = vector.broadcast %906 : vector<8x1xf32> to vector<8x16xf32>
    %909 = vector.broadcast %907 : vector<1x16xf32> to vector<8x16xf32>
    %910 = arith.mulf %908, %909 : vector<8x16xf32>
    %911 = vector.extract_strided_slice %894 {offsets = [0, 0], sizes = [8, 1], strides = [1, 1]} : vector<8x4xf32> to vector<8x1xf32>
    %912 = vector.extract_strided_slice %7 {offsets = [0, 0], sizes = [1, 16], strides = [1, 1]} : vector<4x16xf32> to vector<1x16xf32>
    %913 = vector.broadcast %911 : vector<8x1xf32> to vector<8x16xf32>
    %914 = vector.broadcast %912 : vector<1x16xf32> to vector<8x16xf32>
    %915 = arith.mulf %913, %914 : vector<8x16xf32>
    %916 = arith.addf %910, %915 : vector<8x16xf32>
    %917 = vector.extract_strided_slice %889 {offsets = [0, 1], sizes = [8, 1], strides = [1, 1]} : vector<8x4xf32> to vector<8x1xf32>
    %918 = vector.extract_strided_slice %9 {offsets = [1, 0], sizes = [1, 16], strides = [1, 1]} : vector<4x16xf32> to vector<1x16xf32>
    %919 = vector.broadcast %917 : vector<8x1xf32> to vector<8x16xf32>
    %920 = vector.broadcast %918 : vector<1x16xf32> to vector<8x16xf32>
    %921 = arith.mulf %919, %920 : vector<8x16xf32>
    %922 = vector.extract_strided_slice %893 {offsets = [0, 1], sizes = [8, 1], strides = [1, 1]} : vector<8x4xf32> to vector<8x1xf32>
    %923 = vector.extract_strided_slice %7 {offsets = [1, 0], sizes = [1, 16], strides = [1, 1]} : vector<4x16xf32> to vector<1x16xf32>
    %924 = vector.broadcast %922 : vector<8x1xf32> to vector<8x16xf32>
    %925 = vector.broadcast %923 : vector<1x16xf32> to vector<8x16xf32>
    %926 = arith.mulf %924, %925 : vector<8x16xf32>
    %927 = arith.addf %921, %926 : vector<8x16xf32>
    %928 = vector.extract_strided_slice %892 {offsets = [0, 1], sizes = [8, 1], strides = [1, 1]} : vector<8x4xf32> to vector<8x1xf32>
    %929 = vector.extract_strided_slice %9 {offsets = [1, 0], sizes = [1, 16], strides = [1, 1]} : vector<4x16xf32> to vector<1x16xf32>
    %930 = vector.broadcast %928 : vector<8x1xf32> to vector<8x16xf32>
    %931 = vector.broadcast %929 : vector<1x16xf32> to vector<8x16xf32>
    %932 = arith.mulf %930, %931 : vector<8x16xf32>
    %933 = vector.extract_strided_slice %894 {offsets = [0, 1], sizes = [8, 1], strides = [1, 1]} : vector<8x4xf32> to vector<8x1xf32>
    %934 = vector.extract_strided_slice %7 {offsets = [1, 0], sizes = [1, 16], strides = [1, 1]} : vector<4x16xf32> to vector<1x16xf32>
    %935 = vector.broadcast %933 : vector<8x1xf32> to vector<8x16xf32>
    %936 = vector.broadcast %934 : vector<1x16xf32> to vector<8x16xf32>
    %937 = arith.mulf %935, %936 : vector<8x16xf32>
    %938 = arith.addf %932, %937 : vector<8x16xf32>
    %939 = arith.mulf %905, %927 : vector<8x16xf32>
    %940 = arith.mulf %916, %938 : vector<8x16xf32>
    %941 = arith.subf %939, %940 : vector<8x16xf32>
    %942 = arith.mulf %905, %938 : vector<8x16xf32>
    %943 = arith.mulf %916, %927 : vector<8x16xf32>
    %944 = arith.addf %942, %943 : vector<8x16xf32>
    %945 = vector.extract_strided_slice %889 {offsets = [0, 2], sizes = [8, 1], strides = [1, 1]} : vector<8x4xf32> to vector<8x1xf32>
    %946 = vector.extract_strided_slice %9 {offsets = [2, 0], sizes = [1, 16], strides = [1, 1]} : vector<4x16xf32> to vector<1x16xf32>
    %947 = vector.broadcast %945 : vector<8x1xf32> to vector<8x16xf32>
    %948 = vector.broadcast %946 : vector<1x16xf32> to vector<8x16xf32>
    %949 = arith.mulf %947, %948 : vector<8x16xf32>
    %950 = vector.extract_strided_slice %893 {offsets = [0, 2], sizes = [8, 1], strides = [1, 1]} : vector<8x4xf32> to vector<8x1xf32>
    %951 = vector.extract_strided_slice %7 {offsets = [2, 0], sizes = [1, 16], strides = [1, 1]} : vector<4x16xf32> to vector<1x16xf32>
    %952 = vector.broadcast %950 : vector<8x1xf32> to vector<8x16xf32>
    %953 = vector.broadcast %951 : vector<1x16xf32> to vector<8x16xf32>
    %954 = arith.mulf %952, %953 : vector<8x16xf32>
    %955 = arith.addf %949, %954 : vector<8x16xf32>
    %956 = vector.extract_strided_slice %892 {offsets = [0, 2], sizes = [8, 1], strides = [1, 1]} : vector<8x4xf32> to vector<8x1xf32>
    %957 = vector.extract_strided_slice %9 {offsets = [2, 0], sizes = [1, 16], strides = [1, 1]} : vector<4x16xf32> to vector<1x16xf32>
    %958 = vector.broadcast %956 : vector<8x1xf32> to vector<8x16xf32>
    %959 = vector.broadcast %957 : vector<1x16xf32> to vector<8x16xf32>
    %960 = arith.mulf %958, %959 : vector<8x16xf32>
    %961 = vector.extract_strided_slice %894 {offsets = [0, 2], sizes = [8, 1], strides = [1, 1]} : vector<8x4xf32> to vector<8x1xf32>
    %962 = vector.extract_strided_slice %7 {offsets = [2, 0], sizes = [1, 16], strides = [1, 1]} : vector<4x16xf32> to vector<1x16xf32>
    %963 = vector.broadcast %961 : vector<8x1xf32> to vector<8x16xf32>
    %964 = vector.broadcast %962 : vector<1x16xf32> to vector<8x16xf32>
    %965 = arith.mulf %963, %964 : vector<8x16xf32>
    %966 = arith.addf %960, %965 : vector<8x16xf32>
    %967 = arith.mulf %941, %955 : vector<8x16xf32>
    %968 = arith.mulf %944, %966 : vector<8x16xf32>
    %969 = arith.subf %967, %968 : vector<8x16xf32>
    %970 = arith.mulf %941, %966 : vector<8x16xf32>
    %971 = arith.mulf %944, %955 : vector<8x16xf32>
    %972 = arith.addf %970, %971 : vector<8x16xf32>
    %973 = vector.extract_strided_slice %889 {offsets = [0, 3], sizes = [8, 1], strides = [1, 1]} : vector<8x4xf32> to vector<8x1xf32>
    %974 = vector.extract_strided_slice %9 {offsets = [3, 0], sizes = [1, 16], strides = [1, 1]} : vector<4x16xf32> to vector<1x16xf32>
    %975 = vector.broadcast %973 : vector<8x1xf32> to vector<8x16xf32>
    %976 = vector.broadcast %974 : vector<1x16xf32> to vector<8x16xf32>
    %977 = arith.mulf %975, %976 : vector<8x16xf32>
    %978 = vector.extract_strided_slice %893 {offsets = [0, 3], sizes = [8, 1], strides = [1, 1]} : vector<8x4xf32> to vector<8x1xf32>
    %979 = vector.extract_strided_slice %7 {offsets = [3, 0], sizes = [1, 16], strides = [1, 1]} : vector<4x16xf32> to vector<1x16xf32>
    %980 = vector.broadcast %978 : vector<8x1xf32> to vector<8x16xf32>
    %981 = vector.broadcast %979 : vector<1x16xf32> to vector<8x16xf32>
    %982 = arith.mulf %980, %981 : vector<8x16xf32>
    %983 = arith.addf %977, %982 : vector<8x16xf32>
    %984 = vector.extract_strided_slice %892 {offsets = [0, 3], sizes = [8, 1], strides = [1, 1]} : vector<8x4xf32> to vector<8x1xf32>
    %985 = vector.extract_strided_slice %9 {offsets = [3, 0], sizes = [1, 16], strides = [1, 1]} : vector<4x16xf32> to vector<1x16xf32>
    %986 = vector.broadcast %984 : vector<8x1xf32> to vector<8x16xf32>
    %987 = vector.broadcast %985 : vector<1x16xf32> to vector<8x16xf32>
    %988 = arith.mulf %986, %987 : vector<8x16xf32>
    %989 = vector.extract_strided_slice %894 {offsets = [0, 3], sizes = [8, 1], strides = [1, 1]} : vector<8x4xf32> to vector<8x1xf32>
    %990 = vector.extract_strided_slice %7 {offsets = [3, 0], sizes = [1, 16], strides = [1, 1]} : vector<4x16xf32> to vector<1x16xf32>
    %991 = vector.broadcast %989 : vector<8x1xf32> to vector<8x16xf32>
    %992 = vector.broadcast %990 : vector<1x16xf32> to vector<8x16xf32>
    %993 = arith.mulf %991, %992 : vector<8x16xf32>
    %994 = arith.addf %988, %993 : vector<8x16xf32>
    %995 = arith.mulf %969, %983 : vector<8x16xf32>
    %996 = arith.mulf %972, %994 : vector<8x16xf32>
    %997 = arith.subf %995, %996 : vector<8x16xf32>
    %998 = arith.mulf %969, %994 : vector<8x16xf32>
    %999 = arith.mulf %972, %983 : vector<8x16xf32>
    %1000 = arith.addf %998, %999 : vector<8x16xf32>
    %cst_169 = arith.constant dense<0.000000e+00> : vector<8x128xf32>
    %1001 = tpu.matmul %997, %3, %cst_169 {dimension_numbers = #tpu.dot_dimension_numbers<[1], [0], [0], [1], [0, 0, 1, 1], [], []>} : vector<8x16xf32>, vector<16x128xf32>, vector<8x128xf32> -> vector<8x128xf32>
    %cst_170 = arith.constant dense<0.000000e+00> : vector<8x128xf32>
    %1002 = tpu.matmul %1000, %4, %cst_170 {dimension_numbers = #tpu.dot_dimension_numbers<[1], [0], [0], [1], [0, 0, 1, 1], [], []>} : vector<8x16xf32>, vector<16x128xf32>, vector<8x128xf32> -> vector<8x128xf32>
    %1003 = arith.addf %1001, %1002 : vector<8x128xf32>
    %1004 = arith.mulf %1003, %1003 : vector<8x128xf32>
    %cst_171 = arith.constant dense<0.000000e+00> : vector<8x128xf32>
    %1005 = tpu.matmul %1004, %5, %cst_171 {dimension_numbers = #tpu.dot_dimension_numbers<[1], [0], [0], [1], [0, 0, 1, 1], [], []>} : vector<8x128xf32>, vector<128x128xf32>, vector<8x128xf32> -> vector<8x128xf32>
    %1006 = vector.broadcast %6 : vector<1x128xf32> to vector<8x128xf32>
    %1007 = arith.addf %1005, %1006 : vector<8x128xf32>
    %1008 = vector.extract_strided_slice %1007 {offsets = [0, 0], sizes = [8, 32], strides = [1, 1]} : vector<8x128xf32> to vector<8x32xf32>
    %1009 = arith.negf %1008 : vector<8x32xf32>
    %1010 = math.exp %1009 : vector<8x32xf32>
    %cst_172 = arith.constant 1.000000e+00 : f32
    %1011 = vector.broadcast %cst_172 : f32 to vector<8x32xf32>
    %1012 = arith.addf %1011, %1010 : vector<8x32xf32>
    %1013 = arith.divf %1011, %1012 : vector<8x32xf32>
    %1014 = vector.extract_strided_slice %1007 {offsets = [0, 32], sizes = [8, 32], strides = [1, 1]} : vector<8x128xf32> to vector<8x32xf32>
    %1015 = arith.negf %1014 : vector<8x32xf32>
    %1016 = math.exp %1015 : vector<8x32xf32>
    %cst_173 = arith.constant 1.000000e+00 : f32
    %1017 = vector.broadcast %cst_173 : f32 to vector<8x32xf32>
    %1018 = arith.addf %1017, %1016 : vector<8x32xf32>
    %1019 = arith.divf %1017, %1018 : vector<8x32xf32>
    %1020 = vector.extract_strided_slice %1007 {offsets = [0, 64], sizes = [8, 32], strides = [1, 1]} : vector<8x128xf32> to vector<8x32xf32>
    %1021 = math.tanh %1020 : vector<8x32xf32>
    %1022 = vector.extract_strided_slice %1007 {offsets = [0, 96], sizes = [8, 32], strides = [1, 1]} : vector<8x128xf32> to vector<8x32xf32>
    %1023 = arith.negf %1022 : vector<8x32xf32>
    %1024 = math.exp %1023 : vector<8x32xf32>
    %cst_174 = arith.constant 1.000000e+00 : f32
    %1025 = vector.broadcast %cst_174 : f32 to vector<8x32xf32>
    %1026 = arith.addf %1025, %1024 : vector<8x32xf32>
    %1027 = arith.divf %1025, %1026 : vector<8x32xf32>
    %1028 = arith.mulf %1013, %825 : vector<8x32xf32>
    %1029 = arith.mulf %1019, %1021 : vector<8x32xf32>
    %1030 = arith.addf %1028, %1029 : vector<8x32xf32>
    %1031 = math.tanh %1030 : vector<8x32xf32>
    %1032 = arith.mulf %1027, %1031 : vector<8x32xf32>
    %1033 = arith.index_cast %c4_i32 : i32 to index
    %c0_175 = arith.constant 0 : index
    %c0_176 = arith.constant 0 : index
    %1034 = vector.load %arg10[%1033, %c0_175, %c0_176] : memref<8x8x32xf32, #tpu.memory_space<vmem>>, vector<1x8x32xf32>
    %1035 = vector.shape_cast %1034 : vector<1x8x32xf32> to vector<8x32xf32>
    %1036 = vector.shape_cast %1032 : vector<8x32xf32> to vector<1x8x32xf32>
    tpu.vector_store %arg10[%1033, %c0_175, %c0_176], %1036 {strides = array<i32>} : memref<8x8x32xf32, #tpu.memory_space<vmem>>, vector<1x8x32xf32>,
    %c5_i32 = arith.constant 5 : i32
    %1037 = arith.index_cast %c5_i32 : i32 to index
    %c0_177 = arith.constant 0 : index
    %c0_178 = arith.constant 0 : index
    %1038 = vector.load %arg1[%1037, %c0_177, %c0_178] : memref<8x8x8xf32, #tpu.memory_space<vmem>>, vector<1x8x8xf32>
    %1039 = vector.shape_cast %1038 : vector<1x8x8xf32> to vector<8x8xf32>
    %cst_179 = arith.constant dense<0.000000e+00> : vector<8x4xf32>
    %1040 = tpu.matmul %1032, %0, %cst_179 {dimension_numbers = #tpu.dot_dimension_numbers<[1], [0], [0], [1], [0, 0, 1, 1], [], []>} : vector<8x32xf32>, vector<32x4xf32>, vector<8x4xf32> -> vector<8x4xf32>
    %cst_180 = arith.constant dense<0.000000e+00> : vector<8x4xf32>
    %1041 = tpu.matmul %1039, %1, %cst_180 {dimension_numbers = #tpu.dot_dimension_numbers<[1], [0], [0], [1], [0, 0, 1, 1], [], []>} : vector<8x8xf32>, vector<8x4xf32>, vector<8x4xf32> -> vector<8x4xf32>
    %1042 = arith.addf %1040, %1041 : vector<8x4xf32>
    %1043 = vector.broadcast %2 : vector<1x4xf32> to vector<8x4xf32>
    %1044 = arith.addf %1042, %1043 : vector<8x4xf32>
    %1045 = arith.mulf %1044, %1044 : vector<8x4xf32>
    %cst_181 = arith.constant 1.000000e+00 : f32
    %1046 = vector.broadcast %cst_181 : f32 to vector<8x4xf32>
    %1047 = arith.addf %1046, %1045 : vector<8x4xf32>
    %1048 = math.rsqrt %1047 : vector<8x4xf32>
    %cst_182 = arith.constant 1.000000e+00 : f32
    %1049 = vector.broadcast %cst_182 : f32 to vector<8x4xf32>
    %1050 = arith.addf %1049, %1048 : vector<8x4xf32>
    %cst_183 = arith.constant 5.000000e-01 : f32
    %1051 = vector.broadcast %cst_183 : f32 to vector<8x4xf32>
    %1052 = arith.mulf %1050, %1051 : vector<8x4xf32>
    %cst_184 = arith.constant 0.000000e+00 : f32
    %1053 = vector.broadcast %cst_184 : f32 to vector<8x4xf32>
    %1054 = arith.maximumf %1052, %1053 : vector<8x4xf32>
    %1055 = math.sqrt %1054 : vector<8x4xf32>
    %cst_185 = arith.constant 0.000000e+00 : f32
    %1056 = vector.broadcast %cst_185 : f32 to vector<8x4xf32>
    %1057 = arith.cmpf oge, %1044, %1056 : vector<8x4xf32>
    %cst_186 = arith.constant 1.000000e+00 : f32
    %cst_187 = arith.constant -1.000000e+00 : f32
    %1058 = vector.broadcast %cst_186 : f32 to vector<8x4xf32>
    %1059 = vector.broadcast %cst_187 : f32 to vector<8x4xf32>
    %1060 = arith.select %1057, %1058, %1059 : vector<8x4xi1>, vector<8x4xf32>
    %cst_188 = arith.constant 1.000000e+00 : f32
    %1061 = vector.broadcast %cst_188 : f32 to vector<8x4xf32>
    %1062 = arith.subf %1061, %1048 : vector<8x4xf32>
    %cst_189 = arith.constant 5.000000e-01 : f32
    %1063 = vector.broadcast %cst_189 : f32 to vector<8x4xf32>
    %1064 = arith.mulf %1062, %1063 : vector<8x4xf32>
    %cst_190 = arith.constant 0.000000e+00 : f32
    %1065 = vector.broadcast %cst_190 : f32 to vector<8x4xf32>
    %1066 = arith.maximumf %1064, %1065 : vector<8x4xf32>
    %1067 = math.sqrt %1066 : vector<8x4xf32>
    %1068 = arith.mulf %1060, %1067 : vector<8x4xf32>
    %1069 = arith.mulf %1044, %1044 : vector<8x4xf32>
    %1070 = arith.mulf %1069, %1069 : vector<8x4xf32>
    %cst_191 = arith.constant 1.000000e+00 : f32
    %1071 = vector.broadcast %cst_191 : f32 to vector<8x4xf32>
    %1072 = arith.addf %1071, %1070 : vector<8x4xf32>
    %1073 = math.rsqrt %1072 : vector<8x4xf32>
    %cst_192 = arith.constant 1.000000e+00 : f32
    %1074 = vector.broadcast %cst_192 : f32 to vector<8x4xf32>
    %1075 = arith.addf %1074, %1073 : vector<8x4xf32>
    %cst_193 = arith.constant 5.000000e-01 : f32
    %1076 = vector.broadcast %cst_193 : f32 to vector<8x4xf32>
    %1077 = arith.mulf %1075, %1076 : vector<8x4xf32>
    %cst_194 = arith.constant 0.000000e+00 : f32
    %1078 = vector.broadcast %cst_194 : f32 to vector<8x4xf32>
    %1079 = arith.maximumf %1077, %1078 : vector<8x4xf32>
    %1080 = math.sqrt %1079 : vector<8x4xf32>
    %cst_195 = arith.constant 1.000000e+00 : f32
    %1081 = vector.broadcast %cst_195 : f32 to vector<8x4xf32>
    %1082 = arith.subf %1081, %1073 : vector<8x4xf32>
    %cst_196 = arith.constant 5.000000e-01 : f32
    %1083 = vector.broadcast %cst_196 : f32 to vector<8x4xf32>
    %1084 = arith.mulf %1082, %1083 : vector<8x4xf32>
    %cst_197 = arith.constant 0.000000e+00 : f32
    %1085 = vector.broadcast %cst_197 : f32 to vector<8x4xf32>
    %1086 = arith.maximumf %1084, %1085 : vector<8x4xf32>
    %1087 = math.sqrt %1086 : vector<8x4xf32>
    %1088 = arith.subf %1055, %1068 : vector<8x4xf32>
    %cst_198 = arith.constant 0.707106769 : f32
    %1089 = vector.broadcast %cst_198 : f32 to vector<8x4xf32>
    %1090 = arith.mulf %1088, %1089 : vector<8x4xf32>
    %1091 = arith.addf %1055, %1068 : vector<8x4xf32>
    %cst_199 = arith.constant 0.707106769 : f32
    %1092 = vector.broadcast %cst_199 : f32 to vector<8x4xf32>
    %1093 = arith.mulf %1091, %1092 : vector<8x4xf32>
    %1094 = arith.mulf %1080, %1090 : vector<8x4xf32>
    %cst_200 = arith.constant 0.000000e+00 : f32
    %1095 = vector.broadcast %cst_200 : f32 to vector<8x4xf32>
    %1096 = arith.subf %1095, %1087 : vector<8x4xf32>
    %1097 = arith.mulf %1096, %1090 : vector<8x4xf32>
    %1098 = arith.mulf %1080, %1093 : vector<8x4xf32>
    %1099 = arith.mulf %1087, %1093 : vector<8x4xf32>
    %1100 = vector.extract_strided_slice %1094 {offsets = [0, 0], sizes = [8, 1], strides = [1, 1]} : vector<8x4xf32> to vector<8x1xf32>
    %1101 = vector.extract_strided_slice %9 {offsets = [0, 0], sizes = [1, 16], strides = [1, 1]} : vector<4x16xf32> to vector<1x16xf32>
    %1102 = vector.broadcast %1100 : vector<8x1xf32> to vector<8x16xf32>
    %1103 = vector.broadcast %1101 : vector<1x16xf32> to vector<8x16xf32>
    %1104 = arith.mulf %1102, %1103 : vector<8x16xf32>
    %1105 = vector.extract_strided_slice %1098 {offsets = [0, 0], sizes = [8, 1], strides = [1, 1]} : vector<8x4xf32> to vector<8x1xf32>
    %1106 = vector.extract_strided_slice %7 {offsets = [0, 0], sizes = [1, 16], strides = [1, 1]} : vector<4x16xf32> to vector<1x16xf32>
    %1107 = vector.broadcast %1105 : vector<8x1xf32> to vector<8x16xf32>
    %1108 = vector.broadcast %1106 : vector<1x16xf32> to vector<8x16xf32>
    %1109 = arith.mulf %1107, %1108 : vector<8x16xf32>
    %1110 = arith.addf %1104, %1109 : vector<8x16xf32>
    %1111 = vector.extract_strided_slice %1097 {offsets = [0, 0], sizes = [8, 1], strides = [1, 1]} : vector<8x4xf32> to vector<8x1xf32>
    %1112 = vector.extract_strided_slice %9 {offsets = [0, 0], sizes = [1, 16], strides = [1, 1]} : vector<4x16xf32> to vector<1x16xf32>
    %1113 = vector.broadcast %1111 : vector<8x1xf32> to vector<8x16xf32>
    %1114 = vector.broadcast %1112 : vector<1x16xf32> to vector<8x16xf32>
    %1115 = arith.mulf %1113, %1114 : vector<8x16xf32>
    %1116 = vector.extract_strided_slice %1099 {offsets = [0, 0], sizes = [8, 1], strides = [1, 1]} : vector<8x4xf32> to vector<8x1xf32>
    %1117 = vector.extract_strided_slice %7 {offsets = [0, 0], sizes = [1, 16], strides = [1, 1]} : vector<4x16xf32> to vector<1x16xf32>
    %1118 = vector.broadcast %1116 : vector<8x1xf32> to vector<8x16xf32>
    %1119 = vector.broadcast %1117 : vector<1x16xf32> to vector<8x16xf32>
    %1120 = arith.mulf %1118, %1119 : vector<8x16xf32>
    %1121 = arith.addf %1115, %1120 : vector<8x16xf32>
    %1122 = vector.extract_strided_slice %1094 {offsets = [0, 1], sizes = [8, 1], strides = [1, 1]} : vector<8x4xf32> to vector<8x1xf32>
    %1123 = vector.extract_strided_slice %9 {offsets = [1, 0], sizes = [1, 16], strides = [1, 1]} : vector<4x16xf32> to vector<1x16xf32>
    %1124 = vector.broadcast %1122 : vector<8x1xf32> to vector<8x16xf32>
    %1125 = vector.broadcast %1123 : vector<1x16xf32> to vector<8x16xf32>
    %1126 = arith.mulf %1124, %1125 : vector<8x16xf32>
    %1127 = vector.extract_strided_slice %1098 {offsets = [0, 1], sizes = [8, 1], strides = [1, 1]} : vector<8x4xf32> to vector<8x1xf32>
    %1128 = vector.extract_strided_slice %7 {offsets = [1, 0], sizes = [1, 16], strides = [1, 1]} : vector<4x16xf32> to vector<1x16xf32>
    %1129 = vector.broadcast %1127 : vector<8x1xf32> to vector<8x16xf32>
    %1130 = vector.broadcast %1128 : vector<1x16xf32> to vector<8x16xf32>
    %1131 = arith.mulf %1129, %1130 : vector<8x16xf32>
    %1132 = arith.addf %1126, %1131 : vector<8x16xf32>
    %1133 = vector.extract_strided_slice %1097 {offsets = [0, 1], sizes = [8, 1], strides = [1, 1]} : vector<8x4xf32> to vector<8x1xf32>
    %1134 = vector.extract_strided_slice %9 {offsets = [1, 0], sizes = [1, 16], strides = [1, 1]} : vector<4x16xf32> to vector<1x16xf32>
    %1135 = vector.broadcast %1133 : vector<8x1xf32> to vector<8x16xf32>
    %1136 = vector.broadcast %1134 : vector<1x16xf32> to vector<8x16xf32>
    %1137 = arith.mulf %1135, %1136 : vector<8x16xf32>
    %1138 = vector.extract_strided_slice %1099 {offsets = [0, 1], sizes = [8, 1], strides = [1, 1]} : vector<8x4xf32> to vector<8x1xf32>
    %1139 = vector.extract_strided_slice %7 {offsets = [1, 0], sizes = [1, 16], strides = [1, 1]} : vector<4x16xf32> to vector<1x16xf32>
    %1140 = vector.broadcast %1138 : vector<8x1xf32> to vector<8x16xf32>
    %1141 = vector.broadcast %1139 : vector<1x16xf32> to vector<8x16xf32>
    %1142 = arith.mulf %1140, %1141 : vector<8x16xf32>
    %1143 = arith.addf %1137, %1142 : vector<8x16xf32>
    %1144 = arith.mulf %1110, %1132 : vector<8x16xf32>
    %1145 = arith.mulf %1121, %1143 : vector<8x16xf32>
    %1146 = arith.subf %1144, %1145 : vector<8x16xf32>
    %1147 = arith.mulf %1110, %1143 : vector<8x16xf32>
    %1148 = arith.mulf %1121, %1132 : vector<8x16xf32>
    %1149 = arith.addf %1147, %1148 : vector<8x16xf32>
    %1150 = vector.extract_strided_slice %1094 {offsets = [0, 2], sizes = [8, 1], strides = [1, 1]} : vector<8x4xf32> to vector<8x1xf32>
    %1151 = vector.extract_strided_slice %9 {offsets = [2, 0], sizes = [1, 16], strides = [1, 1]} : vector<4x16xf32> to vector<1x16xf32>
    %1152 = vector.broadcast %1150 : vector<8x1xf32> to vector<8x16xf32>
    %1153 = vector.broadcast %1151 : vector<1x16xf32> to vector<8x16xf32>
    %1154 = arith.mulf %1152, %1153 : vector<8x16xf32>
    %1155 = vector.extract_strided_slice %1098 {offsets = [0, 2], sizes = [8, 1], strides = [1, 1]} : vector<8x4xf32> to vector<8x1xf32>
    %1156 = vector.extract_strided_slice %7 {offsets = [2, 0], sizes = [1, 16], strides = [1, 1]} : vector<4x16xf32> to vector<1x16xf32>
    %1157 = vector.broadcast %1155 : vector<8x1xf32> to vector<8x16xf32>
    %1158 = vector.broadcast %1156 : vector<1x16xf32> to vector<8x16xf32>
    %1159 = arith.mulf %1157, %1158 : vector<8x16xf32>
    %1160 = arith.addf %1154, %1159 : vector<8x16xf32>
    %1161 = vector.extract_strided_slice %1097 {offsets = [0, 2], sizes = [8, 1], strides = [1, 1]} : vector<8x4xf32> to vector<8x1xf32>
    %1162 = vector.extract_strided_slice %9 {offsets = [2, 0], sizes = [1, 16], strides = [1, 1]} : vector<4x16xf32> to vector<1x16xf32>
    %1163 = vector.broadcast %1161 : vector<8x1xf32> to vector<8x16xf32>
    %1164 = vector.broadcast %1162 : vector<1x16xf32> to vector<8x16xf32>
    %1165 = arith.mulf %1163, %1164 : vector<8x16xf32>
    %1166 = vector.extract_strided_slice %1099 {offsets = [0, 2], sizes = [8, 1], strides = [1, 1]} : vector<8x4xf32> to vector<8x1xf32>
    %1167 = vector.extract_strided_slice %7 {offsets = [2, 0], sizes = [1, 16], strides = [1, 1]} : vector<4x16xf32> to vector<1x16xf32>
    %1168 = vector.broadcast %1166 : vector<8x1xf32> to vector<8x16xf32>
    %1169 = vector.broadcast %1167 : vector<1x16xf32> to vector<8x16xf32>
    %1170 = arith.mulf %1168, %1169 : vector<8x16xf32>
    %1171 = arith.addf %1165, %1170 : vector<8x16xf32>
    %1172 = arith.mulf %1146, %1160 : vector<8x16xf32>
    %1173 = arith.mulf %1149, %1171 : vector<8x16xf32>
    %1174 = arith.subf %1172, %1173 : vector<8x16xf32>
    %1175 = arith.mulf %1146, %1171 : vector<8x16xf32>
    %1176 = arith.mulf %1149, %1160 : vector<8x16xf32>
    %1177 = arith.addf %1175, %1176 : vector<8x16xf32>
    %1178 = vector.extract_strided_slice %1094 {offsets = [0, 3], sizes = [8, 1], strides = [1, 1]} : vector<8x4xf32> to vector<8x1xf32>
    %1179 = vector.extract_strided_slice %9 {offsets = [3, 0], sizes = [1, 16], strides = [1, 1]} : vector<4x16xf32> to vector<1x16xf32>
    %1180 = vector.broadcast %1178 : vector<8x1xf32> to vector<8x16xf32>
    %1181 = vector.broadcast %1179 : vector<1x16xf32> to vector<8x16xf32>
    %1182 = arith.mulf %1180, %1181 : vector<8x16xf32>
    %1183 = vector.extract_strided_slice %1098 {offsets = [0, 3], sizes = [8, 1], strides = [1, 1]} : vector<8x4xf32> to vector<8x1xf32>
    %1184 = vector.extract_strided_slice %7 {offsets = [3, 0], sizes = [1, 16], strides = [1, 1]} : vector<4x16xf32> to vector<1x16xf32>
    %1185 = vector.broadcast %1183 : vector<8x1xf32> to vector<8x16xf32>
    %1186 = vector.broadcast %1184 : vector<1x16xf32> to vector<8x16xf32>
    %1187 = arith.mulf %1185, %1186 : vector<8x16xf32>
    %1188 = arith.addf %1182, %1187 : vector<8x16xf32>
    %1189 = vector.extract_strided_slice %1097 {offsets = [0, 3], sizes = [8, 1], strides = [1, 1]} : vector<8x4xf32> to vector<8x1xf32>
    %1190 = vector.extract_strided_slice %9 {offsets = [3, 0], sizes = [1, 16], strides = [1, 1]} : vector<4x16xf32> to vector<1x16xf32>
    %1191 = vector.broadcast %1189 : vector<8x1xf32> to vector<8x16xf32>
    %1192 = vector.broadcast %1190 : vector<1x16xf32> to vector<8x16xf32>
    %1193 = arith.mulf %1191, %1192 : vector<8x16xf32>
    %1194 = vector.extract_strided_slice %1099 {offsets = [0, 3], sizes = [8, 1], strides = [1, 1]} : vector<8x4xf32> to vector<8x1xf32>
    %1195 = vector.extract_strided_slice %7 {offsets = [3, 0], sizes = [1, 16], strides = [1, 1]} : vector<4x16xf32> to vector<1x16xf32>
    %1196 = vector.broadcast %1194 : vector<8x1xf32> to vector<8x16xf32>
    %1197 = vector.broadcast %1195 : vector<1x16xf32> to vector<8x16xf32>
    %1198 = arith.mulf %1196, %1197 : vector<8x16xf32>
    %1199 = arith.addf %1193, %1198 : vector<8x16xf32>
    %1200 = arith.mulf %1174, %1188 : vector<8x16xf32>
    %1201 = arith.mulf %1177, %1199 : vector<8x16xf32>
    %1202 = arith.subf %1200, %1201 : vector<8x16xf32>
    %1203 = arith.mulf %1174, %1199 : vector<8x16xf32>
    %1204 = arith.mulf %1177, %1188 : vector<8x16xf32>
    %1205 = arith.addf %1203, %1204 : vector<8x16xf32>
    %cst_201 = arith.constant dense<0.000000e+00> : vector<8x128xf32>
    %1206 = tpu.matmul %1202, %3, %cst_201 {dimension_numbers = #tpu.dot_dimension_numbers<[1], [0], [0], [1], [0, 0, 1, 1], [], []>} : vector<8x16xf32>, vector<16x128xf32>, vector<8x128xf32> -> vector<8x128xf32>
    %cst_202 = arith.constant dense<0.000000e+00> : vector<8x128xf32>
    %1207 = tpu.matmul %1205, %4, %cst_202 {dimension_numbers = #tpu.dot_dimension_numbers<[1], [0], [0], [1], [0, 0, 1, 1], [], []>} : vector<8x16xf32>, vector<16x128xf32>, vector<8x128xf32> -> vector<8x128xf32>
    %1208 = arith.addf %1206, %1207 : vector<8x128xf32>
    %1209 = arith.mulf %1208, %1208 : vector<8x128xf32>
    %cst_203 = arith.constant dense<0.000000e+00> : vector<8x128xf32>
    %1210 = tpu.matmul %1209, %5, %cst_203 {dimension_numbers = #tpu.dot_dimension_numbers<[1], [0], [0], [1], [0, 0, 1, 1], [], []>} : vector<8x128xf32>, vector<128x128xf32>, vector<8x128xf32> -> vector<8x128xf32>
    %1211 = vector.broadcast %6 : vector<1x128xf32> to vector<8x128xf32>
    %1212 = arith.addf %1210, %1211 : vector<8x128xf32>
    %1213 = vector.extract_strided_slice %1212 {offsets = [0, 0], sizes = [8, 32], strides = [1, 1]} : vector<8x128xf32> to vector<8x32xf32>
    %1214 = arith.negf %1213 : vector<8x32xf32>
    %1215 = math.exp %1214 : vector<8x32xf32>
    %cst_204 = arith.constant 1.000000e+00 : f32
    %1216 = vector.broadcast %cst_204 : f32 to vector<8x32xf32>
    %1217 = arith.addf %1216, %1215 : vector<8x32xf32>
    %1218 = arith.divf %1216, %1217 : vector<8x32xf32>
    %1219 = vector.extract_strided_slice %1212 {offsets = [0, 32], sizes = [8, 32], strides = [1, 1]} : vector<8x128xf32> to vector<8x32xf32>
    %1220 = arith.negf %1219 : vector<8x32xf32>
    %1221 = math.exp %1220 : vector<8x32xf32>
    %cst_205 = arith.constant 1.000000e+00 : f32
    %1222 = vector.broadcast %cst_205 : f32 to vector<8x32xf32>
    %1223 = arith.addf %1222, %1221 : vector<8x32xf32>
    %1224 = arith.divf %1222, %1223 : vector<8x32xf32>
    %1225 = vector.extract_strided_slice %1212 {offsets = [0, 64], sizes = [8, 32], strides = [1, 1]} : vector<8x128xf32> to vector<8x32xf32>
    %1226 = math.tanh %1225 : vector<8x32xf32>
    %1227 = vector.extract_strided_slice %1212 {offsets = [0, 96], sizes = [8, 32], strides = [1, 1]} : vector<8x128xf32> to vector<8x32xf32>
    %1228 = arith.negf %1227 : vector<8x32xf32>
    %1229 = math.exp %1228 : vector<8x32xf32>
    %cst_206 = arith.constant 1.000000e+00 : f32
    %1230 = vector.broadcast %cst_206 : f32 to vector<8x32xf32>
    %1231 = arith.addf %1230, %1229 : vector<8x32xf32>
    %1232 = arith.divf %1230, %1231 : vector<8x32xf32>
    %1233 = arith.mulf %1218, %1030 : vector<8x32xf32>
    %1234 = arith.mulf %1224, %1226 : vector<8x32xf32>
    %1235 = arith.addf %1233, %1234 : vector<8x32xf32>
    %1236 = math.tanh %1235 : vector<8x32xf32>
    %1237 = arith.mulf %1232, %1236 : vector<8x32xf32>
    %1238 = arith.index_cast %c5_i32 : i32 to index
    %c0_207 = arith.constant 0 : index
    %c0_208 = arith.constant 0 : index
    %1239 = vector.load %arg10[%1238, %c0_207, %c0_208] : memref<8x8x32xf32, #tpu.memory_space<vmem>>, vector<1x8x32xf32>
    %1240 = vector.shape_cast %1239 : vector<1x8x32xf32> to vector<8x32xf32>
    %1241 = vector.shape_cast %1237 : vector<8x32xf32> to vector<1x8x32xf32>
    tpu.vector_store %arg10[%1238, %c0_207, %c0_208], %1241 {strides = array<i32>} : memref<8x8x32xf32, #tpu.memory_space<vmem>>, vector<1x8x32xf32>,
    %c6_i32 = arith.constant 6 : i32
    %1242 = arith.index_cast %c6_i32 : i32 to index
    %c0_209 = arith.constant 0 : index
    %c0_210 = arith.constant 0 : index
    %1243 = vector.load %arg1[%1242, %c0_209, %c0_210] : memref<8x8x8xf32, #tpu.memory_space<vmem>>, vector<1x8x8xf32>
    %1244 = vector.shape_cast %1243 : vector<1x8x8xf32> to vector<8x8xf32>
    %cst_211 = arith.constant dense<0.000000e+00> : vector<8x4xf32>
    %1245 = tpu.matmul %1237, %0, %cst_211 {dimension_numbers = #tpu.dot_dimension_numbers<[1], [0], [0], [1], [0, 0, 1, 1], [], []>} : vector<8x32xf32>, vector<32x4xf32>, vector<8x4xf32> -> vector<8x4xf32>
    %cst_212 = arith.constant dense<0.000000e+00> : vector<8x4xf32>
    %1246 = tpu.matmul %1244, %1, %cst_212 {dimension_numbers = #tpu.dot_dimension_numbers<[1], [0], [0], [1], [0, 0, 1, 1], [], []>} : vector<8x8xf32>, vector<8x4xf32>, vector<8x4xf32> -> vector<8x4xf32>
    %1247 = arith.addf %1245, %1246 : vector<8x4xf32>
    %1248 = vector.broadcast %2 : vector<1x4xf32> to vector<8x4xf32>
    %1249 = arith.addf %1247, %1248 : vector<8x4xf32>
    %1250 = arith.mulf %1249, %1249 : vector<8x4xf32>
    %cst_213 = arith.constant 1.000000e+00 : f32
    %1251 = vector.broadcast %cst_213 : f32 to vector<8x4xf32>
    %1252 = arith.addf %1251, %1250 : vector<8x4xf32>
    %1253 = math.rsqrt %1252 : vector<8x4xf32>
    %cst_214 = arith.constant 1.000000e+00 : f32
    %1254 = vector.broadcast %cst_214 : f32 to vector<8x4xf32>
    %1255 = arith.addf %1254, %1253 : vector<8x4xf32>
    %cst_215 = arith.constant 5.000000e-01 : f32
    %1256 = vector.broadcast %cst_215 : f32 to vector<8x4xf32>
    %1257 = arith.mulf %1255, %1256 : vector<8x4xf32>
    %cst_216 = arith.constant 0.000000e+00 : f32
    %1258 = vector.broadcast %cst_216 : f32 to vector<8x4xf32>
    %1259 = arith.maximumf %1257, %1258 : vector<8x4xf32>
    %1260 = math.sqrt %1259 : vector<8x4xf32>
    %cst_217 = arith.constant 0.000000e+00 : f32
    %1261 = vector.broadcast %cst_217 : f32 to vector<8x4xf32>
    %1262 = arith.cmpf oge, %1249, %1261 : vector<8x4xf32>
    %cst_218 = arith.constant 1.000000e+00 : f32
    %cst_219 = arith.constant -1.000000e+00 : f32
    %1263 = vector.broadcast %cst_218 : f32 to vector<8x4xf32>
    %1264 = vector.broadcast %cst_219 : f32 to vector<8x4xf32>
    %1265 = arith.select %1262, %1263, %1264 : vector<8x4xi1>, vector<8x4xf32>
    %cst_220 = arith.constant 1.000000e+00 : f32
    %1266 = vector.broadcast %cst_220 : f32 to vector<8x4xf32>
    %1267 = arith.subf %1266, %1253 : vector<8x4xf32>
    %cst_221 = arith.constant 5.000000e-01 : f32
    %1268 = vector.broadcast %cst_221 : f32 to vector<8x4xf32>
    %1269 = arith.mulf %1267, %1268 : vector<8x4xf32>
    %cst_222 = arith.constant 0.000000e+00 : f32
    %1270 = vector.broadcast %cst_222 : f32 to vector<8x4xf32>
    %1271 = arith.maximumf %1269, %1270 : vector<8x4xf32>
    %1272 = math.sqrt %1271 : vector<8x4xf32>
    %1273 = arith.mulf %1265, %1272 : vector<8x4xf32>
    %1274 = arith.mulf %1249, %1249 : vector<8x4xf32>
    %1275 = arith.mulf %1274, %1274 : vector<8x4xf32>
    %cst_223 = arith.constant 1.000000e+00 : f32
    %1276 = vector.broadcast %cst_223 : f32 to vector<8x4xf32>
    %1277 = arith.addf %1276, %1275 : vector<8x4xf32>
    %1278 = math.rsqrt %1277 : vector<8x4xf32>
    %cst_224 = arith.constant 1.000000e+00 : f32
    %1279 = vector.broadcast %cst_224 : f32 to vector<8x4xf32>
    %1280 = arith.addf %1279, %1278 : vector<8x4xf32>
    %cst_225 = arith.constant 5.000000e-01 : f32
    %1281 = vector.broadcast %cst_225 : f32 to vector<8x4xf32>
    %1282 = arith.mulf %1280, %1281 : vector<8x4xf32>
    %cst_226 = arith.constant 0.000000e+00 : f32
    %1283 = vector.broadcast %cst_226 : f32 to vector<8x4xf32>
    %1284 = arith.maximumf %1282, %1283 : vector<8x4xf32>
    %1285 = math.sqrt %1284 : vector<8x4xf32>
    %cst_227 = arith.constant 1.000000e+00 : f32
    %1286 = vector.broadcast %cst_227 : f32 to vector<8x4xf32>
    %1287 = arith.subf %1286, %1278 : vector<8x4xf32>
    %cst_228 = arith.constant 5.000000e-01 : f32
    %1288 = vector.broadcast %cst_228 : f32 to vector<8x4xf32>
    %1289 = arith.mulf %1287, %1288 : vector<8x4xf32>
    %cst_229 = arith.constant 0.000000e+00 : f32
    %1290 = vector.broadcast %cst_229 : f32 to vector<8x4xf32>
    %1291 = arith.maximumf %1289, %1290 : vector<8x4xf32>
    %1292 = math.sqrt %1291 : vector<8x4xf32>
    %1293 = arith.subf %1260, %1273 : vector<8x4xf32>
    %cst_230 = arith.constant 0.707106769 : f32
    %1294 = vector.broadcast %cst_230 : f32 to vector<8x4xf32>
    %1295 = arith.mulf %1293, %1294 : vector<8x4xf32>
    %1296 = arith.addf %1260, %1273 : vector<8x4xf32>
    %cst_231 = arith.constant 0.707106769 : f32
    %1297 = vector.broadcast %cst_231 : f32 to vector<8x4xf32>
    %1298 = arith.mulf %1296, %1297 : vector<8x4xf32>
    %1299 = arith.mulf %1285, %1295 : vector<8x4xf32>
    %cst_232 = arith.constant 0.000000e+00 : f32
    %1300 = vector.broadcast %cst_232 : f32 to vector<8x4xf32>
    %1301 = arith.subf %1300, %1292 : vector<8x4xf32>
    %1302 = arith.mulf %1301, %1295 : vector<8x4xf32>
    %1303 = arith.mulf %1285, %1298 : vector<8x4xf32>
    %1304 = arith.mulf %1292, %1298 : vector<8x4xf32>
    %1305 = vector.extract_strided_slice %1299 {offsets = [0, 0], sizes = [8, 1], strides = [1, 1]} : vector<8x4xf32> to vector<8x1xf32>
    %1306 = vector.extract_strided_slice %9 {offsets = [0, 0], sizes = [1, 16], strides = [1, 1]} : vector<4x16xf32> to vector<1x16xf32>
    %1307 = vector.broadcast %1305 : vector<8x1xf32> to vector<8x16xf32>
    %1308 = vector.broadcast %1306 : vector<1x16xf32> to vector<8x16xf32>
    %1309 = arith.mulf %1307, %1308 : vector<8x16xf32>
    %1310 = vector.extract_strided_slice %1303 {offsets = [0, 0], sizes = [8, 1], strides = [1, 1]} : vector<8x4xf32> to vector<8x1xf32>
    %1311 = vector.extract_strided_slice %7 {offsets = [0, 0], sizes = [1, 16], strides = [1, 1]} : vector<4x16xf32> to vector<1x16xf32>
    %1312 = vector.broadcast %1310 : vector<8x1xf32> to vector<8x16xf32>
    %1313 = vector.broadcast %1311 : vector<1x16xf32> to vector<8x16xf32>
    %1314 = arith.mulf %1312, %1313 : vector<8x16xf32>
    %1315 = arith.addf %1309, %1314 : vector<8x16xf32>
    %1316 = vector.extract_strided_slice %1302 {offsets = [0, 0], sizes = [8, 1], strides = [1, 1]} : vector<8x4xf32> to vector<8x1xf32>
    %1317 = vector.extract_strided_slice %9 {offsets = [0, 0], sizes = [1, 16], strides = [1, 1]} : vector<4x16xf32> to vector<1x16xf32>
    %1318 = vector.broadcast %1316 : vector<8x1xf32> to vector<8x16xf32>
    %1319 = vector.broadcast %1317 : vector<1x16xf32> to vector<8x16xf32>
    %1320 = arith.mulf %1318, %1319 : vector<8x16xf32>
    %1321 = vector.extract_strided_slice %1304 {offsets = [0, 0], sizes = [8, 1], strides = [1, 1]} : vector<8x4xf32> to vector<8x1xf32>
    %1322 = vector.extract_strided_slice %7 {offsets = [0, 0], sizes = [1, 16], strides = [1, 1]} : vector<4x16xf32> to vector<1x16xf32>
    %1323 = vector.broadcast %1321 : vector<8x1xf32> to vector<8x16xf32>
    %1324 = vector.broadcast %1322 : vector<1x16xf32> to vector<8x16xf32>
    %1325 = arith.mulf %1323, %1324 : vector<8x16xf32>
    %1326 = arith.addf %1320, %1325 : vector<8x16xf32>
    %1327 = vector.extract_strided_slice %1299 {offsets = [0, 1], sizes = [8, 1], strides = [1, 1]} : vector<8x4xf32> to vector<8x1xf32>
    %1328 = vector.extract_strided_slice %9 {offsets = [1, 0], sizes = [1, 16], strides = [1, 1]} : vector<4x16xf32> to vector<1x16xf32>
    %1329 = vector.broadcast %1327 : vector<8x1xf32> to vector<8x16xf32>
    %1330 = vector.broadcast %1328 : vector<1x16xf32> to vector<8x16xf32>
    %1331 = arith.mulf %1329, %1330 : vector<8x16xf32>
    %1332 = vector.extract_strided_slice %1303 {offsets = [0, 1], sizes = [8, 1], strides = [1, 1]} : vector<8x4xf32> to vector<8x1xf32>
    %1333 = vector.extract_strided_slice %7 {offsets = [1, 0], sizes = [1, 16], strides = [1, 1]} : vector<4x16xf32> to vector<1x16xf32>
    %1334 = vector.broadcast %1332 : vector<8x1xf32> to vector<8x16xf32>
    %1335 = vector.broadcast %1333 : vector<1x16xf32> to vector<8x16xf32>
    %1336 = arith.mulf %1334, %1335 : vector<8x16xf32>
    %1337 = arith.addf %1331, %1336 : vector<8x16xf32>
    %1338 = vector.extract_strided_slice %1302 {offsets = [0, 1], sizes = [8, 1], strides = [1, 1]} : vector<8x4xf32> to vector<8x1xf32>
    %1339 = vector.extract_strided_slice %9 {offsets = [1, 0], sizes = [1, 16], strides = [1, 1]} : vector<4x16xf32> to vector<1x16xf32>
    %1340 = vector.broadcast %1338 : vector<8x1xf32> to vector<8x16xf32>
    %1341 = vector.broadcast %1339 : vector<1x16xf32> to vector<8x16xf32>
    %1342 = arith.mulf %1340, %1341 : vector<8x16xf32>
    %1343 = vector.extract_strided_slice %1304 {offsets = [0, 1], sizes = [8, 1], strides = [1, 1]} : vector<8x4xf32> to vector<8x1xf32>
    %1344 = vector.extract_strided_slice %7 {offsets = [1, 0], sizes = [1, 16], strides = [1, 1]} : vector<4x16xf32> to vector<1x16xf32>
    %1345 = vector.broadcast %1343 : vector<8x1xf32> to vector<8x16xf32>
    %1346 = vector.broadcast %1344 : vector<1x16xf32> to vector<8x16xf32>
    %1347 = arith.mulf %1345, %1346 : vector<8x16xf32>
    %1348 = arith.addf %1342, %1347 : vector<8x16xf32>
    %1349 = arith.mulf %1315, %1337 : vector<8x16xf32>
    %1350 = arith.mulf %1326, %1348 : vector<8x16xf32>
    %1351 = arith.subf %1349, %1350 : vector<8x16xf32>
    %1352 = arith.mulf %1315, %1348 : vector<8x16xf32>
    %1353 = arith.mulf %1326, %1337 : vector<8x16xf32>
    %1354 = arith.addf %1352, %1353 : vector<8x16xf32>
    %1355 = vector.extract_strided_slice %1299 {offsets = [0, 2], sizes = [8, 1], strides = [1, 1]} : vector<8x4xf32> to vector<8x1xf32>
    %1356 = vector.extract_strided_slice %9 {offsets = [2, 0], sizes = [1, 16], strides = [1, 1]} : vector<4x16xf32> to vector<1x16xf32>
    %1357 = vector.broadcast %1355 : vector<8x1xf32> to vector<8x16xf32>
    %1358 = vector.broadcast %1356 : vector<1x16xf32> to vector<8x16xf32>
    %1359 = arith.mulf %1357, %1358 : vector<8x16xf32>
    %1360 = vector.extract_strided_slice %1303 {offsets = [0, 2], sizes = [8, 1], strides = [1, 1]} : vector<8x4xf32> to vector<8x1xf32>
    %1361 = vector.extract_strided_slice %7 {offsets = [2, 0], sizes = [1, 16], strides = [1, 1]} : vector<4x16xf32> to vector<1x16xf32>
    %1362 = vector.broadcast %1360 : vector<8x1xf32> to vector<8x16xf32>
    %1363 = vector.broadcast %1361 : vector<1x16xf32> to vector<8x16xf32>
    %1364 = arith.mulf %1362, %1363 : vector<8x16xf32>
    %1365 = arith.addf %1359, %1364 : vector<8x16xf32>
    %1366 = vector.extract_strided_slice %1302 {offsets = [0, 2], sizes = [8, 1], strides = [1, 1]} : vector<8x4xf32> to vector<8x1xf32>
    %1367 = vector.extract_strided_slice %9 {offsets = [2, 0], sizes = [1, 16], strides = [1, 1]} : vector<4x16xf32> to vector<1x16xf32>
    %1368 = vector.broadcast %1366 : vector<8x1xf32> to vector<8x16xf32>
    %1369 = vector.broadcast %1367 : vector<1x16xf32> to vector<8x16xf32>
    %1370 = arith.mulf %1368, %1369 : vector<8x16xf32>
    %1371 = vector.extract_strided_slice %1304 {offsets = [0, 2], sizes = [8, 1], strides = [1, 1]} : vector<8x4xf32> to vector<8x1xf32>
    %1372 = vector.extract_strided_slice %7 {offsets = [2, 0], sizes = [1, 16], strides = [1, 1]} : vector<4x16xf32> to vector<1x16xf32>
    %1373 = vector.broadcast %1371 : vector<8x1xf32> to vector<8x16xf32>
    %1374 = vector.broadcast %1372 : vector<1x16xf32> to vector<8x16xf32>
    %1375 = arith.mulf %1373, %1374 : vector<8x16xf32>
    %1376 = arith.addf %1370, %1375 : vector<8x16xf32>
    %1377 = arith.mulf %1351, %1365 : vector<8x16xf32>
    %1378 = arith.mulf %1354, %1376 : vector<8x16xf32>
    %1379 = arith.subf %1377, %1378 : vector<8x16xf32>
    %1380 = arith.mulf %1351, %1376 : vector<8x16xf32>
    %1381 = arith.mulf %1354, %1365 : vector<8x16xf32>
    %1382 = arith.addf %1380, %1381 : vector<8x16xf32>
    %1383 = vector.extract_strided_slice %1299 {offsets = [0, 3], sizes = [8, 1], strides = [1, 1]} : vector<8x4xf32> to vector<8x1xf32>
    %1384 = vector.extract_strided_slice %9 {offsets = [3, 0], sizes = [1, 16], strides = [1, 1]} : vector<4x16xf32> to vector<1x16xf32>
    %1385 = vector.broadcast %1383 : vector<8x1xf32> to vector<8x16xf32>
    %1386 = vector.broadcast %1384 : vector<1x16xf32> to vector<8x16xf32>
    %1387 = arith.mulf %1385, %1386 : vector<8x16xf32>
    %1388 = vector.extract_strided_slice %1303 {offsets = [0, 3], sizes = [8, 1], strides = [1, 1]} : vector<8x4xf32> to vector<8x1xf32>
    %1389 = vector.extract_strided_slice %7 {offsets = [3, 0], sizes = [1, 16], strides = [1, 1]} : vector<4x16xf32> to vector<1x16xf32>
    %1390 = vector.broadcast %1388 : vector<8x1xf32> to vector<8x16xf32>
    %1391 = vector.broadcast %1389 : vector<1x16xf32> to vector<8x16xf32>
    %1392 = arith.mulf %1390, %1391 : vector<8x16xf32>
    %1393 = arith.addf %1387, %1392 : vector<8x16xf32>
    %1394 = vector.extract_strided_slice %1302 {offsets = [0, 3], sizes = [8, 1], strides = [1, 1]} : vector<8x4xf32> to vector<8x1xf32>
    %1395 = vector.extract_strided_slice %9 {offsets = [3, 0], sizes = [1, 16], strides = [1, 1]} : vector<4x16xf32> to vector<1x16xf32>
    %1396 = vector.broadcast %1394 : vector<8x1xf32> to vector<8x16xf32>
    %1397 = vector.broadcast %1395 : vector<1x16xf32> to vector<8x16xf32>
    %1398 = arith.mulf %1396, %1397 : vector<8x16xf32>
    %1399 = vector.extract_strided_slice %1304 {offsets = [0, 3], sizes = [8, 1], strides = [1, 1]} : vector<8x4xf32> to vector<8x1xf32>
    %1400 = vector.extract_strided_slice %7 {offsets = [3, 0], sizes = [1, 16], strides = [1, 1]} : vector<4x16xf32> to vector<1x16xf32>
    %1401 = vector.broadcast %1399 : vector<8x1xf32> to vector<8x16xf32>
    %1402 = vector.broadcast %1400 : vector<1x16xf32> to vector<8x16xf32>
    %1403 = arith.mulf %1401, %1402 : vector<8x16xf32>
    %1404 = arith.addf %1398, %1403 : vector<8x16xf32>
    %1405 = arith.mulf %1379, %1393 : vector<8x16xf32>
    %1406 = arith.mulf %1382, %1404 : vector<8x16xf32>
    %1407 = arith.subf %1405, %1406 : vector<8x16xf32>
    %1408 = arith.mulf %1379, %1404 : vector<8x16xf32>
    %1409 = arith.mulf %1382, %1393 : vector<8x16xf32>
    %1410 = arith.addf %1408, %1409 : vector<8x16xf32>
    %cst_233 = arith.constant dense<0.000000e+00> : vector<8x128xf32>
    %1411 = tpu.matmul %1407, %3, %cst_233 {dimension_numbers = #tpu.dot_dimension_numbers<[1], [0], [0], [1], [0, 0, 1, 1], [], []>} : vector<8x16xf32>, vector<16x128xf32>, vector<8x128xf32> -> vector<8x128xf32>
    %cst_234 = arith.constant dense<0.000000e+00> : vector<8x128xf32>
    %1412 = tpu.matmul %1410, %4, %cst_234 {dimension_numbers = #tpu.dot_dimension_numbers<[1], [0], [0], [1], [0, 0, 1, 1], [], []>} : vector<8x16xf32>, vector<16x128xf32>, vector<8x128xf32> -> vector<8x128xf32>
    %1413 = arith.addf %1411, %1412 : vector<8x128xf32>
    %1414 = arith.mulf %1413, %1413 : vector<8x128xf32>
    %cst_235 = arith.constant dense<0.000000e+00> : vector<8x128xf32>
    %1415 = tpu.matmul %1414, %5, %cst_235 {dimension_numbers = #tpu.dot_dimension_numbers<[1], [0], [0], [1], [0, 0, 1, 1], [], []>} : vector<8x128xf32>, vector<128x128xf32>, vector<8x128xf32> -> vector<8x128xf32>
    %1416 = vector.broadcast %6 : vector<1x128xf32> to vector<8x128xf32>
    %1417 = arith.addf %1415, %1416 : vector<8x128xf32>
    %1418 = vector.extract_strided_slice %1417 {offsets = [0, 0], sizes = [8, 32], strides = [1, 1]} : vector<8x128xf32> to vector<8x32xf32>
    %1419 = arith.negf %1418 : vector<8x32xf32>
    %1420 = math.exp %1419 : vector<8x32xf32>
    %cst_236 = arith.constant 1.000000e+00 : f32
    %1421 = vector.broadcast %cst_236 : f32 to vector<8x32xf32>
    %1422 = arith.addf %1421, %1420 : vector<8x32xf32>
    %1423 = arith.divf %1421, %1422 : vector<8x32xf32>
    %1424 = vector.extract_strided_slice %1417 {offsets = [0, 32], sizes = [8, 32], strides = [1, 1]} : vector<8x128xf32> to vector<8x32xf32>
    %1425 = arith.negf %1424 : vector<8x32xf32>
    %1426 = math.exp %1425 : vector<8x32xf32>
    %cst_237 = arith.constant 1.000000e+00 : f32
    %1427 = vector.broadcast %cst_237 : f32 to vector<8x32xf32>
    %1428 = arith.addf %1427, %1426 : vector<8x32xf32>
    %1429 = arith.divf %1427, %1428 : vector<8x32xf32>
    %1430 = vector.extract_strided_slice %1417 {offsets = [0, 64], sizes = [8, 32], strides = [1, 1]} : vector<8x128xf32> to vector<8x32xf32>
    %1431 = math.tanh %1430 : vector<8x32xf32>
    %1432 = vector.extract_strided_slice %1417 {offsets = [0, 96], sizes = [8, 32], strides = [1, 1]} : vector<8x128xf32> to vector<8x32xf32>
    %1433 = arith.negf %1432 : vector<8x32xf32>
    %1434 = math.exp %1433 : vector<8x32xf32>
    %cst_238 = arith.constant 1.000000e+00 : f32
    %1435 = vector.broadcast %cst_238 : f32 to vector<8x32xf32>
    %1436 = arith.addf %1435, %1434 : vector<8x32xf32>
    %1437 = arith.divf %1435, %1436 : vector<8x32xf32>
    %1438 = arith.mulf %1423, %1235 : vector<8x32xf32>
    %1439 = arith.mulf %1429, %1431 : vector<8x32xf32>
    %1440 = arith.addf %1438, %1439 : vector<8x32xf32>
    %1441 = math.tanh %1440 : vector<8x32xf32>
    %1442 = arith.mulf %1437, %1441 : vector<8x32xf32>
    %1443 = arith.index_cast %c6_i32 : i32 to index
    %c0_239 = arith.constant 0 : index
    %c0_240 = arith.constant 0 : index
    %1444 = vector.load %arg10[%1443, %c0_239, %c0_240] : memref<8x8x32xf32, #tpu.memory_space<vmem>>, vector<1x8x32xf32>
    %1445 = vector.shape_cast %1444 : vector<1x8x32xf32> to vector<8x32xf32>
    %1446 = vector.shape_cast %1442 : vector<8x32xf32> to vector<1x8x32xf32>
    tpu.vector_store %arg10[%1443, %c0_239, %c0_240], %1446 {strides = array<i32>} : memref<8x8x32xf32, #tpu.memory_space<vmem>>, vector<1x8x32xf32>,
    %c7_i32 = arith.constant 7 : i32
    %1447 = arith.index_cast %c7_i32 : i32 to index
    %c0_241 = arith.constant 0 : index
    %c0_242 = arith.constant 0 : index
    %1448 = vector.load %arg1[%1447, %c0_241, %c0_242] : memref<8x8x8xf32, #tpu.memory_space<vmem>>, vector<1x8x8xf32>
    %1449 = vector.shape_cast %1448 : vector<1x8x8xf32> to vector<8x8xf32>
    %cst_243 = arith.constant dense<0.000000e+00> : vector<8x4xf32>
    %1450 = tpu.matmul %1442, %0, %cst_243 {dimension_numbers = #tpu.dot_dimension_numbers<[1], [0], [0], [1], [0, 0, 1, 1], [], []>} : vector<8x32xf32>, vector<32x4xf32>, vector<8x4xf32> -> vector<8x4xf32>
    %cst_244 = arith.constant dense<0.000000e+00> : vector<8x4xf32>
    %1451 = tpu.matmul %1449, %1, %cst_244 {dimension_numbers = #tpu.dot_dimension_numbers<[1], [0], [0], [1], [0, 0, 1, 1], [], []>} : vector<8x8xf32>, vector<8x4xf32>, vector<8x4xf32> -> vector<8x4xf32>
    %1452 = arith.addf %1450, %1451 : vector<8x4xf32>
    %1453 = vector.broadcast %2 : vector<1x4xf32> to vector<8x4xf32>
    %1454 = arith.addf %1452, %1453 : vector<8x4xf32>
    %1455 = arith.mulf %1454, %1454 : vector<8x4xf32>
    %cst_245 = arith.constant 1.000000e+00 : f32
    %1456 = vector.broadcast %cst_245 : f32 to vector<8x4xf32>
    %1457 = arith.addf %1456, %1455 : vector<8x4xf32>
    %1458 = math.rsqrt %1457 : vector<8x4xf32>
    %cst_246 = arith.constant 1.000000e+00 : f32
    %1459 = vector.broadcast %cst_246 : f32 to vector<8x4xf32>
    %1460 = arith.addf %1459, %1458 : vector<8x4xf32>
    %cst_247 = arith.constant 5.000000e-01 : f32
    %1461 = vector.broadcast %cst_247 : f32 to vector<8x4xf32>
    %1462 = arith.mulf %1460, %1461 : vector<8x4xf32>
    %cst_248 = arith.constant 0.000000e+00 : f32
    %1463 = vector.broadcast %cst_248 : f32 to vector<8x4xf32>
    %1464 = arith.maximumf %1462, %1463 : vector<8x4xf32>
    %1465 = math.sqrt %1464 : vector<8x4xf32>
    %cst_249 = arith.constant 0.000000e+00 : f32
    %1466 = vector.broadcast %cst_249 : f32 to vector<8x4xf32>
    %1467 = arith.cmpf oge, %1454, %1466 : vector<8x4xf32>
    %cst_250 = arith.constant 1.000000e+00 : f32
    %cst_251 = arith.constant -1.000000e+00 : f32
    %1468 = vector.broadcast %cst_250 : f32 to vector<8x4xf32>
    %1469 = vector.broadcast %cst_251 : f32 to vector<8x4xf32>
    %1470 = arith.select %1467, %1468, %1469 : vector<8x4xi1>, vector<8x4xf32>
    %cst_252 = arith.constant 1.000000e+00 : f32
    %1471 = vector.broadcast %cst_252 : f32 to vector<8x4xf32>
    %1472 = arith.subf %1471, %1458 : vector<8x4xf32>
    %cst_253 = arith.constant 5.000000e-01 : f32
    %1473 = vector.broadcast %cst_253 : f32 to vector<8x4xf32>
    %1474 = arith.mulf %1472, %1473 : vector<8x4xf32>
    %cst_254 = arith.constant 0.000000e+00 : f32
    %1475 = vector.broadcast %cst_254 : f32 to vector<8x4xf32>
    %1476 = arith.maximumf %1474, %1475 : vector<8x4xf32>
    %1477 = math.sqrt %1476 : vector<8x4xf32>
    %1478 = arith.mulf %1470, %1477 : vector<8x4xf32>
    %1479 = arith.mulf %1454, %1454 : vector<8x4xf32>
    %1480 = arith.mulf %1479, %1479 : vector<8x4xf32>
    %cst_255 = arith.constant 1.000000e+00 : f32
    %1481 = vector.broadcast %cst_255 : f32 to vector<8x4xf32>
    %1482 = arith.addf %1481, %1480 : vector<8x4xf32>
    %1483 = math.rsqrt %1482 : vector<8x4xf32>
    %cst_256 = arith.constant 1.000000e+00 : f32
    %1484 = vector.broadcast %cst_256 : f32 to vector<8x4xf32>
    %1485 = arith.addf %1484, %1483 : vector<8x4xf32>
    %cst_257 = arith.constant 5.000000e-01 : f32
    %1486 = vector.broadcast %cst_257 : f32 to vector<8x4xf32>
    %1487 = arith.mulf %1485, %1486 : vector<8x4xf32>
    %cst_258 = arith.constant 0.000000e+00 : f32
    %1488 = vector.broadcast %cst_258 : f32 to vector<8x4xf32>
    %1489 = arith.maximumf %1487, %1488 : vector<8x4xf32>
    %1490 = math.sqrt %1489 : vector<8x4xf32>
    %cst_259 = arith.constant 1.000000e+00 : f32
    %1491 = vector.broadcast %cst_259 : f32 to vector<8x4xf32>
    %1492 = arith.subf %1491, %1483 : vector<8x4xf32>
    %cst_260 = arith.constant 5.000000e-01 : f32
    %1493 = vector.broadcast %cst_260 : f32 to vector<8x4xf32>
    %1494 = arith.mulf %1492, %1493 : vector<8x4xf32>
    %cst_261 = arith.constant 0.000000e+00 : f32
    %1495 = vector.broadcast %cst_261 : f32 to vector<8x4xf32>
    %1496 = arith.maximumf %1494, %1495 : vector<8x4xf32>
    %1497 = math.sqrt %1496 : vector<8x4xf32>
    %1498 = arith.subf %1465, %1478 : vector<8x4xf32>
    %cst_262 = arith.constant 0.707106769 : f32
    %1499 = vector.broadcast %cst_262 : f32 to vector<8x4xf32>
    %1500 = arith.mulf %1498, %1499 : vector<8x4xf32>
    %1501 = arith.addf %1465, %1478 : vector<8x4xf32>
    %cst_263 = arith.constant 0.707106769 : f32
    %1502 = vector.broadcast %cst_263 : f32 to vector<8x4xf32>
    %1503 = arith.mulf %1501, %1502 : vector<8x4xf32>
    %1504 = arith.mulf %1490, %1500 : vector<8x4xf32>
    %cst_264 = arith.constant 0.000000e+00 : f32
    %1505 = vector.broadcast %cst_264 : f32 to vector<8x4xf32>
    %1506 = arith.subf %1505, %1497 : vector<8x4xf32>
    %1507 = arith.mulf %1506, %1500 : vector<8x4xf32>
    %1508 = arith.mulf %1490, %1503 : vector<8x4xf32>
    %1509 = arith.mulf %1497, %1503 : vector<8x4xf32>
    %1510 = vector.extract_strided_slice %1504 {offsets = [0, 0], sizes = [8, 1], strides = [1, 1]} : vector<8x4xf32> to vector<8x1xf32>
    %1511 = vector.extract_strided_slice %9 {offsets = [0, 0], sizes = [1, 16], strides = [1, 1]} : vector<4x16xf32> to vector<1x16xf32>
    %1512 = vector.broadcast %1510 : vector<8x1xf32> to vector<8x16xf32>
    %1513 = vector.broadcast %1511 : vector<1x16xf32> to vector<8x16xf32>
    %1514 = arith.mulf %1512, %1513 : vector<8x16xf32>
    %1515 = vector.extract_strided_slice %1508 {offsets = [0, 0], sizes = [8, 1], strides = [1, 1]} : vector<8x4xf32> to vector<8x1xf32>
    %1516 = vector.extract_strided_slice %7 {offsets = [0, 0], sizes = [1, 16], strides = [1, 1]} : vector<4x16xf32> to vector<1x16xf32>
    %1517 = vector.broadcast %1515 : vector<8x1xf32> to vector<8x16xf32>
    %1518 = vector.broadcast %1516 : vector<1x16xf32> to vector<8x16xf32>
    %1519 = arith.mulf %1517, %1518 : vector<8x16xf32>
    %1520 = arith.addf %1514, %1519 : vector<8x16xf32>
    %1521 = vector.extract_strided_slice %1507 {offsets = [0, 0], sizes = [8, 1], strides = [1, 1]} : vector<8x4xf32> to vector<8x1xf32>
    %1522 = vector.extract_strided_slice %9 {offsets = [0, 0], sizes = [1, 16], strides = [1, 1]} : vector<4x16xf32> to vector<1x16xf32>
    %1523 = vector.broadcast %1521 : vector<8x1xf32> to vector<8x16xf32>
    %1524 = vector.broadcast %1522 : vector<1x16xf32> to vector<8x16xf32>
    %1525 = arith.mulf %1523, %1524 : vector<8x16xf32>
    %1526 = vector.extract_strided_slice %1509 {offsets = [0, 0], sizes = [8, 1], strides = [1, 1]} : vector<8x4xf32> to vector<8x1xf32>
    %1527 = vector.extract_strided_slice %7 {offsets = [0, 0], sizes = [1, 16], strides = [1, 1]} : vector<4x16xf32> to vector<1x16xf32>
    %1528 = vector.broadcast %1526 : vector<8x1xf32> to vector<8x16xf32>
    %1529 = vector.broadcast %1527 : vector<1x16xf32> to vector<8x16xf32>
    %1530 = arith.mulf %1528, %1529 : vector<8x16xf32>
    %1531 = arith.addf %1525, %1530 : vector<8x16xf32>
    %1532 = vector.extract_strided_slice %1504 {offsets = [0, 1], sizes = [8, 1], strides = [1, 1]} : vector<8x4xf32> to vector<8x1xf32>
    %1533 = vector.extract_strided_slice %9 {offsets = [1, 0], sizes = [1, 16], strides = [1, 1]} : vector<4x16xf32> to vector<1x16xf32>
    %1534 = vector.broadcast %1532 : vector<8x1xf32> to vector<8x16xf32>
    %1535 = vector.broadcast %1533 : vector<1x16xf32> to vector<8x16xf32>
    %1536 = arith.mulf %1534, %1535 : vector<8x16xf32>
    %1537 = vector.extract_strided_slice %1508 {offsets = [0, 1], sizes = [8, 1], strides = [1, 1]} : vector<8x4xf32> to vector<8x1xf32>
    %1538 = vector.extract_strided_slice %7 {offsets = [1, 0], sizes = [1, 16], strides = [1, 1]} : vector<4x16xf32> to vector<1x16xf32>
    %1539 = vector.broadcast %1537 : vector<8x1xf32> to vector<8x16xf32>
    %1540 = vector.broadcast %1538 : vector<1x16xf32> to vector<8x16xf32>
    %1541 = arith.mulf %1539, %1540 : vector<8x16xf32>
    %1542 = arith.addf %1536, %1541 : vector<8x16xf32>
    %1543 = vector.extract_strided_slice %1507 {offsets = [0, 1], sizes = [8, 1], strides = [1, 1]} : vector<8x4xf32> to vector<8x1xf32>
    %1544 = vector.extract_strided_slice %9 {offsets = [1, 0], sizes = [1, 16], strides = [1, 1]} : vector<4x16xf32> to vector<1x16xf32>
    %1545 = vector.broadcast %1543 : vector<8x1xf32> to vector<8x16xf32>
    %1546 = vector.broadcast %1544 : vector<1x16xf32> to vector<8x16xf32>
    %1547 = arith.mulf %1545, %1546 : vector<8x16xf32>
    %1548 = vector.extract_strided_slice %1509 {offsets = [0, 1], sizes = [8, 1], strides = [1, 1]} : vector<8x4xf32> to vector<8x1xf32>
    %1549 = vector.extract_strided_slice %7 {offsets = [1, 0], sizes = [1, 16], strides = [1, 1]} : vector<4x16xf32> to vector<1x16xf32>
    %1550 = vector.broadcast %1548 : vector<8x1xf32> to vector<8x16xf32>
    %1551 = vector.broadcast %1549 : vector<1x16xf32> to vector<8x16xf32>
    %1552 = arith.mulf %1550, %1551 : vector<8x16xf32>
    %1553 = arith.addf %1547, %1552 : vector<8x16xf32>
    %1554 = arith.mulf %1520, %1542 : vector<8x16xf32>
    %1555 = arith.mulf %1531, %1553 : vector<8x16xf32>
    %1556 = arith.subf %1554, %1555 : vector<8x16xf32>
    %1557 = arith.mulf %1520, %1553 : vector<8x16xf32>
    %1558 = arith.mulf %1531, %1542 : vector<8x16xf32>
    %1559 = arith.addf %1557, %1558 : vector<8x16xf32>
    %1560 = vector.extract_strided_slice %1504 {offsets = [0, 2], sizes = [8, 1], strides = [1, 1]} : vector<8x4xf32> to vector<8x1xf32>
    %1561 = vector.extract_strided_slice %9 {offsets = [2, 0], sizes = [1, 16], strides = [1, 1]} : vector<4x16xf32> to vector<1x16xf32>
    %1562 = vector.broadcast %1560 : vector<8x1xf32> to vector<8x16xf32>
    %1563 = vector.broadcast %1561 : vector<1x16xf32> to vector<8x16xf32>
    %1564 = arith.mulf %1562, %1563 : vector<8x16xf32>
    %1565 = vector.extract_strided_slice %1508 {offsets = [0, 2], sizes = [8, 1], strides = [1, 1]} : vector<8x4xf32> to vector<8x1xf32>
    %1566 = vector.extract_strided_slice %7 {offsets = [2, 0], sizes = [1, 16], strides = [1, 1]} : vector<4x16xf32> to vector<1x16xf32>
    %1567 = vector.broadcast %1565 : vector<8x1xf32> to vector<8x16xf32>
    %1568 = vector.broadcast %1566 : vector<1x16xf32> to vector<8x16xf32>
    %1569 = arith.mulf %1567, %1568 : vector<8x16xf32>
    %1570 = arith.addf %1564, %1569 : vector<8x16xf32>
    %1571 = vector.extract_strided_slice %1507 {offsets = [0, 2], sizes = [8, 1], strides = [1, 1]} : vector<8x4xf32> to vector<8x1xf32>
    %1572 = vector.extract_strided_slice %9 {offsets = [2, 0], sizes = [1, 16], strides = [1, 1]} : vector<4x16xf32> to vector<1x16xf32>
    %1573 = vector.broadcast %1571 : vector<8x1xf32> to vector<8x16xf32>
    %1574 = vector.broadcast %1572 : vector<1x16xf32> to vector<8x16xf32>
    %1575 = arith.mulf %1573, %1574 : vector<8x16xf32>
    %1576 = vector.extract_strided_slice %1509 {offsets = [0, 2], sizes = [8, 1], strides = [1, 1]} : vector<8x4xf32> to vector<8x1xf32>
    %1577 = vector.extract_strided_slice %7 {offsets = [2, 0], sizes = [1, 16], strides = [1, 1]} : vector<4x16xf32> to vector<1x16xf32>
    %1578 = vector.broadcast %1576 : vector<8x1xf32> to vector<8x16xf32>
    %1579 = vector.broadcast %1577 : vector<1x16xf32> to vector<8x16xf32>
    %1580 = arith.mulf %1578, %1579 : vector<8x16xf32>
    %1581 = arith.addf %1575, %1580 : vector<8x16xf32>
    %1582 = arith.mulf %1556, %1570 : vector<8x16xf32>
    %1583 = arith.mulf %1559, %1581 : vector<8x16xf32>
    %1584 = arith.subf %1582, %1583 : vector<8x16xf32>
    %1585 = arith.mulf %1556, %1581 : vector<8x16xf32>
    %1586 = arith.mulf %1559, %1570 : vector<8x16xf32>
    %1587 = arith.addf %1585, %1586 : vector<8x16xf32>
    %1588 = vector.extract_strided_slice %1504 {offsets = [0, 3], sizes = [8, 1], strides = [1, 1]} : vector<8x4xf32> to vector<8x1xf32>
    %1589 = vector.extract_strided_slice %9 {offsets = [3, 0], sizes = [1, 16], strides = [1, 1]} : vector<4x16xf32> to vector<1x16xf32>
    %1590 = vector.broadcast %1588 : vector<8x1xf32> to vector<8x16xf32>
    %1591 = vector.broadcast %1589 : vector<1x16xf32> to vector<8x16xf32>
    %1592 = arith.mulf %1590, %1591 : vector<8x16xf32>
    %1593 = vector.extract_strided_slice %1508 {offsets = [0, 3], sizes = [8, 1], strides = [1, 1]} : vector<8x4xf32> to vector<8x1xf32>
    %1594 = vector.extract_strided_slice %7 {offsets = [3, 0], sizes = [1, 16], strides = [1, 1]} : vector<4x16xf32> to vector<1x16xf32>
    %1595 = vector.broadcast %1593 : vector<8x1xf32> to vector<8x16xf32>
    %1596 = vector.broadcast %1594 : vector<1x16xf32> to vector<8x16xf32>
    %1597 = arith.mulf %1595, %1596 : vector<8x16xf32>
    %1598 = arith.addf %1592, %1597 : vector<8x16xf32>
    %1599 = vector.extract_strided_slice %1507 {offsets = [0, 3], sizes = [8, 1], strides = [1, 1]} : vector<8x4xf32> to vector<8x1xf32>
    %1600 = vector.extract_strided_slice %9 {offsets = [3, 0], sizes = [1, 16], strides = [1, 1]} : vector<4x16xf32> to vector<1x16xf32>
    %1601 = vector.broadcast %1599 : vector<8x1xf32> to vector<8x16xf32>
    %1602 = vector.broadcast %1600 : vector<1x16xf32> to vector<8x16xf32>
    %1603 = arith.mulf %1601, %1602 : vector<8x16xf32>
    %1604 = vector.extract_strided_slice %1509 {offsets = [0, 3], sizes = [8, 1], strides = [1, 1]} : vector<8x4xf32> to vector<8x1xf32>
    %1605 = vector.extract_strided_slice %7 {offsets = [3, 0], sizes = [1, 16], strides = [1, 1]} : vector<4x16xf32> to vector<1x16xf32>
    %1606 = vector.broadcast %1604 : vector<8x1xf32> to vector<8x16xf32>
    %1607 = vector.broadcast %1605 : vector<1x16xf32> to vector<8x16xf32>
    %1608 = arith.mulf %1606, %1607 : vector<8x16xf32>
    %1609 = arith.addf %1603, %1608 : vector<8x16xf32>
    %1610 = arith.mulf %1584, %1598 : vector<8x16xf32>
    %1611 = arith.mulf %1587, %1609 : vector<8x16xf32>
    %1612 = arith.subf %1610, %1611 : vector<8x16xf32>
    %1613 = arith.mulf %1584, %1609 : vector<8x16xf32>
    %1614 = arith.mulf %1587, %1598 : vector<8x16xf32>
    %1615 = arith.addf %1613, %1614 : vector<8x16xf32>
    %cst_265 = arith.constant dense<0.000000e+00> : vector<8x128xf32>
    %1616 = tpu.matmul %1612, %3, %cst_265 {dimension_numbers = #tpu.dot_dimension_numbers<[1], [0], [0], [1], [0, 0, 1, 1], [], []>} : vector<8x16xf32>, vector<16x128xf32>, vector<8x128xf32> -> vector<8x128xf32>
    %cst_266 = arith.constant dense<0.000000e+00> : vector<8x128xf32>
    %1617 = tpu.matmul %1615, %4, %cst_266 {dimension_numbers = #tpu.dot_dimension_numbers<[1], [0], [0], [1], [0, 0, 1, 1], [], []>} : vector<8x16xf32>, vector<16x128xf32>, vector<8x128xf32> -> vector<8x128xf32>
    %1618 = arith.addf %1616, %1617 : vector<8x128xf32>
    %1619 = arith.mulf %1618, %1618 : vector<8x128xf32>
    %cst_267 = arith.constant dense<0.000000e+00> : vector<8x128xf32>
    %1620 = tpu.matmul %1619, %5, %cst_267 {dimension_numbers = #tpu.dot_dimension_numbers<[1], [0], [0], [1], [0, 0, 1, 1], [], []>} : vector<8x128xf32>, vector<128x128xf32>, vector<8x128xf32> -> vector<8x128xf32>
    %1621 = vector.broadcast %6 : vector<1x128xf32> to vector<8x128xf32>
    %1622 = arith.addf %1620, %1621 : vector<8x128xf32>
    %1623 = vector.extract_strided_slice %1622 {offsets = [0, 0], sizes = [8, 32], strides = [1, 1]} : vector<8x128xf32> to vector<8x32xf32>
    %1624 = arith.negf %1623 : vector<8x32xf32>
    %1625 = math.exp %1624 : vector<8x32xf32>
    %cst_268 = arith.constant 1.000000e+00 : f32
    %1626 = vector.broadcast %cst_268 : f32 to vector<8x32xf32>
    %1627 = arith.addf %1626, %1625 : vector<8x32xf32>
    %1628 = arith.divf %1626, %1627 : vector<8x32xf32>
    %1629 = vector.extract_strided_slice %1622 {offsets = [0, 32], sizes = [8, 32], strides = [1, 1]} : vector<8x128xf32> to vector<8x32xf32>
    %1630 = arith.negf %1629 : vector<8x32xf32>
    %1631 = math.exp %1630 : vector<8x32xf32>
    %cst_269 = arith.constant 1.000000e+00 : f32
    %1632 = vector.broadcast %cst_269 : f32 to vector<8x32xf32>
    %1633 = arith.addf %1632, %1631 : vector<8x32xf32>
    %1634 = arith.divf %1632, %1633 : vector<8x32xf32>
    %1635 = vector.extract_strided_slice %1622 {offsets = [0, 64], sizes = [8, 32], strides = [1, 1]} : vector<8x128xf32> to vector<8x32xf32>
    %1636 = math.tanh %1635 : vector<8x32xf32>
    %1637 = vector.extract_strided_slice %1622 {offsets = [0, 96], sizes = [8, 32], strides = [1, 1]} : vector<8x128xf32> to vector<8x32xf32>
    %1638 = arith.negf %1637 : vector<8x32xf32>
    %1639 = math.exp %1638 : vector<8x32xf32>
    %cst_270 = arith.constant 1.000000e+00 : f32
    %1640 = vector.broadcast %cst_270 : f32 to vector<8x32xf32>
    %1641 = arith.addf %1640, %1639 : vector<8x32xf32>
    %1642 = arith.divf %1640, %1641 : vector<8x32xf32>
    %1643 = arith.mulf %1628, %1440 : vector<8x32xf32>
    %1644 = arith.mulf %1634, %1636 : vector<8x32xf32>
    %1645 = arith.addf %1643, %1644 : vector<8x32xf32>
    %1646 = math.tanh %1645 : vector<8x32xf32>
    %1647 = arith.mulf %1642, %1646 : vector<8x32xf32>
    %1648 = arith.index_cast %c7_i32 : i32 to index
    %c0_271 = arith.constant 0 : index
    %c0_272 = arith.constant 0 : index
    %1649 = vector.load %arg10[%1648, %c0_271, %c0_272] : memref<8x8x32xf32, #tpu.memory_space<vmem>>, vector<1x8x32xf32>
    %1650 = vector.shape_cast %1649 : vector<1x8x32xf32> to vector<8x32xf32>
    %1651 = vector.shape_cast %1647 : vector<8x32xf32> to vector<1x8x32xf32>
    tpu.vector_store %arg10[%1648, %c0_271, %c0_272], %1651 {strides = array<i32>} : memref<8x8x32xf32, #tpu.memory_space<vmem>>, vector<1x8x32xf32>,
    %c8_i32 = arith.constant 8 : i32
    %c0_273 = arith.constant 0 : index
    %c0_274 = arith.constant 0 : index
    %1652 = vector.load %arg11[%c0_273, %c0_274] : memref<8x32xf32, #tpu.memory_space<vmem>>, vector<8x32xf32>
    tpu.vector_store %arg11[%c0_273, %c0_274], %1647 {strides = array<i32>} : memref<8x32xf32, #tpu.memory_space<vmem>>, vector<8x32xf32>,
    %c0_275 = arith.constant 0 : index
    %c0_276 = arith.constant 0 : index
    %1653 = vector.load %arg12[%c0_275, %c0_276] : memref<8x32xf32, #tpu.memory_space<vmem>>, vector<8x32xf32>
    tpu.vector_store %arg12[%c0_275, %c0_276], %1645 {strides = array<i32>} : memref<8x32xf32, #tpu.memory_space<vmem>>, vector<8x32xf32>,
    return
  }
  func.func @transform_0(%arg0: i32) -> (i32, i32, i32) {
    %c0_i32 = arith.constant 0 : i32
    %c0_i32_0 = arith.constant 0 : i32
    %c0_i32_1 = arith.constant 0 : i32
    %c0_i32_2 = arith.constant 0 : i32
    return %c0_i32, %c0_i32_0, %c0_i32_1 : i32, i32, i32
  }
  func.func @transform_1(%arg0: i32) -> (i32, i32) {
    %c0_i32 = arith.constant 0 : i32
    %c0_i32_0 = arith.constant 0 : i32
    %c0_i32_1 = arith.constant 0 : i32
    return %c0_i32, %c0_i32_0 : i32, i32
  }
  func.func @transform_2(%arg0: i32) -> (i32, i32) {
    %c0_i32 = arith.constant 0 : i32
    %c0_i32_0 = arith.constant 0 : i32
    %c0_i32_1 = arith.constant 0 : i32
    return %c0_i32, %c0_i32_0 : i32, i32
  }
  func.func @transform_3(%arg0: i32) -> (i32, i32) {
    %c0_i32 = arith.constant 0 : i32
    %c0_i32_0 = arith.constant 0 : i32
    %c0_i32_1 = arith.constant 0 : i32
    return %c0_i32, %c0_i32_0 : i32, i32
  }
  func.func @transform_4(%arg0: i32) -> (i32, i32) {
    %c0_i32 = arith.constant 0 : i32
    %c0_i32_0 = arith.constant 0 : i32
    %c0_i32_1 = arith.constant 0 : i32
    return %c0_i32, %c0_i32_0 : i32, i32
  }
  func.func @transform_5(%arg0: i32) -> (i32, i32) {
    %c0_i32 = arith.constant 0 : i32
    %c0_i32_0 = arith.constant 0 : i32
    %c0_i32_1 = arith.constant 0 : i32
    return %c0_i32, %c0_i32_0 : i32, i32
  }
  func.func @transform_6(%arg0: i32) -> (i32, i32) {
    %c0_i32 = arith.constant 0 : i32
    %c0_i32_0 = arith.constant 0 : i32
    %c0_i32_1 = arith.constant 0 : i32
    return %c0_i32, %c0_i32_0 : i32, i32
  }
  func.func @transform_7(%arg0: i32) -> (i32, i32) {
    %c0_i32 = arith.constant 0 : i32
    %c0_i32_0 = arith.constant 0 : i32
    %c0_i32_1 = arith.constant 0 : i32
    return %c0_i32, %c0_i32_0 : i32, i32
  }
  func.func @transform_8(%arg0: i32) -> (i32, i32) {
    %c0_i32 = arith.constant 0 : i32
    %c0_i32_0 = arith.constant 0 : i32
    %c0_i32_1 = arith.constant 0 : i32
    return %c0_i32, %c0_i32_0 : i32, i32
  }
  func.func @transform_9(%arg0: i32) -> (i32, i32, i32) {
    %c0_i32 = arith.constant 0 : i32
    %c0_i32_0 = arith.constant 0 : i32
    %c0_i32_1 = arith.constant 0 : i32
    %c0_i32_2 = arith.constant 0 : i32
    return %c0_i32, %c0_i32_0, %c0_i32_1 : i32, i32, i32
  }
  func.func @transform_10(%arg0: i32) -> (i32, i32) {
    %c0_i32 = arith.constant 0 : i32
    %c0_i32_0 = arith.constant 0 : i32
    %c0_i32_1 = arith.constant 0 : i32
    return %c0_i32, %c0_i32_0 : i32, i32
  }
  func.func @transform_11(%arg0: i32) -> (i32, i32) {
    %c0_i32 = arith.constant 0 : i32
    %c0_i32_0 = arith.constant 0 : i32
    %c0_i32_1 = arith.constant 0 : i32
    return %c0_i32, %c0_i32_0 : i32, i32
  }
}

</mosaic_0001>

<bundles_post_ra>
// kernel: tpu_custom_call.1
= control target key start
LH: loop header
LB: loop body
LE: loop exit
PB: predicated region body
PF: predicated region fallthrough
CT: control target
= control target key end

     0   :  { %17 = vsyncpa [#allocation3], 0  ;;  %s4493_s0 = inlined_call_operand.hbm [shape: f32[8,8,8], index: 0, kind: input, shape index: {}]   ;;  %s4494_s1 = inlined_call_operand.vmem [shape: f32[32,4], index: 1, kind: input, shape index: {}]   ;;  %s4495_s2 = inlined_call_operand.vmem [shape: f32[8,4], index: 2, kind: input, shape index: {}]   ;;  %s4496_s3 = inlined_call_operand.vmem [shape: f32[1,4], index: 3, kind: input, shape index: {}]   ;;  %s4497_s4 = inlined_call_operand.vmem [shape: f32[16,128], index: 4, kind: input, shape index: {}]   ;;  %s4498_s5 = inlined_call_operand.vmem [shape: f32[16,128], index: 5, kind: input, shape index: {}]   ;;  %s4499_s6 = inlined_call_operand.hbm [shape: f32[128,128], index: 6, kind: input, shape index: {}]   ;;  %s4500_s7 = inlined_call_operand.vmem [shape: f32[1,128], index: 7, kind: input, shape index: {}]   ;;  %s4501_s8 = inlined_call_operand.vmem [shape: f32[4,16], index: 8, kind: input, shape index: {}]   ;;  %s4502_s9 = inlined_call_operand.hbm [shape: f32[8,8,32], index: 9, kind: output, shape index: {0}]   ;;  %s4503_s10 = inlined_call_operand.hbm [shape: f32[8,32], index: 10, kind: output, shape index: {1}]   ;;  %s4504_s11 = inlined_call_operand.hbm [shape: f32[8,32], index: 11, kind: output, shape index: {2}]  }
   0x1   :  { %18 = vsyncpa [#allocation6], 0 }
   0x2   :  { %19 = vsyncpa [#allocation4], 0 }
   0x3   :  { %20 = vsyncpa [#allocation9], 0  ;;  %s25_s19 = sshll.u32 %s4493_s0, 4  ;;  %s3556_s20 = smov [#allocation2]   ;;  %s26_s19 = int_to_ptr.hbm [resolvable:$true] %s25_s19 }
   0x4   :  { %s27_s21 = sshll.u32 %s3556_s20, 4  ;;  %s48_s24 = sshll.u32 %s4499_s6, 4  ;;  %s28_s21 = int_to_ptr.vmem [resolvable:$true] %s27_s21  ;;  %s49_s24 = int_to_ptr.hbm [resolvable:$true] %s48_s24 }
   0x5   :  { %s3557_s25 = smov 128   ;;  %s3558_s26 = smov 8  }
   0x6   :  { %33 = dma.hbm_to_vmem [thread:$0]  %s26_s19, 1024, %s28_s21, [#allocation3], %s3557_s25, %s3557_s25, %s3558_s26  }
   0x7   :  { %s3559_s27 = smov [#allocation5]  }
   0x8   :  { %s50_s28 = sshll.u32 %s3559_s27, 4  ;;  %s51_s28 = int_to_ptr.vmem [resolvable:$true] %s50_s28 }
   0x9   :  { %56 = dma.hbm_to_vmem [thread:$0]  %s49_s24, 2048, %s51_s28, [#allocation6], %s3557_s25, %s3557_s25, %s3558_s26  }
   0xa   :  { %3548 = dma.done.wait [#allocation3], 1024  }
   0xb   :  { %3549 = vsyncadd [#allocation3], 4294966272 }
   0xc   :  { %3550 = dma.done.wait [#allocation6], 2048  }
   0xd   :  { %3551 = vsyncadd [#allocation6], 4294965248  ;;  %v3646_v0 = vld [vmem:[%s4494_s1 + $0x18] sm:$0xff]  ;;  %v3651_v1 = vld [vmem:[%s4494_s1 + $0x10] sm:$0xff]  ;;  %vm99_vm0 = vcmask 64512   ;;  %v3560_v6 = vmov 0.0  }
   0xe   :  { %139 = vmatpush.msra.mxu1 %v3646_v0  ;;  %v3657_v2 = vld [vmem:[%s4495_s2] sm:$0xff]  ;;  %v3662_v4 = vld [vmem:[%s4494_s1 + $0x8] sm:$0xff]  ;;  %v3561_v32 = vmov 1   ;;  %v3562_v33 = vmov 0   ;;  %s3566_s12 = smov 96   ;;  %s3567_s13 = smov 32  }
   0xf   :  { %v98_v3 = vld [vmem:[#allocation2] sm:$0xff]  ;;  %118 = vmatpush.msra.mxu0 %v3657_v2  ;;  %3135 = vset.pattern.permute.xlu2 %v3561_v32  ;;  %s3034_s24 = sshll.u32 %s4502_s9, 4  ;;  %s3569_s27 = smov [#allocation8]   ;;  %s3035_s24 = int_to_ptr.hbm [resolvable:$true] %s3034_s24 }
  0x10   :  { %140 = vmatpush.msra.mxu1 %v3651_v1  ;;  %3079 = vmatmul.msk.f32.vlgmr.msra.gmra.mxu0 %vm99_vm0, %v98_v3  ;;  %v3670_v5 = vld [vmem:[%s4494_s1] sm:$0xff]  ;;  %s3046_s28 = sshll.u32 %s3569_s27, 4  ;;  %s3048_s6 = sshll.u32 %s4503_s10, 4  ;;  %s3047_s28 = int_to_ptr.vmem [resolvable:$true] %s3046_s28  ;;  %s3049_s6 = int_to_ptr.hbm [resolvable:$true] %s3048_s6 }
  0x11   :  { %v3677_v8 = vld [vmem:[%s4496_s3] ss:$0 sm:$0xff]  ;;  %3134 = vset.pattern.permute.xlu1 %v3562_v33  ;;  %3133 = vset.pattern.permute.xlu0 %v3562_v33  ;;  %s3570_s29 = smov [#allocation10]   ;;  %s3059_s14 = sshll.u32 %s4504_s11, 4  ;;  %s3060_s14 = int_to_ptr.hbm [resolvable:$true] %s3059_s14 }
  0x12   :  { %141 = vmatpush.msra.mxu1 %v3662_v4 }
  0x14   :  { %142 = vmatpush.msra.mxu1 %v3670_v5 }
  0x15   :  { %143 = vmatmul.f32.vlgmr.msra.gmra.mxu1 %v3560_v6 }
  0x8d   :  { %v120_v7 = vpop.f32.mrf.mxu0 }
  0x92   :  { %v144_v9 = vpop.f32.mrf.mxu1 }
  0x93   :  { %v145_v10 = vadd.f32 %v144_v9, %v120_v7  ;;  %v3563_v7 = vmov -1.0  }
  0x95   :  { %v3680_v11 = vadd.f32 %v3677_v8, %v145_v10 }
  0x97   :  { %v151_v12 = vmul.f32 %v3680_v11, %v3680_v11  ;;  %vm178_vm7 = vcmp.ge.f32.partialorder %v3680_v11, 0.0 }
  0x98   :  { %v179_v9 = vsel %vm178_vm7, 1.0, %v3563_v7 }
  0x99   :  { %v152_v13 = vadd.f32 1.0, %v151_v12  ;;  %v196_v14 = vmul.f32 %v151_v12, %v151_v12 }
  0x9b   :  { %3228 = vrsqrt.f32 %v152_v13  ;;  %v197_v15 = vadd.f32 1.0, %v196_v14  ;;  %vm159_vm2 = vweird.f32 %v152_v13 }
  0x9d   :  { %3230 = vrsqrt.f32 %v197_v15  ;;  %vm204_vm5 = vweird.f32 %v197_v15 }
  0xa1   :  { %v3229_v16 = vpop.eup %3228 }
  0xa2   :  { %v154_v17 = vmul.f32 %v3229_v16, %v152_v13  ;;  %vm160_vm1 = vweird.f32 %v3229_v16 }
  0xa3   :  { %v3231_v18 = vpop.eup %3230  ;;  %vm161_vm4 = vmor %vm159_vm2, %vm160_vm1  ;;  %vm365_vm1 = vcmask 130048  }
  0xa4   :  { %v155_v19 = vmul.f32 %v3229_v16, %v154_v17  ;;  %v199_v20 = vmul.f32 %v3231_v18, %v197_v15  ;;  %vm205_vm3 = vweird.f32 %v3231_v18 }
  0xa5   :  { %vm206_vm6 = vmor %vm204_vm5, %vm205_vm3 }
  0xa6   :  { %v156_v21 = vmul.f32 0.5, %v155_v19  ;;  %v200_v22 = vmul.f32 %v3231_v18, %v199_v20 }
  0xa8   :  { %v157_v23 = vsub.f32 1.5, %v156_v21  ;;  %v201_v24 = vmul.f32 0.5, %v200_v22 }
  0xaa   :  { %v158_v25 = vmul.f32 %v3229_v16, %v157_v23  ;;  %v202_v26 = vsub.f32 1.5, %v201_v24 }
  0xac   :  { %v162_v27 = vsel %vm161_vm4, %v3229_v16, %v158_v25  ;;  %v203_v28 = vmul.f32 %v3231_v18, %v202_v26 }
  0xad   :  { %v163_v29 = vadd.f32 1.0, %v162_v27  ;;  %v180_v30 = vsub.f32 1.0, %v162_v27 }
  0xae   :  { %v207_v31 = vsel %vm206_vm6, %v3231_v18, %v203_v28  ;;  %vm123_vm6 = vcmask 261120  }
  0xaf   :  { %v164_v34 = vmul.f32 0.5, %v163_v29  ;;  %v181_v35 = vmul.f32 0.5, %v180_v30  ;;  %v208_v36 = vadd.f32 1.0, %v207_v31  ;;  %v223_v37 = vsub.f32 1.0, %v207_v31 }
  0xb1   :  { %v165_v38 = vmax.f32 %v164_v34, 0.0  ;;  %v182_v39 = vmax.f32 %v181_v35, 0.0  ;;  %v209_v40 = vmul.f32 0.5, %v208_v36  ;;  %v224_v41 = vmul.f32 0.5, %v223_v37 }
  0xb3   :  { %3232 = vrsqrt.f32 %v165_v38  ;;  %v210_v42 = vmax.f32 %v209_v40, 0.0  ;;  %v225_v43 = vmax.f32 %v224_v41, 0.0  ;;  %vm173_vm8 = vcmp.eq.f32.partialorder %v165_v38, inf }
  0xb4   :  { %3234 = vrsqrt.f32 %v182_v39  ;;  %vm190_vm9 = vcmp.eq.f32.partialorder %v182_v39, inf  ;;  %v193_v13 = vand.u32 2147483648, %v182_v39  ;;  %vm192_vm10 = vcmp.eq.f32.partialorder %v182_v39, 0.0 }
  0xb5   :  { %3236 = vrsqrt.f32 %v225_v43  ;;  %vm175_vm11 = vcmp.eq.f32.partialorder %v165_v38, 0.0  ;;  %v176_v11 = vand.u32 2147483648, %v165_v38  ;;  %vm233_vm12 = vcmp.eq.f32.partialorder %v225_v43, inf }
  0xb6   :  { %3238 = vrsqrt.f32 %v210_v42  ;;  %v236_v21 = vand.u32 2147483648, %v225_v43  ;;  %vm235_vm13 = vcmp.eq.f32.partialorder %v225_v43, 0.0  ;;  %vm218_vm14 = vcmp.eq.f32.partialorder %v210_v42, inf }
  0xb7   :  { %v221_v28 = vand.u32 2147483648, %v210_v42  ;;  %vm220_vm15 = vcmp.eq.f32.partialorder %v210_v42, 0.0  ;;  %v3564_v40 = vmov 2   ;;  %v3565_v41 = vmov 3  }
  0xb9   :  { %v3233_v44 = vpop.eup %3232 }
  0xba   :  { %v3235_v45 = vpop.eup %3234  ;;  %v167_v46 = vmul.f32 %v3233_v44, %v165_v38 }
  0xbb   :  { %v184_v47 = vmul.f32 %v3235_v45, %v182_v39  ;;  %v3237_v49 = vpop.eup %3236 }
  0xbc   :  { %v168_v48 = vmul.f32 %v3233_v44, %v167_v46  ;;  %v3239_v51 = vpop.eup %3238  ;;  %v227_v53 = vmul.f32 %v3237_v49, %v225_v43 }
  0xbd   :  { %v185_v50 = vmul.f32 %v3235_v45, %v184_v47  ;;  %v212_v55 = vmul.f32 %v3239_v51, %v210_v42 }
  0xbe   :  { %v169_v52 = vmul.f32 0.5, %v168_v48  ;;  %v228_v57 = vmul.f32 %v3237_v49, %v227_v53  ;;  %v3719_v53 = vld [vmem:[%s4497_s4 + $0x8] sm:$0xff] }
  0xbf   :  { %v186_v54 = vmul.f32 0.5, %v185_v50  ;;  %v213_v59 = vmul.f32 %v3239_v51, %v212_v55  ;;  %v3702_v50 = vld [vmem:[%s4498_s5 + $0x8] sm:$0xff] }
  0xc0   :  { %v170_v56 = vsub.f32 1.5, %v169_v52  ;;  %v229_v61 = vmul.f32 0.5, %v228_v57  ;;  %383 = vmatpush.msra.mxu2 %v3702_v50  ;;  %749 = vmatpush.msrb.mxu1 %v3702_v50  ;;  %v96_v52 = vld [vmem:[%s4501_s8] sm:$0xf]  ;;  %s3057_s8 = sshll.u32 %s3570_s29, 4  ;;  %s3058_s8 = int_to_ptr.vmem [resolvable:$true] %s3057_s8 }
  0xc1   :  { %v187_v58 = vsub.f32 1.5, %v186_v54  ;;  %v214_v63 = vmul.f32 0.5, %v213_v59  ;;  %v3724_v54 = vld [vmem:[%s4497_s4] sm:$0xff]  ;;  %v97_v57 = vsub.f32 1.0, %v96_v52  ;;  %v3731_v59 = vperm.slane %v96_v52, 1 }
  0xc2   :  { %v171_v60 = vmul.f32 %v3233_v44, %v170_v56  ;;  %v230_v6 = vsub.f32 1.5, %v229_v61 }
  0xc3   :  { %v188_v62 = vmul.f32 %v3235_v45, %v187_v58  ;;  %v215_v12 = vsub.f32 1.5, %v214_v63  ;;  %v3729_v58 = vperm.slane %v97_v57, 1 }
  0xc4   :  { %v172_v3 = vmul.f32 %v171_v60, %v165_v38  ;;  %v231_v14 = vmul.f32 %v3237_v49, %v230_v6  ;;  %v3733_v60 = vperm.slane %v96_v52, 0  ;;  %v3739_v6 = vld [vmem:[#allocation5 + $0x78] sm:$0xff] }
  0xc5   :  { %v189_v10 = vmul.f32 %v188_v62, %v182_v39  ;;  %v216_v17 = vmul.f32 %v3239_v51, %v215_v12  ;;  %v3707_v51 = vld [vmem:[%s4498_s5] sm:$0xff]  ;;  %v3735_v62 = vperm.slane %v97_v57, 0  ;;  %416 = vmatpush.msrb.mxu0 %v3739_v6  ;;  %779 = vmatpush.msra.mxu3 %v3739_v6 }
  0xc6   :  { %v174_v15 = vsel %vm173_vm8, %v165_v38, %v172_v3  ;;  %v232_v19 = vmul.f32 %v231_v14, %v225_v43  ;;  %384 = vmatpush.msra.mxu2 %v3707_v51  ;;  %750 = vmatpush.msrb.mxu1 %v3707_v51  ;;  %v3749_v14 = vld [vmem:[#allocation5 + $0x68] sm:$0xff] }
  0xc7   :  { %v191_v16 = vsel %vm190_vm9, %v182_v39, %v189_v10  ;;  %v217_v22 = vmul.f32 %v216_v17, %v210_v42  ;;  %v177_v23 = vsel %vm175_vm11, %v176_v11, %v174_v15 }
  0xc8   :  { %v194_v18 = vsel %vm192_vm10, %v193_v13, %v191_v16  ;;  %v234_v24 = vsel %vm233_vm12, %v225_v43, %v232_v19  ;;  %862 = vmatpush.msra.mxu1 %v3657_v2  ;;  %406 = vmatpush.msrb.mxu2 %v3719_v53  ;;  %v3747_v13 = vperm.slane %v96_v52, 2  ;;  %v3752_v16 = vperm.slane %v97_v57, 2 }
  0xc9   :  { %v195_v20 = vmul.f32 %v194_v18, %v179_v9  ;;  %v237_v26 = vsel %vm235_vm13, %v236_v21, %v234_v24  ;;  %v219_v27 = vsel %vm218_vm14, %v210_v42, %v217_v22  ;;  %v3741_v9 = vld [vmem:[#allocation5 + $0x70] sm:$0xff]  ;;  %v3757_v21 = vld [vmem:[#allocation5 + $0x60] sm:$0xff] }
  0xca   :  { %v243_v30 = vsub.f32 0.0, %v237_v26  ;;  %v222_v31 = vsel %vm220_vm15, %v221_v28, %v219_v27  ;;  %407 = vmatpush.msrb.mxu2 %v3724_v54  ;;  %417 = vmatpush.msrb.mxu0 %v3741_v9  ;;  %v3764_v27 = vld [vmem:[#allocation5 + $0x58] sm:$0xff] }
  0xcb   :  { %v238_v25 = vsub.f32 %v177_v23, %v195_v20  ;;  %v240_v34 = vadd.f32 %v195_v20, %v177_v23  ;;  %780 = vmatpush.msra.mxu3 %v3741_v9 }
  0xcc   :  { %418 = vmatpush.msrb.mxu0 %v3749_v14 }
  0xcd   :  { %v239_v29 = vmul.f32 0.70710677, %v238_v25  ;;  %v241_v37 = vmul.f32 0.70710677, %v240_v34  ;;  %781 = vmatpush.msra.mxu3 %v3749_v14 }
  0xce   :  { %419 = vmatpush.msrb.mxu0 %v3757_v21 }
  0xcf   :  { %v244_v35 = vmul.f32 %v243_v30, %v239_v29  ;;  %v242_v36 = vmul.f32 %v239_v29, %v222_v31  ;;  %v246_v38 = vmul.f32 %v241_v37, %v237_v26  ;;  %v245_v39 = vmul.f32 %v241_v37, %v222_v31  ;;  %v3772_v37 = vld [vmem:[#allocation5 + $0x50] sm:$0xff]  ;;  %782 = vmatpush.msra.mxu3 %v3757_v21 }
  0xd0   :  { %420 = vmatpush.msrb.mxu0 %v3764_v27 }
  0xd1   :  { %264 = vperm.xlu1 %3134, %v244_v35   ;;  %276 = vperm.xlu2 %3135, %v242_v36  }
  0xd2   :  { %249 = vperm.xlu0 %3133, %v242_v36   ;;  %783 = vmatpush.msra.mxu3 %v3764_v27 }
  0xd3   :  { %421 = vmatpush.msrb.mxu0 %v3772_v37 }
  0xd4   :  { %784 = vmatpush.msra.mxu3 %v3772_v37 }
  0xd9   :  { %270 = vperm.xlu1 %3134, %v246_v38   ;;  %282 = vperm.xlu2 %3135, %v245_v39  }
  0xda   :  { %256 = vperm.xlu0 %3133, %v245_v39  }
  0xe1   :  { %3137 = vset.pattern.permute.xlu1 %v3561_v32  ;;  %3138 = vset.pattern.permute.xlu2 %v3564_v40 }
  0xe2   :  { %3136 = vset.pattern.permute.xlu0 %v3561_v32  ;;  %294 = vperm.xlu1 %3137, %v246_v38  }
  0xe3   :  { %306 = vperm.xlu2 %3138, %v242_v36   ;;  %289 = vperm.xlu0 %3136, %v244_v35  }
  0xea   :  { %3139 = vset.pattern.permute.xlu1 %v3564_v40 }
  0xeb   :  { %319 = vperm.xlu2 %3138, %v244_v35   ;;  %3140 = vset.pattern.permute.xlu0 %v3564_v40 }
  0xec   :  { %312 = vperm.xlu1 %3139, %v245_v39   ;;  %324 = vperm.xlu0 %3140, %v246_v38  }
  0xf3   :  { %3142 = vset.pattern.permute.xlu2 %v3565_v41 }
  0xf4   :  { %3141 = vset.pattern.permute.xlu1 %v3565_v41  ;;  %342 = vperm.xlu2 %3142, %v245_v39  }
  0xf5   :  { %336 = vperm.xlu1 %3141, %v242_v36   ;;  %3145 = vset.pattern.permute.xlu0 %v3562_v33  ;;  %v3770_v36 = vperm.slane %v97_v57, 3 }
  0xfc   :  { %354 = vperm.xlu2 %3142, %v246_v38   ;;  %v3775_v38 = vperm.slane %v96_v52, 3 }
  0xfd   :  { %349 = vperm.xlu1 %3141, %v244_v35  }
 0x104   :  { %3144 = vset.pattern.permute.xlu2 %v3562_v33 }
 0x105   :  { %3143 = vset.pattern.permute.xlu1 %v3562_v33 }
 0x12b   :  { %v277_v42 = vpop.permute.xlu2 %276 }
 0x12c   :  { %v280_v22 = vmul.f32 %v3729_v58, %v277_v42 }
 0x133   :  { %v283_v44 = vpop.permute.xlu2 %282 }
 0x134   :  { %v286_v15 = vmul.f32 %v3731_v59, %v283_v44 }
 0x136   :  { %v287_v28 = vadd.f32 %v286_v15, %v280_v22 }
 0x13d   :  { %v307_v47 = vpop.permute.xlu2 %306 }
 0x13e   :  { %v310_v29 = vmul.f32 %v3752_v16, %v307_v47 }
 0x143   :  { %v265_v43 = vpop.permute.xlu1 %264 }
 0x144   :  { %v250_v45 = vpop.permute.xlu0 %249  ;;  %v267_v18 = vmul.f32 %v265_v43, %v3735_v62 }
 0x145   :  { %v320_v55 = vpop.permute.xlu2 %319  ;;  %v253_v19 = vmul.f32 %v3735_v62, %v250_v45  ;;  %v3778_v45 = vld [vmem:[#allocation5 + $0x48] sm:$0xff] }
 0x146   :  { %v322_v31 = vmul.f32 %v320_v55, %v3752_v16  ;;  %422 = vmatpush.msrb.mxu0 %v3778_v45  ;;  %785 = vmatpush.msra.mxu3 %v3778_v45 }
 0x14b   :  { %v271_v46 = vpop.permute.xlu1 %270 }
 0x14c   :  { %v257_v48 = vpop.permute.xlu0 %256  ;;  %v273_v10 = vmul.f32 %v271_v46, %v3733_v60 }
 0x14d   :  { %v260_v12 = vmul.f32 %v3733_v60, %v257_v48 }
 0x14e   :  { %v343_v17 = vpop.permute.xlu2 %342  ;;  %v274_v23 = vadd.f32 %v273_v10, %v267_v18 }
 0x14f   :  { %v261_v24 = vadd.f32 %v260_v12, %v253_v19  ;;  %v346_v52 = vmul.f32 %v3775_v38, %v343_v17 }
 0x150   :  { %v303_v39 = vmul.f32 %v287_v28, %v274_v23 }
 0x151   :  { %v299_v42 = vmul.f32 %v287_v28, %v261_v24  ;;  %v3802_v28 = vld [vmem:[#allocation5 + $0x30] sm:$0xff] }
 0x154   :  { %v295_v49 = vpop.permute.xlu1 %294 }
 0x155   :  { %v290_v56 = vpop.permute.xlu0 %289  ;;  %v297_v63 = vmul.f32 %v295_v49, %v3731_v59  ;;  %v3783_v49 = vld [vmem:[#allocation5 + $0x40] sm:$0xff] }
 0x156   :  { %v292_v3 = vmul.f32 %v290_v56, %v3729_v58  ;;  %v355_v55 = vpop.permute.xlu2 %354  ;;  %423 = vmatpush.msrb.mxu0 %v3783_v49  ;;  %786 = vmatpush.msra.mxu3 %v3783_v49 }
 0x157   :  { %v357_v12 = vmul.f32 %v355_v55, %v3775_v38 }
 0x158   :  { %v298_v20 = vadd.f32 %v297_v63, %v292_v3  ;;  %v3788_v3 = vld [vmem:[#allocation5 + $0x38] sm:$0xff] }
 0x159   :  { %424 = vmatpush.msrb.mxu0 %v3788_v3  ;;  %787 = vmatpush.msra.mxu3 %v3788_v3 }
 0x15a   :  { %v300_v34 = vmul.f32 %v298_v20, %v274_v23  ;;  %v302_v35 = vmul.f32 %v298_v20, %v261_v24 }
 0x15b   :  { %425 = vmatpush.msrb.mxu0 %v3802_v28  ;;  %788 = vmatpush.msra.mxu3 %v3802_v28 }
 0x15c   :  { %v301_v46 = vsub.f32 %v299_v42, %v300_v34  ;;  %v304_v47 = vadd.f32 %v303_v39, %v302_v35  ;;  %v3818_v34 = vld [vmem:[#allocation5 + $0x10] sm:$0xff]  ;;  %v3822_v35 = vld [vmem:[#allocation5 + $0x8] sm:$0xff]  ;;  %v3825_v39 = vld [vmem:[#allocation5] sm:$0xff] }
 0x15e   :  { %v313_v61 = vpop.permute.xlu1 %312  ;;  %v325_v11 = vpop.permute.xlu0 %324 }
 0x15f   :  { %v316_v25 = vmul.f32 %v3747_v13, %v313_v61  ;;  %v327_v26 = vmul.f32 %v325_v11, %v3747_v13 }
 0x161   :  { %v317_v43 = vadd.f32 %v316_v25, %v310_v29  ;;  %v328_v44 = vadd.f32 %v327_v26, %v322_v31  ;;  %v3804_v29 = vld [vmem:[#allocation5 + $0x28] sm:$0xff]  ;;  %v3812_v31 = vld [vmem:[#allocation5 + $0x18] sm:$0xff] }
 0x162   :  { %426 = vmatpush.msrb.mxu0 %v3804_v29  ;;  %789 = vmatpush.msra.mxu3 %v3804_v29 }
 0x163   :  { %v329_v56 = vmul.f32 %v317_v43, %v301_v46  ;;  %v333_v57 = vmul.f32 %v317_v43, %v304_v47  ;;  %v330_v61 = vmul.f32 %v328_v44, %v304_v47  ;;  %v332_v63 = vmul.f32 %v328_v44, %v301_v46  ;;  %v3854_v47 = vld [vmem:[%s4500_s7] ss:$0 sm:$0xff] }
 0x165   :  { %v331_v17 = vsub.f32 %v329_v56, %v330_v61  ;;  %v334_v18 = vadd.f32 %v333_v57, %v332_v63 }
 0x167   :  { %v337_v30 = vpop.permute.xlu1 %336 }
 0x168   :  { %v340_v48 = vmul.f32 %v3770_v36, %v337_v30  ;;  %v3808_v30 = vld [vmem:[#allocation5 + $0x20] sm:$0xff] }
 0x169   :  { %427 = vmatpush.msrb.mxu0 %v3808_v30  ;;  %790 = vmatpush.msra.mxu3 %v3808_v30 }
 0x16a   :  { %v347_v15 = vadd.f32 %v346_v52, %v340_v48 }
 0x16b   :  { %428 = vmatpush.msrb.mxu0 %v3812_v31  ;;  %791 = vmatpush.msra.mxu3 %v3812_v31 }
 0x16c   :  { %v363_v20 = vmul.f32 %v347_v15, %v334_v18  ;;  %v359_v25 = vmul.f32 %v347_v15, %v331_v17 }
 0x16d   :  { %429 = vmatpush.msrb.mxu0 %v3818_v34  ;;  %792 = vmatpush.msra.mxu3 %v3818_v34 }
 0x16f   :  { %v350_v10 = vpop.permute.xlu1 %349  ;;  %430 = vmatpush.msrb.mxu0 %v3822_v35  ;;  %793 = vmatpush.msra.mxu3 %v3822_v35 }
 0x170   :  { %v352_v11 = vmul.f32 %v350_v10, %v3770_v36 }
 0x171   :  { %431 = vmatpush.msrb.mxu0 %v3825_v39  ;;  %794 = vmatpush.msra.mxu3 %v3825_v39 }
 0x172   :  { %v358_v19 = vadd.f32 %v357_v12, %v352_v11 }
 0x173   :  { %517 = vmatpush.msra.mxu0 %v3646_v0  ;;  %1507 = vmatpush.msrb.mxu3 %v3739_v6 }
 0x174   :  { %v362_v22 = vmul.f32 %v358_v19, %v331_v17  ;;  %v360_v24 = vmul.f32 %v358_v19, %v334_v18 }
 0x175   :  { %518 = vmatpush.msra.mxu0 %v3651_v1  ;;  %1508 = vmatpush.msrb.mxu3 %v3741_v9 }
 0x176   :  { %v364_v23 = vadd.f32 %v363_v20, %v362_v22  ;;  %v361_v26 = vsub.f32 %v359_v25, %v360_v24 }
 0x177   :  { %519 = vmatpush.msra.mxu0 %v3662_v4  ;;  %1509 = vmatpush.msrb.mxu3 %v3749_v14 }
 0x178   :  { %3080 = vmatmul.msk.f32.vlgmr.msra.gmra.mxu2 %vm365_vm1, %v364_v23 }
 0x179   :  { %498 = vmatpush.msra.mxu2 %v3657_v2  ;;  %520 = vmatpush.msra.mxu0 %v3670_v5 }
 0x17a   :  { %1510 = vmatpush.msrb.mxu3 %v3757_v21 }
 0x17c   :  { %1511 = vmatpush.msrb.mxu3 %v3764_v27 }
 0x17e   :  { %1512 = vmatpush.msrb.mxu3 %v3772_v37 }
 0x180   :  { %3081 = vmatmul.msk.f32.vlgmr.msrb.gmra.mxu2 %vm365_vm1, %v361_v26  ;;  %1513 = vmatpush.msrb.mxu3 %v3778_v45 }
 0x181   :  { %772 = vmatpush.msrb.mxu2 %v3719_v53 }
 0x182   :  { %1514 = vmatpush.msrb.mxu3 %v3783_v49 }
 0x183   :  { %773 = vmatpush.msrb.mxu2 %v3724_v54 }
 0x184   :  { %1515 = vmatpush.msrb.mxu3 %v3788_v3 }
 0x186   :  { %1516 = vmatpush.msrb.mxu3 %v3802_v28 }
 0x188   :  { %1517 = vmatpush.msrb.mxu3 %v3804_v29 }
 0x18a   :  { %1518 = vmatpush.msrb.mxu3 %v3808_v30 }
 0x18c   :  { %1519 = vmatpush.msrb.mxu3 %v3812_v31 }
 0x18e   :  { %1520 = vmatpush.msrb.mxu3 %v3818_v34 }
 0x190   :  { %1521 = vmatpush.msrb.mxu3 %v3822_v35 }
 0x192   :  { %1522 = vmatpush.msrb.mxu3 %v3825_v39 }
 0x1fb   :  { %v386_v42 = vpop.f32.mrf.mxu2 }
 0x203   :  { %v409_v43 = vpop.f32.mrf.mxu2 }
 0x204   :  { %v410_v44 = vadd.f32 %v409_v43, %v386_v42  ;;  %v479_v43 = vld [vmem:[#allocation2 + $0x8] sm:$0xff] }
 0x205   :  { %3083 = vmatmul.msk.f32.vlgmr.msra.gmra.mxu2 %vm99_vm0, %v479_v43 }
 0x206   :  { %v412_v46 = vmul.f32 %v410_v44, %v410_v44  ;;  %881 = vmatpush.msra.mxu2 %v3646_v0 }
 0x208   :  { %432 = vmatmul.f32.vlgmr.msrb.gmra.mxu0 %v412_v46  ;;  %882 = vmatpush.msra.mxu2 %v3651_v1 }
 0x209   :  { %1226 = vmatpush.msrb.mxu0 %v3657_v2 }
 0x20a   :  { %883 = vmatpush.msra.mxu2 %v3662_v4 }
 0x20c   :  { %884 = vmatpush.msra.mxu2 %v3670_v5 }
 0x285   :  { %v433_v48 = vpop.f32.mrf.mxu0 }
 0x286   :  { %v434_v52 = vadd.f32 %v3854_v47, %v433_v48 }
 0x288   :  { %3240 = vtanh.f32 %v434_v52  ;;  %v3082_v56 = vmul.f32 -1.442695, %v434_v52  ;;  %v500_v0 = vpop.f32.mrf.mxu2 }
 0x28a   :  { %3242 = vpow2.f32 %v3082_v56 }
 0x28e   :  { %v3241_v55 = vpop.eup %3240 }
 0x28f   :  { %458 = vrot.lane.b32.xlu0 %v3241_v55, %s3566_s12 }
 0x290   :  { %v3243_v57 = vpop.eup %3242 }
 0x291   :  { %v439_v61 = vadd.f32 1.0, %v3243_v57 }
 0x293   :  { %3244 = vrcp.f32 %v439_v61  ;;  %v451_v11 = vand.u32 2147483648, %v439_v61  ;;  %vm445_vm3 = vweird.f32 %v439_v61  ;;  %v449_v17 = vand.u32 2147483647, %v439_v61 }
 0x295   :  { %v452_v19 = vor.u32 1.1754944e-38, %v451_v11  ;;  %vm450_vm5 = vcmp.eq.f32.partialorder %v449_v17, 8.507059e+37 }
 0x299   :  { %v3245_v63 = vpop.eup %3244 }
 0x29a   :  { %v441_v2 = vmul.f32 %v3245_v63, %v439_v61  ;;  %vm446_vm2 = vweird.f32 %v3245_v63 }
 0x29b   :  { %vm447_vm4 = vmor %vm445_vm3, %vm446_vm2 }
 0x29c   :  { %v442_v10 = vsub.f32 1.0, %v441_v2 }
 0x29e   :  { %v443_v12 = vmul.f32 %v3245_v63, %v442_v10 }
 0x2a0   :  { %v444_v15 = vadd.f32 %v3245_v63, %v443_v12 }
 0x2a2   :  { %v448_v18 = vsel %vm447_vm4, %v3245_v63, %v444_v15 }
 0x2a3   :  { %v453_v22 = vsel %vm450_vm5, %v452_v19, %v448_v18 }
 0x2a4   :  { %v456_v24 = vmul.f32 0.0, %v453_v22 }
 0x301   :  { %v459_v20 = vpop.permute.xlu0 %458 }
 0x302   :  { %v461_v23 = vmul.f32 %v459_v20, %v453_v22 }
 0x304   :  { %463 = vrot.lane.b32.xlu1 %v461_v23, %s3566_s12 }
 0x376   :  { %v464_v25 = vpop.permute.xlu1 %463 }
 0x377   :  { %v3859_v26 = vadd.f32 %v464_v25, %v456_v24 }
 0x379   :  { %3246 = vtanh.f32 %v3859_v26 }
 0x37f   :  { %v3247_v42 = vpop.eup %3246 }
 0x380   :  { %469 = vrot.lane.b32.xlu2 %v3247_v42, %s3566_s12 }
 0x3da   :  { %v470_v44 = vpop.permute.xlu2 %469 }
 0x3db   :  { %v472_v46 = vmul.f32 %v470_v44, %v453_v22 }
 0x3dd   :  { %474 = vrot.lane.b32.xlu0 %v472_v46, %s3567_s13 }
 0x44f   :  { %v475_v48 = vpop.permute.xlu0 %474 }
 0x450   :  { %477 = vst.msk [vmem:[#allocation7] sm:$0xff] %vm123_vm6, %v475_v48  ;;  %3084 = vmatmul.msk.f32.vlgmr.msra.gmra.mxu0 %vm123_vm6, %v475_v48 }
 0x451   :  { %1477 = vmatpush.msra.mxu0 %v3702_v50 }
 0x453   :  { %1478 = vmatpush.msra.mxu0 %v3707_v51 }
 0x4cd   :  { %v522_v1 = vpop.f32.mrf.mxu0 }
 0x4ce   :  { %v523_v4 = vadd.f32 %v522_v1, %v500_v0 }
 0x4d0   :  { %v3874_v5 = vadd.f32 %v3677_v8, %v523_v4 }
 0x4d2   :  { %v526_v52 = vmul.f32 %v3874_v5, %v3874_v5  ;;  %vm553_vm13 = vcmp.ge.f32.partialorder %v3874_v5, 0.0 }
 0x4d4   :  { %v527_v55 = vadd.f32 1.0, %v526_v52  ;;  %v571_v56 = vmul.f32 %v526_v52, %v526_v52 }
 0x4d6   :  { %3248 = vrsqrt.f32 %v527_v55  ;;  %v572_v57 = vadd.f32 1.0, %v571_v56  ;;  %vm534_vm8 = vweird.f32 %v527_v55 }
 0x4d8   :  { %3250 = vrsqrt.f32 %v572_v57  ;;  %vm579_vm11 = vweird.f32 %v572_v57 }
 0x4dc   :  { %v3249_v61 = vpop.eup %3248 }
 0x4dd   :  { %v529_v63 = vmul.f32 %v3249_v61, %v527_v55  ;;  %vm535_vm7 = vweird.f32 %v3249_v61 }
 0x4de   :  { %v3251_v2 = vpop.eup %3250  ;;  %vm536_vm10 = vmor %vm534_vm8, %vm535_vm7 }
 0x4df   :  { %v530_v10 = vmul.f32 %v3249_v61, %v529_v63  ;;  %v574_v12 = vmul.f32 %v3251_v2, %v572_v57  ;;  %vm580_vm9 = vweird.f32 %v3251_v2 }
 0x4e0   :  { %vm581_vm12 = vmor %vm579_vm11, %vm580_vm9 }
 0x4e1   :  { %v531_v15 = vmul.f32 0.5, %v530_v10  ;;  %v575_v11 = vmul.f32 %v3251_v2, %v574_v12 }
 0x4e3   :  { %v532_v17 = vsub.f32 1.5, %v531_v15  ;;  %v576_v18 = vmul.f32 0.5, %v575_v11 }
 0x4e5   :  { %v533_v8 = vmul.f32 %v3249_v61, %v532_v17  ;;  %v577_v19 = vsub.f32 1.5, %v576_v18 }
 0x4e7   :  { %v537_v20 = vsel %vm536_vm10, %v3249_v61, %v533_v8  ;;  %v578_v22 = vmul.f32 %v3251_v2, %v577_v19 }
 0x4e8   :  { %v538_v23 = vadd.f32 1.0, %v537_v20  ;;  %v555_v24 = vsub.f32 1.0, %v537_v20 }
 0x4e9   :  { %v582_v25 = vsel %vm581_vm12, %v3251_v2, %v578_v22 }
 0x4ea   :  { %v539_v42 = vmul.f32 0.5, %v538_v23  ;;  %v556_v43 = vmul.f32 0.5, %v555_v24  ;;  %v583_v44 = vadd.f32 1.0, %v582_v25  ;;  %v598_v46 = vsub.f32 1.0, %v582_v25 }
 0x4ec   :  { %v540_v48 = vmax.f32 %v539_v42, 0.0  ;;  %v557_v0 = vmax.f32 %v556_v43, 0.0  ;;  %v584_v1 = vmul.f32 0.5, %v583_v44  ;;  %v599_v4 = vmul.f32 0.5, %v598_v46 }
 0x4ee   :  { %3252 = vrsqrt.f32 %v540_v48  ;;  %v585_v52 = vmax.f32 %v584_v1, 0.0  ;;  %v600_v55 = vmax.f32 %v599_v4, 0.0  ;;  %vm548_vm14 = vcmp.eq.f32.partialorder %v540_v48, inf }
 0x4ef   :  { %3254 = vrsqrt.f32 %v557_v0  ;;  %vm565_vm15 = vcmp.eq.f32.partialorder %v557_v0, inf  ;;  %vm567_vm2 = vcmp.eq.f32.partialorder %v557_v0, 0.0  ;;  %vm550_vm3 = vcmp.eq.f32.partialorder %v540_v48, 0.0 }
 0x4f0   :  { %3256 = vrsqrt.f32 %v585_v52  ;;  %vm593_vm4 = vcmp.eq.f32.partialorder %v585_v52, inf  ;;  %vm608_vm5 = vcmp.eq.f32.partialorder %v600_v55, inf  ;;  %vm610_vm7 = vcmp.eq.f32.partialorder %v600_v55, 0.0 }
 0x4f1   :  { %3258 = vrsqrt.f32 %v600_v55  ;;  %vm595_vm8 = vcmp.eq.f32.partialorder %v585_v52, 0.0 }
 0x4f4   :  { %v3253_v56 = vpop.eup %3252 }
 0x4f5   :  { %v3255_v57 = vpop.eup %3254  ;;  %v542_v61 = vmul.f32 %v3253_v56, %v540_v48 }
 0x4f6   :  { %v559_v63 = vmul.f32 %v3255_v57, %v557_v0  ;;  %v3257_v2 = vpop.eup %3256 }
 0x4f7   :  { %v543_v10 = vmul.f32 %v3253_v56, %v542_v61  ;;  %v3259_v15 = vpop.eup %3258  ;;  %v587_v17 = vmul.f32 %v3257_v2, %v585_v52  ;;  %v568_v61 = vand.u32 2147483648, %v557_v0 }
 0x4f8   :  { %v560_v12 = vmul.f32 %v3255_v57, %v559_v63  ;;  %v602_v8 = vmul.f32 %v3259_v15, %v600_v55 }
 0x4f9   :  { %v544_v11 = vmul.f32 0.5, %v543_v10  ;;  %v588_v20 = vmul.f32 %v3257_v2, %v587_v17  ;;  %v551_v17 = vand.u32 2147483648, %v540_v48 }
 0x4fa   :  { %v561_v18 = vmul.f32 0.5, %v560_v12  ;;  %v603_v23 = vmul.f32 %v3259_v15, %v602_v8 }
 0x4fb   :  { %v545_v19 = vsub.f32 1.5, %v544_v11  ;;  %v589_v25 = vmul.f32 0.5, %v588_v20  ;;  %v611_v20 = vand.u32 2147483648, %v600_v55 }
 0x4fc   :  { %v562_v22 = vsub.f32 1.5, %v561_v18  ;;  %v604_v43 = vmul.f32 0.5, %v603_v23 }
 0x4fd   :  { %v546_v24 = vmul.f32 %v3253_v56, %v545_v19  ;;  %v590_v46 = vsub.f32 1.5, %v589_v25  ;;  %v554_v56 = vsel %vm553_vm13, 1.0, %v3563_v7  ;;  %v596_v25 = vand.u32 2147483648, %v585_v52 }
 0x4fe   :  { %v563_v42 = vmul.f32 %v3255_v57, %v562_v22  ;;  %v605_v4 = vsub.f32 1.5, %v604_v43 }
 0x4ff   :  { %v547_v44 = vmul.f32 %v546_v24, %v540_v48  ;;  %v591_v63 = vmul.f32 %v3257_v2, %v590_v46 }
 0x500   :  { %v564_v1 = vmul.f32 %v563_v42, %v557_v0  ;;  %v606_v11 = vmul.f32 %v3259_v15, %v605_v4 }
 0x501   :  { %v549_v10 = vsel %vm548_vm14, %v540_v48, %v547_v44  ;;  %v592_v57 = vmul.f32 %v591_v63, %v585_v52 }
 0x502   :  { %v566_v12 = vsel %vm565_vm15, %v557_v0, %v564_v1  ;;  %v607_v19 = vmul.f32 %v606_v11, %v600_v55  ;;  %v552_v5 = vsel %vm550_vm3, %v551_v17, %v549_v10 }
 0x503   :  { %v569_v18 = vsel %vm567_vm2, %v568_v61, %v566_v12  ;;  %v594_v2 = vsel %vm593_vm4, %v585_v52, %v592_v57 }
 0x504   :  { %v570_v8 = vmul.f32 %v569_v18, %v554_v56  ;;  %v609_v24 = vsel %vm608_vm5, %v600_v55, %v607_v19  ;;  %v597_v44 = vsel %vm595_vm8, %v596_v25, %v594_v2 }
 0x505   :  { %v612_v0 = vsel %vm610_vm7, %v611_v20, %v609_v24 }
 0x506   :  { %v613_v22 = vsub.f32 %v552_v5, %v570_v8  ;;  %v615_v23 = vadd.f32 %v570_v8, %v552_v5  ;;  %v618_v43 = vsub.f32 0.0, %v612_v0 }
 0x508   :  { %v614_v15 = vmul.f32 0.70710677, %v613_v22  ;;  %v616_v42 = vmul.f32 0.70710677, %v615_v23 }
 0x50a   :  { %v620_v46 = vmul.f32 %v616_v42, %v597_v44  ;;  %v619_v48 = vmul.f32 %v618_v43, %v614_v15  ;;  %v617_v1 = vmul.f32 %v614_v15, %v597_v44  ;;  %v621_v4 = vmul.f32 %v616_v42, %v612_v0 }
 0x50c   :  { %630 = vperm.xlu2 %3144, %v620_v46   ;;  %637 = vperm.xlu0 %3145, %v619_v48  }
 0x50d   :  { %624 = vperm.xlu1 %3143, %v617_v1  }
 0x514   :  { %3146 = vset.pattern.permute.xlu2 %v3561_v32  ;;  %3148 = vset.pattern.permute.xlu0 %v3561_v32 }
 0x515   :  { %643 = vperm.xlu1 %3143, %v621_v4   ;;  %665 = vperm.xlu0 %3148, %v621_v4  }
 0x516   :  { %649 = vperm.xlu2 %3146, %v617_v1  }
 0x51d   :  { %3147 = vset.pattern.permute.xlu1 %v3561_v32  ;;  %3151 = vset.pattern.permute.xlu0 %v3565_v41 }
 0x51e   :  { %660 = vperm.xlu2 %3146, %v619_v48   ;;  %654 = vperm.xlu1 %3147, %v620_v46  }
 0x51f   :  { %705 = vperm.xlu0 %3151, %v617_v1  }
 0x526   :  { %3150 = vset.pattern.permute.xlu2 %v3564_v40  ;;  %3149 = vset.pattern.permute.xlu1 %v3564_v40 }
 0x527   :  { %682 = vperm.xlu2 %3150, %v620_v46   ;;  %677 = vperm.xlu1 %3149, %v617_v1  }
 0x528   :  { %3154 = vset.pattern.permute.xlu0 %v3562_v33 }
 0x52f   :  { %693 = vperm.xlu2 %3150, %v621_v4   ;;  %688 = vperm.xlu1 %3149, %v619_v48  }
 0x537   :  { %3153 = vset.pattern.permute.xlu2 %v3565_v41  ;;  %3152 = vset.pattern.permute.xlu1 %v3565_v41 }
 0x538   :  { %716 = vperm.xlu2 %3153, %v619_v48   ;;  %710 = vperm.xlu1 %3152, %v620_v46  }
 0x540   :  { %721 = vperm.xlu1 %3152, %v621_v4   ;;  %3156 = vset.pattern.permute.xlu2 %v3562_v33 }
 0x548   :  { %3155 = vset.pattern.permute.xlu1 %v3562_v33 }
 0x566   :  { %v631_v52 = vpop.permute.xlu2 %630 }
 0x567   :  { %v633_v2 = vmul.f32 %v631_v52, %v3733_v60 }
 0x570   :  { %v650_v61 = vpop.permute.xlu2 %649 }
 0x571   :  { %v652_v19 = vmul.f32 %v650_v61, %v3729_v58 }
 0x578   :  { %v661_v12 = vpop.permute.xlu2 %660 }
 0x579   :  { %v663_v24 = vmul.f32 %v661_v12, %v3729_v58 }
 0x57e   :  { %v638_v11 = vpop.permute.xlu0 %637 }
 0x57f   :  { %v625_v55 = vpop.permute.xlu1 %624  ;;  %v640_v25 = vmul.f32 %v638_v11, %v3735_v62 }
 0x580   :  { %v627_v5 = vmul.f32 %v625_v55, %v3735_v62 }
 0x581   :  { %v683_v56 = vpop.permute.xlu2 %682 }
 0x582   :  { %v634_v15 = vadd.f32 %v633_v2, %v627_v5  ;;  %v685_v61 = vmul.f32 %v683_v56, %v3747_v13 }
 0x587   :  { %v644_v63 = vpop.permute.xlu1 %643  ;;  %v666_v57 = vpop.permute.xlu0 %665 }
 0x588   :  { %v646_v20 = vmul.f32 %v644_v63, %v3733_v60  ;;  %v668_v22 = vmul.f32 %v666_v57, %v3731_v59 }
 0x589   :  { %v694_v23 = vpop.permute.xlu2 %693 }
 0x58a   :  { %v647_v42 = vadd.f32 %v646_v20, %v640_v25  ;;  %v669_v43 = vadd.f32 %v668_v22, %v663_v24  ;;  %v696_v48 = vmul.f32 %v694_v23, %v3747_v13 }
 0x58c   :  { %v671_v52 = vmul.f32 %v669_v43, %v647_v42  ;;  %v673_v63 = vmul.f32 %v669_v43, %v634_v15 }
 0x590   :  { %v655_v10 = vpop.permute.xlu1 %654 }
 0x591   :  { %v657_v8 = vmul.f32 %v655_v10, %v3731_v59  ;;  %v706_v12 = vpop.permute.xlu0 %705 }
 0x592   :  { %v717_v11 = vpop.permute.xlu2 %716 }
 0x593   :  { %v658_v0 = vadd.f32 %v657_v8, %v652_v19  ;;  %v719_v23 = vmul.f32 %v717_v11, %v3770_v36 }
 0x595   :  { %v670_v1 = vmul.f32 %v658_v0, %v634_v15  ;;  %v674_v4 = vmul.f32 %v658_v0, %v647_v42 }
 0x597   :  { %v672_v57 = vsub.f32 %v670_v1, %v671_v52  ;;  %v675_v8 = vadd.f32 %v674_v4, %v673_v63 }
 0x599   :  { %v678_v17 = vpop.permute.xlu1 %677 }
 0x59a   :  { %v680_v55 = vmul.f32 %v678_v17, %v3752_v16 }
 0x59c   :  { %v686_v19 = vadd.f32 %v685_v61, %v680_v55 }
 0x59e   :  { %v698_v17 = vmul.f32 %v686_v19, %v672_v57  ;;  %v702_v24 = vmul.f32 %v686_v19, %v675_v8 }
 0x5a1   :  { %v689_v18 = vpop.permute.xlu1 %688 }
 0x5a2   :  { %v691_v44 = vmul.f32 %v689_v18, %v3752_v16  ;;  %v708_v18 = vmul.f32 %v706_v12, %v3770_v36 }
 0x5a4   :  { %v697_v10 = vadd.f32 %v696_v48, %v691_v44 }
 0x5a6   :  { %v699_v20 = vmul.f32 %v697_v10, %v675_v8  ;;  %v701_v22 = vmul.f32 %v697_v10, %v672_v57 }
 0x5a8   :  { %v700_v0 = vsub.f32 %v698_v17, %v699_v20  ;;  %v703_v15 = vadd.f32 %v702_v24, %v701_v22 }
 0x5aa   :  { %v711_v46 = vpop.permute.xlu1 %710 }
 0x5ab   :  { %v713_v5 = vmul.f32 %v711_v46, %v3775_v38 }
 0x5ad   :  { %v714_v56 = vadd.f32 %v713_v5, %v708_v18 }
 0x5af   :  { %v726_v43 = vmul.f32 %v714_v56, %v700_v0  ;;  %v730_v44 = vmul.f32 %v714_v56, %v703_v15 }
 0x5b2   :  { %v722_v2 = vpop.permute.xlu1 %721 }
 0x5b3   :  { %v724_v25 = vmul.f32 %v722_v2, %v3775_v38 }
 0x5b5   :  { %v725_v42 = vadd.f32 %v724_v25, %v719_v23 }
 0x5b7   :  { %v727_v48 = vmul.f32 %v725_v42, %v703_v15  ;;  %v729_v1 = vmul.f32 %v725_v42, %v700_v0 }
 0x5b9   :  { %v728_v46 = vsub.f32 %v726_v43, %v727_v48  ;;  %v731_v4 = vadd.f32 %v730_v44, %v729_v1  ;;  %v843_v43 = vld [vmem:[#allocation2 + $0x10] sm:$0xff] }
 0x5bb   :  { %3085 = vmatmul.msk.f32.vlgmr.msrb.gmra.mxu1 %vm365_vm1, %v731_v4  ;;  %3086 = vmatmul.msk.f32.vlgmr.msrb.gmra.mxu2 %vm365_vm1, %v728_v46 }
 0x5bc   :  { %1136 = vmatpush.msrb.mxu2 %v3719_v53  ;;  %1113 = vmatpush.msrb.mxu1 %v3702_v50 }
 0x5be   :  { %1137 = vmatpush.msrb.mxu2 %v3724_v54  ;;  %1114 = vmatpush.msrb.mxu1 %v3707_v51 }
 0x5c3   :  { %3088 = vmatmul.msk.f32.vlgmr.msra.gmra.mxu1 %vm99_vm0, %v843_v43 }
 0x5c4   :  { %1143 = vmatpush.msra.mxu1 %v3739_v6 }
 0x5c6   :  { %1144 = vmatpush.msra.mxu1 %v3741_v9 }
 0x5c8   :  { %1145 = vmatpush.msra.mxu1 %v3749_v14 }
 0x5ca   :  { %1146 = vmatpush.msra.mxu1 %v3757_v21 }
 0x5cc   :  { %1147 = vmatpush.msra.mxu1 %v3764_v27 }
 0x5ce   :  { %1148 = vmatpush.msra.mxu1 %v3772_v37 }
 0x5d0   :  { %1149 = vmatpush.msra.mxu1 %v3778_v45 }
 0x5d2   :  { %1150 = vmatpush.msra.mxu1 %v3783_v49 }
 0x5d4   :  { %1151 = vmatpush.msra.mxu1 %v3788_v3 }
 0x5d6   :  { %1152 = vmatpush.msra.mxu1 %v3802_v28 }
 0x5d8   :  { %1153 = vmatpush.msra.mxu1 %v3804_v29 }
 0x5da   :  { %1154 = vmatpush.msra.mxu1 %v3808_v30 }
 0x5dc   :  { %1155 = vmatpush.msra.mxu1 %v3812_v31 }
 0x5de   :  { %1156 = vmatpush.msra.mxu1 %v3818_v34 }
 0x5e0   :  { %1157 = vmatpush.msra.mxu1 %v3822_v35 }
 0x5e2   :  { %1158 = vmatpush.msra.mxu1 %v3825_v39 }
 0x638   :  { %v752_v55 = vpop.f32.mrf.mxu1 }
 0x63e   :  { %v775_v61 = vpop.f32.mrf.mxu2 }
 0x63f   :  { %v776_v52 = vadd.f32 %v775_v61, %v752_v55 }
 0x641   :  { %v778_v63 = vmul.f32 %v776_v52, %v776_v52 }
 0x643   :  { %795 = vmatmul.f32.vlgmr.msra.gmra.mxu3 %v778_v63 }
 0x644   :  { %2235 = vmatpush.msra.mxu3 %v3739_v6 }
 0x646   :  { %2236 = vmatpush.msra.mxu3 %v3741_v9  ;;  %v3960_v9 = vld [vmem:[%s4494_s1 + $0x18] sm:$0xff] }
 0x648   :  { %2237 = vmatpush.msra.mxu3 %v3749_v14  ;;  %v3966_v14 = vld [vmem:[%s4494_s1 + $0x10] sm:$0xff] }
 0x64a   :  { %2238 = vmatpush.msra.mxu3 %v3757_v21  ;;  %v3972_v21 = vld [vmem:[%s4494_s1 + $0x8] sm:$0xff] }
 0x64c   :  { %2239 = vmatpush.msra.mxu3 %v3764_v27  ;;  %v3978_v27 = vld [vmem:[%s4494_s1] sm:$0xff] }
 0x64e   :  { %2240 = vmatpush.msra.mxu3 %v3772_v37  ;;  %v864_v37 = vpop.f32.mrf.mxu1 }
 0x650   :  { %2241 = vmatpush.msra.mxu3 %v3778_v45 }
 0x652   :  { %2242 = vmatpush.msra.mxu3 %v3783_v49 }
 0x654   :  { %2243 = vmatpush.msra.mxu3 %v3788_v3  ;;  %v3984_v3 = vld [vmem:[%s4496_s3] ss:$0 sm:$0xff] }
 0x656   :  { %2244 = vmatpush.msra.mxu3 %v3802_v28 }
 0x658   :  { %2245 = vmatpush.msra.mxu3 %v3804_v29 }
 0x65a   :  { %2246 = vmatpush.msra.mxu3 %v3808_v30 }
 0x65c   :  { %2247 = vmatpush.msra.mxu3 %v3812_v31 }
 0x65e   :  { %2248 = vmatpush.msra.mxu3 %v3818_v34 }
 0x660   :  { %2249 = vmatpush.msra.mxu3 %v3822_v35 }
 0x662   :  { %2250 = vmatpush.msra.mxu3 %v3825_v39 }
 0x6c6   :  { %v796_v50 = vpop.f32.mrf.mxu3 }
 0x6c7   :  { %v797_v51 = vadd.f32 %v3854_v47, %v796_v50 }
 0x6c9   :  { %3260 = vtanh.f32 %v797_v51  ;;  %v3087_v54 = vmul.f32 -1.442695, %v797_v51 }
 0x6cb   :  { %3262 = vpow2.f32 %v3087_v54 }
 0x6cf   :  { %v3261_v53 = vpop.eup %3260 }
 0x6d0   :  { %821 = vrot.lane.b32.xlu2 %v3261_v53, %s3566_s12 }
 0x6d1   :  { %v3263_v10 = vpop.eup %3262 }
 0x6d2   :  { %v802_v12 = vadd.f32 1.0, %v3263_v10 }
 0x6d4   :  { %3264 = vrcp.f32 %v802_v12  ;;  %v814_v18 = vand.u32 2147483648, %v802_v12  ;;  %vm808_vm10 = vweird.f32 %v802_v12  ;;  %v812_v20 = vand.u32 2147483647, %v802_v12 }
 0x6d6   :  { %v815_v22 = vor.u32 1.1754944e-38, %v814_v18  ;;  %vm813_vm12 = vcmp.eq.f32.partialorder %v812_v20, 8.507059e+37 }
 0x6da   :  { %v3265_v11 = vpop.eup %3264 }
 0x6db   :  { %v804_v57 = vmul.f32 %v3265_v11, %v802_v12  ;;  %vm809_vm9 = vweird.f32 %v3265_v11 }
 0x6dc   :  { %vm810_vm11 = vmor %vm808_vm10, %vm809_vm9 }
 0x6dd   :  { %v805_v8 = vsub.f32 1.0, %v804_v57 }
 0x6df   :  { %v806_v19 = vmul.f32 %v3265_v11, %v805_v8 }
 0x6e1   :  { %v807_v5 = vadd.f32 %v3265_v11, %v806_v19 }
 0x6e3   :  { %v811_v47 = vsel %vm810_vm11, %v3265_v11, %v807_v5 }
 0x6e4   :  { %v816_v2 = vsel %vm813_vm12, %v815_v22, %v811_v47 }
 0x6e5   :  { %v819_v24 = vmul.f32 %v816_v2, %v3859_v26 }
 0x72a   :  { %v822_v23 = vpop.permute.xlu2 %821 }
 0x72b   :  { %v824_v17 = vmul.f32 %v822_v23, %v816_v2 }
 0x72d   :  { %826 = vrot.lane.b32.xlu0 %v824_v17, %s3566_s12 }
 0x79f   :  { %v827_v56 = vpop.permute.xlu0 %826 }
 0x7a0   :  { %v3933_v25 = vadd.f32 %v827_v56, %v819_v24 }
 0x7a2   :  { %3266 = vtanh.f32 %v3933_v25 }
 0x7a8   :  { %v3267_v0 = vpop.eup %3266 }
 0x7a9   :  { %832 = vrot.lane.b32.xlu1 %v3267_v0, %s3566_s12 }
 0x81b   :  { %v833_v15 = vpop.permute.xlu1 %832 }
 0x81c   :  { %v835_v42 = vmul.f32 %v833_v15, %v816_v2 }
 0x81e   :  { %837 = vrot.lane.b32.xlu2 %v835_v42, %s3567_s13 }
 0x878   :  { %v838_v6 = vpop.permute.xlu2 %837 }
 0x879   :  { %841 = vst.msk [vmem:[#allocation7 + $0x8] sm:$0xff] %vm123_vm6, %v838_v6  ;;  %3089 = vmatmul.msk.f32.vlgmr.msra.gmra.mxu2 %vm123_vm6, %v838_v6 }
 0x87a   :  { %1245 = vmatpush.msra.mxu2 %v3960_v9 }
 0x87c   :  { %1246 = vmatpush.msra.mxu2 %v3966_v14 }
 0x87e   :  { %1247 = vmatpush.msra.mxu2 %v3972_v21 }
 0x880   :  { %1248 = vmatpush.msra.mxu2 %v3978_v27 }
 0x8fc   :  { %v886_v45 = vpop.f32.mrf.mxu2 }
 0x8fd   :  { %v887_v49 = vadd.f32 %v886_v45, %v864_v37 }
 0x8ff   :  { %v3987_v28 = vadd.f32 %v3984_v3, %v887_v49 }
 0x901   :  { %v890_v29 = vmul.f32 %v3987_v28, %v3987_v28  ;;  %vm917_vm5 = vcmp.ge.f32.partialorder %v3987_v28, 0.0 }
 0x903   :  { %v891_v30 = vadd.f32 1.0, %v890_v29  ;;  %v935_v31 = vmul.f32 %v890_v29, %v890_v29 }
 0x905   :  { %3268 = vrsqrt.f32 %v891_v30  ;;  %v936_v34 = vadd.f32 1.0, %v935_v31  ;;  %vm898_vm14 = vweird.f32 %v891_v30 }
 0x907   :  { %3270 = vrsqrt.f32 %v936_v34  ;;  %vm943_vm3 = vweird.f32 %v936_v34 }
 0x90b   :  { %v3269_v35 = vpop.eup %3268 }
 0x90c   :  { %v893_v39 = vmul.f32 %v3269_v35, %v891_v30  ;;  %vm899_vm13 = vweird.f32 %v3269_v35 }
 0x90d   :  { %v3271_v26 = vpop.eup %3270  ;;  %vm900_vm2 = vmor %vm898_vm14, %vm899_vm13 }
 0x90e   :  { %v894_v44 = vmul.f32 %v3269_v35, %v893_v39  ;;  %v938_v48 = vmul.f32 %v3271_v26, %v936_v34  ;;  %vm944_vm15 = vweird.f32 %v3271_v26 }
 0x90f   :  { %vm945_vm4 = vmor %vm943_vm3, %vm944_vm15 }
 0x910   :  { %v895_v1 = vmul.f32 0.5, %v894_v44  ;;  %v939_v46 = vmul.f32 %v3271_v26, %v938_v48 }
 0x912   :  { %v896_v4 = vsub.f32 1.5, %v895_v1  ;;  %v940_v55 = vmul.f32 0.5, %v939_v46 }
 0x914   :  { %v897_v61 = vmul.f32 %v3269_v35, %v896_v4  ;;  %v941_v52 = vsub.f32 1.5, %v940_v55 }
 0x916   :  { %v901_v63 = vsel %vm900_vm2, %v3269_v35, %v897_v61  ;;  %v942_v50 = vmul.f32 %v3271_v26, %v941_v52 }
 0x917   :  { %v902_v51 = vadd.f32 1.0, %v901_v63  ;;  %v919_v53 = vsub.f32 1.0, %v901_v63 }
 0x918   :  { %v946_v54 = vsel %vm945_vm4, %v3271_v26, %v942_v50  ;;  %v918_v50 = vsel %vm917_vm5, 1.0, %v3563_v7 }
 0x919   :  { %v903_v10 = vmul.f32 0.5, %v902_v51  ;;  %v920_v12 = vmul.f32 0.5, %v919_v53  ;;  %v947_v11 = vadd.f32 1.0, %v946_v54  ;;  %v962_v57 = vsub.f32 1.0, %v946_v54 }
 0x91b   :  { %v904_v8 = vmax.f32 %v903_v10, 0.0  ;;  %v921_v19 = vmax.f32 %v920_v12, 0.0  ;;  %v948_v5 = vmul.f32 0.5, %v947_v11  ;;  %v963_v18 = vmul.f32 0.5, %v962_v57 }
 0x91d   :  { %3272 = vrsqrt.f32 %v904_v8  ;;  %v949_v20 = vmax.f32 %v948_v5, 0.0  ;;  %v964_v47 = vmax.f32 %v963_v18, 0.0  ;;  %vm912_vm7 = vcmp.eq.f32.partialorder %v904_v8, inf }
 0x91e   :  { %3274 = vrsqrt.f32 %v921_v19  ;;  %vm929_vm8 = vcmp.eq.f32.partialorder %v921_v19, inf  ;;  %v932_v46 = vand.u32 2147483648, %v921_v19  ;;  %vm931_vm9 = vcmp.eq.f32.partialorder %v921_v19, 0.0 }
 0x91f   :  { %3276 = vrsqrt.f32 %v949_v20  ;;  %v915_v63 = vand.u32 2147483648, %v904_v8  ;;  %vm914_vm10 = vcmp.eq.f32.partialorder %v904_v8, 0.0  ;;  %vm957_vm11 = vcmp.eq.f32.partialorder %v949_v20, inf }
 0x920   :  { %3278 = vrsqrt.f32 %v964_v47  ;;  %vm972_vm12 = vcmp.eq.f32.partialorder %v964_v47, inf  ;;  %vm974_vm13 = vcmp.eq.f32.partialorder %v964_v47, 0.0  ;;  %v975_v12 = vand.u32 2147483648, %v964_v47 }
 0x921   :  { %vm959_vm14 = vcmp.eq.f32.partialorder %v949_v20, 0.0 }
 0x923   :  { %v3273_v22 = vpop.eup %3272 }
 0x924   :  { %v3275_v23 = vpop.eup %3274  ;;  %v906_v2 = vmul.f32 %v3273_v22, %v904_v8 }
 0x925   :  { %v923_v17 = vmul.f32 %v3275_v23, %v921_v19  ;;  %v3277_v56 = vpop.eup %3276 }
 0x926   :  { %v907_v24 = vmul.f32 %v3273_v22, %v906_v2  ;;  %v3279_v15 = vpop.eup %3278  ;;  %v951_v43 = vmul.f32 %v3277_v56, %v949_v20 }
 0x927   :  { %v924_v0 = vmul.f32 %v3275_v23, %v923_v17  ;;  %v966_v37 = vmul.f32 %v3279_v15, %v964_v47 }
 0x928   :  { %v908_v42 = vmul.f32 0.5, %v907_v24  ;;  %v952_v49 = vmul.f32 %v3277_v56, %v951_v43 }
 0x929   :  { %v925_v6 = vmul.f32 0.5, %v924_v0  ;;  %v967_v30 = vmul.f32 %v3279_v15, %v966_v37 }
 0x92a   :  { %v909_v45 = vsub.f32 1.5, %v908_v42  ;;  %v953_v34 = vmul.f32 0.5, %v952_v49 }
 0x92b   :  { %v926_v29 = vsub.f32 1.5, %v925_v6  ;;  %v968_v39 = vmul.f32 0.5, %v967_v30 }
 0x92c   :  { %v910_v31 = vmul.f32 %v3273_v22, %v909_v45  ;;  %v954_v44 = vsub.f32 1.5, %v953_v34  ;;  %v960_v22 = vand.u32 2147483648, %v949_v20 }
 0x92d   :  { %v927_v35 = vmul.f32 %v3275_v23, %v926_v29  ;;  %v969_v1 = vsub.f32 1.5, %v968_v39 }
 0x92e   :  { %v911_v26 = vmul.f32 %v910_v31, %v904_v8  ;;  %v955_v4 = vmul.f32 %v3277_v56, %v954_v44 }
 0x92f   :  { %v928_v48 = vmul.f32 %v927_v35, %v921_v19  ;;  %v970_v52 = vmul.f32 %v3279_v15, %v969_v1 }
 0x930   :  { %v913_v55 = vsel %vm912_vm7, %v904_v8, %v911_v26  ;;  %v956_v53 = vmul.f32 %v955_v4, %v949_v20 }
 0x931   :  { %v930_v61 = vsel %vm929_vm8, %v921_v19, %v928_v48  ;;  %v971_v10 = vmul.f32 %v970_v52, %v964_v47  ;;  %v916_v28 = vsel %vm914_vm10, %v915_v63, %v913_v55 }
 0x932   :  { %v933_v51 = vsel %vm931_vm9, %v932_v46, %v930_v61  ;;  %v958_v5 = vsel %vm957_vm11, %v949_v20, %v956_v53 }
 0x933   :  { %v934_v54 = vmul.f32 %v933_v51, %v918_v50  ;;  %v973_v18 = vsel %vm972_vm12, %v964_v47, %v971_v10  ;;  %v961_v24 = vsel %vm959_vm14, %v960_v22, %v958_v5 }
 0x934   :  { %v976_v19 = vsel %vm974_vm13, %v975_v12, %v973_v18 }
 0x935   :  { %v977_v11 = vsub.f32 %v916_v28, %v934_v54  ;;  %v979_v57 = vadd.f32 %v934_v54, %v916_v28  ;;  %v982_v17 = vsub.f32 0.0, %v976_v19 }
 0x937   :  { %v978_v23 = vmul.f32 0.70710677, %v977_v11  ;;  %v980_v2 = vmul.f32 0.70710677, %v979_v57 }
 0x939   :  { %v984_v56 = vmul.f32 %v980_v2, %v961_v24  ;;  %v983_v8 = vmul.f32 %v982_v17, %v978_v23  ;;  %v981_v0 = vmul.f32 %v978_v23, %v961_v24  ;;  %v985_v15 = vmul.f32 %v980_v2, %v976_v19 }
 0x93b   :  { %994 = vperm.xlu1 %3155, %v984_v56   ;;  %1001 = vperm.xlu2 %3156, %v983_v8  }
 0x93c   :  { %988 = vperm.xlu0 %3154, %v981_v0  }
 0x943   :  { %1007 = vperm.xlu1 %3155, %v985_v15   ;;  %3157 = vset.pattern.permute.xlu2 %v3561_v32 }
 0x944   :  { %3158 = vset.pattern.permute.xlu0 %v3561_v32  ;;  %1013 = vperm.xlu2 %3157, %v981_v0  }
 0x945   :  { %1018 = vperm.xlu0 %3158, %v984_v56  }
 0x94b   :  { %3159 = vset.pattern.permute.xlu1 %v3561_v32 }
 0x94c   :  { %1024 = vperm.xlu1 %3159, %v983_v8   ;;  %1029 = vperm.xlu2 %3157, %v985_v15  }
 0x94d   :  { %3162 = vset.pattern.permute.xlu0 %v3564_v40 }
 0x94e   :  { %1052 = vperm.xlu0 %3162, %v983_v8  }
 0x954   :  { %3160 = vset.pattern.permute.xlu1 %v3564_v40  ;;  %3161 = vset.pattern.permute.xlu2 %v3564_v40 }
 0x955   :  { %1041 = vperm.xlu1 %3160, %v981_v0   ;;  %1046 = vperm.xlu2 %3161, %v984_v56  }
 0x956   :  { %3165 = vset.pattern.permute.xlu0 %v3565_v41 }
 0x957   :  { %1085 = vperm.xlu0 %3165, %v985_v15  }
 0x95d   :  { %1057 = vperm.xlu1 %3160, %v985_v15   ;;  %3163 = vset.pattern.permute.xlu2 %v3565_v41 }
 0x95e   :  { %1069 = vperm.xlu2 %3163, %v981_v0  }
 0x95f   :  { %3166 = vset.pattern.permute.xlu0 %v3562_v33 }
 0x965   :  { %3164 = vset.pattern.permute.xlu1 %v3565_v41 }
 0x966   :  { %1074 = vperm.xlu1 %3164, %v984_v56   ;;  %1080 = vperm.xlu2 %3163, %v983_v8  }
 0x96e   :  { %3167 = vset.pattern.permute.xlu1 %v3562_v33  ;;  %3168 = vset.pattern.permute.xlu2 %v3562_v33 }
 0x995   :  { %v1002_v20 = vpop.permute.xlu2 %1001 }
 0x996   :  { %v1004_v1 = vmul.f32 %v1002_v20, %v3735_v62 }
 0x99e   :  { %v1014_v42 = vpop.permute.xlu2 %1013 }
 0x99f   :  { %v1016_v46 = vmul.f32 %v1014_v42, %v3729_v58 }
 0x9a6   :  { %v1030_v37 = vpop.permute.xlu2 %1029 }
 0x9a7   :  { %v1032_v34 = vmul.f32 %v1030_v37, %v3731_v59 }
 0x9ad   :  { %v995_v47 = vpop.permute.xlu1 %994 }
 0x9ae   :  { %v989_v6 = vpop.permute.xlu0 %988  ;;  %v997_v35 = vmul.f32 %v995_v47, %v3733_v60 }
 0x9af   :  { %v1047_v29 = vpop.permute.xlu2 %1046  ;;  %v991_v39 = vmul.f32 %v989_v6, %v3735_v62 }
 0x9b0   :  { %v1049_v12 = vmul.f32 %v1047_v29, %v3747_v13 }
 0x9b1   :  { %v998_v61 = vadd.f32 %v997_v35, %v991_v39  ;;  %v4026_v39 = vld [vmem:[%s4497_s4 + $0x8] sm:$0xff] }
 0x9b5   :  { %v1008_v43 = vpop.permute.xlu1 %1007 }
 0x9b6   :  { %v1010_v26 = vmul.f32 %v1008_v43, %v3733_v60 }
 0x9b7   :  { %v1019_v49 = vpop.permute.xlu0 %1018 }
 0x9b8   :  { %v1021_v44 = vmul.f32 %v1019_v49, %v3731_v59  ;;  %v1070_v55 = vpop.permute.xlu2 %1069  ;;  %v1011_v52 = vadd.f32 %v1010_v26, %v1004_v1  ;;  %v4029_v26 = vld [vmem:[#allocation5 + $0x78] sm:$0xff]  ;;  %v4041_v1 = vld [vmem:[#allocation5 + $0x68] sm:$0xff] }
 0x9b9   :  { %v1072_v15 = vmul.f32 %v1070_v55, %v3770_v36  ;;  %v4050_v55 = vld [vmem:[#allocation5 + $0x50] sm:$0xff] }
 0x9ba   :  { %v1022_v63 = vadd.f32 %v1021_v44, %v1016_v46  ;;  %v4035_v44 = vld [vmem:[%s4497_s4] sm:$0xff] }
 0x9bb   :  { %v4044_v46 = vld [vmem:[#allocation5 + $0x60] sm:$0xff] }
 0x9bc   :  { %v1034_v11 = vmul.f32 %v1022_v63, %v998_v61  ;;  %v1038_v57 = vmul.f32 %v1022_v63, %v1011_v52  ;;  %v4059_v63 = vld [vmem:[#allocation5 + $0x38] sm:$0xff] }
 0x9be   :  { %v1025_v45 = vpop.permute.xlu1 %1024 }
 0x9bf   :  { %v1027_v30 = vmul.f32 %v1025_v45, %v3729_v58 }
 0x9c0   :  { %v1053_v48 = vpop.permute.xlu0 %1052  ;;  %v1081_v24 = vpop.permute.xlu2 %1080 }
 0x9c1   :  { %v1033_v4 = vadd.f32 %v1032_v34, %v1027_v30  ;;  %v1055_v10 = vmul.f32 %v1053_v48, %v3752_v16  ;;  %v1083_v47 = vmul.f32 %v1081_v24, %v3770_v36  ;;  %v4038_v48 = vld [vmem:[#allocation5 + $0x70] sm:$0xff] }
 0x9c3   :  { %v1035_v50 = vmul.f32 %v1033_v4, %v1011_v52  ;;  %v1037_v51 = vmul.f32 %v1033_v4, %v998_v61  ;;  %v4047_v4 = vld [vmem:[#allocation5 + $0x58] sm:$0xff]  ;;  %v4053_v61 = vld [vmem:[#allocation5 + $0x48] sm:$0xff]  ;;  %v4056_v52 = vld [vmem:[#allocation5 + $0x40] sm:$0xff] }
 0x9c5   :  { %v1036_v18 = vsub.f32 %v1034_v11, %v1035_v50  ;;  %v1039_v22 = vadd.f32 %v1038_v57, %v1037_v51  ;;  %v4062_v50 = vld [vmem:[#allocation5 + $0x30] sm:$0xff]  ;;  %v4065_v51 = vld [vmem:[#allocation5 + $0x28] sm:$0xff] }
 0x9c7   :  { %v1042_v31 = vpop.permute.xlu1 %1041 }
 0x9c8   :  { %v1044_v53 = vmul.f32 %v1042_v31, %v3752_v16 }
 0x9c9   :  { %v1086_v23 = vpop.permute.xlu0 %1085 }
 0x9ca   :  { %v1050_v19 = vadd.f32 %v1049_v12, %v1044_v53  ;;  %v1088_v0 = vmul.f32 %v1086_v23, %v3775_v38  ;;  %v4068_v53 = vld [vmem:[#allocation5 + $0x20] sm:$0xff] }
 0x9cb   :  { %v4080_v12 = vld [vmem:[#allocation5] sm:$0xff] }
 0x9cc   :  { %v1062_v56 = vmul.f32 %v1050_v19, %v1036_v18  ;;  %v1066_v8 = vmul.f32 %v1050_v19, %v1039_v22  ;;  %v1089_v37 = vadd.f32 %v1088_v0, %v1083_v47  ;;  %v4102_v19 = vld [vmem:[%s4500_s7] ss:$0 sm:$0xff] }
 0x9cf   :  { %v1058_v54 = vpop.permute.xlu1 %1057 }
 0x9d0   :  { %v1060_v28 = vmul.f32 %v1058_v54, %v3747_v13  ;;  %v4071_v54 = vld [vmem:[#allocation5 + $0x18] sm:$0xff] }
 0x9d2   :  { %v1061_v5 = vadd.f32 %v1060_v28, %v1055_v10  ;;  %v4074_v10 = vld [vmem:[#allocation5 + $0x10] sm:$0xff]  ;;  %v4077_v28 = vld [vmem:[#allocation5 + $0x8] sm:$0xff] }
 0x9d4   :  { %v1063_v2 = vmul.f32 %v1061_v5, %v1039_v22  ;;  %v1065_v17 = vmul.f32 %v1061_v5, %v1036_v18 }
 0x9d6   :  { %v1064_v42 = vsub.f32 %v1062_v56, %v1063_v2  ;;  %v1067_v43 = vadd.f32 %v1066_v8, %v1065_v17 }
 0x9d8   :  { %v1075_v20 = vpop.permute.xlu1 %1074  ;;  %v1091_v29 = vmul.f32 %v1089_v37, %v1067_v43  ;;  %v1093_v30 = vmul.f32 %v1089_v37, %v1064_v42 }
 0x9d9   :  { %v1077_v6 = vmul.f32 %v1075_v20, %v3775_v38 }
 0x9db   :  { %v1078_v45 = vadd.f32 %v1077_v6, %v1072_v15 }
 0x9dd   :  { %v1090_v49 = vmul.f32 %v1078_v45, %v1064_v42  ;;  %v1094_v31 = vmul.f32 %v1078_v45, %v1067_v43 }
 0x9df   :  { %v1092_v34 = vsub.f32 %v1090_v49, %v1091_v29  ;;  %v1095_v35 = vadd.f32 %v1094_v31, %v1093_v30 }
 0x9e1   :  { %3090 = vmatmul.msk.f32.vlgmr.msrb.gmra.mxu1 %vm365_vm1, %v1095_v35  ;;  %3091 = vmatmul.msk.f32.vlgmr.msrb.gmra.mxu2 %vm365_vm1, %v1092_v34 }
 0x9e2   :  { %1500 = vmatpush.msrb.mxu2 %v4026_v39  ;;  %1871 = vmatpush.msrb.mxu1 %v4029_v26 }
 0x9e4   :  { %1501 = vmatpush.msrb.mxu2 %v4035_v44  ;;  %1872 = vmatpush.msrb.mxu1 %v4038_v48 }
 0x9e6   :  { %1873 = vmatpush.msrb.mxu1 %v4041_v1 }
 0x9e8   :  { %1874 = vmatpush.msrb.mxu1 %v4044_v46 }
 0x9ea   :  { %1875 = vmatpush.msrb.mxu1 %v4047_v4 }
 0x9ec   :  { %1876 = vmatpush.msrb.mxu1 %v4050_v55 }
 0x9ee   :  { %1877 = vmatpush.msrb.mxu1 %v4053_v61 }
 0x9f0   :  { %1878 = vmatpush.msrb.mxu1 %v4056_v52 }
 0x9f2   :  { %1879 = vmatpush.msrb.mxu1 %v4059_v63 }
 0x9f4   :  { %1880 = vmatpush.msrb.mxu1 %v4062_v50 }
 0x9f6   :  { %1881 = vmatpush.msrb.mxu1 %v4065_v51 }
 0x9f8   :  { %1882 = vmatpush.msrb.mxu1 %v4068_v53 }
 0x9fa   :  { %1883 = vmatpush.msrb.mxu1 %v4071_v54 }
 0x9fc   :  { %1884 = vmatpush.msrb.mxu1 %v4074_v10 }
 0x9fe   :  { %1885 = vmatpush.msrb.mxu1 %v4077_v28 }
 0xa00   :  { %1886 = vmatpush.msrb.mxu1 %v4080_v12 }
 0xa5e   :  { %v1116_v11 = vpop.f32.mrf.mxu1 }
 0xa64   :  { %v1139_v57 = vpop.f32.mrf.mxu2 }
 0xa65   :  { %v1140_v5 = vadd.f32 %v1139_v57, %v1116_v11 }
 0xa67   :  { %v1142_v18 = vmul.f32 %v1140_v5, %v1140_v5  ;;  %v1207_v5 = vld [vmem:[#allocation2 + $0x18] sm:$0xff] }
 0xa68   :  { %3093 = vmatmul.msk.f32.vlgmr.msrb.gmra.mxu0 %vm99_vm0, %v1207_v5 }
 0xa69   :  { %1159 = vmatmul.f32.vlgmr.msra.gmra.mxu1 %v1142_v18  ;;  %v4117_v18 = vld [vmem:[%s4495_s2] sm:$0xff] }
 0xa6a   :  { %2599 = vmatpush.msra.mxu1 %v4029_v26  ;;  %1590 = vmatpush.msrb.mxu0 %v4117_v18 }
 0xa6c   :  { %2600 = vmatpush.msra.mxu1 %v4038_v48 }
 0xa6e   :  { %2601 = vmatpush.msra.mxu1 %v4041_v1 }
 0xa70   :  { %2602 = vmatpush.msra.mxu1 %v4044_v46 }
 0xa72   :  { %2603 = vmatpush.msra.mxu1 %v4047_v4 }
 0xa74   :  { %2604 = vmatpush.msra.mxu1 %v4050_v55 }
 0xa76   :  { %2605 = vmatpush.msra.mxu1 %v4053_v61 }
 0xa78   :  { %2606 = vmatpush.msra.mxu1 %v4056_v52 }
 0xa7a   :  { %2607 = vmatpush.msra.mxu1 %v4059_v63 }
 0xa7c   :  { %2608 = vmatpush.msra.mxu1 %v4062_v50 }
 0xa7e   :  { %2609 = vmatpush.msra.mxu1 %v4065_v51 }
 0xa80   :  { %2610 = vmatpush.msra.mxu1 %v4068_v53 }
 0xa82   :  { %2611 = vmatpush.msra.mxu1 %v4071_v54 }
 0xa84   :  { %2612 = vmatpush.msra.mxu1 %v4074_v10 }
 0xa86   :  { %2613 = vmatpush.msra.mxu1 %v4077_v28 }
 0xa88   :  { %2614 = vmatpush.msra.mxu1 %v4080_v12 }
 0xae6   :  { %v1160_v22 = vpop.f32.mrf.mxu1 }
 0xae7   :  { %v1161_v23 = vadd.f32 %v4102_v19, %v1160_v22  ;;  %v1228_v22 = vpop.f32.mrf.mxu0 }
 0xae9   :  { %3280 = vtanh.f32 %v1161_v23  ;;  %v3092_v17 = vmul.f32 -1.442695, %v1161_v23 }
 0xaeb   :  { %3282 = vpow2.f32 %v3092_v17 }
 0xaef   :  { %v3281_v2 = vpop.eup %3280 }
 0xaf0   :  { %1185 = vrot.lane.b32.xlu1 %v3281_v2, %s3566_s12 }
 0xaf1   :  { %v3283_v24 = vpop.eup %3282 }
 0xaf2   :  { %v1166_v56 = vadd.f32 1.0, %v3283_v24 }
 0xaf4   :  { %3284 = vrcp.f32 %v1166_v56  ;;  %v1178_v42 = vand.u32 2147483648, %v1166_v56  ;;  %vm1172_vm2 = vweird.f32 %v1166_v56  ;;  %v1176_v43 = vand.u32 2147483647, %v1166_v56 }
 0xaf6   :  { %v1179_v37 = vor.u32 1.1754944e-38, %v1178_v42  ;;  %vm1177_vm4 = vcmp.eq.f32.partialorder %v1176_v43, 8.507059e+37 }
 0xafa   :  { %v3285_v8 = vpop.eup %3284 }
 0xafb   :  { %v1168_v0 = vmul.f32 %v3285_v8, %v1166_v56  ;;  %vm1173_vm15 = vweird.f32 %v3285_v8 }
 0xafc   :  { %vm1174_vm3 = vmor %vm1172_vm2, %vm1173_vm15 }
 0xafd   :  { %v1169_v15 = vsub.f32 1.0, %v1168_v0 }
 0xaff   :  { %v1170_v20 = vmul.f32 %v3285_v8, %v1169_v15 }
 0xb01   :  { %v1171_v47 = vadd.f32 %v3285_v8, %v1170_v20 }
 0xb03   :  { %v1175_v6 = vsel %vm1174_vm3, %v3285_v8, %v1171_v47 }
 0xb04   :  { %v1180_v49 = vsel %vm1177_vm4, %v1179_v37, %v1175_v6 }
 0xb05   :  { %v1183_v30 = vmul.f32 %v1180_v49, %v3933_v25 }
 0xb62   :  { %v1186_v45 = vpop.permute.xlu1 %1185 }
 0xb63   :  { %v1188_v29 = vmul.f32 %v1186_v45, %v1180_v49 }
 0xb65   :  { %1190 = vrot.lane.b32.xlu2 %v1188_v29, %s3566_s12 }
 0xbbf   :  { %v1191_v31 = vpop.permute.xlu2 %1190 }
 0xbc0   :  { %v4108_v34 = vadd.f32 %v1191_v31, %v1183_v30 }
 0xbc2   :  { %3286 = vtanh.f32 %v4108_v34 }
 0xbc8   :  { %v3287_v35 = vpop.eup %3286 }
 0xbc9   :  { %1196 = vrot.lane.b32.xlu1 %v3287_v35, %s3566_s12 }
 0xc3b   :  { %v1197_v11 = vpop.permute.xlu1 %1196 }
 0xc3c   :  { %v1199_v57 = vmul.f32 %v1197_v11, %v1180_v49 }
 0xc3e   :  { %1201 = vrot.lane.b32.xlu2 %v1199_v57, %s3567_s13 }
 0xc98   :  { %v1202_v25 = vpop.permute.xlu2 %1201 }
 0xc99   :  { %1205 = vst.msk [vmem:[#allocation7 + $0x10] sm:$0xff] %vm123_vm6, %v1202_v25  ;;  %3094 = vmatmul.msk.f32.vlgmr.msra.gmra.mxu2 %vm123_vm6, %v1202_v25 }
 0xc9a   :  { %1609 = vmatpush.msra.mxu2 %v3960_v9 }
 0xc9c   :  { %1610 = vmatpush.msra.mxu2 %v3966_v14 }
 0xc9e   :  { %1611 = vmatpush.msra.mxu2 %v3972_v21 }
 0xca0   :  { %1612 = vmatpush.msra.mxu2 %v3978_v27 }
 0xd1c   :  { %v1250_v23 = vpop.f32.mrf.mxu2 }
 0xd1d   :  { %v1251_v2 = vadd.f32 %v1250_v23, %v1228_v22 }
 0xd1f   :  { %v4127_v17 = vadd.f32 %v3984_v3, %v1251_v2 }
 0xd21   :  { %v1254_v24 = vmul.f32 %v4127_v17, %v4127_v17  ;;  %vm1281_vm12 = vcmp.ge.f32.partialorder %v4127_v17, 0.0 }
 0xd23   :  { %v1255_v56 = vadd.f32 1.0, %v1254_v24  ;;  %v1299_v8 = vmul.f32 %v1254_v24, %v1254_v24 }
 0xd25   :  { %3288 = vrsqrt.f32 %v1255_v56  ;;  %v1300_v0 = vadd.f32 1.0, %v1299_v8  ;;  %vm1262_vm7 = vweird.f32 %v1255_v56 }
 0xd27   :  { %3290 = vrsqrt.f32 %v1300_v0  ;;  %vm1307_vm10 = vweird.f32 %v1300_v0 }
 0xd2b   :  { %v3289_v9 = vpop.eup %3288 }
 0xd2c   :  { %v1257_v14 = vmul.f32 %v3289_v9, %v1255_v56  ;;  %vm1263_vm5 = vweird.f32 %v3289_v9 }
 0xd2d   :  { %v3291_v15 = vpop.eup %3290  ;;  %vm1264_vm9 = vmor %vm1262_vm7, %vm1263_vm5 }
 0xd2e   :  { %v1258_v21 = vmul.f32 %v3289_v9, %v1257_v14  ;;  %v1302_v20 = vmul.f32 %v3291_v15, %v1300_v0  ;;  %vm1308_vm8 = vweird.f32 %v3291_v15 }
 0xd2f   :  { %vm1309_vm11 = vmor %vm1307_vm10, %vm1308_vm8 }
 0xd30   :  { %v1259_v27 = vmul.f32 0.5, %v1258_v21  ;;  %v1303_v47 = vmul.f32 %v3291_v15, %v1302_v20 }
 0xd32   :  { %v1260_v42 = vsub.f32 1.5, %v1259_v27  ;;  %v1304_v43 = vmul.f32 0.5, %v1303_v47 }
 0xd34   :  { %v1261_v3 = vmul.f32 %v3289_v9, %v1260_v42  ;;  %v1305_v6 = vsub.f32 1.5, %v1304_v43 }
 0xd36   :  { %v1265_v37 = vsel %vm1264_vm9, %v3289_v9, %v1261_v3  ;;  %v1306_v45 = vmul.f32 %v3291_v15, %v1305_v6 }
 0xd37   :  { %v1266_v49 = vadd.f32 1.0, %v1265_v37  ;;  %v1283_v29 = vsub.f32 1.0, %v1265_v37 }
 0xd38   :  { %v1310_v30 = vsel %vm1309_vm11, %v3291_v15, %v1306_v45 }
 0xd39   :  { %v1267_v31 = vmul.f32 0.5, %v1266_v49  ;;  %v1284_v35 = vmul.f32 0.5, %v1283_v29  ;;  %v1311_v11 = vadd.f32 1.0, %v1310_v30  ;;  %v1326_v57 = vsub.f32 1.0, %v1310_v30 }
 0xd3b   :  { %v1268_v5 = vmax.f32 %v1267_v31, 0.0  ;;  %v1285_v25 = vmax.f32 %v1284_v35, 0.0  ;;  %v1312_v22 = vmul.f32 0.5, %v1311_v11  ;;  %v1327_v23 = vmul.f32 0.5, %v1326_v57 }
 0xd3d   :  { %3292 = vrsqrt.f32 %v1268_v5  ;;  %v1313_v2 = vmax.f32 %v1312_v22, 0.0  ;;  %v1328_v24 = vmax.f32 %v1327_v23, 0.0  ;;  %vm1276_vm13 = vcmp.eq.f32.partialorder %v1268_v5, inf }
 0xd3e   :  { %3294 = vrsqrt.f32 %v1285_v25  ;;  %vm1293_vm14 = vcmp.eq.f32.partialorder %v1285_v25, inf  ;;  %v1296_v23 = vand.u32 2147483648, %v1285_v25  ;;  %vm1295_vm15 = vcmp.eq.f32.partialorder %v1285_v25, 0.0 }
 0xd3f   :  { %3296 = vrsqrt.f32 %v1313_v2  ;;  %vm1278_vm2 = vcmp.eq.f32.partialorder %v1268_v5, 0.0  ;;  %vm1321_vm3 = vcmp.eq.f32.partialorder %v1313_v2, inf  ;;  %vm1336_vm4 = vcmp.eq.f32.partialorder %v1328_v24, inf }
 0xd40   :  { %3298 = vrsqrt.f32 %v1328_v24  ;;  %vm1338_vm5 = vcmp.eq.f32.partialorder %v1328_v24, 0.0  ;;  %vm1323_vm7 = vcmp.eq.f32.partialorder %v1313_v2, 0.0 }
 0xd43   :  { %v3293_v56 = vpop.eup %3292 }
 0xd44   :  { %v3295_v8 = vpop.eup %3294  ;;  %v1270_v0 = vmul.f32 %v3293_v56, %v1268_v5 }
 0xd45   :  { %v1287_v9 = vmul.f32 %v3295_v8, %v1285_v25  ;;  %v3297_v15 = vpop.eup %3296 }
 0xd46   :  { %v1271_v14 = vmul.f32 %v3293_v56, %v1270_v0  ;;  %v3299_v20 = vpop.eup %3298  ;;  %v1315_v47 = vmul.f32 %v3297_v15, %v1313_v2 }
 0xd47   :  { %v1288_v21 = vmul.f32 %v3295_v8, %v1287_v9  ;;  %v1330_v43 = vmul.f32 %v3299_v20, %v1328_v24 }
 0xd48   :  { %v1272_v27 = vmul.f32 0.5, %v1271_v14  ;;  %v1316_v6 = vmul.f32 %v3297_v15, %v1315_v47 }
 0xd49   :  { %v1289_v42 = vmul.f32 0.5, %v1288_v21  ;;  %v1331_v45 = vmul.f32 %v3299_v20, %v1330_v43 }
 0xd4a   :  { %v1273_v3 = vsub.f32 1.5, %v1272_v27  ;;  %v1317_v29 = vmul.f32 0.5, %v1316_v6  ;;  %v1279_v27 = vand.u32 2147483648, %v1268_v5 }
 0xd4b   :  { %v1290_v37 = vsub.f32 1.5, %v1289_v42  ;;  %v1332_v31 = vmul.f32 0.5, %v1331_v45 }
 0xd4c   :  { %v1274_v49 = vmul.f32 %v3293_v56, %v1273_v3  ;;  %v1318_v11 = vsub.f32 1.5, %v1317_v29  ;;  %v1282_v56 = vsel %vm1281_vm12, 1.0, %v3563_v7  ;;  %v1339_v3 = vand.u32 2147483648, %v1328_v24 }
 0xd4d   :  { %v1291_v30 = vmul.f32 %v3295_v8, %v1290_v37  ;;  %v1333_v22 = vsub.f32 1.5, %v1332_v31 }
 0xd4e   :  { %v1275_v35 = vmul.f32 %v1274_v49, %v1268_v5  ;;  %v1319_v0 = vmul.f32 %v3297_v15, %v1318_v11  ;;  %v1324_v49 = vand.u32 2147483648, %v1313_v2 }
 0xd4f   :  { %v1292_v57 = vmul.f32 %v1291_v30, %v1285_v25  ;;  %v1334_v21 = vmul.f32 %v3299_v20, %v1333_v22 }
 0xd50   :  { %v1277_v9 = vsel %vm1276_vm13, %v1268_v5, %v1275_v35  ;;  %v1320_v8 = vmul.f32 %v1319_v0, %v1313_v2 }
 0xd51   :  { %v1294_v14 = vsel %vm1293_vm14, %v1285_v25, %v1292_v57  ;;  %v1335_v43 = vmul.f32 %v1334_v21, %v1328_v24  ;;  %v1280_v17 = vsel %vm1278_vm2, %v1279_v27, %v1277_v9 }
 0xd52   :  { %v1297_v47 = vsel %vm1295_vm15, %v1296_v23, %v1294_v14  ;;  %v1322_v15 = vsel %vm1321_vm3, %v1313_v2, %v1320_v8 }
 0xd53   :  { %v1298_v42 = vmul.f32 %v1297_v47, %v1282_v56  ;;  %v1337_v45 = vsel %vm1336_vm4, %v1328_v24, %v1335_v43  ;;  %v1325_v31 = vsel %vm1323_vm7, %v1324_v49, %v1322_v15 }
 0xd54   :  { %v1340_v25 = vsel %vm1338_vm5, %v1339_v3, %v1337_v45 }
 0xd55   :  { %v1341_v6 = vsub.f32 %v1280_v17, %v1298_v42  ;;  %v1343_v37 = vadd.f32 %v1298_v42, %v1280_v17  ;;  %v1346_v30 = vsub.f32 0.0, %v1340_v25 }
 0xd57   :  { %v1342_v20 = vmul.f32 0.70710677, %v1341_v6  ;;  %v1344_v29 = vmul.f32 0.70710677, %v1343_v37 }
 0xd59   :  { %v1348_v35 = vmul.f32 %v1344_v29, %v1325_v31  ;;  %v1347_v5 = vmul.f32 %v1346_v30, %v1342_v20  ;;  %v1345_v11 = vmul.f32 %v1342_v20, %v1325_v31  ;;  %v1349_v57 = vmul.f32 %v1344_v29, %v1340_v25 }
 0xd5b   :  { %1358 = vperm.xlu1 %3167, %v1348_v35   ;;  %1365 = vperm.xlu2 %3168, %v1347_v5  }
 0xd5c   :  { %1352 = vperm.xlu0 %3166, %v1345_v11  }
 0xd63   :  { %1371 = vperm.xlu1 %3167, %v1349_v57   ;;  %3169 = vset.pattern.permute.xlu2 %v3561_v32 }
 0xd64   :  { %3170 = vset.pattern.permute.xlu0 %v3561_v32  ;;  %1377 = vperm.xlu2 %3169, %v1345_v11  }
 0xd65   :  { %1382 = vperm.xlu0 %3170, %v1348_v35  }
 0xd6b   :  { %3171 = vset.pattern.permute.xlu1 %v3561_v32 }
 0xd6c   :  { %1388 = vperm.xlu1 %3171, %v1347_v5   ;;  %1393 = vperm.xlu2 %3169, %v1349_v57  }
 0xd6d   :  { %3174 = vset.pattern.permute.xlu0 %v3564_v40 }
 0xd6e   :  { %1416 = vperm.xlu0 %3174, %v1347_v5  }
 0xd74   :  { %3172 = vset.pattern.permute.xlu1 %v3564_v40  ;;  %3173 = vset.pattern.permute.xlu2 %v3564_v40 }
 0xd75   :  { %1405 = vperm.xlu1 %3172, %v1345_v11   ;;  %1410 = vperm.xlu2 %3173, %v1348_v35  }
 0xd76   :  { %3177 = vset.pattern.permute.xlu0 %v3565_v41 }
 0xd77   :  { %1449 = vperm.xlu0 %3177, %v1349_v57  }
 0xd7d   :  { %1421 = vperm.xlu1 %3172, %v1349_v57   ;;  %3175 = vset.pattern.permute.xlu2 %v3565_v41 }
 0xd7e   :  { %1433 = vperm.xlu2 %3175, %v1345_v11  }
 0xd7f   :  { %3178 = vset.pattern.permute.xlu0 %v3562_v33 }
 0xd85   :  { %3176 = vset.pattern.permute.xlu1 %v3565_v41 }
 0xd86   :  { %1438 = vperm.xlu1 %3176, %v1348_v35   ;;  %1444 = vperm.xlu2 %3175, %v1347_v5  }
 0xd8e   :  { %3179 = vset.pattern.permute.xlu1 %v3562_v33  ;;  %3180 = vset.pattern.permute.xlu2 %v3562_v33 }
 0xdb5   :  { %v1366_v2 = vpop.permute.xlu2 %1365 }
 0xdb6   :  { %v1368_v37 = vmul.f32 %v1366_v2, %v3735_v62 }
 0xdbe   :  { %v1378_v22 = vpop.permute.xlu2 %1377 }
 0xdbf   :  { %v1380_v15 = vmul.f32 %v1378_v22, %v3729_v58 }
 0xdc6   :  { %v1394_v9 = vpop.permute.xlu2 %1393 }
 0xdc7   :  { %v1396_v8 = vmul.f32 %v1394_v9, %v3731_v59 }
 0xdcd   :  { %v1359_v24 = vpop.permute.xlu1 %1358 }
 0xdce   :  { %v1353_v0 = vpop.permute.xlu0 %1352  ;;  %v1361_v42 = vmul.f32 %v1359_v24, %v3733_v60 }
 0xdcf   :  { %v1411_v27 = vpop.permute.xlu2 %1410  ;;  %v1355_v43 = vmul.f32 %v1353_v0, %v3735_v62 }
 0xdd0   :  { %v1413_v24 = vmul.f32 %v1411_v27, %v3747_v13 }
 0xdd1   :  { %v1362_v25 = vadd.f32 %v1361_v42, %v1355_v43 }
 0xdd5   :  { %v1372_v23 = vpop.permute.xlu1 %1371 }
 0xdd6   :  { %v1374_v17 = vmul.f32 %v1372_v23, %v3733_v60 }
 0xdd7   :  { %v1383_v21 = vpop.permute.xlu0 %1382 }
 0xdd8   :  { %v1385_v3 = vmul.f32 %v1383_v21, %v3731_v59  ;;  %v1434_v49 = vpop.permute.xlu2 %1433  ;;  %v1375_v20 = vadd.f32 %v1374_v17, %v1368_v37 }
 0xdda   :  { %v1386_v29 = vadd.f32 %v1385_v3, %v1380_v15  ;;  %v1436_v3 = vmul.f32 %v1434_v49, %v3770_v36  ;;  %v4167_v49 = vld [vmem:[%s4498_s5 + $0x8] sm:$0xff] }
 0xddc   :  { %v1398_v23 = vmul.f32 %v1386_v29, %v1362_v25  ;;  %v1402_v2 = vmul.f32 %v1386_v29, %v1375_v20 }
 0xdde   :  { %v1389_v14 = vpop.permute.xlu1 %1388 }
 0xddf   :  { %v1391_v56 = vmul.f32 %v1389_v14, %v3729_v58 }
 0xde0   :  { %v1417_v6 = vpop.permute.xlu0 %1416  ;;  %v1445_v42 = vpop.permute.xlu2 %1444 }
 0xde1   :  { %v1397_v45 = vadd.f32 %v1396_v8, %v1391_v56  ;;  %v1419_v11 = vmul.f32 %v1417_v6, %v3752_v16  ;;  %v1447_v37 = vmul.f32 %v1445_v42, %v3770_v36 }
 0xde3   :  { %v1399_v30 = vmul.f32 %v1397_v45, %v1375_v20  ;;  %v1401_v31 = vmul.f32 %v1397_v45, %v1362_v25 }
 0xde5   :  { %v1400_v22 = vsub.f32 %v1398_v23, %v1399_v30  ;;  %v1403_v9 = vadd.f32 %v1402_v2, %v1401_v31 }
 0xde7   :  { %v1406_v47 = vpop.permute.xlu1 %1405 }
 0xde8   :  { %v1408_v35 = vmul.f32 %v1406_v47, %v3752_v16 }
 0xde9   :  { %v1450_v21 = vpop.permute.xlu0 %1449 }
 0xdea   :  { %v1414_v14 = vadd.f32 %v1413_v24, %v1408_v35  ;;  %v1452_v47 = vmul.f32 %v1450_v21, %v3775_v38 }
 0xdec   :  { %v1426_v43 = vmul.f32 %v1414_v14, %v1400_v22  ;;  %v1430_v17 = vmul.f32 %v1414_v14, %v1403_v9  ;;  %v1453_v25 = vadd.f32 %v1452_v47, %v1447_v37  ;;  %v4233_v37 = vld [vmem:[%s4496_s3] ss:$0 sm:$0xff] }
 0xdef   :  { %v1422_v5 = vpop.permute.xlu1 %1421 }
 0xdf0   :  { %v1424_v57 = vmul.f32 %v1422_v5, %v3747_v13 }
 0xdf2   :  { %v1425_v0 = vadd.f32 %v1424_v57, %v1419_v11  ;;  %v4174_v57 = vld [vmem:[%s4498_s5] sm:$0xff] }
 0xdf4   :  { %v1427_v56 = vmul.f32 %v1425_v0, %v1403_v9  ;;  %v1429_v8 = vmul.f32 %v1425_v0, %v1400_v22 }
 0xdf6   :  { %v1428_v27 = vsub.f32 %v1426_v43, %v1427_v56  ;;  %v1431_v15 = vadd.f32 %v1430_v17, %v1429_v8  ;;  %v1571_v8 = vld [vmem:[#allocation2 + $0x20] sm:$0xff]  ;;  %v4215_v43 = vld [vmem:[%s4494_s1 + $0x10] sm:$0xff] }
 0xdf7   :  { %v4227_v17 = vld [vmem:[%s4494_s1] sm:$0xff] }
 0xdf8   :  { %v1439_v6 = vpop.permute.xlu1 %1438  ;;  %v1455_v30 = vmul.f32 %v1453_v25, %v1431_v15  ;;  %v1457_v31 = vmul.f32 %v1453_v25, %v1428_v27 }
 0xdf9   :  { %v1441_v45 = vmul.f32 %v1439_v6, %v3775_v38 }
 0xdfb   :  { %v1442_v20 = vadd.f32 %v1441_v45, %v1436_v3 }
 0xdfd   :  { %v1454_v29 = vmul.f32 %v1442_v20, %v1428_v27  ;;  %v1458_v35 = vmul.f32 %v1442_v20, %v1431_v15 }
 0xdff   :  { %v1456_v5 = vsub.f32 %v1454_v29, %v1455_v30  ;;  %v1459_v11 = vadd.f32 %v1458_v35, %v1457_v31 }
 0xe01   :  { %3095 = vmatmul.msk.f32.vlgmr.msra.gmra.mxu0 %vm365_vm1, %v1459_v11  ;;  %3096 = vmatmul.msk.f32.vlgmr.msrb.gmra.mxu2 %vm365_vm1, %v1456_v5 }
 0xe02   :  { %1864 = vmatpush.msrb.mxu2 %v4026_v39  ;;  %1841 = vmatpush.msra.mxu0 %v4167_v49 }
 0xe04   :  { %1865 = vmatpush.msrb.mxu2 %v4035_v44  ;;  %1842 = vmatpush.msra.mxu0 %v4174_v57 }
 0xe09   :  { %3098 = vmatmul.msk.f32.vlgmr.msrb.gmra.mxu0 %vm99_vm0, %v1571_v8 }
 0xe0a   :  { %1954 = vmatpush.msrb.mxu0 %v4117_v18  ;;  %v4221_v18 = vld [vmem:[%s4494_s1 + $0x8] sm:$0xff] }
 0xe7e   :  { %v1480_v24 = vpop.f32.mrf.mxu0 }
 0xe84   :  { %v1503_v23 = vpop.f32.mrf.mxu2 }
 0xe85   :  { %v1504_v2 = vadd.f32 %v1503_v23, %v1480_v24 }
 0xe86   :  { %v1592_v47 = vpop.f32.mrf.mxu0 }
 0xe87   :  { %v1506_v39 = vmul.f32 %v1504_v2, %v1504_v2 }
 0xe89   :  { %1523 = vmatmul.f32.vlgmr.msrb.gmra.mxu3 %v1506_v39 }
 0xe8a   :  { %2963 = vmatpush.msrb.mxu3 %v4029_v26 }
 0xe8c   :  { %2964 = vmatpush.msrb.mxu3 %v4038_v48 }
 0xe8e   :  { %2965 = vmatpush.msrb.mxu3 %v4041_v1 }
 0xe90   :  { %2966 = vmatpush.msrb.mxu3 %v4044_v46 }
 0xe92   :  { %2967 = vmatpush.msrb.mxu3 %v4047_v4 }
 0xe94   :  { %2968 = vmatpush.msrb.mxu3 %v4050_v55 }
 0xe96   :  { %2969 = vmatpush.msrb.mxu3 %v4053_v61 }
 0xe98   :  { %2970 = vmatpush.msrb.mxu3 %v4056_v52 }
 0xe9a   :  { %2971 = vmatpush.msrb.mxu3 %v4059_v63 }
 0xe9c   :  { %2972 = vmatpush.msrb.mxu3 %v4062_v50 }
 0xe9e   :  { %2973 = vmatpush.msrb.mxu3 %v4065_v51 }
 0xea0   :  { %2974 = vmatpush.msrb.mxu3 %v4068_v53 }
 0xea2   :  { %2975 = vmatpush.msrb.mxu3 %v4071_v54 }
 0xea4   :  { %2976 = vmatpush.msrb.mxu3 %v4074_v10 }
 0xea6   :  { %2977 = vmatpush.msrb.mxu3 %v4077_v28 }
 0xea8   :  { %2978 = vmatpush.msrb.mxu3 %v4080_v12 }
 0xf0c   :  { %v1524_v26 = vpop.f32.mrf.mxu3 }
 0xf0d   :  { %v1525_v44 = vadd.f32 %v4102_v19, %v1524_v26 }
 0xf0f   :  { %3300 = vtanh.f32 %v1525_v44  ;;  %v3097_v1 = vmul.f32 -1.442695, %v1525_v44 }
 0xf11   :  { %3302 = vpow2.f32 %v3097_v1 }
 0xf15   :  { %v3301_v48 = vpop.eup %3300 }
 0xf16   :  { %1549 = vrot.lane.b32.xlu1 %v3301_v48, %s3566_s12 }
 0xf17   :  { %v3303_v46 = vpop.eup %3302 }
 0xf18   :  { %v1530_v4 = vadd.f32 1.0, %v3303_v46 }
 0xf1a   :  { %3304 = vrcp.f32 %v1530_v4  ;;  %v1542_v51 = vand.u32 2147483648, %v1530_v4  ;;  %vm1536_vm9 = vweird.f32 %v1530_v4  ;;  %v1540_v53 = vand.u32 2147483647, %v1530_v4 }
 0xf1c   :  { %v1543_v10 = vor.u32 1.1754944e-38, %v1542_v51  ;;  %vm1541_vm11 = vcmp.eq.f32.partialorder %v1540_v53, 8.507059e+37 }
 0xf20   :  { %v3305_v55 = vpop.eup %3304 }
 0xf21   :  { %v1532_v61 = vmul.f32 %v3305_v55, %v1530_v4  ;;  %vm1537_vm8 = vweird.f32 %v3305_v55 }
 0xf22   :  { %vm1538_vm10 = vmor %vm1536_vm9, %vm1537_vm8 }
 0xf23   :  { %v1533_v52 = vsub.f32 1.0, %v1532_v61 }
 0xf25   :  { %v1534_v63 = vmul.f32 %v3305_v55, %v1533_v52 }
 0xf27   :  { %v1535_v50 = vadd.f32 %v3305_v55, %v1534_v63 }
 0xf29   :  { %v1539_v54 = vsel %vm1538_vm10, %v3305_v55, %v1535_v50 }
 0xf2a   :  { %v1544_v12 = vsel %vm1541_vm11, %v1543_v10, %v1539_v54 }
 0xf2b   :  { %v1547_v0 = vmul.f32 %v1544_v12, %v4108_v34  ;;  %v4209_v34 = vld [vmem:[%s4494_s1 + $0x18] sm:$0xff] }
 0xf88   :  { %v1550_v28 = vpop.permute.xlu1 %1549 }
 0xf89   :  { %v1552_v19 = vmul.f32 %v1550_v28, %v1544_v12 }
 0xf8b   :  { %1554 = vrot.lane.b32.xlu2 %v1552_v19, %s3566_s12 }
 0xfe5   :  { %v1555_v22 = vpop.permute.xlu2 %1554 }
 0xfe6   :  { %v4197_v9 = vadd.f32 %v1555_v22, %v1547_v0 }
 0xfe8   :  { %3306 = vtanh.f32 %v4197_v9 }
 0xfee   :  { %v3307_v14 = vpop.eup %3306 }
 0xfef   :  { %1560 = vrot.lane.b32.xlu1 %v3307_v14, %s3566_s12 }
0x1061   :  { %v1561_v21 = vpop.permute.xlu1 %1560 }
0x1062   :  { %v1563_v56 = vmul.f32 %v1561_v21, %v1544_v12 }
0x1064   :  { %1565 = vrot.lane.b32.xlu2 %v1563_v56, %s3567_s13 }
0x10be   :  { %v1566_v42 = vpop.permute.xlu2 %1565 }
0x10bf   :  { %1569 = vst.msk [vmem:[#allocation7 + $0x18] sm:$0xff] %vm123_vm6, %v1566_v42  ;;  %3099 = vmatmul.msk.f32.vlgmr.msra.gmra.mxu2 %vm123_vm6, %v1566_v42 }
0x10c0   :  { %1973 = vmatpush.msra.mxu2 %v4209_v34 }
0x10c2   :  { %1974 = vmatpush.msra.mxu2 %v4215_v43 }
0x10c4   :  { %1975 = vmatpush.msra.mxu2 %v4221_v18 }
0x10c6   :  { %1976 = vmatpush.msra.mxu2 %v4227_v17 }
0x1142   :  { %v1614_v3 = vpop.f32.mrf.mxu2 }
0x1143   :  { %v1615_v6 = vadd.f32 %v1614_v3, %v1592_v47 }
0x1145   :  { %v4236_v27 = vadd.f32 %v4233_v37, %v1615_v6 }
0x1147   :  { %v1618_v15 = vmul.f32 %v4236_v27, %v4236_v27  ;;  %vm1645_vm4 = vcmp.ge.f32.partialorder %v4236_v27, 0.0 }
0x1149   :  { %v1619_v45 = vadd.f32 1.0, %v1618_v15  ;;  %v1663_v25 = vmul.f32 %v1618_v15, %v1618_v15 }
0x114b   :  { %3308 = vrsqrt.f32 %v1619_v45  ;;  %v1664_v20 = vadd.f32 1.0, %v1663_v25  ;;  %vm1626_vm13 = vweird.f32 %v1619_v45 }
0x114d   :  { %3310 = vrsqrt.f32 %v1664_v20  ;;  %vm1671_vm2 = vweird.f32 %v1664_v20 }
0x1151   :  { %v3309_v29 = vpop.eup %3308 }
0x1152   :  { %v1621_v30 = vmul.f32 %v3309_v29, %v1619_v45  ;;  %vm1627_vm12 = vweird.f32 %v3309_v29 }
0x1153   :  { %v3311_v31 = vpop.eup %3310  ;;  %vm1628_vm15 = vmor %vm1626_vm13, %vm1627_vm12 }
0x1154   :  { %v1622_v35 = vmul.f32 %v3309_v29, %v1621_v30  ;;  %v1666_v5 = vmul.f32 %v3311_v31, %v1664_v20  ;;  %vm1672_vm14 = vweird.f32 %v3311_v31 }
0x1155   :  { %vm1673_vm3 = vmor %vm1671_vm2, %vm1672_vm14 }
0x1156   :  { %v1623_v11 = vmul.f32 0.5, %v1622_v35  ;;  %v1667_v24 = vmul.f32 %v3311_v31, %v1666_v5 }
0x1158   :  { %v1624_v23 = vsub.f32 1.5, %v1623_v11  ;;  %v1668_v2 = vmul.f32 0.5, %v1667_v24 }
0x115a   :  { %v1625_v39 = vmul.f32 %v3309_v29, %v1624_v23  ;;  %v1669_v26 = vsub.f32 1.5, %v1668_v2 }
0x115c   :  { %v1629_v44 = vsel %vm1628_vm15, %v3309_v29, %v1625_v39  ;;  %v1670_v48 = vmul.f32 %v3311_v31, %v1669_v26 }
0x115d   :  { %v1630_v1 = vadd.f32 1.0, %v1629_v44  ;;  %v1647_v46 = vsub.f32 1.0, %v1629_v44 }
0x115e   :  { %v1674_v4 = vsel %vm1673_vm3, %v3311_v31, %v1670_v48 }
0x115f   :  { %v1631_v55 = vmul.f32 0.5, %v1630_v1  ;;  %v1648_v61 = vmul.f32 0.5, %v1647_v46  ;;  %v1675_v52 = vadd.f32 1.0, %v1674_v4  ;;  %v1690_v63 = vsub.f32 1.0, %v1674_v4 }
0x1160   :  { %v1646_v46 = vsel %vm1645_vm4, 1.0, %v3563_v7 }
0x1161   :  { %v1632_v50 = vmax.f32 %v1631_v55, 0.0  ;;  %v1649_v51 = vmax.f32 %v1648_v61, 0.0  ;;  %v1676_v53 = vmul.f32 0.5, %v1675_v52  ;;  %v1691_v54 = vmul.f32 0.5, %v1690_v63 }
0x1163   :  { %3312 = vrsqrt.f32 %v1632_v50  ;;  %v1677_v10 = vmax.f32 %v1676_v53, 0.0  ;;  %v1692_v28 = vmax.f32 %v1691_v54, 0.0  ;;  %vm1640_vm5 = vcmp.eq.f32.partialorder %v1632_v50, inf }
0x1164   :  { %3314 = vrsqrt.f32 %v1649_v51  ;;  %vm1657_vm7 = vcmp.eq.f32.partialorder %v1649_v51, inf  ;;  %v1660_v2 = vand.u32 2147483648, %v1649_v51  ;;  %vm1659_vm8 = vcmp.eq.f32.partialorder %v1649_v51, 0.0 }
0x1165   :  { %3316 = vrsqrt.f32 %v1677_v10  ;;  %v1643_v1 = vand.u32 2147483648, %v1632_v50  ;;  %vm1642_vm9 = vcmp.eq.f32.partialorder %v1632_v50, 0.0  ;;  %vm1685_vm10 = vcmp.eq.f32.partialorder %v1677_v10, inf }
0x1166   :  { %3318 = vrsqrt.f32 %v1692_v28  ;;  %vm1700_vm11 = vcmp.eq.f32.partialorder %v1692_v28, inf  ;;  %vm1702_vm12 = vcmp.eq.f32.partialorder %v1692_v28, 0.0  ;;  %v1703_v63 = vand.u32 2147483648, %v1692_v28 }
0x1167   :  { %vm1687_vm13 = vcmp.eq.f32.partialorder %v1677_v10, 0.0 }
0x1169   :  { %v3313_v12 = vpop.eup %3312 }
0x116a   :  { %v3315_v19 = vpop.eup %3314  ;;  %v1634_v0 = vmul.f32 %v3313_v12, %v1632_v50 }
0x116b   :  { %v1651_v22 = vmul.f32 %v3315_v19, %v1649_v51  ;;  %v3317_v21 = vpop.eup %3316 }
0x116c   :  { %v1635_v14 = vmul.f32 %v3313_v12, %v1634_v0  ;;  %v3319_v8 = vpop.eup %3318  ;;  %v1679_v47 = vmul.f32 %v3317_v21, %v1677_v10  ;;  %v1688_v0 = vand.u32 2147483648, %v1677_v10 }
0x116d   :  { %v1652_v56 = vmul.f32 %v3315_v19, %v1651_v22  ;;  %v1694_v6 = vmul.f32 %v3319_v8, %v1692_v28 }
0x116e   :  { %v1636_v42 = vmul.f32 0.5, %v1635_v14  ;;  %v1680_v45 = vmul.f32 %v3317_v21, %v1679_v47 }
0x116f   :  { %v1653_v3 = vmul.f32 0.5, %v1652_v56  ;;  %v1695_v20 = vmul.f32 %v3319_v8, %v1694_v6 }
0x1170   :  { %v1637_v15 = vsub.f32 1.5, %v1636_v42  ;;  %v1681_v30 = vmul.f32 0.5, %v1680_v45 }
0x1171   :  { %v1654_v25 = vsub.f32 1.5, %v1653_v3  ;;  %v1696_v35 = vmul.f32 0.5, %v1695_v20 }
0x1172   :  { %v1638_v29 = vmul.f32 %v3313_v12, %v1637_v15  ;;  %v1682_v11 = vsub.f32 1.5, %v1681_v30 }
0x1173   :  { %v1655_v31 = vmul.f32 %v3315_v19, %v1654_v25  ;;  %v1697_v23 = vsub.f32 1.5, %v1696_v35 }
0x1174   :  { %v1639_v5 = vmul.f32 %v1638_v29, %v1632_v50  ;;  %v1683_v39 = vmul.f32 %v3317_v21, %v1682_v11 }
0x1175   :  { %v1656_v24 = vmul.f32 %v1655_v31, %v1649_v51  ;;  %v1698_v48 = vmul.f32 %v3319_v8, %v1697_v23 }
0x1176   :  { %v1641_v26 = vsel %vm1640_vm5, %v1632_v50, %v1639_v5  ;;  %v1684_v55 = vmul.f32 %v1683_v39, %v1677_v10 }
0x1177   :  { %v1658_v44 = vsel %vm1657_vm7, %v1649_v51, %v1656_v24  ;;  %v1699_v52 = vmul.f32 %v1698_v48, %v1692_v28  ;;  %v1644_v27 = vsel %vm1642_vm9, %v1643_v1, %v1641_v26 }
0x1178   :  { %v1661_v4 = vsel %vm1659_vm8, %v1660_v2, %v1658_v44  ;;  %v1686_v12 = vsel %vm1685_vm10, %v1677_v10, %v1684_v55 }
0x1179   :  { %v1662_v61 = vmul.f32 %v1661_v4, %v1646_v46  ;;  %v1701_v19 = vsel %vm1700_vm11, %v1692_v28, %v1699_v52  ;;  %v1689_v56 = vsel %vm1687_vm13, %v1688_v0, %v1686_v12 }
0x117a   :  { %v1704_v51 = vsel %vm1702_vm12, %v1703_v63, %v1701_v19 }
0x117b   :  { %v1705_v53 = vsub.f32 %v1644_v27, %v1662_v61  ;;  %v1707_v54 = vadd.f32 %v1662_v61, %v1644_v27  ;;  %v1710_v21 = vsub.f32 0.0, %v1704_v51 }
0x117d   :  { %v1706_v22 = vmul.f32 0.70710677, %v1705_v53  ;;  %v1708_v14 = vmul.f32 0.70710677, %v1707_v54 }
0x117f   :  { %v1712_v8 = vmul.f32 %v1708_v14, %v1689_v56  ;;  %v1711_v50 = vmul.f32 %v1710_v21, %v1706_v22  ;;  %v1709_v42 = vmul.f32 %v1706_v22, %v1689_v56  ;;  %v1713_v47 = vmul.f32 %v1708_v14, %v1704_v51 }
0x1181   :  { %1722 = vperm.xlu1 %3179, %v1712_v8   ;;  %1729 = vperm.xlu2 %3180, %v1711_v50  }
0x1182   :  { %1716 = vperm.xlu0 %3178, %v1709_v42  }
0x1189   :  { %1735 = vperm.xlu1 %3179, %v1713_v47   ;;  %3181 = vset.pattern.permute.xlu2 %v3561_v32 }
0x118a   :  { %3182 = vset.pattern.permute.xlu0 %v3561_v32  ;;  %1741 = vperm.xlu2 %3181, %v1709_v42  }
0x118b   :  { %1746 = vperm.xlu0 %3182, %v1712_v8  }
0x1191   :  { %3183 = vset.pattern.permute.xlu1 %v3561_v32 }
0x1192   :  { %1752 = vperm.xlu1 %3183, %v1711_v50   ;;  %1757 = vperm.xlu2 %3181, %v1713_v47  }
0x1193   :  { %3186 = vset.pattern.permute.xlu0 %v3564_v40 }
0x1194   :  { %1780 = vperm.xlu0 %3186, %v1711_v50  }
0x119a   :  { %3184 = vset.pattern.permute.xlu1 %v3564_v40  ;;  %3185 = vset.pattern.permute.xlu2 %v3564_v40 }
0x119b   :  { %1769 = vperm.xlu1 %3184, %v1709_v42   ;;  %1774 = vperm.xlu2 %3185, %v1712_v8  }
0x119c   :  { %3189 = vset.pattern.permute.xlu0 %v3565_v41 }
0x119d   :  { %1813 = vperm.xlu0 %3189, %v1713_v47  }
0x11a3   :  { %1785 = vperm.xlu1 %3184, %v1713_v47   ;;  %3187 = vset.pattern.permute.xlu2 %v3565_v41 }
0x11a4   :  { %1797 = vperm.xlu2 %3187, %v1709_v42  }
0x11a5   :  { %3190 = vset.pattern.permute.xlu0 %v3562_v33 }
0x11ab   :  { %3188 = vset.pattern.permute.xlu1 %v3565_v41 }
0x11ac   :  { %1802 = vperm.xlu1 %3188, %v1712_v8   ;;  %1808 = vperm.xlu2 %3187, %v1711_v50  }
0x11b4   :  { %3191 = vset.pattern.permute.xlu1 %v3562_v33  ;;  %3192 = vset.pattern.permute.xlu2 %v3562_v33 }
0x11db   :  { %v1730_v10 = vpop.permute.xlu2 %1729 }
0x11dc   :  { %v1732_v39 = vmul.f32 %v1730_v10, %v3735_v62 }
0x11e4   :  { %v1742_v3 = vpop.permute.xlu2 %1741 }
0x11e5   :  { %v1744_v26 = vmul.f32 %v1742_v3, %v3729_v58 }
0x11ec   :  { %v1758_v45 = vpop.permute.xlu2 %1757 }
0x11ed   :  { %v1760_v35 = vmul.f32 %v1758_v45, %v3731_v59 }
0x11f3   :  { %v1723_v28 = vpop.permute.xlu1 %1722 }
0x11f4   :  { %v1717_v15 = vpop.permute.xlu0 %1716  ;;  %v1725_v5 = vmul.f32 %v1723_v28, %v3733_v60 }
0x11f5   :  { %v1775_v29 = vpop.permute.xlu2 %1774  ;;  %v1719_v11 = vmul.f32 %v1717_v15, %v3735_v62 }
0x11f6   :  { %v1777_v54 = vmul.f32 %v1775_v29, %v3747_v13 }
0x11f7   :  { %v1726_v1 = vadd.f32 %v1725_v5, %v1719_v11 }
0x11fb   :  { %v1736_v6 = vpop.permute.xlu1 %1735 }
0x11fc   :  { %v1738_v24 = vmul.f32 %v1736_v6, %v3733_v60 }
0x11fd   :  { %v1747_v20 = vpop.permute.xlu0 %1746 }
0x11fe   :  { %v1749_v23 = vmul.f32 %v1747_v20, %v3731_v59  ;;  %v1798_v48 = vpop.permute.xlu2 %1797  ;;  %v1739_v46 = vadd.f32 %v1738_v24, %v1732_v39 }
0x11ff   :  { %v1800_v28 = vmul.f32 %v1798_v48, %v3770_v36 }
0x1200   :  { %v1750_v4 = vadd.f32 %v1749_v23, %v1744_v26  ;;  %v4275_v23 = vld [vmem:[%s4497_s4 + $0x8] sm:$0xff] }
0x1202   :  { %v1762_v12 = vmul.f32 %v1750_v4, %v1726_v1  ;;  %v1766_v19 = vmul.f32 %v1750_v4, %v1739_v46 }
0x1204   :  { %v1753_v25 = vpop.permute.xlu1 %1752 }
0x1205   :  { %v1755_v30 = vmul.f32 %v1753_v25, %v3729_v58 }
0x1206   :  { %v1781_v2 = vpop.permute.xlu0 %1780  ;;  %v1809_v50 = vpop.permute.xlu2 %1808 }
0x1207   :  { %v1761_v44 = vadd.f32 %v1760_v35, %v1755_v30  ;;  %v1783_v63 = vmul.f32 %v1781_v2, %v3752_v16  ;;  %v1811_v6 = vmul.f32 %v1809_v50, %v3770_v36  ;;  %v4282_v2 = vld [vmem:[%s4497_s4] sm:$0xff] }
0x1209   :  { %v1763_v55 = vmul.f32 %v1761_v44, %v1739_v46  ;;  %v1765_v61 = vmul.f32 %v1761_v44, %v1726_v1  ;;  %v4289_v46 = vld [vmem:[%s4500_s7] ss:$0 sm:$0xff] }
0x120b   :  { %v1764_v51 = vsub.f32 %v1762_v12, %v1763_v55  ;;  %v1767_v22 = vadd.f32 %v1766_v19, %v1765_v61 }
0x120d   :  { %v1770_v31 = vpop.permute.xlu1 %1769 }
0x120e   :  { %v1772_v52 = vmul.f32 %v1770_v31, %v3752_v16 }
0x120f   :  { %v1814_v21 = vpop.permute.xlu0 %1813 }
0x1210   :  { %v1778_v14 = vadd.f32 %v1777_v54, %v1772_v52  ;;  %v1816_v10 = vmul.f32 %v1814_v21, %v3775_v38 }
0x1212   :  { %v1790_v42 = vmul.f32 %v1778_v14, %v1764_v51  ;;  %v1794_v47 = vmul.f32 %v1778_v14, %v1767_v22  ;;  %v1817_v20 = vadd.f32 %v1816_v10, %v1811_v6 }
0x1215   :  { %v1786_v27 = vpop.permute.xlu1 %1785 }
0x1216   :  { %v1788_v53 = vmul.f32 %v1786_v27, %v3747_v13 }
0x1218   :  { %v1789_v0 = vadd.f32 %v1788_v53, %v1783_v63 }
0x121a   :  { %v1791_v56 = vmul.f32 %v1789_v0, %v1767_v22  ;;  %v1793_v8 = vmul.f32 %v1789_v0, %v1764_v51 }
0x121c   :  { %v1792_v15 = vsub.f32 %v1790_v42, %v1791_v56  ;;  %v1795_v45 = vadd.f32 %v1794_v47, %v1793_v8 }
0x121e   :  { %v1803_v3 = vpop.permute.xlu1 %1802  ;;  %v1819_v31 = vmul.f32 %v1817_v20, %v1795_v45  ;;  %v1821_v35 = vmul.f32 %v1817_v20, %v1792_v15 }
0x121f   :  { %v1805_v25 = vmul.f32 %v1803_v3, %v3775_v38  ;;  %v4304_v3 = vld [vmem:[%s4495_s2] sm:$0xff] }
0x1221   :  { %v1806_v29 = vadd.f32 %v1805_v25, %v1800_v28  ;;  %v1935_v28 = vld [vmem:[#allocation2 + $0x28] sm:$0xff] }
0x1223   :  { %v1818_v30 = vmul.f32 %v1806_v29, %v1792_v15  ;;  %v1822_v5 = vmul.f32 %v1806_v29, %v1795_v45 }
0x1225   :  { %v1820_v11 = vsub.f32 %v1818_v30, %v1819_v31  ;;  %v1823_v24 = vadd.f32 %v1822_v5, %v1821_v35 }
0x1227   :  { %3100 = vmatmul.msk.f32.vlgmr.msra.gmra.mxu0 %vm365_vm1, %v1823_v24  ;;  %3101 = vmatmul.msk.f32.vlgmr.msrb.gmra.mxu2 %vm365_vm1, %v1820_v11 }
0x1228   :  { %2228 = vmatpush.msrb.mxu2 %v4275_v23  ;;  %2205 = vmatpush.msra.mxu0 %v4167_v49 }
0x122a   :  { %2229 = vmatpush.msrb.mxu2 %v4282_v2  ;;  %2206 = vmatpush.msra.mxu0 %v4174_v57 }
0x122f   :  { %3103 = vmatmul.msk.f32.vlgmr.msrb.gmra.mxu0 %vm99_vm0, %v1935_v28 }
0x1230   :  { %2318 = vmatpush.msrb.mxu0 %v4304_v3 }
0x12a4   :  { %v1844_v39 = vpop.f32.mrf.mxu0 }
0x12aa   :  { %v1867_v26 = vpop.f32.mrf.mxu2 }
0x12ab   :  { %v1868_v44 = vadd.f32 %v1867_v26, %v1844_v39 }
0x12ac   :  { %v1956_v6 = vpop.f32.mrf.mxu0 }
0x12ad   :  { %v1870_v48 = vmul.f32 %v1868_v44, %v1868_v44 }
0x12af   :  { %1887 = vmatmul.f32.vlgmr.msrb.gmra.mxu1 %v1870_v48 }
0x132c   :  { %v1888_v1 = vpop.f32.mrf.mxu1 }
0x132d   :  { %v1889_v49 = vadd.f32 %v4289_v46, %v1888_v1 }
0x132f   :  { %3320 = vtanh.f32 %v1889_v49  ;;  %v3102_v55 = vmul.f32 -1.442695, %v1889_v49 }
0x1331   :  { %3322 = vpow2.f32 %v3102_v55 }
0x1335   :  { %v3321_v4 = vpop.eup %3320 }
0x1336   :  { %1913 = vrot.lane.b32.xlu1 %v3321_v4, %s3566_s12 }
0x1337   :  { %v3323_v57 = vpop.eup %3322 }
0x1338   :  { %v1894_v61 = vadd.f32 1.0, %v3323_v57 }
0x133a   :  { %3324 = vrcp.f32 %v1894_v61  ;;  %v1906_v12 = vand.u32 2147483648, %v1894_v61  ;;  %vm1900_vm15 = vweird.f32 %v1894_v61  ;;  %v1904_v19 = vand.u32 2147483647, %v1894_v61 }
0x133c   :  { %v1907_v51 = vor.u32 1.1754944e-38, %v1906_v12  ;;  %vm1905_vm3 = vcmp.eq.f32.partialorder %v1904_v19, 8.507059e+37 }
0x1340   :  { %v3325_v52 = vpop.eup %3324 }
0x1341   :  { %v1896_v27 = vmul.f32 %v3325_v52, %v1894_v61  ;;  %vm1901_vm14 = vweird.f32 %v3325_v52 }
0x1342   :  { %vm1902_vm2 = vmor %vm1900_vm15, %vm1901_vm14 }
0x1343   :  { %v1897_v63 = vsub.f32 1.0, %v1896_v27 }
0x1345   :  { %v1898_v53 = vmul.f32 %v3325_v52, %v1897_v63 }
0x1347   :  { %v1899_v54 = vadd.f32 %v3325_v52, %v1898_v53 }
0x1349   :  { %v1903_v0 = vsel %vm1902_vm2, %v3325_v52, %v1899_v54 }
0x134a   :  { %v1908_v14 = vsel %vm1905_vm3, %v1907_v51, %v1903_v0 }
0x134b   :  { %v1911_v56 = vmul.f32 %v1908_v14, %v4197_v9 }
0x13a8   :  { %v1914_v22 = vpop.permute.xlu1 %1913 }
0x13a9   :  { %v1916_v21 = vmul.f32 %v1914_v22, %v1908_v14 }
0x13ab   :  { %1918 = vrot.lane.b32.xlu2 %v1916_v21, %s3566_s12 }
0x1405   :  { %v1919_v8 = vpop.permute.xlu2 %1918 }
0x1406   :  { %v4295_v50 = vadd.f32 %v1919_v8, %v1911_v56 }
0x1408   :  { %3326 = vtanh.f32 %v4295_v50 }
0x140e   :  { %v3327_v42 = vpop.eup %3326 }
0x140f   :  { %1924 = vrot.lane.b32.xlu1 %v3327_v42, %s3566_s12 }
0x1481   :  { %v1925_v47 = vpop.permute.xlu1 %1924 }
0x1482   :  { %v1927_v10 = vmul.f32 %v1925_v47, %v1908_v14 }
0x1484   :  { %1929 = vrot.lane.b32.xlu2 %v1927_v10, %s3567_s13 }
0x14de   :  { %v1930_v9 = vpop.permute.xlu2 %1929 }
0x14df   :  { %1933 = vst.msk [vmem:[#allocation7 + $0x20] sm:$0xff] %vm123_vm6, %v1930_v9  ;;  %3104 = vmatmul.msk.f32.vlgmr.msra.gmra.mxu2 %vm123_vm6, %v1930_v9 }
0x14e0   :  { %2337 = vmatpush.msra.mxu2 %v4209_v34 }
0x14e2   :  { %2338 = vmatpush.msra.mxu2 %v4215_v43 }
0x14e4   :  { %2339 = vmatpush.msra.mxu2 %v4221_v18 }
0x14e6   :  { %2340 = vmatpush.msra.mxu2 %v4227_v17 }
0x1562   :  { %v1978_v15 = vpop.f32.mrf.mxu2 }
0x1563   :  { %v1979_v45 = vadd.f32 %v1978_v15, %v1956_v6 }
0x1565   :  { %v4314_v25 = vadd.f32 %v4233_v37, %v1979_v45 }
0x1567   :  { %v1982_v20 = vmul.f32 %v4314_v25, %v4314_v25  ;;  %vm2009_vm11 = vcmp.ge.f32.partialorder %v4314_v25, 0.0 }
0x1569   :  { %v1983_v29 = vadd.f32 1.0, %v1982_v20  ;;  %v2027_v30 = vmul.f32 %v1982_v20, %v1982_v20 }
0x156b   :  { %3328 = vrsqrt.f32 %v1983_v29  ;;  %v2028_v31 = vadd.f32 1.0, %v2027_v30  ;;  %vm1990_vm5 = vweird.f32 %v1983_v29 }
0x156d   :  { %3330 = vrsqrt.f32 %v2028_v31  ;;  %vm2035_vm9 = vweird.f32 %v2028_v31 }
0x1571   :  { %v3329_v35 = vpop.eup %3328 }
0x1572   :  { %v1985_v5 = vmul.f32 %v3329_v35, %v1983_v29  ;;  %vm1991_vm4 = vweird.f32 %v3329_v35 }
0x1573   :  { %v3331_v11 = vpop.eup %3330  ;;  %vm1992_vm8 = vmor %vm1990_vm5, %vm1991_vm4 }
0x1574   :  { %v1986_v24 = vmul.f32 %v3329_v35, %v1985_v5  ;;  %v2030_v39 = vmul.f32 %v3331_v11, %v2028_v31  ;;  %vm2036_vm7 = vweird.f32 %v3331_v11 }
0x1575   :  { %vm2037_vm10 = vmor %vm2035_vm9, %vm2036_vm7 }
0x1576   :  { %v1987_v26 = vmul.f32 0.5, %v1986_v24  ;;  %v2031_v44 = vmul.f32 %v3331_v11, %v2030_v39 }
0x1578   :  { %v1988_v48 = vsub.f32 1.5, %v1987_v26  ;;  %v2032_v1 = vmul.f32 0.5, %v2031_v44 }
0x157a   :  { %v1989_v49 = vmul.f32 %v3329_v35, %v1988_v48  ;;  %v2033_v4 = vsub.f32 1.5, %v2032_v1 }
0x157c   :  { %v1993_v55 = vsel %vm1992_vm8, %v3329_v35, %v1989_v49  ;;  %v2034_v57 = vmul.f32 %v3331_v11, %v2033_v4 }
0x157d   :  { %v1994_v61 = vadd.f32 1.0, %v1993_v55  ;;  %v2011_v52 = vsub.f32 1.0, %v1993_v55 }
0x157e   :  { %v2038_v27 = vsel %vm2037_vm10, %v3331_v11, %v2034_v57 }
0x157f   :  { %v1995_v63 = vmul.f32 0.5, %v1994_v61  ;;  %v2012_v53 = vmul.f32 0.5, %v2011_v52  ;;  %v2039_v54 = vadd.f32 1.0, %v2038_v27  ;;  %v2054_v12 = vsub.f32 1.0, %v2038_v27 }
0x1581   :  { %v1996_v19 = vmax.f32 %v1995_v63, 0.0  ;;  %v2013_v0 = vmax.f32 %v2012_v53, 0.0  ;;  %v2040_v51 = vmul.f32 0.5, %v2039_v54  ;;  %v2055_v22 = vmul.f32 0.5, %v2054_v12 }
0x1582   :  { %v2010_v63 = vsel %vm2009_vm11, 1.0, %v3563_v7 }
0x1583   :  { %3332 = vrsqrt.f32 %v1996_v19  ;;  %v2041_v14 = vmax.f32 %v2040_v51, 0.0  ;;  %v2056_v21 = vmax.f32 %v2055_v22, 0.0  ;;  %vm2004_vm12 = vcmp.eq.f32.partialorder %v1996_v19, inf }
0x1584   :  { %3334 = vrsqrt.f32 %v2013_v0  ;;  %vm2021_vm13 = vcmp.eq.f32.partialorder %v2013_v0, inf  ;;  %v2024_v4 = vand.u32 2147483648, %v2013_v0  ;;  %vm2023_vm14 = vcmp.eq.f32.partialorder %v2013_v0, 0.0 }
0x1585   :  { %3336 = vrsqrt.f32 %v2041_v14  ;;  %v2007_v27 = vand.u32 2147483648, %v1996_v19  ;;  %vm2006_vm15 = vcmp.eq.f32.partialorder %v1996_v19, 0.0  ;;  %vm2049_vm2 = vcmp.eq.f32.partialorder %v2041_v14, inf }
0x1586   :  { %3338 = vrsqrt.f32 %v2056_v21  ;;  %vm2064_vm3 = vcmp.eq.f32.partialorder %v2056_v21, inf  ;;  %vm2066_vm4 = vcmp.eq.f32.partialorder %v2056_v21, 0.0  ;;  %v2067_v22 = vand.u32 2147483648, %v2056_v21 }
0x1587   :  { %vm2051_vm5 = vcmp.eq.f32.partialorder %v2041_v14, 0.0 }
0x1589   :  { %v3333_v56 = vpop.eup %3332 }
0x158a   :  { %v3335_v8 = vpop.eup %3334  ;;  %v1998_v42 = vmul.f32 %v3333_v56, %v1996_v19 }
0x158b   :  { %v2015_v47 = vmul.f32 %v3335_v8, %v2013_v0  ;;  %v3337_v28 = vpop.eup %3336 }
0x158c   :  { %v1999_v10 = vmul.f32 %v3333_v56, %v1998_v42  ;;  %v3339_v6 = vpop.eup %3338  ;;  %v2043_v45 = vmul.f32 %v3337_v28, %v2041_v14 }
0x158d   :  { %v2016_v9 = vmul.f32 %v3335_v8, %v2015_v47  ;;  %v2058_v29 = vmul.f32 %v3339_v6, %v2056_v21 }
0x158e   :  { %v2000_v15 = vmul.f32 0.5, %v1999_v10  ;;  %v2044_v31 = vmul.f32 %v3337_v28, %v2043_v45  ;;  %v2052_v10 = vand.u32 2147483648, %v2041_v14 }
0x158f   :  { %v2017_v20 = vmul.f32 0.5, %v2016_v9  ;;  %v2059_v5 = vmul.f32 %v3339_v6, %v2058_v29 }
0x1590   :  { %v2001_v30 = vsub.f32 1.5, %v2000_v15  ;;  %v2045_v24 = vmul.f32 0.5, %v2044_v31 }
0x1591   :  { %v2018_v35 = vsub.f32 1.5, %v2017_v20  ;;  %v2060_v26 = vmul.f32 0.5, %v2059_v5 }
0x1592   :  { %v2002_v11 = vmul.f32 %v3333_v56, %v2001_v30  ;;  %v2046_v48 = vsub.f32 1.5, %v2045_v24 }
0x1593   :  { %v2019_v39 = vmul.f32 %v3335_v8, %v2018_v35  ;;  %v2061_v49 = vsub.f32 1.5, %v2060_v26 }
0x1594   :  { %v2003_v44 = vmul.f32 %v2002_v11, %v1996_v19  ;;  %v2047_v55 = vmul.f32 %v3337_v28, %v2046_v48 }
0x1595   :  { %v2020_v1 = vmul.f32 %v2019_v39, %v2013_v0  ;;  %v2062_v52 = vmul.f32 %v3339_v6, %v2061_v49 }
0x1596   :  { %v2005_v57 = vsel %vm2004_vm12, %v1996_v19, %v2003_v44  ;;  %v2048_v54 = vmul.f32 %v2047_v55, %v2041_v14 }
0x1597   :  { %v2022_v61 = vsel %vm2021_vm13, %v2013_v0, %v2020_v1  ;;  %v2063_v51 = vmul.f32 %v2062_v52, %v2056_v21  ;;  %v2008_v25 = vsel %vm2006_vm15, %v2007_v27, %v2005_v57 }
0x1598   :  { %v2025_v53 = vsel %vm2023_vm14, %v2024_v4, %v2022_v61  ;;  %v2050_v42 = vsel %vm2049_vm2, %v2041_v14, %v2048_v54 }
0x1599   :  { %v2026_v12 = vmul.f32 %v2025_v53, %v2010_v63  ;;  %v2065_v47 = vsel %vm2064_vm3, %v2056_v21, %v2063_v51  ;;  %v2053_v15 = vsel %vm2051_vm5, %v2052_v10, %v2050_v42 }
0x159a   :  { %v2068_v0 = vsel %vm2066_vm4, %v2067_v22, %v2065_v47 }
0x159b   :  { %v2069_v56 = vsub.f32 %v2008_v25, %v2026_v12  ;;  %v2071_v8 = vadd.f32 %v2026_v12, %v2008_v25  ;;  %v2074_v6 = vsub.f32 0.0, %v2068_v0 }
0x159d   :  { %v2070_v28 = vmul.f32 0.70710677, %v2069_v56  ;;  %v2072_v9 = vmul.f32 0.70710677, %v2071_v8 }
0x159f   :  { %v2076_v45 = vmul.f32 %v2072_v9, %v2053_v15  ;;  %v2075_v19 = vmul.f32 %v2074_v6, %v2070_v28  ;;  %v2073_v20 = vmul.f32 %v2070_v28, %v2053_v15  ;;  %v2077_v29 = vmul.f32 %v2072_v9, %v2068_v0 }
0x15a1   :  { %2086 = vperm.xlu1 %3191, %v2076_v45   ;;  %2093 = vperm.xlu2 %3192, %v2075_v19  }
0x15a2   :  { %2080 = vperm.xlu0 %3190, %v2073_v20  }
0x15a9   :  { %2099 = vperm.xlu1 %3191, %v2077_v29   ;;  %3193 = vset.pattern.permute.xlu2 %v3561_v32 }
0x15aa   :  { %3194 = vset.pattern.permute.xlu0 %v3561_v32  ;;  %2105 = vperm.xlu2 %3193, %v2073_v20  }
0x15ab   :  { %2110 = vperm.xlu0 %3194, %v2076_v45  }
0x15b1   :  { %3195 = vset.pattern.permute.xlu1 %v3561_v32 }
0x15b2   :  { %2116 = vperm.xlu1 %3195, %v2075_v19   ;;  %2121 = vperm.xlu2 %3193, %v2077_v29  }
0x15b3   :  { %3198 = vset.pattern.permute.xlu0 %v3564_v40 }
0x15b4   :  { %2144 = vperm.xlu0 %3198, %v2075_v19  }
0x15ba   :  { %3196 = vset.pattern.permute.xlu1 %v3564_v40  ;;  %3197 = vset.pattern.permute.xlu2 %v3564_v40 }
0x15bb   :  { %2133 = vperm.xlu1 %3196, %v2073_v20   ;;  %2138 = vperm.xlu2 %3197, %v2076_v45  }
0x15bc   :  { %3201 = vset.pattern.permute.xlu0 %v3565_v41 }
0x15bd   :  { %2177 = vperm.xlu0 %3201, %v2077_v29  }
0x15c3   :  { %2149 = vperm.xlu1 %3196, %v2077_v29   ;;  %3199 = vset.pattern.permute.xlu2 %v3565_v41 }
0x15c4   :  { %2161 = vperm.xlu2 %3199, %v2073_v20  }
0x15c5   :  { %3202 = vset.pattern.permute.xlu0 %v3562_v33 }
0x15cb   :  { %3200 = vset.pattern.permute.xlu1 %v3565_v41 }
0x15cc   :  { %2166 = vperm.xlu1 %3200, %v2076_v45   ;;  %2172 = vperm.xlu2 %3199, %v2075_v19  }
0x15d4   :  { %3203 = vset.pattern.permute.xlu1 %v3562_v33  ;;  %3204 = vset.pattern.permute.xlu2 %v3562_v33 }
0x15fb   :  { %v2094_v14 = vpop.permute.xlu2 %2093 }
0x15fc   :  { %v2096_v61 = vmul.f32 %v2094_v14, %v3735_v62 }
0x1604   :  { %v2106_v30 = vpop.permute.xlu2 %2105 }
0x1605   :  { %v2108_v52 = vmul.f32 %v2106_v30, %v3729_v58 }
0x160c   :  { %v2122_v5 = vpop.permute.xlu2 %2121 }
0x160d   :  { %v2124_v48 = vmul.f32 %v2122_v5, %v3731_v59 }
0x1613   :  { %v2087_v21 = vpop.permute.xlu1 %2086 }
0x1614   :  { %v2081_v35 = vpop.permute.xlu0 %2080  ;;  %v2089_v1 = vmul.f32 %v2087_v21, %v3733_v60 }
0x1615   :  { %v2139_v39 = vpop.permute.xlu2 %2138  ;;  %v2083_v49 = vmul.f32 %v2081_v35, %v3735_v62 }
0x1616   :  { %v2141_v47 = vmul.f32 %v2139_v39, %v3747_v13 }
0x1617   :  { %v2090_v53 = vadd.f32 %v2089_v1, %v2083_v49 }
0x161b   :  { %v2100_v31 = vpop.permute.xlu1 %2099 }
0x161c   :  { %v2102_v4 = vmul.f32 %v2100_v31, %v3733_v60 }
0x161d   :  { %v2111_v24 = vpop.permute.xlu0 %2110 }
0x161e   :  { %v2113_v55 = vmul.f32 %v2111_v24, %v3731_v59  ;;  %v2162_v63 = vpop.permute.xlu2 %2161  ;;  %v2103_v54 = vadd.f32 %v2102_v4, %v2096_v61  ;;  %v4354_v61 = vld [vmem:[%s4498_s5 + $0x8] sm:$0xff] }
0x161f   :  { %v2164_v31 = vmul.f32 %v2162_v63, %v3770_v36 }
0x1620   :  { %v2114_v12 = vadd.f32 %v2113_v55, %v2108_v52  ;;  %v4361_v52 = vld [vmem:[%s4498_s5] sm:$0xff] }
0x1622   :  { %v2126_v10 = vmul.f32 %v2114_v12, %v2090_v53  ;;  %v2130_v0 = vmul.f32 %v2114_v12, %v2103_v54 }
0x1624   :  { %v2117_v11 = vpop.permute.xlu1 %2116 }
0x1625   :  { %v2119_v26 = vmul.f32 %v2117_v11, %v3729_v58 }
0x1626   :  { %v2145_v57 = vpop.permute.xlu0 %2144  ;;  %v2173_v29 = vpop.permute.xlu2 %2172 }
0x1627   :  { %v2125_v27 = vadd.f32 %v2124_v48, %v2119_v26  ;;  %v2147_v8 = vmul.f32 %v2145_v57, %v3752_v16  ;;  %v2175_v5 = vmul.f32 %v2173_v29, %v3770_v36 }
0x1629   :  { %v2127_v51 = vmul.f32 %v2125_v27, %v2103_v54  ;;  %v2129_v25 = vmul.f32 %v2125_v27, %v2090_v53 }
0x162b   :  { %v2128_v9 = vsub.f32 %v2126_v10, %v2127_v51  ;;  %v2131_v6 = vadd.f32 %v2130_v0, %v2129_v25 }
0x162d   :  { %v2134_v44 = vpop.permute.xlu1 %2133 }
0x162e   :  { %v2136_v22 = vmul.f32 %v2134_v44, %v3752_v16 }
0x162f   :  { %v2178_v45 = vpop.permute.xlu0 %2177 }
0x1630   :  { %v2142_v15 = vadd.f32 %v2141_v47, %v2136_v22  ;;  %v2180_v30 = vmul.f32 %v2178_v45, %v3775_v38 }
0x1632   :  { %v2154_v14 = vmul.f32 %v2142_v15, %v2128_v9  ;;  %v2158_v21 = vmul.f32 %v2142_v15, %v2131_v6  ;;  %v2181_v26 = vadd.f32 %v2180_v30, %v2175_v5 }
0x1635   :  { %v2150_v56 = vpop.permute.xlu1 %2149 }
0x1636   :  { %v2152_v42 = vmul.f32 %v2150_v56, %v3747_v13 }
0x1638   :  { %v2153_v28 = vadd.f32 %v2152_v42, %v2147_v8 }
0x163a   :  { %v2155_v19 = vmul.f32 %v2153_v28, %v2131_v6  ;;  %v2157_v20 = vmul.f32 %v2153_v28, %v2128_v9 }
0x163c   :  { %v2156_v11 = vsub.f32 %v2154_v14, %v2155_v19  ;;  %v2159_v24 = vadd.f32 %v2158_v21, %v2157_v20 }
0x163e   :  { %v2167_v35 = vpop.permute.xlu1 %2166  ;;  %v2183_v1 = vmul.f32 %v2181_v26, %v2159_v24  ;;  %v2185_v49 = vmul.f32 %v2181_v26, %v2156_v11 }
0x163f   :  { %v2169_v39 = vmul.f32 %v2167_v35, %v3775_v38 }
0x1641   :  { %v2170_v44 = vadd.f32 %v2169_v39, %v2164_v31 }
0x1643   :  { %v2182_v48 = vmul.f32 %v2170_v44, %v2156_v11  ;;  %v2186_v4 = vmul.f32 %v2170_v44, %v2159_v24  ;;  %v2299_v11 = vld [vmem:[#allocation2 + $0x30] sm:$0xff] }
0x1645   :  { %v2184_v55 = vsub.f32 %v2182_v48, %v2183_v1  ;;  %v2187_v57 = vadd.f32 %v2186_v4, %v2185_v49 }
0x1647   :  { %3105 = vmatmul.msk.f32.vlgmr.msra.gmra.mxu0 %vm365_vm1, %v2187_v57  ;;  %3106 = vmatmul.msk.f32.vlgmr.msrb.gmra.mxu2 %vm365_vm1, %v2184_v55 }
0x1648   :  { %2592 = vmatpush.msrb.mxu2 %v4275_v23  ;;  %2569 = vmatpush.msra.mxu0 %v4354_v61 }
0x164a   :  { %2593 = vmatpush.msrb.mxu2 %v4282_v2  ;;  %2570 = vmatpush.msra.mxu0 %v4361_v52 }
0x164f   :  { %3108 = vmatmul.msk.f32.vlgmr.msrb.gmra.mxu0 %vm99_vm0, %v2299_v11 }
0x1650   :  { %2682 = vmatpush.msrb.mxu0 %v4304_v3 }
0x16c4   :  { %v2208_v27 = vpop.f32.mrf.mxu0 }
0x16ca   :  { %v2231_v63 = vpop.f32.mrf.mxu2 }
0x16cb   :  { %v2232_v53 = vadd.f32 %v2231_v63, %v2208_v27 }
0x16cd   :  { %v2234_v54 = vmul.f32 %v2232_v53, %v2232_v53 }
0x16cf   :  { %2251 = vmatmul.f32.vlgmr.msra.gmra.mxu3 %v2234_v54 }
0x1752   :  { %v2252_v12 = vpop.f32.mrf.mxu3 }
0x1753   :  { %v2253_v51 = vadd.f32 %v4289_v46, %v2252_v12 }
0x1755   :  { %3340 = vtanh.f32 %v2253_v51  ;;  %v3107_v22 = vmul.f32 -1.442695, %v2253_v51 }
0x1757   :  { %3342 = vpow2.f32 %v3107_v22 }
0x175b   :  { %v3341_v25 = vpop.eup %3340 }
0x175c   :  { %2277 = vrot.lane.b32.xlu1 %v3341_v25, %s3566_s12 }
0x175d   :  { %v3343_v56 = vpop.eup %3342 }
0x175e   :  { %v2258_v8 = vadd.f32 1.0, %v3343_v56 }
0x1760   :  { %3344 = vrcp.f32 %v2258_v8  ;;  %v2270_v9 = vand.u32 2147483648, %v2258_v8  ;;  %vm2264_vm8 = vweird.f32 %v2258_v8  ;;  %v2268_v6 = vand.u32 2147483647, %v2258_v8 }
0x1762   :  { %v2271_v45 = vor.u32 1.1754944e-38, %v2270_v9  ;;  %vm2269_vm10 = vcmp.eq.f32.partialorder %v2268_v6, 8.507059e+37 }
0x1766   :  { %v3345_v42 = vpop.eup %3344 }
0x1767   :  { %v2260_v47 = vmul.f32 %v3345_v42, %v2258_v8  ;;  %vm2265_vm7 = vweird.f32 %v3345_v42 }
0x1768   :  { %vm2266_vm9 = vmor %vm2264_vm8, %vm2265_vm7 }
0x1769   :  { %v2261_v10 = vsub.f32 1.0, %v2260_v47 }
0x176b   :  { %v2262_v0 = vmul.f32 %v3345_v42, %v2261_v10 }
0x176d   :  { %v2263_v28 = vadd.f32 %v3345_v42, %v2262_v0 }
0x176f   :  { %v2267_v15 = vsel %vm2266_vm9, %v3345_v42, %v2263_v28 }
0x1770   :  { %v2272_v20 = vsel %vm2269_vm10, %v2271_v45, %v2267_v15 }
0x1771   :  { %v2275_v14 = vmul.f32 %v2272_v20, %v4295_v50  ;;  %v2320_v50 = vpop.f32.mrf.mxu0 }
0x17ce   :  { %v2278_v19 = vpop.permute.xlu1 %2277 }
0x17cf   :  { %v2280_v29 = vmul.f32 %v2278_v19, %v2272_v20 }
0x17d1   :  { %2282 = vrot.lane.b32.xlu2 %v2280_v29, %s3566_s12 }
0x182b   :  { %v2283_v21 = vpop.permute.xlu2 %2282 }
0x182c   :  { %v4368_v30 = vadd.f32 %v2283_v21, %v2275_v14 }
0x182e   :  { %3346 = vtanh.f32 %v4368_v30 }
0x1834   :  { %v3347_v31 = vpop.eup %3346 }
0x1835   :  { %2288 = vrot.lane.b32.xlu1 %v3347_v31, %s3566_s12 }
0x18a7   :  { %v2289_v35 = vpop.permute.xlu1 %2288 }
0x18a8   :  { %v2291_v5 = vmul.f32 %v2289_v35, %v2272_v20 }
0x18aa   :  { %2293 = vrot.lane.b32.xlu2 %v2291_v5, %s3567_s13 }
0x1904   :  { %v2294_v24 = vpop.permute.xlu2 %2293 }
0x1905   :  { %2297 = vst.msk [vmem:[#allocation7 + $0x28] sm:$0xff] %vm123_vm6, %v2294_v24  ;;  %3109 = vmatmul.msk.f32.vlgmr.msra.gmra.mxu2 %vm123_vm6, %v2294_v24 }
0x1906   :  { %2701 = vmatpush.msra.mxu2 %v4209_v34 }
0x1908   :  { %2702 = vmatpush.msra.mxu2 %v4215_v43 }
0x190a   :  { %2703 = vmatpush.msra.mxu2 %v4221_v18 }
0x190c   :  { %2704 = vmatpush.msra.mxu2 %v4227_v17 }
0x1988   :  { %v2342_v39 = vpop.f32.mrf.mxu2 }
0x1989   :  { %v2343_v26 = vadd.f32 %v2342_v39, %v2320_v50 }
0x198b   :  { %v4382_v44 = vadd.f32 %v4233_v37, %v2343_v26 }
0x198d   :  { %v2346_v3 = vmul.f32 %v4382_v44, %v4382_v44  ;;  %vm2373_vm3 = vcmp.ge.f32.partialorder %v4382_v44, 0.0 }
0x198f   :  { %v2347_v48 = vadd.f32 1.0, %v2346_v3  ;;  %v2391_v1 = vmul.f32 %v2346_v3, %v2346_v3 }
0x1991   :  { %3348 = vrsqrt.f32 %v2347_v48  ;;  %v2392_v49 = vadd.f32 1.0, %v2391_v1  ;;  %vm2354_vm12 = vweird.f32 %v2347_v48 }
0x1993   :  { %3350 = vrsqrt.f32 %v2392_v49  ;;  %vm2399_vm15 = vweird.f32 %v2392_v49 }
0x1997   :  { %v3349_v34 = vpop.eup %3348 }
0x1998   :  { %v2349_v43 = vmul.f32 %v3349_v34, %v2347_v48  ;;  %vm2355_vm11 = vweird.f32 %v3349_v34 }
0x1999   :  { %v3351_v4 = vpop.eup %3350  ;;  %vm2356_vm14 = vmor %vm2354_vm12, %vm2355_vm11 }
0x199a   :  { %v2350_v18 = vmul.f32 %v3349_v34, %v2349_v43  ;;  %v2394_v55 = vmul.f32 %v3351_v4, %v2392_v49  ;;  %vm2400_vm13 = vweird.f32 %v3351_v4 }
0x199b   :  { %vm2401_vm2 = vmor %vm2399_vm15, %vm2400_vm13 }
0x199c   :  { %v2351_v17 = vmul.f32 0.5, %v2350_v18  ;;  %v2395_v57 = vmul.f32 %v3351_v4, %v2394_v55 }
0x199e   :  { %v2352_v27 = vsub.f32 1.5, %v2351_v17  ;;  %v2396_v63 = vmul.f32 0.5, %v2395_v57 }
0x19a0   :  { %v2353_v37 = vmul.f32 %v3349_v34, %v2352_v27  ;;  %v2397_v53 = vsub.f32 1.5, %v2396_v63 }
0x19a2   :  { %v2357_v54 = vsel %vm2356_vm14, %v3349_v34, %v2353_v37  ;;  %v2398_v12 = vmul.f32 %v3351_v4, %v2397_v53 }
0x19a3   :  { %v2358_v51 = vadd.f32 1.0, %v2357_v54  ;;  %v2375_v25 = vsub.f32 1.0, %v2357_v54 }
0x19a4   :  { %v2402_v22 = vsel %vm2401_vm2, %v3351_v4, %v2398_v12  ;;  %v2374_v12 = vsel %vm2373_vm3, 1.0, %v3563_v7 }
0x19a5   :  { %v2359_v56 = vmul.f32 0.5, %v2358_v51  ;;  %v2376_v8 = vmul.f32 0.5, %v2375_v25  ;;  %v2403_v42 = vadd.f32 1.0, %v2402_v22  ;;  %v2418_v47 = vsub.f32 1.0, %v2402_v22 }
0x19a7   :  { %v2360_v10 = vmax.f32 %v2359_v56, 0.0  ;;  %v2377_v0 = vmax.f32 %v2376_v8, 0.0  ;;  %v2404_v28 = vmul.f32 0.5, %v2403_v42  ;;  %v2419_v9 = vmul.f32 0.5, %v2418_v47 }
0x19a9   :  { %3352 = vrsqrt.f32 %v2360_v10  ;;  %v2405_v6 = vmax.f32 %v2404_v28, 0.0  ;;  %v2420_v15 = vmax.f32 %v2419_v9, 0.0  ;;  %vm2368_vm4 = vcmp.eq.f32.partialorder %v2360_v10, inf }
0x19aa   :  { %3354 = vrsqrt.f32 %v2377_v0  ;;  %vm2385_vm5 = vcmp.eq.f32.partialorder %v2377_v0, inf  ;;  %v2388_v57 = vand.u32 2147483648, %v2377_v0  ;;  %vm2387_vm7 = vcmp.eq.f32.partialorder %v2377_v0, 0.0 }
0x19ab   :  { %3356 = vrsqrt.f32 %v2405_v6  ;;  %v2371_v54 = vand.u32 2147483648, %v2360_v10  ;;  %vm2370_vm8 = vcmp.eq.f32.partialorder %v2360_v10, 0.0  ;;  %vm2413_vm9 = vcmp.eq.f32.partialorder %v2405_v6, inf }
0x19ac   :  { %3358 = vrsqrt.f32 %v2420_v15  ;;  %vm2428_vm10 = vcmp.eq.f32.partialorder %v2420_v15, inf  ;;  %vm2430_vm11 = vcmp.eq.f32.partialorder %v2420_v15, 0.0  ;;  %v2431_v8 = vand.u32 2147483648, %v2420_v15 }
0x19ad   :  { %vm2415_vm12 = vcmp.eq.f32.partialorder %v2405_v6, 0.0 }
0x19af   :  { %v3353_v45 = vpop.eup %3352 }
0x19b0   :  { %v3355_v19 = vpop.eup %3354  ;;  %v2362_v20 = vmul.f32 %v3353_v45, %v2360_v10 }
0x19b1   :  { %v2379_v29 = vmul.f32 %v3355_v19, %v2377_v0  ;;  %v3357_v21 = vpop.eup %3356 }
0x19b2   :  { %v2363_v14 = vmul.f32 %v3353_v45, %v2362_v20  ;;  %v3359_v35 = vpop.eup %3358  ;;  %v2407_v11 = vmul.f32 %v3357_v21, %v2405_v6 }
0x19b3   :  { %v2380_v31 = vmul.f32 %v3355_v19, %v2379_v29  ;;  %v2422_v50 = vmul.f32 %v3359_v35, %v2420_v15 }
0x19b4   :  { %v2364_v5 = vmul.f32 0.5, %v2363_v14  ;;  %v2408_v26 = vmul.f32 %v3357_v21, %v2407_v11 }
0x19b5   :  { %v2381_v24 = vmul.f32 0.5, %v2380_v31  ;;  %v2423_v48 = vmul.f32 %v3359_v35, %v2422_v50 }
0x19b6   :  { %v2365_v39 = vsub.f32 1.5, %v2364_v5  ;;  %v2409_v49 = vmul.f32 0.5, %v2408_v26 }
0x19b7   :  { %v2382_v3 = vsub.f32 1.5, %v2381_v24  ;;  %v2424_v43 = vmul.f32 0.5, %v2423_v48 }
0x19b8   :  { %v2366_v1 = vmul.f32 %v3353_v45, %v2365_v39  ;;  %v2410_v18 = vsub.f32 1.5, %v2409_v49  ;;  %v2416_v45 = vand.u32 2147483648, %v2405_v6 }
0x19b9   :  { %v2383_v34 = vmul.f32 %v3355_v19, %v2382_v3  ;;  %v2425_v17 = vsub.f32 1.5, %v2424_v43 }
0x19ba   :  { %v2367_v4 = vmul.f32 %v2366_v1, %v2360_v10  ;;  %v2411_v27 = vmul.f32 %v3357_v21, %v2410_v18 }
0x19bb   :  { %v2384_v55 = vmul.f32 %v2383_v34, %v2377_v0  ;;  %v2426_v53 = vmul.f32 %v3359_v35, %v2425_v17 }
0x19bc   :  { %v2369_v63 = vsel %vm2368_vm4, %v2360_v10, %v2367_v4  ;;  %v2412_v25 = vmul.f32 %v2411_v27, %v2405_v6 }
0x19bd   :  { %v2386_v37 = vsel %vm2385_vm5, %v2377_v0, %v2384_v55  ;;  %v2427_v56 = vmul.f32 %v2426_v53, %v2420_v15  ;;  %v2372_v44 = vsel %vm2370_vm8, %v2371_v54, %v2369_v63 }
0x19be   :  { %v2389_v51 = vsel %vm2387_vm7, %v2388_v57, %v2386_v37  ;;  %v2414_v28 = vsel %vm2413_vm9, %v2405_v6, %v2412_v25 }
0x19bf   :  { %v2390_v22 = vmul.f32 %v2389_v51, %v2374_v12  ;;  %v2429_v9 = vsel %vm2428_vm10, %v2420_v15, %v2427_v56  ;;  %v2417_v14 = vsel %vm2415_vm12, %v2416_v45, %v2414_v28 }
0x19c0   :  { %v2432_v0 = vsel %vm2430_vm11, %v2431_v8, %v2429_v9 }
0x19c1   :  { %v2433_v42 = vsub.f32 %v2372_v44, %v2390_v22  ;;  %v2435_v47 = vadd.f32 %v2390_v22, %v2372_v44  ;;  %v2438_v29 = vsub.f32 0.0, %v2432_v0 }
0x19c3   :  { %v2434_v19 = vmul.f32 0.70710677, %v2433_v42  ;;  %v2436_v20 = vmul.f32 0.70710677, %v2435_v47 }
0x19c5   :  { %v2440_v21 = vmul.f32 %v2436_v20, %v2417_v14  ;;  %v2439_v10 = vmul.f32 %v2438_v29, %v2434_v19  ;;  %v2437_v31 = vmul.f32 %v2434_v19, %v2417_v14  ;;  %v2441_v35 = vmul.f32 %v2436_v20, %v2432_v0 }
0x19c7   :  { %2450 = vperm.xlu1 %3203, %v2440_v21   ;;  %2457 = vperm.xlu2 %3204, %v2439_v10  }
0x19c8   :  { %2444 = vperm.xlu0 %3202, %v2437_v31  }
0x19cf   :  { %2463 = vperm.xlu1 %3203, %v2441_v35   ;;  %3205 = vset.pattern.permute.xlu2 %v3561_v32 }
0x19d0   :  { %3206 = vset.pattern.permute.xlu0 %v3561_v32  ;;  %2469 = vperm.xlu2 %3205, %v2437_v31  }
0x19d1   :  { %2474 = vperm.xlu0 %3206, %v2440_v21  }
0x19d7   :  { %3207 = vset.pattern.permute.xlu1 %v3561_v32 }
0x19d8   :  { %2480 = vperm.xlu1 %3207, %v2439_v10   ;;  %2485 = vperm.xlu2 %3205, %v2441_v35  }
0x19d9   :  { %3210 = vset.pattern.permute.xlu0 %v3564_v40 }
0x19da   :  { %2508 = vperm.xlu0 %3210, %v2439_v10  }
0x19e0   :  { %3208 = vset.pattern.permute.xlu1 %v3564_v40  ;;  %3209 = vset.pattern.permute.xlu2 %v3564_v40 }
0x19e1   :  { %2497 = vperm.xlu1 %3208, %v2437_v31   ;;  %2502 = vperm.xlu2 %3209, %v2440_v21  }
0x19e2   :  { %3213 = vset.pattern.permute.xlu0 %v3565_v41 }
0x19e3   :  { %2541 = vperm.xlu0 %3213, %v2441_v35  }
0x19e9   :  { %2513 = vperm.xlu1 %3208, %v2441_v35   ;;  %3211 = vset.pattern.permute.xlu2 %v3565_v41 }
0x19ea   :  { %2525 = vperm.xlu2 %3211, %v2437_v31  }
0x19eb   :  { %3214 = vset.pattern.permute.xlu0 %v3562_v33 }
0x19f1   :  { %3212 = vset.pattern.permute.xlu1 %v3565_v41 }
0x19f2   :  { %2530 = vperm.xlu1 %3212, %v2440_v21   ;;  %2536 = vperm.xlu2 %3211, %v2439_v10  }
0x19fa   :  { %3215 = vset.pattern.permute.xlu1 %v3562_v33  ;;  %3216 = vset.pattern.permute.xlu2 %v3562_v33 }
0x1a21   :  { %v2458_v6 = vpop.permute.xlu2 %2457 }
0x1a22   :  { %v2460_v55 = vmul.f32 %v2458_v6, %v3735_v62 }
0x1a2a   :  { %v2470_v5 = vpop.permute.xlu2 %2469 }
0x1a2b   :  { %v2472_v17 = vmul.f32 %v2470_v5, %v3729_v58 }
0x1a32   :  { %v2486_v50 = vpop.permute.xlu2 %2485 }
0x1a33   :  { %v2488_v49 = vmul.f32 %v2486_v50, %v3731_v59 }
0x1a39   :  { %v2451_v15 = vpop.permute.xlu1 %2450 }
0x1a3a   :  { %v2445_v24 = vpop.permute.xlu0 %2444  ;;  %v2453_v34 = vmul.f32 %v2451_v15, %v3733_v60 }
0x1a3b   :  { %v2503_v3 = vpop.permute.xlu2 %2502  ;;  %v2447_v43 = vmul.f32 %v2445_v24, %v3735_v62 }
0x1a3c   :  { %v2505_v44 = vmul.f32 %v2503_v3, %v3747_v13 }
0x1a3d   :  { %v2454_v63 = vadd.f32 %v2453_v34, %v2447_v43 }
0x1a41   :  { %v2464_v11 = vpop.permute.xlu1 %2463 }
0x1a42   :  { %v2466_v33 = vmul.f32 %v2464_v11, %v3733_v60 }
0x1a43   :  { %v2475_v26 = vpop.permute.xlu0 %2474 }
0x1a44   :  { %v2477_v4 = vmul.f32 %v2475_v26, %v3731_v59  ;;  %v2526_v27 = vpop.permute.xlu2 %2525  ;;  %v2467_v37 = vadd.f32 %v2466_v33, %v2460_v55 }
0x1a45   :  { %v2528_v31 = vmul.f32 %v2526_v27, %v3770_v36 }
0x1a46   :  { %v2478_v53 = vadd.f32 %v2477_v4, %v2472_v17 }
0x1a48   :  { %v2490_v8 = vmul.f32 %v2478_v53, %v2454_v63  ;;  %v2494_v42 = vmul.f32 %v2478_v53, %v2467_v37 }
0x1a4a   :  { %v2481_v39 = vpop.permute.xlu1 %2480 }
0x1a4b   :  { %v2483_v48 = vmul.f32 %v2481_v39, %v3729_v58 }
0x1a4c   :  { %v2509_v18 = vpop.permute.xlu0 %2508  ;;  %v2537_v29 = vpop.permute.xlu2 %2536 }
0x1a4d   :  { %v2489_v57 = vadd.f32 %v2488_v49, %v2483_v48  ;;  %v2511_v22 = vmul.f32 %v2509_v18, %v3752_v16  ;;  %v2539_v6 = vmul.f32 %v2537_v29, %v3770_v36 }
0x1a4f   :  { %v2491_v54 = vmul.f32 %v2489_v57, %v2467_v37  ;;  %v2493_v12 = vmul.f32 %v2489_v57, %v2454_v63 }
0x1a51   :  { %v2492_v28 = vsub.f32 %v2490_v8, %v2491_v54  ;;  %v2495_v9 = vadd.f32 %v2494_v42, %v2493_v12 }
0x1a53   :  { %v2498_v1 = vpop.permute.xlu1 %2497 }
0x1a54   :  { %v2500_v51 = vmul.f32 %v2498_v1, %v3752_v16 }
0x1a55   :  { %v2542_v0 = vpop.permute.xlu0 %2541 }
0x1a56   :  { %v2506_v45 = vadd.f32 %v2505_v44, %v2500_v51  ;;  %v2544_v10 = vmul.f32 %v2542_v0, %v3775_v38 }
0x1a58   :  { %v2518_v14 = vmul.f32 %v2506_v45, %v2492_v28  ;;  %v2522_v21 = vmul.f32 %v2506_v45, %v2495_v9  ;;  %v2545_v24 = vadd.f32 %v2544_v10, %v2539_v6 }
0x1a5b   :  { %v2514_v25 = vpop.permute.xlu1 %2513 }
0x1a5c   :  { %v2516_v56 = vmul.f32 %v2514_v25, %v3747_v13 }
0x1a5e   :  { %v2517_v47 = vadd.f32 %v2516_v56, %v2511_v22 }
0x1a60   :  { %v2519_v19 = vmul.f32 %v2517_v47, %v2495_v9  ;;  %v2521_v20 = vmul.f32 %v2517_v47, %v2492_v28  ;;  %v2663_v9 = vld [vmem:[#allocation2 + $0x38] sm:$0xff] }
0x1a62   :  { %v2520_v15 = vsub.f32 %v2518_v14, %v2519_v19  ;;  %v2523_v5 = vadd.f32 %v2522_v21, %v2521_v20  ;;  %v3426_v20 = vld [vmem:[%s4496_s3] ss:$0 sm:$0xff] }
0x1a64   :  { %v2531_v35 = vpop.permute.xlu1 %2530  ;;  %v2547_v26 = vmul.f32 %v2545_v24, %v2523_v5  ;;  %v2549_v3 = vmul.f32 %v2545_v24, %v2520_v15 }
0x1a65   :  { %v2533_v11 = vmul.f32 %v2531_v35, %v3775_v38 }
0x1a67   :  { %v2534_v50 = vadd.f32 %v2533_v11, %v2528_v31 }
0x1a69   :  { %v2546_v39 = vmul.f32 %v2534_v50, %v2520_v15  ;;  %v2550_v48 = vmul.f32 %v2534_v50, %v2523_v5 }
0x1a6b   :  { %v2548_v1 = vsub.f32 %v2546_v39, %v2547_v26  ;;  %v2551_v49 = vadd.f32 %v2550_v48, %v2549_v3 }
0x1a6d   :  { %3110 = vmatmul.msk.f32.vlgmr.msra.gmra.mxu0 %vm365_vm1, %v2551_v49  ;;  %3111 = vmatmul.msk.f32.vlgmr.msrb.gmra.mxu2 %vm365_vm1, %v2548_v1 }
0x1a6e   :  { %2956 = vmatpush.msrb.mxu2 %v4275_v23  ;;  %2933 = vmatpush.msra.mxu0 %v4354_v61 }
0x1a70   :  { %2957 = vmatpush.msrb.mxu2 %v4282_v2  ;;  %2934 = vmatpush.msra.mxu0 %v4361_v52 }
0x1a75   :  { %3113 = vmatmul.msk.f32.vlgmr.msrb.gmra.mxu0 %vm99_vm0, %v2663_v9 }
0x1aea   :  { %v2572_v34 = vpop.f32.mrf.mxu0 }
0x1af0   :  { %v2595_v43 = vpop.f32.mrf.mxu2 }
0x1af1   :  { %v2596_v33 = vadd.f32 %v2595_v43, %v2572_v34 }
0x1af3   :  { %v2598_v4 = vmul.f32 %v2596_v33, %v2596_v33 }
0x1af5   :  { %2615 = vmatmul.f32.vlgmr.msra.gmra.mxu1 %v2598_v4 }
0x1b72   :  { %v2616_v18 = vpop.f32.mrf.mxu1 }
0x1b73   :  { %v2617_v55 = vadd.f32 %v4289_v46, %v2616_v18 }
0x1b75   :  { %3360 = vtanh.f32 %v2617_v55  ;;  %v3112_v57 = vmul.f32 -1.442695, %v2617_v55 }
0x1b77   :  { %3362 = vpow2.f32 %v3112_v57 }
0x1b7b   :  { %v3361_v17 = vpop.eup %3360 }
0x1b7c   :  { %2641 = vrot.lane.b32.xlu1 %v3361_v17, %s3566_s12 }
0x1b7d   :  { %v3363_v23 = vpop.eup %3362 }
0x1b7e   :  { %v2622_v61 = vadd.f32 1.0, %v3363_v23 }
0x1b80   :  { %3364 = vrcp.f32 %v2622_v61  ;;  %v2634_v53 = vand.u32 2147483648, %v2622_v61  ;;  %vm2628_vm14 = vweird.f32 %v2622_v61  ;;  %v2632_v54 = vand.u32 2147483647, %v2622_v61 }
0x1b82   :  { %v2635_v12 = vor.u32 1.1754944e-38, %v2634_v53  ;;  %vm2633_vm2 = vcmp.eq.f32.partialorder %v2632_v54, 8.507059e+37 }
0x1b86   :  { %v3365_v2 = vpop.eup %3364 }
0x1b87   :  { %v2624_v27 = vmul.f32 %v3365_v2, %v2622_v61  ;;  %vm2629_vm13 = vweird.f32 %v3365_v2 }
0x1b88   :  { %vm2630_vm15 = vmor %vm2628_vm14, %vm2629_vm13 }
0x1b89   :  { %v2625_v52 = vsub.f32 1.0, %v2624_v27 }
0x1b8b   :  { %v2626_v63 = vmul.f32 %v3365_v2, %v2625_v52 }
0x1b8d   :  { %v2627_v37 = vadd.f32 %v3365_v2, %v2626_v63 }
0x1b8f   :  { %v2631_v46 = vsel %vm2630_vm15, %v3365_v2, %v2627_v37 }
0x1b90   :  { %v2636_v25 = vsel %vm2633_vm2, %v2635_v12, %v2631_v46 }
0x1b91   :  { %v2639_v56 = vmul.f32 %v2636_v25, %v4368_v30  ;;  %v2684_v30 = vpop.f32.mrf.mxu0 }
0x1bee   :  { %v2642_v51 = vpop.permute.xlu1 %2641 }
0x1bef   :  { %v2644_v22 = vmul.f32 %v2642_v51, %v2636_v25 }
0x1bf1   :  { %2646 = vrot.lane.b32.xlu2 %v2644_v22, %s3566_s12 }
0x1c4b   :  { %v2647_v44 = vpop.permute.xlu2 %2646 }
0x1c4c   :  { %v4426_v8 = vadd.f32 %v2647_v44, %v2639_v56 }
0x1c4e   :  { %3366 = vtanh.f32 %v4426_v8 }
0x1c54   :  { %v3367_v42 = vpop.eup %3366 }
0x1c55   :  { %2652 = vrot.lane.b32.xlu1 %v3367_v42, %s3566_s12 }
0x1cc7   :  { %v2653_v47 = vpop.permute.xlu1 %2652 }
0x1cc8   :  { %v2655_v28 = vmul.f32 %v2653_v47, %v2636_v25 }
0x1cca   :  { %2657 = vrot.lane.b32.xlu2 %v2655_v28, %s3567_s13 }
0x1d24   :  { %v2658_v45 = vpop.permute.xlu2 %2657 }
0x1d25   :  { %2661 = vst.msk [vmem:[#allocation7 + $0x30] sm:$0xff] %vm123_vm6, %v2658_v45  ;;  %3114 = vmatmul.msk.f32.vlgmr.msra.gmra.mxu2 %vm123_vm6, %v2658_v45 }
0x1da8   :  { %v2706_v0 = vpop.f32.mrf.mxu2 }
0x1da9   :  { %v2707_v19 = vadd.f32 %v2706_v0, %v2684_v30 }
0x1dab   :  { %v4437_v29 = vadd.f32 %v3426_v20, %v2707_v19 }
0x1dad   :  { %v2710_v14 = vmul.f32 %v4437_v29, %v4437_v29  ;;  %vm2737_vm9 = vcmp.ge.f32.partialorder %v4437_v29, 0.0 }
0x1daf   :  { %v2711_v21 = vadd.f32 1.0, %v2710_v14  ;;  %v2755_v10 = vmul.f32 %v2710_v14, %v2710_v14 }
0x1db1   :  { %3368 = vrsqrt.f32 %v2711_v21  ;;  %v2756_v31 = vadd.f32 1.0, %v2755_v10  ;;  %vm2718_vm3 = vweird.f32 %v2711_v21 }
0x1db3   :  { %3370 = vrsqrt.f32 %v2756_v31  ;;  %vm2763_vm7 = vweird.f32 %v2756_v31 }
0x1db7   :  { %v3369_v35 = vpop.eup %3368 }
0x1db8   :  { %v2713_v6 = vmul.f32 %v3369_v35, %v2711_v21  ;;  %vm2719_vm0 = vweird.f32 %v3369_v35 }
0x1db9   :  { %v3371_v15 = vpop.eup %3370  ;;  %vm2720_vm5 = vmor %vm2718_vm3, %vm2719_vm0 }
0x1dba   :  { %v2714_v5 = vmul.f32 %v3369_v35, %v2713_v6  ;;  %v2758_v11 = vmul.f32 %v3371_v15, %v2756_v31  ;;  %vm2764_vm4 = vweird.f32 %v3371_v15 }
0x1dbb   :  { %vm2765_vm8 = vmor %vm2763_vm7, %vm2764_vm4 }
0x1dbc   :  { %v2715_v24 = vmul.f32 0.5, %v2714_v5  ;;  %v2759_v50 = vmul.f32 %v3371_v15, %v2758_v11 }
0x1dbe   :  { %v2716_v39 = vsub.f32 1.5, %v2715_v24  ;;  %v2760_v26 = vmul.f32 0.5, %v2759_v50  ;;  %v2738_v50 = vsel %vm2737_vm9, 1.0, %v3563_v7 }
0x1dc0   :  { %v2717_v3 = vmul.f32 %v3369_v35, %v2716_v39  ;;  %v2761_v48 = vsub.f32 1.5, %v2760_v26 }
0x1dc2   :  { %v2721_v1 = vsel %vm2720_vm5, %v3369_v35, %v2717_v3  ;;  %v2762_v49 = vmul.f32 %v3371_v15, %v2761_v48 }
0x1dc3   :  { %v2722_v34 = vadd.f32 1.0, %v2721_v1  ;;  %v2739_v43 = vsub.f32 1.0, %v2721_v1 }
0x1dc4   :  { %v2766_v33 = vsel %vm2765_vm8, %v3371_v15, %v2762_v49 }
0x1dc5   :  { %v2723_v4 = vmul.f32 0.5, %v2722_v34  ;;  %v2740_v18 = vmul.f32 0.5, %v2739_v43  ;;  %v2767_v55 = vadd.f32 1.0, %v2766_v33  ;;  %v2782_v17 = vsub.f32 1.0, %v2766_v33 }
0x1dc7   :  { %v2724_v57 = vmax.f32 %v2723_v4, 0.0  ;;  %v2741_v23 = vmax.f32 %v2740_v18, 0.0  ;;  %v2768_v61 = vmul.f32 0.5, %v2767_v55  ;;  %v2783_v2 = vmul.f32 0.5, %v2782_v17 }
0x1dc9   :  { %3372 = vrsqrt.f32 %v2724_v57  ;;  %v2769_v27 = vmax.f32 %v2768_v61, 0.0  ;;  %v2784_v52 = vmax.f32 %v2783_v2, 0.0  ;;  %vm2732_vm10 = vcmp.eq.f32.partialorder %v2724_v57, inf }
0x1dca   :  { %3374 = vrsqrt.f32 %v2741_v23  ;;  %vm2749_vm11 = vcmp.eq.f32.partialorder %v2741_v23, inf  ;;  %v2752_v35 = vand.u32 2147483648, %v2741_v23  ;;  %vm2751_vm12 = vcmp.eq.f32.partialorder %v2741_v23, 0.0 }
0x1dcb   :  { %3376 = vrsqrt.f32 %v2769_v27  ;;  %v2735_v24 = vand.u32 2147483648, %v2724_v57  ;;  %vm2734_vm13 = vcmp.eq.f32.partialorder %v2724_v57, 0.0  ;;  %vm2777_vm14 = vcmp.eq.f32.partialorder %v2769_v27, inf }
0x1dcc   :  { %3378 = vrsqrt.f32 %v2784_v52  ;;  %vm2792_vm15 = vcmp.eq.f32.partialorder %v2784_v52, inf  ;;  %vm2794_vm2 = vcmp.eq.f32.partialorder %v2784_v52, 0.0  ;;  %v2795_v1 = vand.u32 2147483648, %v2784_v52 }
0x1dcd   :  { %v2780_v4 = vand.u32 2147483648, %v2769_v27  ;;  %vm2779_vm0 = vcmp.eq.f32.partialorder %v2769_v27, 0.0 }
0x1dcf   :  { %v3373_v63 = vpop.eup %3372 }
0x1dd0   :  { %v3375_v37 = vpop.eup %3374  ;;  %v2726_v53 = vmul.f32 %v3373_v63, %v2724_v57 }
0x1dd1   :  { %v2743_v54 = vmul.f32 %v3375_v37, %v2741_v23  ;;  %v3377_v12 = vpop.eup %3376 }
0x1dd2   :  { %v2727_v46 = vmul.f32 %v3373_v63, %v2726_v53  ;;  %v3379_v25 = vpop.eup %3378  ;;  %v2771_v56 = vmul.f32 %v3377_v12, %v2769_v27 }
0x1dd3   :  { %v2744_v51 = vmul.f32 %v3375_v37, %v2743_v54  ;;  %v2786_v42 = vmul.f32 %v3379_v25, %v2784_v52 }
0x1dd4   :  { %v2728_v22 = vmul.f32 0.5, %v2727_v46  ;;  %v2772_v28 = vmul.f32 %v3377_v12, %v2771_v56 }
0x1dd5   :  { %v2745_v44 = vmul.f32 0.5, %v2744_v51  ;;  %v2787_v45 = vmul.f32 %v3379_v25, %v2786_v42 }
0x1dd6   :  { %v2729_v47 = vsub.f32 1.5, %v2728_v22  ;;  %v2773_v0 = vmul.f32 0.5, %v2772_v28 }
0x1dd7   :  { %v2746_v9 = vsub.f32 1.5, %v2745_v44  ;;  %v2788_v20 = vmul.f32 0.5, %v2787_v45 }
0x1dd8   :  { %v2730_v30 = vmul.f32 %v3373_v63, %v2729_v47  ;;  %v2774_v21 = vsub.f32 1.5, %v2773_v0 }
0x1dd9   :  { %v2747_v19 = vmul.f32 %v3375_v37, %v2746_v9  ;;  %v2789_v31 = vsub.f32 1.5, %v2788_v20 }
0x1dda   :  { %v2731_v14 = vmul.f32 %v2730_v30, %v2724_v57  ;;  %v2775_v6 = vmul.f32 %v3377_v12, %v2774_v21 }
0x1ddb   :  { %v2748_v10 = vmul.f32 %v2747_v19, %v2741_v23  ;;  %v2790_v11 = vmul.f32 %v3379_v25, %v2789_v31 }
0x1ddc   :  { %v2733_v15 = vsel %vm2732_vm10, %v2724_v57, %v2731_v14  ;;  %v2776_v26 = vmul.f32 %v2775_v6, %v2769_v27 }
0x1ddd   :  { %v2750_v5 = vsel %vm2749_vm11, %v2741_v23, %v2748_v10  ;;  %v2791_v48 = vmul.f32 %v2790_v11, %v2784_v52  ;;  %v2736_v29 = vsel %vm2734_vm13, %v2735_v24, %v2733_v15 }
0x1dde   :  { %v2753_v39 = vsel %vm2751_vm12, %v2752_v35, %v2750_v5  ;;  %v2778_v43 = vsel %vm2777_vm14, %v2769_v27, %v2776_v26 }
0x1ddf   :  { %v2754_v3 = vmul.f32 %v2753_v39, %v2738_v50  ;;  %v2793_v33 = vsel %vm2792_vm15, %v2784_v52, %v2791_v48  ;;  %v2781_v23 = vsel %vm2779_vm0, %v2780_v4, %v2778_v43 }
0x1de0   :  { %v2796_v18 = vsel %vm2794_vm2, %v2795_v1, %v2793_v33 }
0x1de1   :  { %v2797_v49 = vsub.f32 %v2736_v29, %v2754_v3  ;;  %v2799_v34 = vadd.f32 %v2754_v3, %v2736_v29  ;;  %v2802_v7 = vsub.f32 0.0, %v2796_v18 }
0x1de3   :  { %v2798_v55 = vmul.f32 0.70710677, %v2797_v49  ;;  %v2800_v17 = vmul.f32 0.70710677, %v2799_v34 }
0x1de5   :  { %v2804_v61 = vmul.f32 %v2800_v17, %v2781_v23  ;;  %v2803_v57 = vmul.f32 %v2802_v7, %v2798_v55  ;;  %v2801_v2 = vmul.f32 %v2798_v55, %v2781_v23  ;;  %v2805_v63 = vmul.f32 %v2800_v17, %v2796_v18 }
0x1de7   :  { %2814 = vperm.xlu1 %3215, %v2804_v61   ;;  %2821 = vperm.xlu2 %3216, %v2803_v57  }
0x1de8   :  { %2808 = vperm.xlu0 %3214, %v2801_v2  }
0x1def   :  { %2827 = vperm.xlu1 %3215, %v2805_v63   ;;  %3217 = vset.pattern.permute.xlu2 %v3561_v32 }
0x1df0   :  { %3218 = vset.pattern.permute.xlu0 %v3561_v32  ;;  %2833 = vperm.xlu2 %3217, %v2801_v2  }
0x1df1   :  { %2838 = vperm.xlu0 %3218, %v2804_v61  }
0x1df7   :  { %3219 = vset.pattern.permute.xlu1 %v3561_v32 }
0x1df8   :  { %2844 = vperm.xlu1 %3219, %v2803_v57   ;;  %2849 = vperm.xlu2 %3217, %v2805_v63  }
0x1df9   :  { %3222 = vset.pattern.permute.xlu0 %v3564_v40 }
0x1dfa   :  { %2872 = vperm.xlu0 %3222, %v2803_v57  }
0x1e00   :  { %3220 = vset.pattern.permute.xlu1 %v3564_v40  ;;  %3221 = vset.pattern.permute.xlu2 %v3564_v40 }
0x1e01   :  { %2861 = vperm.xlu1 %3220, %v2801_v2   ;;  %2866 = vperm.xlu2 %3221, %v2804_v61  }
0x1e02   :  { %3225 = vset.pattern.permute.xlu0 %v3565_v41 }
0x1e03   :  { %2905 = vperm.xlu0 %3225, %v2805_v63  }
0x1e09   :  { %2877 = vperm.xlu1 %3220, %v2805_v63   ;;  %3223 = vset.pattern.permute.xlu2 %v3565_v41 }
0x1e0a   :  { %2889 = vperm.xlu2 %3223, %v2801_v2  }
0x1e11   :  { %3224 = vset.pattern.permute.xlu1 %v3565_v41 }
0x1e12   :  { %2894 = vperm.xlu1 %3224, %v2804_v61   ;;  %2900 = vperm.xlu2 %3223, %v2803_v57  }
0x1e41   :  { %v2822_v32 = vpop.permute.xlu2 %2821 }
0x1e42   :  { %v2824_v28 = vmul.f32 %v2822_v32, %v3735_v62 }
0x1e4a   :  { %v2834_v52 = vpop.permute.xlu2 %2833 }
0x1e4b   :  { %v2836_v9 = vmul.f32 %v2834_v52, %v3729_v58 }
0x1e52   :  { %v2850_v54 = vpop.permute.xlu2 %2849 }
0x1e53   :  { %v2852_v22 = vmul.f32 %v2850_v54, %v3731_v59 }
0x1e59   :  { %v2815_v27 = vpop.permute.xlu1 %2814 }
0x1e5a   :  { %v2809_v53 = vpop.permute.xlu0 %2808  ;;  %v2817_v56 = vmul.f32 %v2815_v27, %v3733_v60 }
0x1e5b   :  { %v2867_v12 = vpop.permute.xlu2 %2866  ;;  %v2811_v41 = vmul.f32 %v2809_v53, %v3735_v62 }
0x1e5d   :  { %v2818_v0 = vadd.f32 %v2817_v56, %v2811_v41 }
0x1e61   :  { %v2828_v37 = vpop.permute.xlu1 %2827 }
0x1e62   :  { %v2830_v44 = vmul.f32 %v2828_v37, %v3733_v60 }
0x1e63   :  { %v2839_v46 = vpop.permute.xlu0 %2838 }
0x1e64   :  { %v2841_v42 = vmul.f32 %v2839_v46, %v3731_v59  ;;  %v2890_v30 = vpop.permute.xlu2 %2889  ;;  %v2831_v19 = vadd.f32 %v2830_v44, %v2824_v28  ;;  %v2869_v59 = vmul.f32 %v2867_v12, %v3747_v13 }
0x1e66   :  { %v2842_v20 = vadd.f32 %v2841_v42, %v2836_v9 }
0x1e68   :  { %v2854_v6 = vmul.f32 %v2842_v20, %v2818_v0  ;;  %v2858_v62 = vmul.f32 %v2842_v20, %v2831_v19 }
0x1e6a   :  { %v2845_v40 = vpop.permute.xlu1 %2844 }
0x1e6b   :  { %v2847_v51 = vmul.f32 %v2845_v40, %v3729_v58 }
0x1e6c   :  { %v2873_v47 = vpop.permute.xlu0 %2872  ;;  %v2901_v26 = vpop.permute.xlu2 %2900 }
0x1e6d   :  { %v2853_v45 = vadd.f32 %v2852_v22, %v2847_v51  ;;  %v2875_v35 = vmul.f32 %v2873_v47, %v3752_v16  ;;  %v2903_v49 = vmul.f32 %v2901_v26, %v3770_v36 }
0x1e6f   :  { %v2855_v14 = vmul.f32 %v2853_v45, %v2831_v19  ;;  %v2857_v21 = vmul.f32 %v2853_v45, %v2818_v0 }
0x1e71   :  { %v2856_v58 = vsub.f32 %v2854_v6, %v2855_v14  ;;  %v2859_v5 = vadd.f32 %v2858_v62, %v2857_v21 }
0x1e73   :  { %v2862_v25 = vpop.permute.xlu1 %2861 }
0x1e74   :  { %v2864_v10 = vmul.f32 %v2862_v25, %v3752_v16  ;;  %v2892_v16 = vmul.f32 %v2890_v30, %v3770_v36 }
0x1e75   :  { %v2906_v24 = vpop.permute.xlu0 %2905 }
0x1e76   :  { %v2870_v11 = vadd.f32 %v2869_v59, %v2864_v10  ;;  %v2908_v29 = vmul.f32 %v2906_v24, %v3775_v38 }
0x1e78   :  { %v2882_v3 = vmul.f32 %v2870_v11, %v2856_v58  ;;  %v2886_v48 = vmul.f32 %v2870_v11, %v2859_v5  ;;  %v2909_v33 = vadd.f32 %v2908_v29, %v2903_v49 }
0x1e7b   :  { %v2878_v31 = vpop.permute.xlu1 %2877 }
0x1e7c   :  { %v2880_v60 = vmul.f32 %v2878_v31, %v3747_v13 }
0x1e7e   :  { %v2881_v15 = vadd.f32 %v2880_v60, %v2875_v35 }
0x1e80   :  { %v2883_v50 = vmul.f32 %v2881_v15, %v2859_v5  ;;  %v2885_v39 = vmul.f32 %v2881_v15, %v2856_v58 }
0x1e82   :  { %v2884_v13 = vsub.f32 %v2882_v3, %v2883_v50  ;;  %v2887_v34 = vadd.f32 %v2886_v48, %v2885_v39 }
0x1e84   :  { %v2895_v1 = vpop.permute.xlu1 %2894  ;;  %v2911_v55 = vmul.f32 %v2909_v33, %v2887_v34  ;;  %v2913_v17 = vmul.f32 %v2909_v33, %v2884_v13 }
0x1e85   :  { %v2897_v43 = vmul.f32 %v2895_v1, %v3775_v38  ;;  %v3427_v38 = vld [vmem:[%s4500_s7] ss:$0 sm:$0xff]  ;;  %s3568_s7 = smov [#allocation7]  }
0x1e86   :  { %s3032_s21 = sshll.u32 %s3568_s7, 4  ;;  %s3033_s21 = int_to_ptr.vmem [resolvable:$true] %s3032_s21 }
0x1e87   :  { %v2898_v4 = vadd.f32 %v2897_v43, %v2892_v16 }
0x1e89   :  { %v2910_v18 = vmul.f32 %v2898_v4, %v2884_v13  ;;  %v2914_v7 = vmul.f32 %v2898_v4, %v2887_v34 }
0x1e8b   :  { %v2912_v23 = vsub.f32 %v2910_v18, %v2911_v55  ;;  %v2915_v61 = vadd.f32 %v2914_v7, %v2913_v17 }
0x1e8d   :  { %3115 = vmatmul.msk.f32.vlgmr.msra.gmra.mxu0 %vm365_vm1, %v2915_v61  ;;  %3116 = vmatmul.msk.f32.vlgmr.msrb.gmra.mxu2 %vm365_vm1, %v2912_v23 }
0x1f0a   :  { %v2936_v57 = vpop.f32.mrf.mxu0 }
0x1f10   :  { %v2959_v2 = vpop.f32.mrf.mxu2 }
0x1f11   :  { %v2960_v63 = vadd.f32 %v2959_v2, %v2936_v57 }
0x1f13   :  { %v2962_v36 = vmul.f32 %v2960_v63, %v2960_v63 }
0x1f15   :  { %2979 = vmatmul.f32.vlgmr.msrb.gmra.mxu3 %v2962_v36 }
0x1f98   :  { %v2980_v32 = vpop.f32.mrf.mxu3 }
0x1f99   :  { %v2981_v27 = vadd.f32 %v3427_v38, %v2980_v32 }
0x1f9b   :  { %3380 = vtanh.f32 %v2981_v27  ;;  %v3117_v37 = vmul.f32 -1.442695, %v2981_v27 }
0x1f9d   :  { %3382 = vpow2.f32 %v3117_v37 }
0x1fa1   :  { %v3381_v52 = vpop.eup %3380 }
0x1fa2   :  { %3005 = vrot.lane.b32.xlu1 %v3381_v52, %s3566_s12 }
0x1fa3   :  { %v3383_v53 = vpop.eup %3382 }
0x1fa4   :  { %v2986_v54 = vadd.f32 1.0, %v3383_v53 }
0x1fa6   :  { %3384 = vrcp.f32 %v2986_v54  ;;  %v2998_v22 = vand.u32 2147483648, %v2986_v54  ;;  %vm2992_vm3 = vweird.f32 %v2986_v54  ;;  %v2996_v56 = vand.u32 2147483647, %v2986_v54 }
0x1fa8   :  { %v2999_v44 = vor.u32 1.1754944e-38, %v2998_v22  ;;  %vm2997_vm5 = vcmp.eq.f32.partialorder %v2996_v56, 8.507059e+37 }
0x1fac   :  { %v3385_v40 = vpop.eup %3384 }
0x1fad   :  { %v2988_v46 = vmul.f32 %v3385_v40, %v2986_v54  ;;  %vm2993_vm1 = vweird.f32 %v3385_v40 }
0x1fae   :  { %vm2994_vm4 = vmor %vm2992_vm3, %vm2993_vm1 }
0x1faf   :  { %v2989_v12 = vsub.f32 1.0, %v2988_v46 }
0x1fb1   :  { %v2990_v51 = vmul.f32 %v3385_v40, %v2989_v12 }
0x1fb3   :  { %v2991_v25 = vadd.f32 %v3385_v40, %v2990_v51 }
0x1fb5   :  { %v2995_v41 = vsel %vm2994_vm4, %v3385_v40, %v2991_v25 }
0x1fb6   :  { %v3000_v47 = vsel %vm2997_vm5, %v2999_v44, %v2995_v41 }
0x1fb7   :  { %v3003_v9 = vmul.f32 %v3000_v47, %v4426_v8 }
0x2014   :  { %v3006_v42 = vpop.permute.xlu1 %3005 }
0x2015   :  { %v3008_v28 = vmul.f32 %v3006_v42, %v3000_v47 }
0x2017   :  { %3010 = vrot.lane.b32.xlu2 %v3008_v28, %s3566_s12 }
0x2071   :  { %v3011_v45 = vpop.permute.xlu2 %3010 }
0x2072   :  { %v3013_v30 = vadd.f32 %v3011_v45, %v3003_v9 }
0x2074   :  { %3386 = vtanh.f32 %v3013_v30  ;;  %3027 = vst.msk [vmem:[#allocation10] sm:$0xff] %vm123_vm6, %v3013_v30 }
0x207a   :  { %v3387_v0 = vpop.eup %3386 }
0x207b   :  { %3016 = vrot.lane.b32.xlu1 %v3387_v0, %s3566_s12 }
0x20ed   :  { %v3017_v19 = vpop.permute.xlu1 %3016 }
0x20ee   :  { %v3019_v20 = vmul.f32 %v3017_v19, %v3000_v47 }
0x20f0   :  { %3021 = vrot.lane.b32.xlu2 %v3019_v20, %s3567_s13 }
0x214a   :  { %v3022_v8 = vpop.permute.xlu2 %3021 }
0x214b   :  { %3025 = vst.msk [vmem:[#allocation7 + $0x38] sm:$0xff] %vm123_vm6, %v3022_v8 }
0x214c   :  { %3026 = vst.msk [vmem:[#allocation8] sm:$0xff] %vm123_vm6, %v3022_v8  ;;  %3040 = dma.vmem_to_hbm [thread:$0]  %s3033_s21, 1024, %s3035_s24, [#allocation4], %s3557_s25, %s3557_s25, %s3558_s26  }
0x214d   :  { %3051 = dma.vmem_to_hbm [thread:$0]  %s3047_s28, 128, %s3049_s6, [#allocation9]  }
0x214e   :  { %3062 = dma.vmem_to_hbm [thread:$0]  %s3058_s8, 128, %s3060_s14, [#allocation9]  }
0x214f   :  { %3552 = dma.done.wait [#allocation4], 1024  }
0x2150   :  { %3553 = vsyncadd [#allocation4], 4294966272 }
0x2151   :  { %3554 = dma.done.wait [#allocation9], 256  }
0x2152   :  { %3555 = vsyncadd [#allocation9], 4294967040 }
0x2153   :  { %3075 = vsyncpa [#allocation3], 1 }
0x2154   :  { %3076 = vsyncpa [#allocation6], 1 }
0x2155   :  { %3077 = vsyncpa [#allocation4], 1 }
0x2156   :  { %3078 = vsyncpa [#allocation9], 1 }

</bundles_post_ra>
